<compile_context>
chip_gen: v5e
topology: v5e:2x2
jax: 0.10.0
libtpu: 0.0.40
codegen_flags: <defaults>
</compile_context>

<pallas_src>
import jax
import jax.numpy as jnp
from jax import lax
from jax.experimental import pallas as pl
from jax.experimental.pallas import tpu as pltpu


_VMEM = pl.BlockSpec(memory_space=pltpu.MemorySpace.VMEM)


# ------------------------------ Pallas kernel --------------------------------

def _make_qnet_kernel(B, H, W, CIN, C1, C2, H1):
    """Builds the fused QNetwork kernel for static shapes (closure constants)."""
    HB = H * B

    def kernel(x_ref, w1_ref, b1_ref, w2_ref, b2_ref, wf1_hbm, bf1_ref,
               wf2_ref, bf2_ref, o_ref,
               xp_ref, h1p_ref, h2_ref, wf1_vmem, dma_sem):
        # 0. Kick off the 4 MiB fc1 weight fetch immediately; it overlaps with
        #    all conv compute and is only waited on right before fc1.
        wf1_cp = pltpu.make_async_copy(wf1_hbm, wf1_vmem, dma_sem)
        wf1_cp.start()

        def banded_conv_relu(src_ref, w_ref, bias_row, n_out):
            # src_ref: ((H+2)*B, K) bf16, rows = h-major/b-minor, 1-row halo
            #          top & bottom only (width padding lives in the weights).
            # w_ref  : (3, K, n_out) bf16 block-banded weights (one per dy).
            acc = jnp.zeros((HB, n_out), jnp.float32)
            for dy in range(3):
                acc = acc + jnp.dot(src_ref[dy * B:dy * B + HB, :], w_ref[dy],
                                    preferred_element_type=jnp.float32)
            return jnp.maximum(acc + bias_row, 0.0)

        # 1. conv1 + ReLU: zero only the halo rows, overwrite the interior.
        xp_ref[0:B, :] = jnp.zeros((B, W * CIN), jnp.bfloat16)
        xp_ref[(H + 1) * B:(H + 2) * B, :] = jnp.zeros((B, W * CIN), jnp.bfloat16)
        xp_ref[B:(H + 1) * B, :] = x_ref[...].astype(jnp.bfloat16)
        h1 = banded_conv_relu(xp_ref, w1_ref, b1_ref[...], W * C1)

        # 2. conv2 + ReLU: h1 never leaves VMEM.
        h1p_ref[0:B, :] = jnp.zeros((B, W * C1), jnp.bfloat16)
        h1p_ref[(H + 1) * B:(H + 2) * B, :] = jnp.zeros((B, W * C1), jnp.bfloat16)
        h1p_ref[B:(H + 1) * B, :] = h1.astype(jnp.bfloat16)
        h2_ref[...] = banded_conv_relu(h1p_ref, w2_ref, b2_ref[...],
                                       W * C2).astype(jnp.bfloat16)

        # 3. fc1 + ReLU + fc2.  Per output-height h, rows [h*B, (h+1)*B) of the
        #    (H*B, W*C2) conv output are exactly batch-rows for that h, so the
        #    flatten is expressed as a contiguous-slice contraction (no reshape).
        wf1_cp.wait()
        acc = jnp.zeros((B, H1), jnp.float32)
        for h in range(H):
            acc = acc + jnp.dot(h2_ref[h * B:(h + 1) * B, :], wf1_vmem[h],
                                preferred_element_type=jnp.float32)
        hid = jnp.maximum(acc + bf1_ref[...], 0.0)
        o_ref[...] = jnp.dot(hid.astype(jnp.bfloat16), wf2_ref[...],
                             preferred_element_type=jnp.float32) + bf2_ref[...]

    return kernel


# -------------------------------- wrapper -------------------------------------

@jax.jit
def qnetwork_forward(x_nchw, prep):
    """Pallas implementation of QNetwork.forward.  x_nchw: (B, 4, H, W) f32."""
    B, CIN, H, W = x_nchw.shape
    C1 = prep['w1'].shape[-1] // W
    C2 = prep['w2'].shape[-1] // W
    H1 = prep['wf1'].shape[-1]
    A = prep['wf2'].shape[-1]

    # (B, Cin, H, W) -> rows (h*B + b), lanes (w*Cin + ci).  8 KB, one XLA op.
    # TODO(synk): accept row-major/NHWC input upstream to drop this transpose.
    x_rows = jnp.transpose(x_nchw, (2, 0, 3, 1)).reshape(H * B, W * CIN)

    kernel = _make_qnet_kernel(B, H, W, CIN, C1, C2, H1)
    return pl.pallas_call(
        kernel,
        out_shape=jax.ShapeDtypeStruct((B, A), jnp.float32),
        in_specs=[_VMEM,                                   # x rows
                  _VMEM, _VMEM,                            # conv1 w/b
                  _VMEM, _VMEM,                            # conv2 w/b
                  pl.BlockSpec(memory_space=pl.ANY),       # fc1 weight stays in HBM
                  _VMEM, _VMEM, _VMEM],                    # fc1 b, fc2 w/b
        out_specs=_VMEM,
        scratch_shapes=[
            pltpu.VMEM(((H + 2) * B, W * CIN), jnp.bfloat16),  # padded input
            pltpu.VMEM(((H + 2) * B, W * C1), jnp.bfloat16),   # padded h1
            pltpu.VMEM((H * B, W * C2), jnp.bfloat16),         # conv2 out (lane-dense)
            pltpu.VMEM((H, W * C2, H1), jnp.bfloat16),         # fc1 weight landing zone
            pltpu.SemaphoreType.DMA(()),                       # fc1 weight DMA sem
        ],
        compiler_params=pltpu.CompilerParams(vmem_limit_bytes=32 * 1024 * 1024),
    )(x_rows, prep['w1'], prep['b1'], prep['w2'], prep['b2'],
      prep['wf1'], prep['bf1'], prep['wf2'], prep['bf2'])


# ---------------------- one-time parameter preparation ------------------------

def prepare_params(params, h, w):
    """One-time weight re-layout (hoisted out of the per-step forward path)."""
    (w_c1, b_c1, w_c2, b_c2, w_fc1, b_fc1, w_fc2, b_fc2) = params
    c2 = w_c2.shape[0]
    h1n = w_fc1.shape[0]

    def banded(wk):
        # wk: (Cout, Cin, 3, 3) OIHW -> (3, W*Cin, W*Cout) block-banded bf16.
        # ind[dx, wi, wo] = 1 iff wi == wo + dx - 1; missing wi at the borders
        # implements zero padding along the width for free.
        cout, cin = wk.shape[0], wk.shape[1]
        ind = jnp.stack([jnp.eye(w, k=1 - dx, dtype=jnp.float32)
                         for dx in range(3)])                       # (dx, wi, wo)
        kk = jnp.transpose(wk, (2, 3, 1, 0)).astype(jnp.float32)    # (dy, dx, ci, co)
        bw = jnp.einsum('xpq,yxio->ypiqo', ind, kk)                 # (dy, wi, ci, wo, co)
        return bw.reshape(3, w * cin, w * cout).astype(jnp.bfloat16)

    # PyTorch flattens conv output in (c, h, w) order; our kernel layout is
    # rows=(h,b), lanes=(w,c2), so permute fc1's input dim to (h, w*c2).
    wf1_3d = (w_fc1.reshape(h1n, c2, h, w)
              .transpose(2, 3, 1, 0)                                # (h, w, c2, 256)
              .reshape(h, w * c2, h1n)
              .astype(jnp.bfloat16))

    return dict(
        w1=banded(w_c1),
        b1=jnp.tile(b_c1, w).reshape(1, -1).astype(jnp.float32),
        w2=banded(w_c2),
        b2=jnp.tile(b_c2, w).reshape(1, -1).astype(jnp.float32),
        wf1=wf1_3d,
        bf1=b_fc1.reshape(1, -1).astype(jnp.float32),
        wf2=w_fc2.T.astype(jnp.bfloat16),
        bf2=b_fc2.reshape(1, -1).astype(jnp.float32),
    )


# -------------------------------- reference ------------------------------------

def qnetwork_reference(x_nchw, params):
    """Pure-JAX f32 reference with PyTorch semantics (NCHW / OIHW / CHW flatten)."""
    (w_c1, b_c1, w_c2, b_c2, w_fc1, b_fc1, w_fc2, b_fc2) = params
    dn = ('NCHW', 'OIHW', 'NCHW')

    def conv(x, wk, b):
        y = lax.conv_general_dilated(x, wk, (1, 1), ((1, 1), (1, 1)),
                                     dimension_numbers=dn,
                                     precision=lax.Precision.HIGHEST)
        return jax.nn.relu(y + b.reshape(1, -1, 1, 1))

    h = conv(x_nchw, w_c1, b_c1)
    h = conv(h, w_c2, b_c2)
    h = h.reshape(h.shape[0], -1)                  # (C, H, W) flatten order
    h = jax.nn.relu(h @ w_fc1.T + b_fc1)
    return h @ w_fc2.T + b_fc2


# --------------------------------- params --------------------------------------

def init_params(key, h, w, n_actions):
    ks = jax.random.split(key, 8)

    def norm(k, shape, fan_in):
        return jax.random.normal(k, shape, jnp.float32) / jnp.sqrt(fan_in)

    w_c1 = norm(ks[0], (16, 4, 3, 3), 4 * 9)
    b_c1 = norm(ks[1], (16,), 4 * 9)
    w_c2 = norm(ks[2], (32, 16, 3, 3), 16 * 9)
    b_c2 = norm(ks[3], (32,), 16 * 9)
    lin_in = h * w * 32
    w_fc1 = norm(ks[4], (256, lin_in), lin_in)
    b_fc1 = norm(ks[5], (256,), lin_in)
    w_fc2 = norm(ks[6], (n_actions, 256), 256)
    b_fc2 = norm(ks[7], (n_actions,), 256)
    return (w_c1, b_c1, w_c2, b_c2, w_fc1, b_fc1, w_fc2, b_fc2)


# ---------------------------------- main ----------------------------------------

if __name__ == "__main__":
    B, H, W, N_ACTIONS = 2, 16, 16, 8
    key = jax.random.PRNGKey(0)
    k_x, k_p = jax.random.split(key)

    x = jax.random.normal(k_x, (B, 4, H, W), jnp.float32)
    params = init_params(k_p, H, W, N_ACTIONS)
    prep = prepare_params(params, H, W)            # one-time weight re-layout

    out = jax.block_until_ready(qnetwork_forward(x, prep))
    ref = jax.block_until_ready(qnetwork_reference(x, params))

    assert out.shape == (B, N_ACTIONS)
    assert jnp.allclose(out, ref, rtol=2e-2, atol=2e-2), (
        f"max abs diff {jnp.max(jnp.abs(out - ref))}")
    print("KERNEL_OK")
</pallas_src>

<mosaic_0001>
module attributes {stable_mosaic.version = 11 : i64} {
  func.func @kernel(%arg0: memref<32x64xf32, #tpu.memory_space<vmem>>, %arg1: memref<3x64x256xbf16, #tpu.memory_space<vmem>>, %arg2: memref<1x256xf32, #tpu.memory_space<vmem>>, %arg3: memref<3x256x512xbf16, #tpu.memory_space<vmem>>, %arg4: memref<1x512xf32, #tpu.memory_space<vmem>>, %arg5: memref<16x512x256xbf16, #tpu.memory_space<any>>, %arg6: memref<1x256xf32, #tpu.memory_space<vmem>>, %arg7: memref<256x8xbf16, #tpu.memory_space<vmem>>, %arg8: memref<1x8xf32, #tpu.memory_space<vmem>>, %arg9: memref<2x8xf32, #tpu.memory_space<vmem>>, %arg10: memref<36x64xbf16, #tpu.memory_space<vmem>>, %arg11: memref<36x256xbf16, #tpu.memory_space<vmem>>, %arg12: memref<32x512xbf16, #tpu.memory_space<vmem>>, %arg13: memref<16x512x256xbf16, #tpu.memory_space<vmem>>, %arg14: memref<!tpu.dma_semaphore, #tpu.memory_space<semaphore_mem>>) attributes {dimension_semantics = [], scalar_prefetch = 0 : i64, scratch_operands = 5 : i64, tpu.core_type = #tpu.core_type<tc>} {
    tpu.enqueue_dma source(%arg5 : memref<16x512x256xbf16, #tpu.memory_space<any>>) target(%arg13 : memref<16x512x256xbf16, #tpu.memory_space<vmem>>) target_semaphore(%arg14 : memref<!tpu.dma_semaphore, #tpu.memory_space<semaphore_mem>>)
    %cst = arith.constant 0.000000e+00 : bf16
    %0 = vector.broadcast %cst : bf16 to vector<2x64xbf16>
    %c0 = arith.constant 0 : index
    %c0_0 = arith.constant 0 : index
    %1 = vector.load %arg10[%c0, %c0_0] : memref<36x64xbf16, #tpu.memory_space<vmem>>, vector<2x64xbf16>
    tpu.vector_store %arg10[%c0, %c0_0], %0 {strides = array<i32>} : memref<36x64xbf16, #tpu.memory_space<vmem>>, vector<2x64xbf16>,
    %cst_1 = arith.constant 0.000000e+00 : bf16
    %2 = vector.broadcast %cst_1 : bf16 to vector<2x64xbf16>
    %c34 = arith.constant 34 : index
    %c0_2 = arith.constant 0 : index
    %3 = vector.load %arg10[%c34, %c0_2] : memref<36x64xbf16, #tpu.memory_space<vmem>>, vector<2x64xbf16>
    tpu.vector_store %arg10[%c34, %c0_2], %2 {strides = array<i32>} : memref<36x64xbf16, #tpu.memory_space<vmem>>, vector<2x64xbf16>,
    %c0_3 = arith.constant 0 : index
    %c0_4 = arith.constant 0 : index
    %4 = vector.load %arg0[%c0_3, %c0_4] : memref<32x64xf32, #tpu.memory_space<vmem>>, vector<32x64xf32>
    %5 = arith.truncf %4 : vector<32x64xf32> to vector<32x64xbf16>
    %c2 = arith.constant 2 : index
    %c0_5 = arith.constant 0 : index
    %6 = vector.load %arg10[%c2, %c0_5] : memref<36x64xbf16, #tpu.memory_space<vmem>>, vector<32x64xbf16>
    tpu.vector_store %arg10[%c2, %c0_5], %5 {strides = array<i32>} : memref<36x64xbf16, #tpu.memory_space<vmem>>, vector<32x64xbf16>,
    %c0_6 = arith.constant 0 : index
    %c0_7 = arith.constant 0 : index
    %7 = vector.load %arg2[%c0_6, %c0_7] : memref<1x256xf32, #tpu.memory_space<vmem>>, vector<1x256xf32>
    %cst_8 = arith.constant 0.000000e+00 : f32
    %8 = vector.broadcast %cst_8 : f32 to vector<32x256xf32>
    %c0_9 = arith.constant 0 : index
    %c0_10 = arith.constant 0 : index
    %9 = vector.load %arg10[%c0_9, %c0_10] : memref<36x64xbf16, #tpu.memory_space<vmem>>, vector<32x64xbf16>
    %c0_11 = arith.constant 0 : index
    %c0_12 = arith.constant 0 : index
    %c0_13 = arith.constant 0 : index
    %10 = vector.load %arg1[%c0_11, %c0_12, %c0_13] : memref<3x64x256xbf16, #tpu.memory_space<vmem>>, vector<1x64x256xbf16>
    %11 = vector.shape_cast %10 : vector<1x64x256xbf16> to vector<64x256xbf16>
    %cst_14 = arith.constant dense<0.000000e+00> : vector<32x256xf32>
    %12 = tpu.matmul %9, %11, %cst_14 {dimension_numbers = #tpu.dot_dimension_numbers<[1], [0], [0], [1], [0, 0, 1, 1], [], []>} : vector<32x64xbf16>, vector<64x256xbf16>, vector<32x256xf32> -> vector<32x256xf32>
    %13 = arith.addf %8, %12 : vector<32x256xf32>
    %c2_15 = arith.constant 2 : index
    %c0_16 = arith.constant 0 : index
    %14 = vector.load %arg10[%c2_15, %c0_16] : memref<36x64xbf16, #tpu.memory_space<vmem>>, vector<32x64xbf16>
    %c1 = arith.constant 1 : index
    %c0_17 = arith.constant 0 : index
    %c0_18 = arith.constant 0 : index
    %15 = vector.load %arg1[%c1, %c0_17, %c0_18] : memref<3x64x256xbf16, #tpu.memory_space<vmem>>, vector<1x64x256xbf16>
    %16 = vector.shape_cast %15 : vector<1x64x256xbf16> to vector<64x256xbf16>
    %cst_19 = arith.constant dense<0.000000e+00> : vector<32x256xf32>
    %17 = tpu.matmul %14, %16, %cst_19 {dimension_numbers = #tpu.dot_dimension_numbers<[1], [0], [0], [1], [0, 0, 1, 1], [], []>} : vector<32x64xbf16>, vector<64x256xbf16>, vector<32x256xf32> -> vector<32x256xf32>
    %18 = arith.addf %13, %17 : vector<32x256xf32>
    %c4 = arith.constant 4 : index
    %c0_20 = arith.constant 0 : index
    %19 = vector.load %arg10[%c4, %c0_20] : memref<36x64xbf16, #tpu.memory_space<vmem>>, vector<32x64xbf16>
    %c2_21 = arith.constant 2 : index
    %c0_22 = arith.constant 0 : index
    %c0_23 = arith.constant 0 : index
    %20 = vector.load %arg1[%c2_21, %c0_22, %c0_23] : memref<3x64x256xbf16, #tpu.memory_space<vmem>>, vector<1x64x256xbf16>
    %21 = vector.shape_cast %20 : vector<1x64x256xbf16> to vector<64x256xbf16>
    %cst_24 = arith.constant dense<0.000000e+00> : vector<32x256xf32>
    %22 = tpu.matmul %19, %21, %cst_24 {dimension_numbers = #tpu.dot_dimension_numbers<[1], [0], [0], [1], [0, 0, 1, 1], [], []>} : vector<32x64xbf16>, vector<64x256xbf16>, vector<32x256xf32> -> vector<32x256xf32>
    %23 = arith.addf %18, %22 : vector<32x256xf32>
    %24 = vector.broadcast %7 : vector<1x256xf32> to vector<32x256xf32>
    %25 = arith.addf %23, %24 : vector<32x256xf32>
    %cst_25 = arith.constant 0.000000e+00 : f32
    %26 = vector.broadcast %cst_25 : f32 to vector<32x256xf32>
    %27 = arith.maximumf %25, %26 : vector<32x256xf32>
    %cst_26 = arith.constant 0.000000e+00 : bf16
    %28 = vector.broadcast %cst_26 : bf16 to vector<2x256xbf16>
    %c0_27 = arith.constant 0 : index
    %c0_28 = arith.constant 0 : index
    %29 = vector.load %arg11[%c0_27, %c0_28] : memref<36x256xbf16, #tpu.memory_space<vmem>>, vector<2x256xbf16>
    tpu.vector_store %arg11[%c0_27, %c0_28], %28 {strides = array<i32>} : memref<36x256xbf16, #tpu.memory_space<vmem>>, vector<2x256xbf16>,
    %cst_29 = arith.constant 0.000000e+00 : bf16
    %30 = vector.broadcast %cst_29 : bf16 to vector<2x256xbf16>
    %c34_30 = arith.constant 34 : index
    %c0_31 = arith.constant 0 : index
    %31 = vector.load %arg11[%c34_30, %c0_31] : memref<36x256xbf16, #tpu.memory_space<vmem>>, vector<2x256xbf16>
    tpu.vector_store %arg11[%c34_30, %c0_31], %30 {strides = array<i32>} : memref<36x256xbf16, #tpu.memory_space<vmem>>, vector<2x256xbf16>,
    %32 = arith.truncf %27 : vector<32x256xf32> to vector<32x256xbf16>
    %c2_32 = arith.constant 2 : index
    %c0_33 = arith.constant 0 : index
    %33 = vector.load %arg11[%c2_32, %c0_33] : memref<36x256xbf16, #tpu.memory_space<vmem>>, vector<32x256xbf16>
    tpu.vector_store %arg11[%c2_32, %c0_33], %32 {strides = array<i32>} : memref<36x256xbf16, #tpu.memory_space<vmem>>, vector<32x256xbf16>,
    %c0_34 = arith.constant 0 : index
    %c0_35 = arith.constant 0 : index
    %34 = vector.load %arg4[%c0_34, %c0_35] : memref<1x512xf32, #tpu.memory_space<vmem>>, vector<1x512xf32>
    %cst_36 = arith.constant 0.000000e+00 : f32
    %35 = vector.broadcast %cst_36 : f32 to vector<32x512xf32>
    %c0_37 = arith.constant 0 : index
    %c0_38 = arith.constant 0 : index
    %36 = vector.load %arg11[%c0_37, %c0_38] : memref<36x256xbf16, #tpu.memory_space<vmem>>, vector<32x256xbf16>
    %c0_39 = arith.constant 0 : index
    %c0_40 = arith.constant 0 : index
    %c0_41 = arith.constant 0 : index
    %37 = vector.load %arg3[%c0_39, %c0_40, %c0_41] : memref<3x256x512xbf16, #tpu.memory_space<vmem>>, vector<1x256x512xbf16>
    %38 = vector.shape_cast %37 : vector<1x256x512xbf16> to vector<256x512xbf16>
    %cst_42 = arith.constant dense<0.000000e+00> : vector<32x512xf32>
    %39 = tpu.matmul %36, %38, %cst_42 {dimension_numbers = #tpu.dot_dimension_numbers<[1], [0], [0], [1], [0, 0, 1, 1], [], []>} : vector<32x256xbf16>, vector<256x512xbf16>, vector<32x512xf32> -> vector<32x512xf32>
    %40 = arith.addf %35, %39 : vector<32x512xf32>
    %c2_43 = arith.constant 2 : index
    %c0_44 = arith.constant 0 : index
    %41 = vector.load %arg11[%c2_43, %c0_44] : memref<36x256xbf16, #tpu.memory_space<vmem>>, vector<32x256xbf16>
    %c1_45 = arith.constant 1 : index
    %c0_46 = arith.constant 0 : index
    %c0_47 = arith.constant 0 : index
    %42 = vector.load %arg3[%c1_45, %c0_46, %c0_47] : memref<3x256x512xbf16, #tpu.memory_space<vmem>>, vector<1x256x512xbf16>
    %43 = vector.shape_cast %42 : vector<1x256x512xbf16> to vector<256x512xbf16>
    %cst_48 = arith.constant dense<0.000000e+00> : vector<32x512xf32>
    %44 = tpu.matmul %41, %43, %cst_48 {dimension_numbers = #tpu.dot_dimension_numbers<[1], [0], [0], [1], [0, 0, 1, 1], [], []>} : vector<32x256xbf16>, vector<256x512xbf16>, vector<32x512xf32> -> vector<32x512xf32>
    %45 = arith.addf %40, %44 : vector<32x512xf32>
    %c4_49 = arith.constant 4 : index
    %c0_50 = arith.constant 0 : index
    %46 = vector.load %arg11[%c4_49, %c0_50] : memref<36x256xbf16, #tpu.memory_space<vmem>>, vector<32x256xbf16>
    %c2_51 = arith.constant 2 : index
    %c0_52 = arith.constant 0 : index
    %c0_53 = arith.constant 0 : index
    %47 = vector.load %arg3[%c2_51, %c0_52, %c0_53] : memref<3x256x512xbf16, #tpu.memory_space<vmem>>, vector<1x256x512xbf16>
    %48 = vector.shape_cast %47 : vector<1x256x512xbf16> to vector<256x512xbf16>
    %cst_54 = arith.constant dense<0.000000e+00> : vector<32x512xf32>
    %49 = tpu.matmul %46, %48, %cst_54 {dimension_numbers = #tpu.dot_dimension_numbers<[1], [0], [0], [1], [0, 0, 1, 1], [], []>} : vector<32x256xbf16>, vector<256x512xbf16>, vector<32x512xf32> -> vector<32x512xf32>
    %50 = arith.addf %45, %49 : vector<32x512xf32>
    %51 = vector.broadcast %34 : vector<1x512xf32> to vector<32x512xf32>
    %52 = arith.addf %50, %51 : vector<32x512xf32>
    %cst_55 = arith.constant 0.000000e+00 : f32
    %53 = vector.broadcast %cst_55 : f32 to vector<32x512xf32>
    %54 = arith.maximumf %52, %53 : vector<32x512xf32>
    %55 = arith.truncf %54 : vector<32x512xf32> to vector<32x512xbf16>
    %c0_56 = arith.constant 0 : index
    %c0_57 = arith.constant 0 : index
    %56 = vector.load %arg12[%c0_56, %c0_57] : memref<32x512xbf16, #tpu.memory_space<vmem>>, vector<32x512xbf16>
    tpu.vector_store %arg12[%c0_56, %c0_57], %55 {strides = array<i32>} : memref<32x512xbf16, #tpu.memory_space<vmem>>, vector<32x512xbf16>,
    tpu.wait_dma2 semaphore(%arg14 : memref<!tpu.dma_semaphore, #tpu.memory_space<semaphore_mem>>) src(%arg5 : memref<16x512x256xbf16, #tpu.memory_space<any>>) dst(%arg13 : memref<16x512x256xbf16, #tpu.memory_space<vmem>>)
    %cst_58 = arith.constant 0.000000e+00 : f32
    %57 = vector.broadcast %cst_58 : f32 to vector<2x256xf32>
    %c0_59 = arith.constant 0 : index
    %c0_60 = arith.constant 0 : index
    %58 = vector.load %arg12[%c0_59, %c0_60] : memref<32x512xbf16, #tpu.memory_space<vmem>>, vector<2x512xbf16>
    %c0_61 = arith.constant 0 : index
    %c0_62 = arith.constant 0 : index
    %c0_63 = arith.constant 0 : index
    %59 = vector.load %arg13[%c0_61, %c0_62, %c0_63] : memref<16x512x256xbf16, #tpu.memory_space<vmem>>, vector<1x512x256xbf16>
    %60 = vector.shape_cast %59 : vector<1x512x256xbf16> to vector<512x256xbf16>
    %cst_64 = arith.constant dense<0.000000e+00> : vector<2x256xf32>
    %61 = tpu.matmul %58, %60, %cst_64 {dimension_numbers = #tpu.dot_dimension_numbers<[1], [0], [0], [1], [0, 0, 1, 1], [], []>} : vector<2x512xbf16>, vector<512x256xbf16>, vector<2x256xf32> -> vector<2x256xf32>
    %62 = arith.addf %57, %61 : vector<2x256xf32>
    %c2_65 = arith.constant 2 : index
    %c0_66 = arith.constant 0 : index
    %63 = vector.load %arg12[%c2_65, %c0_66] : memref<32x512xbf16, #tpu.memory_space<vmem>>, vector<2x512xbf16>
    %c1_67 = arith.constant 1 : index
    %c0_68 = arith.constant 0 : index
    %c0_69 = arith.constant 0 : index
    %64 = vector.load %arg13[%c1_67, %c0_68, %c0_69] : memref<16x512x256xbf16, #tpu.memory_space<vmem>>, vector<1x512x256xbf16>
    %65 = vector.shape_cast %64 : vector<1x512x256xbf16> to vector<512x256xbf16>
    %cst_70 = arith.constant dense<0.000000e+00> : vector<2x256xf32>
    %66 = tpu.matmul %63, %65, %cst_70 {dimension_numbers = #tpu.dot_dimension_numbers<[1], [0], [0], [1], [0, 0, 1, 1], [], []>} : vector<2x512xbf16>, vector<512x256xbf16>, vector<2x256xf32> -> vector<2x256xf32>
    %67 = arith.addf %62, %66 : vector<2x256xf32>
    %c4_71 = arith.constant 4 : index
    %c0_72 = arith.constant 0 : index
    %68 = vector.load %arg12[%c4_71, %c0_72] : memref<32x512xbf16, #tpu.memory_space<vmem>>, vector<2x512xbf16>
    %c2_73 = arith.constant 2 : index
    %c0_74 = arith.constant 0 : index
    %c0_75 = arith.constant 0 : index
    %69 = vector.load %arg13[%c2_73, %c0_74, %c0_75] : memref<16x512x256xbf16, #tpu.memory_space<vmem>>, vector<1x512x256xbf16>
    %70 = vector.shape_cast %69 : vector<1x512x256xbf16> to vector<512x256xbf16>
    %cst_76 = arith.constant dense<0.000000e+00> : vector<2x256xf32>
    %71 = tpu.matmul %68, %70, %cst_76 {dimension_numbers = #tpu.dot_dimension_numbers<[1], [0], [0], [1], [0, 0, 1, 1], [], []>} : vector<2x512xbf16>, vector<512x256xbf16>, vector<2x256xf32> -> vector<2x256xf32>
    %72 = arith.addf %67, %71 : vector<2x256xf32>
    %c6 = arith.constant 6 : index
    %c0_77 = arith.constant 0 : index
    %73 = vector.load %arg12[%c6, %c0_77] : memref<32x512xbf16, #tpu.memory_space<vmem>>, vector<2x512xbf16>
    %c3 = arith.constant 3 : index
    %c0_78 = arith.constant 0 : index
    %c0_79 = arith.constant 0 : index
    %74 = vector.load %arg13[%c3, %c0_78, %c0_79] : memref<16x512x256xbf16, #tpu.memory_space<vmem>>, vector<1x512x256xbf16>
    %75 = vector.shape_cast %74 : vector<1x512x256xbf16> to vector<512x256xbf16>
    %cst_80 = arith.constant dense<0.000000e+00> : vector<2x256xf32>
    %76 = tpu.matmul %73, %75, %cst_80 {dimension_numbers = #tpu.dot_dimension_numbers<[1], [0], [0], [1], [0, 0, 1, 1], [], []>} : vector<2x512xbf16>, vector<512x256xbf16>, vector<2x256xf32> -> vector<2x256xf32>
    %77 = arith.addf %72, %76 : vector<2x256xf32>
    %c8 = arith.constant 8 : index
    %c0_81 = arith.constant 0 : index
    %78 = vector.load %arg12[%c8, %c0_81] : memref<32x512xbf16, #tpu.memory_space<vmem>>, vector<2x512xbf16>
    %c4_82 = arith.constant 4 : index
    %c0_83 = arith.constant 0 : index
    %c0_84 = arith.constant 0 : index
    %79 = vector.load %arg13[%c4_82, %c0_83, %c0_84] : memref<16x512x256xbf16, #tpu.memory_space<vmem>>, vector<1x512x256xbf16>
    %80 = vector.shape_cast %79 : vector<1x512x256xbf16> to vector<512x256xbf16>
    %cst_85 = arith.constant dense<0.000000e+00> : vector<2x256xf32>
    %81 = tpu.matmul %78, %80, %cst_85 {dimension_numbers = #tpu.dot_dimension_numbers<[1], [0], [0], [1], [0, 0, 1, 1], [], []>} : vector<2x512xbf16>, vector<512x256xbf16>, vector<2x256xf32> -> vector<2x256xf32>
    %82 = arith.addf %77, %81 : vector<2x256xf32>
    %c10 = arith.constant 10 : index
    %c0_86 = arith.constant 0 : index
    %83 = vector.load %arg12[%c10, %c0_86] : memref<32x512xbf16, #tpu.memory_space<vmem>>, vector<2x512xbf16>
    %c5 = arith.constant 5 : index
    %c0_87 = arith.constant 0 : index
    %c0_88 = arith.constant 0 : index
    %84 = vector.load %arg13[%c5, %c0_87, %c0_88] : memref<16x512x256xbf16, #tpu.memory_space<vmem>>, vector<1x512x256xbf16>
    %85 = vector.shape_cast %84 : vector<1x512x256xbf16> to vector<512x256xbf16>
    %cst_89 = arith.constant dense<0.000000e+00> : vector<2x256xf32>
    %86 = tpu.matmul %83, %85, %cst_89 {dimension_numbers = #tpu.dot_dimension_numbers<[1], [0], [0], [1], [0, 0, 1, 1], [], []>} : vector<2x512xbf16>, vector<512x256xbf16>, vector<2x256xf32> -> vector<2x256xf32>
    %87 = arith.addf %82, %86 : vector<2x256xf32>
    %c12 = arith.constant 12 : index
    %c0_90 = arith.constant 0 : index
    %88 = vector.load %arg12[%c12, %c0_90] : memref<32x512xbf16, #tpu.memory_space<vmem>>, vector<2x512xbf16>
    %c6_91 = arith.constant 6 : index
    %c0_92 = arith.constant 0 : index
    %c0_93 = arith.constant 0 : index
    %89 = vector.load %arg13[%c6_91, %c0_92, %c0_93] : memref<16x512x256xbf16, #tpu.memory_space<vmem>>, vector<1x512x256xbf16>
    %90 = vector.shape_cast %89 : vector<1x512x256xbf16> to vector<512x256xbf16>
    %cst_94 = arith.constant dense<0.000000e+00> : vector<2x256xf32>
    %91 = tpu.matmul %88, %90, %cst_94 {dimension_numbers = #tpu.dot_dimension_numbers<[1], [0], [0], [1], [0, 0, 1, 1], [], []>} : vector<2x512xbf16>, vector<512x256xbf16>, vector<2x256xf32> -> vector<2x256xf32>
    %92 = arith.addf %87, %91 : vector<2x256xf32>
    %c14 = arith.constant 14 : index
    %c0_95 = arith.constant 0 : index
    %93 = vector.load %arg12[%c14, %c0_95] : memref<32x512xbf16, #tpu.memory_space<vmem>>, vector<2x512xbf16>
    %c7 = arith.constant 7 : index
    %c0_96 = arith.constant 0 : index
    %c0_97 = arith.constant 0 : index
    %94 = vector.load %arg13[%c7, %c0_96, %c0_97] : memref<16x512x256xbf16, #tpu.memory_space<vmem>>, vector<1x512x256xbf16>
    %95 = vector.shape_cast %94 : vector<1x512x256xbf16> to vector<512x256xbf16>
    %cst_98 = arith.constant dense<0.000000e+00> : vector<2x256xf32>
    %96 = tpu.matmul %93, %95, %cst_98 {dimension_numbers = #tpu.dot_dimension_numbers<[1], [0], [0], [1], [0, 0, 1, 1], [], []>} : vector<2x512xbf16>, vector<512x256xbf16>, vector<2x256xf32> -> vector<2x256xf32>
    %97 = arith.addf %92, %96 : vector<2x256xf32>
    %c16 = arith.constant 16 : index
    %c0_99 = arith.constant 0 : index
    %98 = vector.load %arg12[%c16, %c0_99] : memref<32x512xbf16, #tpu.memory_space<vmem>>, vector<2x512xbf16>
    %c8_100 = arith.constant 8 : index
    %c0_101 = arith.constant 0 : index
    %c0_102 = arith.constant 0 : index
    %99 = vector.load %arg13[%c8_100, %c0_101, %c0_102] : memref<16x512x256xbf16, #tpu.memory_space<vmem>>, vector<1x512x256xbf16>
    %100 = vector.shape_cast %99 : vector<1x512x256xbf16> to vector<512x256xbf16>
    %cst_103 = arith.constant dense<0.000000e+00> : vector<2x256xf32>
    %101 = tpu.matmul %98, %100, %cst_103 {dimension_numbers = #tpu.dot_dimension_numbers<[1], [0], [0], [1], [0, 0, 1, 1], [], []>} : vector<2x512xbf16>, vector<512x256xbf16>, vector<2x256xf32> -> vector<2x256xf32>
    %102 = arith.addf %97, %101 : vector<2x256xf32>
    %c18 = arith.constant 18 : index
    %c0_104 = arith.constant 0 : index
    %103 = vector.load %arg12[%c18, %c0_104] : memref<32x512xbf16, #tpu.memory_space<vmem>>, vector<2x512xbf16>
    %c9 = arith.constant 9 : index
    %c0_105 = arith.constant 0 : index
    %c0_106 = arith.constant 0 : index
    %104 = vector.load %arg13[%c9, %c0_105, %c0_106] : memref<16x512x256xbf16, #tpu.memory_space<vmem>>, vector<1x512x256xbf16>
    %105 = vector.shape_cast %104 : vector<1x512x256xbf16> to vector<512x256xbf16>
    %cst_107 = arith.constant dense<0.000000e+00> : vector<2x256xf32>
    %106 = tpu.matmul %103, %105, %cst_107 {dimension_numbers = #tpu.dot_dimension_numbers<[1], [0], [0], [1], [0, 0, 1, 1], [], []>} : vector<2x512xbf16>, vector<512x256xbf16>, vector<2x256xf32> -> vector<2x256xf32>
    %107 = arith.addf %102, %106 : vector<2x256xf32>
    %c20 = arith.constant 20 : index
    %c0_108 = arith.constant 0 : index
    %108 = vector.load %arg12[%c20, %c0_108] : memref<32x512xbf16, #tpu.memory_space<vmem>>, vector<2x512xbf16>
    %c10_109 = arith.constant 10 : index
    %c0_110 = arith.constant 0 : index
    %c0_111 = arith.constant 0 : index
    %109 = vector.load %arg13[%c10_109, %c0_110, %c0_111] : memref<16x512x256xbf16, #tpu.memory_space<vmem>>, vector<1x512x256xbf16>
    %110 = vector.shape_cast %109 : vector<1x512x256xbf16> to vector<512x256xbf16>
    %cst_112 = arith.constant dense<0.000000e+00> : vector<2x256xf32>
    %111 = tpu.matmul %108, %110, %cst_112 {dimension_numbers = #tpu.dot_dimension_numbers<[1], [0], [0], [1], [0, 0, 1, 1], [], []>} : vector<2x512xbf16>, vector<512x256xbf16>, vector<2x256xf32> -> vector<2x256xf32>
    %112 = arith.addf %107, %111 : vector<2x256xf32>
    %c22 = arith.constant 22 : index
    %c0_113 = arith.constant 0 : index
    %113 = vector.load %arg12[%c22, %c0_113] : memref<32x512xbf16, #tpu.memory_space<vmem>>, vector<2x512xbf16>
    %c11 = arith.constant 11 : index
    %c0_114 = arith.constant 0 : index
    %c0_115 = arith.constant 0 : index
    %114 = vector.load %arg13[%c11, %c0_114, %c0_115] : memref<16x512x256xbf16, #tpu.memory_space<vmem>>, vector<1x512x256xbf16>
    %115 = vector.shape_cast %114 : vector<1x512x256xbf16> to vector<512x256xbf16>
    %cst_116 = arith.constant dense<0.000000e+00> : vector<2x256xf32>
    %116 = tpu.matmul %113, %115, %cst_116 {dimension_numbers = #tpu.dot_dimension_numbers<[1], [0], [0], [1], [0, 0, 1, 1], [], []>} : vector<2x512xbf16>, vector<512x256xbf16>, vector<2x256xf32> -> vector<2x256xf32>
    %117 = arith.addf %112, %116 : vector<2x256xf32>
    %c24 = arith.constant 24 : index
    %c0_117 = arith.constant 0 : index
    %118 = vector.load %arg12[%c24, %c0_117] : memref<32x512xbf16, #tpu.memory_space<vmem>>, vector<2x512xbf16>
    %c12_118 = arith.constant 12 : index
    %c0_119 = arith.constant 0 : index
    %c0_120 = arith.constant 0 : index
    %119 = vector.load %arg13[%c12_118, %c0_119, %c0_120] : memref<16x512x256xbf16, #tpu.memory_space<vmem>>, vector<1x512x256xbf16>
    %120 = vector.shape_cast %119 : vector<1x512x256xbf16> to vector<512x256xbf16>
    %cst_121 = arith.constant dense<0.000000e+00> : vector<2x256xf32>
    %121 = tpu.matmul %118, %120, %cst_121 {dimension_numbers = #tpu.dot_dimension_numbers<[1], [0], [0], [1], [0, 0, 1, 1], [], []>} : vector<2x512xbf16>, vector<512x256xbf16>, vector<2x256xf32> -> vector<2x256xf32>
    %122 = arith.addf %117, %121 : vector<2x256xf32>
    %c26 = arith.constant 26 : index
    %c0_122 = arith.constant 0 : index
    %123 = vector.load %arg12[%c26, %c0_122] : memref<32x512xbf16, #tpu.memory_space<vmem>>, vector<2x512xbf16>
    %c13 = arith.constant 13 : index
    %c0_123 = arith.constant 0 : index
    %c0_124 = arith.constant 0 : index
    %124 = vector.load %arg13[%c13, %c0_123, %c0_124] : memref<16x512x256xbf16, #tpu.memory_space<vmem>>, vector<1x512x256xbf16>
    %125 = vector.shape_cast %124 : vector<1x512x256xbf16> to vector<512x256xbf16>
    %cst_125 = arith.constant dense<0.000000e+00> : vector<2x256xf32>
    %126 = tpu.matmul %123, %125, %cst_125 {dimension_numbers = #tpu.dot_dimension_numbers<[1], [0], [0], [1], [0, 0, 1, 1], [], []>} : vector<2x512xbf16>, vector<512x256xbf16>, vector<2x256xf32> -> vector<2x256xf32>
    %127 = arith.addf %122, %126 : vector<2x256xf32>
    %c28 = arith.constant 28 : index
    %c0_126 = arith.constant 0 : index
    %128 = vector.load %arg12[%c28, %c0_126] : memref<32x512xbf16, #tpu.memory_space<vmem>>, vector<2x512xbf16>
    %c14_127 = arith.constant 14 : index
    %c0_128 = arith.constant 0 : index
    %c0_129 = arith.constant 0 : index
    %129 = vector.load %arg13[%c14_127, %c0_128, %c0_129] : memref<16x512x256xbf16, #tpu.memory_space<vmem>>, vector<1x512x256xbf16>
    %130 = vector.shape_cast %129 : vector<1x512x256xbf16> to vector<512x256xbf16>
    %cst_130 = arith.constant dense<0.000000e+00> : vector<2x256xf32>
    %131 = tpu.matmul %128, %130, %cst_130 {dimension_numbers = #tpu.dot_dimension_numbers<[1], [0], [0], [1], [0, 0, 1, 1], [], []>} : vector<2x512xbf16>, vector<512x256xbf16>, vector<2x256xf32> -> vector<2x256xf32>
    %132 = arith.addf %127, %131 : vector<2x256xf32>
    %c30 = arith.constant 30 : index
    %c0_131 = arith.constant 0 : index
    %133 = vector.load %arg12[%c30, %c0_131] : memref<32x512xbf16, #tpu.memory_space<vmem>>, vector<2x512xbf16>
    %c15 = arith.constant 15 : index
    %c0_132 = arith.constant 0 : index
    %c0_133 = arith.constant 0 : index
    %134 = vector.load %arg13[%c15, %c0_132, %c0_133] : memref<16x512x256xbf16, #tpu.memory_space<vmem>>, vector<1x512x256xbf16>
    %135 = vector.shape_cast %134 : vector<1x512x256xbf16> to vector<512x256xbf16>
    %cst_134 = arith.constant dense<0.000000e+00> : vector<2x256xf32>
    %136 = tpu.matmul %133, %135, %cst_134 {dimension_numbers = #tpu.dot_dimension_numbers<[1], [0], [0], [1], [0, 0, 1, 1], [], []>} : vector<2x512xbf16>, vector<512x256xbf16>, vector<2x256xf32> -> vector<2x256xf32>
    %137 = arith.addf %132, %136 : vector<2x256xf32>
    %c0_135 = arith.constant 0 : index
    %c0_136 = arith.constant 0 : index
    %138 = vector.load %arg6[%c0_135, %c0_136] : memref<1x256xf32, #tpu.memory_space<vmem>>, vector<1x256xf32>
    %139 = vector.broadcast %138 : vector<1x256xf32> to vector<2x256xf32>
    %140 = arith.addf %137, %139 : vector<2x256xf32>
    %cst_137 = arith.constant 0.000000e+00 : f32
    %141 = vector.broadcast %cst_137 : f32 to vector<2x256xf32>
    %142 = arith.maximumf %140, %141 : vector<2x256xf32>
    %143 = arith.truncf %142 : vector<2x256xf32> to vector<2x256xbf16>
    %c0_138 = arith.constant 0 : index
    %c0_139 = arith.constant 0 : index
    %144 = vector.load %arg7[%c0_138, %c0_139] : memref<256x8xbf16, #tpu.memory_space<vmem>>, vector<256x8xbf16>
    %cst_140 = arith.constant dense<0.000000e+00> : vector<2x8xf32>
    %145 = tpu.matmul %143, %144, %cst_140 {dimension_numbers = #tpu.dot_dimension_numbers<[1], [0], [0], [1], [0, 0, 1, 1], [], []>} : vector<2x256xbf16>, vector<256x8xbf16>, vector<2x8xf32> -> vector<2x8xf32>
    %c0_141 = arith.constant 0 : index
    %c0_142 = arith.constant 0 : index
    %146 = vector.load %arg8[%c0_141, %c0_142] : memref<1x8xf32, #tpu.memory_space<vmem>>, vector<1x8xf32>
    %147 = vector.broadcast %146 : vector<1x8xf32> to vector<2x8xf32>
    %148 = arith.addf %145, %147 : vector<2x8xf32>
    %c0_143 = arith.constant 0 : index
    %c0_144 = arith.constant 0 : index
    %149 = vector.load %arg9[%c0_143, %c0_144] : memref<2x8xf32, #tpu.memory_space<vmem>>, vector<2x8xf32>
    tpu.vector_store %arg9[%c0_143, %c0_144], %148 {strides = array<i32>} : memref<2x8xf32, #tpu.memory_space<vmem>>, vector<2x8xf32>,
    return
  }
}

</mosaic_0001>

<bundles_post_ra>
// kernel: qnetwork_forward.1
= control target key start
LH: loop header
LB: loop body
LE: loop exit
PB: predicated region body
PF: predicated region fallthrough
CT: control target
= control target key end

     0   :  { %14 = vsyncpa [#allocation8], 0  ;;  %s18092_s0 = inlined_call_operand.vmem [shape: f32[32,64], index: 0, kind: input, shape index: {}]   ;;  %s18093_s1 = inlined_call_operand.hbm [shape: bf16[3,64,256], index: 1, kind: input, shape index: {}]   ;;  %s18094_s2 = inlined_call_operand.hbm [shape: f32[1,256], index: 2, kind: input, shape index: {}]   ;;  %s18095_s3 = inlined_call_operand.hbm [shape: bf16[3,256,512], index: 3, kind: input, shape index: {}]   ;;  %s18096_s4 = inlined_call_operand.hbm [shape: f32[1,512], index: 4, kind: input, shape index: {}]   ;;  %s18097_s5 = inlined_call_operand.hbm [shape: bf16[16,512,256], index: 5, kind: input, shape index: {}]   ;;  %s18098_s6 = inlined_call_operand.hbm [shape: f32[1,256], index: 6, kind: input, shape index: {}]   ;;  %s18099_s7 = inlined_call_operand.vmem [shape: bf16[256,8], index: 7, kind: input, shape index: {}]   ;;  %s18100_s8 = inlined_call_operand.hbm [shape: f32[1,8], index: 8, kind: input, shape index: {}]   ;;  %s18101_s9 = inlined_call_operand.hbm [shape: f32[2,8], index: 9, kind: output, shape index: {}]  }
   0x1   :  { %15 = vsyncpa [#allocation11], 0 }
   0x2   :  { %16 = vsyncpa [#allocation14], 0 }
   0x3   :  { %17 = vsyncpa [#allocation17], 0  ;;  %s39_s11 = sshll.u32 %s18094_s2, 4  ;;  %s40_s11 = int_to_ptr.hbm [resolvable:$true] %s39_s11 }
   0x4   :  { %18 = vsyncpa [#allocation9], 0  ;;  %s17203_s12 = smov [#allocation10]   ;;  %s63_s16 = sshll.u32 %s18096_s4, 4  ;;  %s64_s16 = int_to_ptr.hbm [resolvable:$true] %s63_s16 }
   0x5   :  { %s41_s13 = sshll.u32 %s17203_s12, 4  ;;  %s17204_s17 = smov [#allocation13]   ;;  %s42_s13 = int_to_ptr.vmem [resolvable:$true] %s41_s13 }
   0x6   :  { %44 = dma.hbm_to_vmem [thread:$0]  %s40_s11, 32, %s42_s13, [#allocation11]  }
   0x7   :  { %s65_s18 = sshll.u32 %s17204_s17, 4  ;;  %s25_s21 = sshll.u32 %s18093_s1, 4  ;;  %s66_s18 = int_to_ptr.vmem [resolvable:$true] %s65_s18  ;;  %s26_s21 = int_to_ptr.hbm [resolvable:$true] %s25_s21 }
   0x8   :  { %68 = dma.hbm_to_vmem [thread:$0]  %s64_s16, 64, %s66_s18, [#allocation14]  }
   0x9   :  { %s17205_s2 = smov [#allocation7]   ;;  %s49_s25 = sshll.u32 %s18095_s3, 4  ;;  %s50_s25 = int_to_ptr.hbm [resolvable:$true] %s49_s25 }
   0xa   :  { %s27_s22 = sshll.u32 %s17205_s2, 4  ;;  %s17206_s26 = smov 128   ;;  %s28_s22 = int_to_ptr.vmem [resolvable:$true] %s27_s22 }
   0xb   :  { %s17207_s4 = smov 8   ;;  %s17208_s27 = smov [#allocation12]  }
   0xc   :  { %33 = dma.hbm_to_vmem [thread:$0]  %s26_s21, 3072, %s28_s22, [#allocation8], %s17206_s26, %s17206_s26, %s17207_s4  }
   0xd   :  { %s51_s28 = sshll.u32 %s17208_s27, 4  ;;  %s17209_s29 = smov 256   ;;  %s52_s28 = int_to_ptr.vmem [resolvable:$true] %s51_s28 }
   0xe   :  { %s17210_s30 = smov 16   ;;  %s74_s11 = sshll.u32 %s18098_s6, 4  ;;  %s75_s11 = int_to_ptr.hbm [resolvable:$true] %s74_s11 }
   0xf   :  { %57 = dma.hbm_to_vmem [thread:$0]  %s50_s25, 24576, %s52_s28, [#allocation11], %s17209_s29, %s17209_s29, %s17210_s30  }
  0x10   :  { %s17211_s12 = smov [#allocation15]   ;;  %s87_s15 = sshll.u32 %s18100_s8, 4  ;;  %s88_s15 = int_to_ptr.hbm [resolvable:$true] %s87_s15 }
  0x11   :  { %s76_s13 = sshll.u32 %s17211_s12, 4  ;;  %s17212_s16 = smov [#allocation16]   ;;  %s77_s13 = int_to_ptr.vmem [resolvable:$true] %s76_s13 }
  0x12   :  { %79 = dma.hbm_to_vmem [thread:$0]  %s75_s11, 32, %s77_s13, [#allocation14]  }
  0x13   :  { %s89_s17 = sshll.u32 %s17212_s16, 4  ;;  %s90_s17 = int_to_ptr.vmem [resolvable:$true] %s89_s17 }
  0x14   :  { %92 = dma.hbm_to_vmem [thread:$0]  %s88_s15, 16, %s90_s17, [#allocation17]  }
  0x15   :  { %17191 = dma.done.wait [#allocation8], 3072  }
  0x16   :  { %17192 = vsyncadd [#allocation8], 4294964224 }
  0x17   :  { %17193 = dma.done.wait [#allocation11], 24608  }
  0x18   :  { %17194 = vsyncadd [#allocation11], 4294942688 }
  0x19   :  { %17195 = dma.done.wait [#allocation14], 96  }
  0x1a   :  { %17196 = vsyncadd [#allocation14], 4294967200 }
  0x1b   :  { %17197 = dma.done.wait [#allocation17], 16  }
  0x1c   :  { %17198 = vsyncadd [#allocation17], 4294967280  ;;  %vm131_vm0 = vcmask 516096   ;;  %v17213_v0 = vmov 0   ;;  %v10739_v1 = vld [vmem:[#allocation7 + $0x30] sm:$0xf] }
  0x1d   :  { %132 = vst.msk [vmem:[#allocation2] sm:$0x1] %vm131_vm0, %v17213_v0  ;;  %v15730_v2 = vld [vmem:[#allocation7 + $0x34] sm:$0xf0]  ;;  %v15729_v3 = vld [vmem:[#allocation7 + $0x34] sm:$0xf] }
  0x1e   :  { %524 = vst [vmem:[#allocation3] sm:$0x11] %v17213_v0  ;;  %v10740_v4 = vor.u32 %v15730_v2, %v10739_v1  ;;  %v10741_v5 = vld [vmem:[#allocation7 + $0x38] sm:$0xf0]  ;;  %v10731_v6 = vld [vmem:[#allocation7 + $0x20] sm:$0xf] }
  0x1f   :  { %525 = vst [vmem:[#allocation3 + $0x20] sm:$0x22] %v17213_v0  ;;  %v15728_v7 = vld [vmem:[#allocation7 + $0x24] sm:$0xf0]  ;;  %v10744_v8 = vor.u32 %v15729_v3, %v10741_v5  ;;  %v15727_v9 = vld [vmem:[#allocation7 + $0x24] sm:$0xf] }
  0x20   :  { %v10733_v10 = vld [vmem:[#allocation7 + $0x28] sm:$0xf0]  ;;  %v10703_v11 = vld [vmem:[#allocation7 + $0x70] sm:$0xf]  ;;  %vm147_vm1 = vcmask 1040384   ;;  %354 = vmatpush.bf16.msra.mxu2 %v10740_v4  ;;  %v10732_v12 = vor.u32 %v15728_v7, %v10731_v6  ;;  %v135_v40 = vld [vmem:[%s18092_s0] sm:$0xff] }
  0x21   :  { %v15738_v13 = vld [vmem:[#allocation7 + $0x74] sm:$0xf0]  ;;  %v15737_v14 = vld [vmem:[#allocation7 + $0x74] sm:$0xf]  ;;  %v10705_v15 = vld [vmem:[#allocation7 + $0x78] sm:$0xf0]  ;;  %373 = vmatpush.bf16.msra.mxu3 %v10744_v8  ;;  %v10736_v16 = vor.u32 %v15727_v9, %v10733_v10  ;;  %v139_v45 = vpack.c.bf16 %v135_v40, %v135_v40 }
  0x22   :  { %v10704_v17 = vor.u32 %v15738_v13, %v10703_v11  ;;  %v10708_v18 = vor.u32 %v15737_v14, %v10705_v15  ;;  %v10723_v19 = vld [vmem:[#allocation7 + $0x10] sm:$0xf]  ;;  %v15726_v20 = vld [vmem:[#allocation7 + $0x14] sm:$0xf0]  ;;  %v15725_v21 = vld [vmem:[#allocation7 + $0x14] sm:$0xf] }
  0x23   :  { %v10725_v22 = vld [vmem:[#allocation7 + $0x18] sm:$0xf0]  ;;  %v10695_v23 = vld [vmem:[#allocation7 + $0x60] sm:$0xf]  ;;  %v15736_v24 = vld [vmem:[#allocation7 + $0x64] sm:$0xf0]  ;;  %v10724_v29 = vor.u32 %v15726_v20, %v10723_v19 }
  0x24   :  { %267 = vmatpush.bf16.msra.mxu0 %v10704_v17  ;;  %286 = vmatpush.bf16.msra.mxu1 %v10708_v18  ;;  %v10696_v25 = vor.u32 %v15736_v24, %v10695_v23  ;;  %v15735_v26 = vld [vmem:[#allocation7 + $0x64] sm:$0xf]  ;;  %v10697_v27 = vld [vmem:[#allocation7 + $0x68] sm:$0xf0]  ;;  %v10715_v28 = vld [vmem:[#allocation7] sm:$0xf]  ;;  %v10728_v34 = vor.u32 %v15725_v21, %v10725_v22 }
  0x25   :  { %355 = vmatpush.bf16.msra.mxu2 %v10732_v12  ;;  %v10700_v30 = vor.u32 %v15735_v26, %v10697_v27  ;;  %v15724_v31 = vld [vmem:[#allocation7 + $0x4] sm:$0xf0]  ;;  %v15723_v32 = vld [vmem:[#allocation7 + $0x4] sm:$0xf]  ;;  %v10717_v33 = vld [vmem:[#allocation7 + $0x8] sm:$0xf0]  ;;  %374 = vmatpush.bf16.msra.mxu3 %v10736_v16 }
  0x26   :  { %v10687_v35 = vld [vmem:[#allocation7 + $0x50] sm:$0xf]  ;;  %v15734_v36 = vld [vmem:[#allocation7 + $0x54] sm:$0xf0]  ;;  %v15733_v37 = vld [vmem:[#allocation7 + $0x54] sm:$0xf]  ;;  %v10716_v48 = vor.u32 %v15724_v31, %v10715_v28  ;;  %v10720_v54 = vor.u32 %v15723_v32, %v10717_v33 }
  0x27   :  { %v10688_v38 = vor.u32 %v15734_v36, %v10687_v35  ;;  %v10689_v39 = vld [vmem:[#allocation7 + $0x58] sm:$0xf0]  ;;  %v136_v41 = vld [vmem:[%s18092_s0 + $0x8] sm:$0xff]  ;;  %vm148_vm2 = vcmask 1044484   ;;  %vm166_vm3 = vcmask 519169   ;;  %v137_v43 = vld [vmem:[%s18092_s0 + $0x10] sm:$0xff] }
  0x28   :  { %268 = vmatpush.bf16.msra.mxu0 %v10696_v25  ;;  %287 = vmatpush.bf16.msra.mxu1 %v10700_v30  ;;  %v10692_v42 = vor.u32 %v15733_v37, %v10689_v39  ;;  %v138_v44 = vld [vmem:[%s18092_s0 + $0x18] sm:$0xff]  ;;  %v140_v46 = vpack.c.bf16 %v136_v41, %v136_v41  ;;  %vm168_vm4 = vcmask 519168   ;;  %v141_v49 = vpack.c.bf16 %v137_v43, %v137_v43  ;;  %v15732_v51 = vld [vmem:[#allocation7 + $0x44] sm:$0xf0]  ;;  %v15731_v52 = vld [vmem:[#allocation7 + $0x44] sm:$0xf] }
  0x29   :  { %v10679_v47 = vld [vmem:[#allocation7 + $0x40] sm:$0xf]  ;;  %356 = vmatpush.bf16.msra.mxu2 %v10724_v29  ;;  %v142_v50 = vpack.c.bf16 %v138_v44, %v138_v44  ;;  %v10681_v53 = vld [vmem:[#allocation7 + $0x48] sm:$0xf0]  ;;  %375 = vmatpush.bf16.msra.mxu3 %v10728_v34  ;;  %v150_v55 = vrot.slane %v139_v45, 7  ;;  %vm17302_vm5 = vmor %vm147_vm1, %vm148_vm2  ;;  %vm256_vm6 = vcmask 523264  }
  0x2a   :  { %v152_v56 = vrot.slane %v140_v46, 7  ;;  %v10775_v57 = vld [vmem:[#allocation7 + $0xb0] sm:$0xf]  ;;  %v15746_v58 = vld [vmem:[#allocation7 + $0xb4] sm:$0xf0]  ;;  %v155_v60 = vrot.slane %v141_v49, 7  ;;  %v10680_v3 = vor.u32 %v15732_v51, %v10679_v47  ;;  %v10684_v4 = vor.u32 %v15731_v52, %v10681_v53 }
  0x2b   :  { %v158_v61 = vrot.slane %v142_v50, 7  ;;  %v15745_v62 = vld [vmem:[#allocation7 + $0xb4] sm:$0xf]  ;;  %v10777_v63 = vld [vmem:[#allocation7 + $0xb8] sm:$0xf0]  ;;  %v151_v1 = vrot.slane %v150_v55, 4  ;;  %v10776_v7 = vor.u32 %v15746_v58, %v10775_v57 }
  0x2c   :  { %269 = vmatpush.bf16.msra.mxu0 %v10688_v38  ;;  %288 = vmatpush.bf16.msra.mxu1 %v10692_v42  ;;  %v154_v2 = vrot.slane %v152_v56, 4  ;;  %167 = vst.msk [vmem:[#allocation2] sm:$0xe] %vm166_vm3, %v150_v55  ;;  %v157_v5 = vrot.slane %v155_v60, 4  ;;  %v10780_v8 = vor.u32 %v15745_v62, %v10777_v63  ;;  %v10767_v9 = vld [vmem:[#allocation7 + $0xa0] sm:$0xf] }
  0x2d   :  { %357 = vmatpush.bf16.msra.mxu2 %v10716_v48  ;;  %v160_v6 = vrot.slane %v158_v61, 4  ;;  %376 = vmatpush.bf16.msra.mxu3 %v10720_v54  ;;  %v153_v10 = vsel %vm17302_vm5, %v151_v1, %v152_v56  ;;  %v15744_v12 = vld [vmem:[#allocation7 + $0xa4] sm:$0xf0]  ;;  %v15743_v13 = vld [vmem:[#allocation7 + $0xa4] sm:$0xf]  ;;  %vm210_vm7 = vcmask 1046528  }
  0x2e   :  { %v156_v11 = vsel %vm17302_vm5, %v154_v2, %v155_v60  ;;  %v10769_v14 = vld [vmem:[#allocation7 + $0xa8] sm:$0xf0]  ;;  %v159_v15 = vsel %vm17302_vm5, %v157_v5, %v158_v61  ;;  %169 = vst.msk [vmem:[#allocation2 + $0x4] sm:$0xf] %vm168_vm4, %v153_v10  ;;  %v10768_v16 = vor.u32 %v15744_v12, %v10767_v9  ;;  %v10759_v18 = vld [vmem:[#allocation7 + $0x90] sm:$0xf] }
  0x2f   :  { %170 = vst.msk [vmem:[#allocation2 + $0x8] sm:$0xf] %vm168_vm4, %v156_v11  ;;  %v10772_v17 = vor.u32 %v15743_v13, %v10769_v14  ;;  %v15742_v19 = vld [vmem:[#allocation7 + $0x94] sm:$0xf0]  ;;  %v15741_v20 = vld [vmem:[#allocation7 + $0x94] sm:$0xf] }
  0x30   :  { %270 = vmatpush.bf16.msra.mxu0 %v10680_v3  ;;  %289 = vmatpush.bf16.msra.mxu1 %v10684_v4  ;;  %171 = vst.msk [vmem:[#allocation2 + $0xc] sm:$0xf] %vm168_vm4, %v159_v15  ;;  %v10761_v21 = vld [vmem:[#allocation7 + $0x98] sm:$0xf0]  ;;  %v10760_v24 = vor.u32 %v15742_v19, %v10759_v18  ;;  %v10751_v26 = vld [vmem:[#allocation7 + $0x80] sm:$0xf] }
  0x31   :  { %172 = vst.msk [vmem:[#allocation2 + $0x10] sm:$0x1] %vm131_vm0, %v160_v6  ;;  %v10764_v25 = vor.u32 %v15741_v20, %v10761_v21  ;;  %v15740_v27 = vld [vmem:[#allocation7 + $0x84] sm:$0xf0]  ;;  %v15739_v29 = vld [vmem:[#allocation7 + $0x84] sm:$0xf] }
  0x32   :  { %v10753_v30 = vld [vmem:[#allocation7 + $0x88] sm:$0xf0]  ;;  %v10752_v34 = vor.u32 %v15740_v27, %v10751_v26  ;;  %vm133_vm8 = vcmask 517121   ;;  %vm405_vm9 = vcmask 1045504   ;;  %v10907_v58 = vld [vmem:[#allocation12 + $0x2e0] sm:$0xf] }
  0x33   :  { %v186_v22 = vld [vmem:[#allocation2] sm:$0xe]  ;;  %v10756_v35 = vor.u32 %v15739_v29, %v10753_v30  ;;  %134 = vst.msk [vmem:[#allocation2 + $0x10] sm:$0x2] %vm133_vm8, %v17213_v0  ;;  %v15843_v60 = vld [vmem:[#allocation12 + $0x2ec] sm:$0xf0] }
  0x34   :  { %461 = vmatpush.bf16.msrb.mxu0 %v10776_v7  ;;  %480 = vmatpush.bf16.msrb.mxu1 %v10780_v8  ;;  %v202_v23 = vunpack.c.l.b16 %v186_v22  ;;  %v388_v44 = vld [vmem:[#allocation2] sm:$0xc]  ;;  %v11035_v61 = vld [vmem:[#allocation12 + $0x3e0] sm:$0xf]  ;;  %v10908_v1 = vor.u32 %v15843_v60, %v10907_v58  ;;  %v15875_v2 = vld [vmem:[#allocation12 + $0x3ec] sm:$0xf0] }
  0x35   :  { %v16982_v28 = vld [vmem:[#allocation2] sm:$0xff]   ;;  %v401_v45 = vunpack.c.l.b16 %v388_v44  ;;  %v10909_v4 = vld [vmem:[#allocation12 + $0x2f0] sm:$0xf0]  ;;  %v11036_v5 = vor.u32 %v15875_v2, %v11035_v61  ;;  %v15839_v11 = vld [vmem:[#allocation12 + $0x2cc] sm:$0xf0]  ;;  %s125_s24 = sshll.u32 %s18097_s5, 4  ;;  %s126_s24 = int_to_ptr.hbm [resolvable:$true] %s125_s24 }
  0x36   :  { %v16984_v31 = vunpack.c.h.b16 %v16982_v28  ;;  %10745 = vmatmul.msk.bf16.vlgmr.msra.gmra.mxu2 %vm256_vm6, %v16982_v28  ;;  %10747 = vmatmul.msk.bf16.vlgmr.msra.gmra.mxu3 %vm256_vm6, %v16982_v28  ;;  %v15841_v3 = vld [vmem:[#allocation12 + $0x2e4] sm:$0xf]  ;;  %v11037_v8 = vld [vmem:[#allocation12 + $0x3f0] sm:$0xf0]  ;;  %v10891_v10 = vld [vmem:[#allocation12 + $0x2c0] sm:$0xf] }
  0x37   :  { %v15722_v32 = vld [vmem:[#allocation2 + $0x8] sm:$0xff]  ;;  %v10912_v6 = vor.u32 %v15841_v3, %v10909_v4  ;;  %v15873_v7 = vld [vmem:[#allocation12 + $0x3e4] sm:$0xf]  ;;  %1046 = vmatpush.bf16.msrb.mxu2 %v10908_v1  ;;  %1065 = vmatpush.bf16.msrb.mxu3 %v11036_v5  ;;  %v11019_v12 = vld [vmem:[#allocation12 + $0x3c0] sm:$0xf]  ;;  %v10892_v13 = vor.u32 %v15839_v11, %v10891_v10  ;;  %s17214_s25 = smov [#allocation5]  }
  0x38   :  { %462 = vmatpush.bf16.msrb.mxu0 %v10768_v16  ;;  %481 = vmatpush.bf16.msrb.mxu1 %v10772_v17  ;;  %v207_v33 = vpack.c.b16 %v16984_v31, %v202_v23  ;;  %v212_v36 = vrot.slane %v15722_v32, 1  ;;  %v187_v38 = vld [vmem:[#allocation2 + $0x10] sm:$0x1]  ;;  %v403_v46 = vpack.c.b16 %v16984_v31, %v401_v45  ;;  %v407_v48 = vrot.slane %v15722_v32, 2  ;;  %v15837_v15 = vld [vmem:[#allocation12 + $0x2c4] sm:$0xf] }
  0x39   :  { %v206_v40 = vunpack.c.l.b16 %v187_v38  ;;  %v11040_v9 = vor.u32 %v15873_v7, %v11037_v8  ;;  %v15871_v14 = vld [vmem:[#allocation12 + $0x3cc] sm:$0xf0]  ;;  %v10893_v16 = vld [vmem:[#allocation12 + $0x2d0] sm:$0xf0]  ;;  %v15869_v21 = vld [vmem:[#allocation12 + $0x3c4] sm:$0xf] }
  0x3a   :  { %v211_v37 = vrot.slane %v207_v33, 1  ;;  %v406_v47 = vrot.slane %v403_v46, 2  ;;  %v389_v49 = vld [vmem:[#allocation2 + $0x10] sm:$0x3]  ;;  %v11020_v19 = vor.u32 %v15871_v14, %v11019_v12  ;;  %v10896_v20 = vor.u32 %v15837_v15, %v10893_v16  ;;  %v11021_v22 = vld [vmem:[#allocation12 + $0x3d0] sm:$0xf0] }
  0x3b   :  { %v209_v41 = vpack.c.b16 %v206_v40, %v206_v40  ;;  %v402_v50 = vunpack.c.l.b16 %v389_v49  ;;  %1047 = vmatpush.bf16.msrb.mxu2 %v10892_v13  ;;  %v11024_v23 = vor.u32 %v15869_v21, %v11021_v22  ;;  %v11003_v26 = vld [vmem:[#allocation12 + $0x3a0] sm:$0xf]  ;;  %v15867_v30 = vld [vmem:[#allocation12 + $0x3ac] sm:$0xf0]  ;;  %v15833_v31 = vld [vmem:[#allocation12 + $0x2a4] sm:$0xf] }
  0x3c   :  { %463 = vmatpush.bf16.msrb.mxu0 %v10760_v24  ;;  %482 = vmatpush.bf16.msrb.mxu1 %v10764_v25  ;;  %v213_v39 = vsel %vm210_vm7, %v211_v37, %v212_v36  ;;  %v408_v0 = vsel %vm405_vm9, %v406_v47, %v407_v48  ;;  %v10875_v24 = vld [vmem:[#allocation12 + $0x2a0] sm:$0xf]  ;;  %v15835_v25 = vld [vmem:[#allocation12 + $0x2ac] sm:$0xf0]  ;;  %v11004_v33 = vor.u32 %v15867_v30, %v11003_v26  ;;  %v173_v37 = vld [vmem:[#allocation10] sm:$0x3] }
  0x3d   :  { %10709 = vmatmul.msk.bf16.vlgmr.msra.gmra.mxu0 %vm256_vm6, %v213_v39  ;;  %10711 = vmatmul.msk.bf16.vlgmr.msra.gmra.mxu1 %vm256_vm6, %v213_v39  ;;  %v214_v42 = vrot.slane %v209_v41, 1  ;;  %v404_v51 = vpack.c.b16 %v402_v50, %v402_v50  ;;  %v10876_v29 = vor.u32 %v15835_v25, %v10875_v24  ;;  %v10859_v39 = vld [vmem:[#allocation12 + $0x280] sm:$0xf]  ;;  %v15831_v40 = vld [vmem:[#allocation12 + $0x28c] sm:$0xf0]  ;;  %v17350_v49 = vperm.slane %v173_v37, 0 }
  0x3e   :  { %1066 = vmatpush.bf16.msrb.mxu3 %v11020_v19  ;;  %v10987_v41 = vld [vmem:[#allocation12 + $0x380] sm:$0xf]  ;;  %v15829_v44 = vld [vmem:[#allocation12 + $0x284] sm:$0xf]  ;;  %v10861_v45 = vld [vmem:[#allocation12 + $0x290] sm:$0xf0] }
  0x3f   :  { %v215_v43 = vsel %vm210_vm7, %v212_v36, %v214_v42  ;;  %v409_v52 = vrot.slane %v404_v51, 2  ;;  %v11005_v36 = vld [vmem:[#allocation12 + $0x3b0] sm:$0xf0]  ;;  %1048 = vmatpush.bf16.msrb.mxu2 %v10876_v29  ;;  %v10860_v42 = vor.u32 %v15831_v40, %v10859_v39  ;;  %v10864_v47 = vor.u32 %v15829_v44, %v10861_v45  ;;  %v10843_v61 = vld [vmem:[#allocation12 + $0x260] sm:$0xf]  ;;  %s127_s26 = sshll.u32 %s17214_s25, 4  ;;  %s128_s26 = int_to_ptr.vmem [resolvable:$true] %s127_s26 }
  0x40   :  { %464 = vmatpush.bf16.msrb.mxu0 %v10752_v34  ;;  %483 = vmatpush.bf16.msrb.mxu1 %v10756_v35  ;;  %v15865_v35 = vld [vmem:[#allocation12 + $0x3a4] sm:$0xf]  ;;  %v17352_v50 = vperm.slane %v173_v37, 1  ;;  %v15827_v1 = vld [vmem:[#allocation12 + $0x26c] sm:$0xf0] }
  0x41   :  { %v410_v53 = vsel %vm405_vm9, %v407_v48, %v409_v52  ;;  %v11008_v38 = vor.u32 %v15865_v35, %v11005_v36  ;;  %v15861_v48 = vld [vmem:[#allocation12 + $0x384] sm:$0xf]  ;;  %v10971_v2 = vld [vmem:[#allocation12 + $0x360] sm:$0xf]  ;;  %v10844_v5 = vor.u32 %v15827_v1, %v10843_v61  ;;  %v10845_v8 = vld [vmem:[#allocation12 + $0x270] sm:$0xf0] }
  0x42   :  { %1067 = vmatpush.bf16.msrb.mxu3 %v11004_v33  ;;  %v15825_v7 = vld [vmem:[#allocation12 + $0x264] sm:$0xf]  ;;  %v10827_v16 = vld [vmem:[#allocation12 + $0x240] sm:$0xf]  ;;  %v10829_v22 = vld [vmem:[#allocation12 + $0x250] sm:$0xf0] }
  0x43   :  { %1049 = vmatpush.bf16.msrb.mxu2 %v10860_v42  ;;  %v15857_v12 = vld [vmem:[#allocation12 + $0x364] sm:$0xf]  ;;  %v10957_v30 = vld [vmem:[#allocation12 + $0x350] sm:$0xf0]  ;;  %v10811_v33 = vld [vmem:[#allocation12 + $0x220] sm:$0xf] }
  0x44   :  { %1084 = vmatpush.bf16.msra.mxu0 %v10912_v6  ;;  %1103 = vmatpush.bf16.msra.mxu1 %v11040_v9  ;;  %v15859_v6 = vld [vmem:[#allocation12 + $0x36c] sm:$0xf0]  ;;  %v15821_v21 = vld [vmem:[#allocation12 + $0x244] sm:$0xf]  ;;  %v10939_v35 = vld [vmem:[#allocation12 + $0x320] sm:$0xf] }
  0x45   :  { %v10972_v11 = vor.u32 %v15859_v6, %v10971_v2  ;;  %v10832_v26 = vor.u32 %v15821_v21, %v10829_v22  ;;  %v15853_v29 = vld [vmem:[#allocation12 + $0x344] sm:$0xf]  ;;  %v15851_v39 = vld [vmem:[#allocation12 + $0x32c] sm:$0xf0]  ;;  %130 = dma.hbm_to_vmem [thread:$0]  %s126_s24, 131072, %s128_s26, [#allocation6] }
  0x46   :  { %10746 = vmatmul.msk.bf16.gmra.mxu2 %vm256_vm6, %v15722_v32  ;;  %10748 = vmatmul.msk.bf16.gmra.mxu3 %vm256_vm6, %v15722_v32  ;;  %v10877_v32 = vld [vmem:[#allocation12 + $0x2b0] sm:$0xf0]  ;;  %v15817_v40 = vld [vmem:[#allocation12 + $0x224] sm:$0xf]  ;;  %v10940_v44 = vor.u32 %v15851_v39, %v10939_v35  ;;  %v15847_v1 = vld [vmem:[#allocation12 + $0x30c] sm:$0xf0] }
  0x47   :  { %v10880_v34 = vor.u32 %v15833_v31, %v10877_v32  ;;  %1050 = vmatpush.bf16.msrb.mxu2 %v10844_v5  ;;  %v10960_v32 = vor.u32 %v15853_v29, %v10957_v30  ;;  %v15813_v2 = vld [vmem:[#allocation12 + $0x204] sm:$0xf]  ;;  %v15874_v29 = vld [vmem:[#allocation12 + $0x3ec] sm:$0xf]  ;;  %v10899_v35 = vld [vmem:[#allocation12 + $0x2c8] sm:$0xf] }
  0x48   :  { %1085 = vmatpush.bf16.msra.mxu0 %v10896_v20  ;;  %1104 = vmatpush.bf16.msra.mxu1 %v11024_v23  ;;  %v15855_v20 = vld [vmem:[#allocation12 + $0x34c] sm:$0xf0]  ;;  %v15845_v6 = vld [vmem:[#allocation12 + $0x304] sm:$0xf] }
  0x4c   :  { %1086 = vmatpush.bf16.msra.mxu0 %v10880_v34  ;;  %1105 = vmatpush.bf16.msra.mxu1 %v11008_v38  ;;  %v15819_v34 = vld [vmem:[#allocation12 + $0x22c] sm:$0xf0] }
  0x4d   :  { %10710 = vmatmul.msk.bf16.gmra.mxu0 %vm256_vm6, %v215_v43  ;;  %10712 = vmatmul.msk.bf16.gmra.mxu1 %vm256_vm6, %v215_v43  ;;  %v15863_v43 = vld [vmem:[#allocation12 + $0x38c] sm:$0xf0]  ;;  %v10812_v38 = vor.u32 %v15819_v34, %v10811_v33  ;;  %v11045_v34 = vld [vmem:[#allocation12 + $0x3f8] sm:$0xf0] }
  0x4e   :  { %v10988_v46 = vor.u32 %v15863_v43, %v10987_v41  ;;  %v10813_v41 = vld [vmem:[#allocation12 + $0x230] sm:$0xf0] }
  0x4f   :  { %v10816_v45 = vor.u32 %v15817_v40, %v10813_v41  ;;  %v11048_v41 = vor.u32 %v15874_v29, %v11045_v34  ;;  %v10851_v29 = vld [vmem:[#allocation12 + $0x268] sm:$0xf] }
  0x50   :  { %1068 = vmatpush.bf16.msrb.mxu3 %v10988_v46  ;;  %1087 = vmatpush.bf16.msra.mxu0 %v10864_v47  ;;  %v10941_v46 = vld [vmem:[#allocation12 + $0x330] sm:$0xf0]  ;;  %v10795_v47 = vld [vmem:[#allocation12 + $0x200] sm:$0xf] }
  0x54   :  { %1069 = vmatpush.bf16.msrb.mxu3 %v10972_v11 }
  0x5d   :  { %10781 = vmatmul.msk.bf16.vlgmr.msrb.gmra.mxu0 %vm256_vm6, %v408_v0  ;;  %10783 = vmatmul.msk.bf16.vlgmr.msrb.gmra.mxu1 %vm256_vm6, %v408_v0  ;;  %v10989_v0 = vld [vmem:[#allocation12 + $0x390] sm:$0xf0] }
  0x5e   :  { %v10992_v51 = vor.u32 %v15861_v48, %v10989_v0 }
  0x60   :  { %1106 = vmatpush.bf16.msra.mxu1 %v10992_v51 }
  0x6d   :  { %10782 = vmatmul.msk.bf16.gmra.mxu0 %vm256_vm6, %v410_v53  ;;  %10784 = vmatmul.msk.bf16.gmra.mxu1 %vm256_vm6, %v410_v53 }
  0xb9   :  { %v359_v17 = vpop.f32.mrf.mxu2  ;;  %v378_v18 = vpop.f32.mrf.mxu3 }
  0xba   :  { %v17334_v54 = vpop.f32.mrf.mxu0  ;;  %v17336_v55 = vpop.f32.mrf.mxu1 }
  0xbb   :  { %v360_v52 = vadd.f32 %v359_v17, %v17334_v54  ;;  %v379_v53 = vadd.f32 %v378_v18, %v17336_v55  ;;  %v10848_v54 = vor.u32 %v15825_v7, %v10845_v8  ;;  %v10973_v55 = vld [vmem:[#allocation12 + $0x370] sm:$0xf0]  ;;  %v15823_v17 = vld [vmem:[#allocation12 + $0x24c] sm:$0xf0]  ;;  %v10955_v18 = vld [vmem:[#allocation12 + $0x340] sm:$0xf] }
  0xbc   :  { %v10976_v13 = vor.u32 %v15857_v12, %v10973_v55  ;;  %v10828_v19 = vor.u32 %v15823_v17, %v10827_v16  ;;  %v10956_v25 = vor.u32 %v15855_v20, %v10955_v18  ;;  %v10915_v17 = vld [vmem:[#allocation12 + $0x2e8] sm:$0xf]  ;;  %v15844_v18 = vld [vmem:[#allocation12 + $0x2f4] sm:$0xf0] }
  0xbd   :  { %1088 = vmatpush.bf16.msra.mxu0 %v10848_v54 }
  0xbe   :  { %1107 = vmatpush.bf16.msra.mxu1 %v10976_v13  ;;  %1051 = vmatpush.bf16.msrb.mxu2 %v10828_v19  ;;  %v11043_v19 = vld [vmem:[#allocation12 + $0x3e8] sm:$0xf] }
  0xbf   :  { %1070 = vmatpush.bf16.msrb.mxu3 %v10956_v25 }
  0xc1   :  { %v361_v58 = vpop.f32.mrf.mxu2  ;;  %v380_v60 = vpop.f32.mrf.mxu3  ;;  %1089 = vmatpush.bf16.msra.mxu0 %v10832_v26  ;;  %v15842_v26 = vld [vmem:[#allocation12 + $0x2ec] sm:$0xf] }
  0xc2   :  { %v17338_v56 = vpop.f32.mrf.mxu0  ;;  %v17340_v57 = vpop.f32.mrf.mxu1  ;;  %1108 = vmatpush.bf16.msra.mxu1 %v10960_v32  ;;  %1052 = vmatpush.bf16.msrb.mxu2 %v10812_v38 }
  0xc3   :  { %v362_v31 = vadd.f32 %v361_v58, %v17338_v56  ;;  %v381_v36 = vadd.f32 %v380_v60, %v17340_v57  ;;  %v15849_v56 = vld [vmem:[#allocation12 + $0x324] sm:$0xf]  ;;  %v15815_v58 = vld [vmem:[#allocation12 + $0x20c] sm:$0xf0]  ;;  %v10923_v60 = vld [vmem:[#allocation12 + $0x300] sm:$0xf]  ;;  %1071 = vmatpush.bf16.msrb.mxu3 %v10940_v44 }
  0xc4   :  { %v10796_v61 = vor.u32 %v15815_v58, %v10795_v47  ;;  %v10924_v7 = vor.u32 %v15847_v1, %v10923_v60  ;;  %v10901_v47 = vld [vmem:[#allocation12 + $0x2d8] sm:$0xf0]  ;;  %v15836_v58 = vld [vmem:[#allocation12 + $0x2b4] sm:$0xf0]  ;;  %v11011_v60 = vld [vmem:[#allocation12 + $0x3a8] sm:$0xf] }
  0xc5   :  { %1090 = vmatpush.bf16.msra.mxu0 %v10816_v45 }
  0xc6   :  { %1053 = vmatpush.bf16.msrb.mxu2 %v10796_v61 }
  0xc7   :  { %1072 = vmatpush.bf16.msrb.mxu3 %v10924_v7 }
  0xc9   :  { %v364_v48 = vpop.f32.mrf.mxu2  ;;  %v383_v0 = vpop.f32.mrf.mxu3 }
  0xca   :  { %v17342_v62 = vpop.f32.mrf.mxu0  ;;  %v17344_v63 = vpop.f32.mrf.mxu1 }
  0xcb   :  { %v365_v12 = vadd.f32 %v364_v48, %v17342_v62  ;;  %v384_v55 = vadd.f32 %v383_v0, %v17344_v63  ;;  %v10917_v62 = vld [vmem:[#allocation12 + $0x2f8] sm:$0xf0]  ;;  %v15870_v48 = vld [vmem:[#allocation12 + $0x3cc] sm:$0xf] }
  0xcc   :  { %v10920_v40 = vor.u32 %v15842_v26, %v10917_v62  ;;  %v11029_v0 = vld [vmem:[#allocation12 + $0x3d8] sm:$0xf0] }
  0xd1   :  { %v366_v63 = vpop.f32.mrf.mxu2  ;;  %v385_v30 = vpop.f32.mrf.mxu3 }
  0xd2   :  { %v17346_v27 = vpop.f32.mrf.mxu0  ;;  %v17348_v28 = vpop.f32.mrf.mxu1 }
  0xd3   :  { %v367_v44 = vadd.f32 %v366_v63, %v17346_v27  ;;  %v386_v45 = vadd.f32 %v385_v30, %v17348_v28  ;;  %v15868_v28 = vld [vmem:[#allocation12 + $0x3b4] sm:$0xf0]  ;;  %v10979_v30 = vld [vmem:[#allocation12 + $0x368] sm:$0xf] }
  0xd4   :  { %v11012_v7 = vor.u32 %v15868_v28, %v11011_v60  ;;  %v15828_v63 = vld [vmem:[#allocation12 + $0x274] sm:$0xf0]  ;;  %v15854_v60 = vld [vmem:[#allocation12 + $0x34c] sm:$0xf] }
  0xd5   :  { %v10852_v34 = vor.u32 %v15828_v63, %v10851_v29 }
  0xda   :  { %v466_v3 = vpop.f32.mrf.mxu0  ;;  %v485_v4 = vpop.f32.mrf.mxu1 }
  0xdb   :  { %v495_v9 = vadd.f32 %v466_v3, %v360_v52  ;;  %v496_v10 = vadd.f32 %v485_v4, %v379_v53  ;;  %v10944_v53 = vor.u32 %v15849_v56, %v10941_v46  ;;  %v10797_v3 = vld [vmem:[#allocation12 + $0x210] sm:$0xf0] }
  0xdc   :  { %v10800_v8 = vor.u32 %v15813_v2, %v10797_v3  ;;  %v15834_v3 = vld [vmem:[#allocation12 + $0x2ac] sm:$0xf] }
  0xdd   :  { %v508_v14 = vadd.f32 %v17350_v49, %v495_v9  ;;  %v509_v15 = vadd.f32 %v17352_v50, %v496_v10  ;;  %1109 = vmatpush.bf16.msra.mxu1 %v10944_v53  ;;  %v10925_v9 = vld [vmem:[#allocation12 + $0x310] sm:$0xf0]  ;;  %v10883_v53 = vld [vmem:[#allocation12 + $0x2a8] sm:$0xf] }
  0xde   :  { %v10928_v54 = vor.u32 %v15845_v6, %v10925_v9  ;;  %1091 = vmatpush.bf16.msra.mxu0 %v10800_v8  ;;  %v10884_v27 = vor.u32 %v15836_v58, %v10883_v53  ;;  %v10885_v8 = vld [vmem:[#allocation12 + $0x2b8] sm:$0xf0]  ;;  %v15866_v9 = vld [vmem:[#allocation12 + $0x3ac] sm:$0xf] }
  0xdf   :  { %v516_v23 = vmax.f32 %v508_v14, 0.0  ;;  %v517_v24 = vmax.f32 %v509_v15, 0.0  ;;  %v15822_v53 = vld [vmem:[#allocation12 + $0x24c] sm:$0xf]  ;;  %v10837_v58 = vld [vmem:[#allocation12 + $0x258] sm:$0xf0] }
  0xe1   :  { %v526_v37 = vpack.c.bf16 %v517_v24, %v516_v23  ;;  %1110 = vmatpush.bf16.msra.mxu1 %v10928_v54  ;;  %v10916_v23 = vor.u32 %v15844_v18, %v10915_v17  ;;  %v15876_v24 = vld [vmem:[#allocation12 + $0x3f4] sm:$0xf0]  ;;  %v10867_v54 = vld [vmem:[#allocation12 + $0x288] sm:$0xf] }
  0xe2   :  { %v468_v42 = vpop.f32.mrf.mxu0  ;;  %v487_v43 = vpop.f32.mrf.mxu1  ;;  %v11044_v25 = vor.u32 %v15876_v24, %v11043_v19  ;;  %1160 = vmatpush.bf16.msrb.mxu0 %v10920_v40  ;;  %v15862_v24 = vld [vmem:[#allocation12 + $0x38c] sm:$0xf]  ;;  %v10981_v40 = vld [vmem:[#allocation12 + $0x378] sm:$0xf0] }
  0xe3   :  { %v534_v51 = vrot.slane %v526_v37, 7  ;;  %v497_v52 = vadd.f32 %v468_v42, %v362_v31  ;;  %v498_v57 = vadd.f32 %v487_v43, %v381_v36  ;;  %1122 = vmatpush.bf16.msra.mxu2 %v10916_v23  ;;  %v15840_v36 = vld [vmem:[#allocation12 + $0x2d4] sm:$0xf0]  ;;  %v11027_v37 = vld [vmem:[#allocation12 + $0x3c8] sm:$0xf] }
  0xe4   :  { %1141 = vmatpush.bf16.msra.mxu3 %v11044_v25  ;;  %v15872_v42 = vld [vmem:[#allocation12 + $0x3d4] sm:$0xf0]  ;;  %v15838_v43 = vld [vmem:[#allocation12 + $0x2cc] sm:$0xf]  ;;  %v10900_v56 = vor.u32 %v15840_v36, %v10899_v35  ;;  %v10997_v25 = vld [vmem:[#allocation12 + $0x398] sm:$0xf0] }
  0xe5   :  { %550 = vst [vmem:[#allocation3] sm:$0xee] %v534_v51  ;;  %v510_v4 = vadd.f32 %v17350_v49, %v497_v52  ;;  %v511_v5 = vadd.f32 %v17352_v50, %v498_v57  ;;  %v535_v13 = vrot.slane %v534_v51, 4  ;;  %v11028_v46 = vor.u32 %v15872_v42, %v11027_v37  ;;  %1179 = vmatpush.bf16.msrb.mxu1 %v11048_v41  ;;  %v15860_v35 = vld [vmem:[#allocation12 + $0x374] sm:$0xf0] }
  0xe6   :  { %v10904_v52 = vor.u32 %v15838_v43, %v10901_v47  ;;  %v11032_v57 = vor.u32 %v15870_v48, %v11029_v0  ;;  %v15826_v36 = vld [vmem:[#allocation12 + $0x26c] sm:$0xf]  ;;  %v10980_v37 = vor.u32 %v15860_v35, %v10979_v30  ;;  %v10963_v48 = vld [vmem:[#allocation12 + $0x348] sm:$0xf]  ;;  %v15856_v0 = vld [vmem:[#allocation12 + $0x354] sm:$0xf0] }
  0xe7   :  { %v518_v10 = vmax.f32 %v510_v4, 0.0  ;;  %v519_v11 = vmax.f32 %v511_v5, 0.0  ;;  %1123 = vmatpush.bf16.msra.mxu2 %v10900_v56  ;;  %v15824_v56 = vld [vmem:[#allocation12 + $0x254] sm:$0xf0] }
  0xe8   :  { %1142 = vmatpush.bf16.msra.mxu3 %v11028_v46  ;;  %1161 = vmatpush.bf16.msrb.mxu0 %v10904_v52 }
  0xe9   :  { %v527_v14 = vpack.c.bf16 %v519_v11, %v518_v10  ;;  %v10888_v10 = vor.u32 %v15834_v3, %v10885_v8  ;;  %v11013_v11 = vld [vmem:[#allocation12 + $0x3b8] sm:$0xf0]  ;;  %1180 = vmatpush.bf16.msrb.mxu1 %v11032_v57  ;;  %v10964_v57 = vor.u32 %v15856_v0, %v10963_v48  ;;  %v11147_v48 = vld [vmem:[#allocation12 + $0xc0] sm:$0xf]  ;;  %v15775_v0 = vld [vmem:[#allocation12 + $0xcc] sm:$0xf0] }
  0xea   :  { %v471_v15 = vpop.f32.mrf.mxu0  ;;  %v490_v16 = vpop.f32.mrf.mxu1  ;;  %v11016_v17 = vor.u32 %v15866_v9, %v11013_v11  ;;  %v10821_v9 = vld [vmem:[#allocation12 + $0x238] sm:$0xf0] }
  0xeb   :  { %v536_v20 = vrot.slane %v527_v14, 7  ;;  %v499_v21 = vadd.f32 %v471_v15, %v365_v12  ;;  %v500_v22 = vadd.f32 %v490_v16, %v384_v55  ;;  %v15832_v12 = vld [vmem:[#allocation12 + $0x294] sm:$0xf0]  ;;  %v10995_v15 = vld [vmem:[#allocation12 + $0x388] sm:$0xf]  ;;  %1124 = vmatpush.bf16.msra.mxu2 %v10884_v27 }
  0xec   :  { %v15864_v16 = vld [vmem:[#allocation12 + $0x394] sm:$0xf0]  ;;  %1143 = vmatpush.bf16.msra.mxu3 %v11012_v7  ;;  %v10868_v18 = vor.u32 %v15832_v12, %v10867_v54  ;;  %1162 = vmatpush.bf16.msrb.mxu0 %v10888_v10  ;;  %v15850_v10 = vld [vmem:[#allocation12 + $0x32c] sm:$0xf]  ;;  %v10949_v11 = vld [vmem:[#allocation12 + $0x338] sm:$0xf0] }
  0xed   :  { %v17366_v31 = vsel %vm17302_vm5, %v535_v13, %v536_v20  ;;  %v512_v32 = vadd.f32 %v17350_v49, %v499_v21  ;;  %v513_v33 = vadd.f32 %v17352_v50, %v500_v22  ;;  %v538_v61 = vrot.slane %v536_v20, 4  ;;  %v15830_v20 = vld [vmem:[#allocation12 + $0x28c] sm:$0xf]  ;;  %v10869_v21 = vld [vmem:[#allocation12 + $0x298] sm:$0xf0]  ;;  %1181 = vmatpush.bf16.msrb.mxu1 %v11016_v17 }
  0xee   :  { %v10996_v19 = vor.u32 %v15864_v16, %v10995_v15  ;;  %v624_v62 = vld [vmem:[#allocation3] sm:$0xee]  ;;  %v17382_v52 = vunpack.c.h.b16 %v17366_v31 }
  0xef   :  { %v520_v38 = vmax.f32 %v512_v32, 0.0  ;;  %v521_v39 = vmax.f32 %v513_v33, 0.0  ;;  %1125 = vmatpush.bf16.msra.mxu2 %v10868_v18  ;;  %v696_v46 = vunpack.c.l.b16 %v624_v62  ;;  %v697_v59 = vunpack.c.h.b16 %v624_v62  ;;  %v15820_v27 = vld [vmem:[#allocation12 + $0x234] sm:$0xf0] }
  0xf0   :  { %1144 = vmatpush.bf16.msra.mxu3 %v10996_v19  ;;  %v10952_v18 = vor.u32 %v15850_v10, %v10949_v11  ;;  %v11133_v10 = vld [vmem:[#allocation12 + $0xb0] sm:$0xf0]  ;;  %v15801_v11 = vld [vmem:[#allocation12 + $0x1a4] sm:$0xf] }
  0xf1   :  { %v528_v51 = vpack.c.bf16 %v521_v39, %v520_v38  ;;  %v10853_v38 = vld [vmem:[#allocation12 + $0x278] sm:$0xf0]  ;;  %v15858_v39 = vld [vmem:[#allocation12 + $0x36c] sm:$0xf]  ;;  %v707_v12 = vpack.c.b16 %v17382_v52, %v697_v59  ;;  %v11275_v59 = vld [vmem:[#allocation12 + $0x1c0] sm:$0xf] }
  0xf2   :  { %v473_v1 = vpop.f32.mrf.mxu0  ;;  %v492_v2 = vpop.f32.mrf.mxu1  ;;  %v10856_v43 = vor.u32 %v15826_v36, %v10853_v38  ;;  %v11163_v36 = vld [vmem:[#allocation12 + $0xe0] sm:$0xf] }
  0xf3   :  { %v539_v4 = vrot.slane %v528_v51, 7  ;;  %v501_v5 = vadd.f32 %v473_v1, %v367_v44  ;;  %v502_v6 = vadd.f32 %v492_v2, %v386_v45  ;;  %v10984_v44 = vor.u32 %v15858_v39, %v10981_v40  ;;  %1126 = vmatpush.bf16.msra.mxu2 %v10852_v34  ;;  %v10835_v45 = vld [vmem:[#allocation12 + $0x248] sm:$0xf]  ;;  %v10965_v1 = vld [vmem:[#allocation12 + $0x358] sm:$0xf0] }
  0xf4   :  { %1145 = vmatpush.bf16.msra.mxu3 %v10980_v37  ;;  %v10836_v47 = vor.u32 %v15824_v56, %v10835_v45  ;;  %v17379_v51 = vunpack.c.l.b16 %v17366_v31  ;;  %v10819_v2 = vld [vmem:[#allocation12 + $0x228] sm:$0xf]  ;;  %v10968_v28 = vor.u32 %v15854_v60, %v10965_v1  ;;  %v715_v29 = vrot.slane %v707_v12, 1  ;;  %v15779_v37 = vld [vmem:[#allocation12 + $0xec] sm:$0xf0] }
  0xf5   :  { %v540_v55 = vsel %vm17302_vm5, %v538_v61, %v539_v4  ;;  %v514_v13 = vadd.f32 %v17350_v49, %v501_v5  ;;  %v515_v14 = vadd.f32 %v17352_v50, %v502_v6  ;;  %v10872_v49 = vor.u32 %v15830_v20, %v10869_v21  ;;  %v15852_v5 = vld [vmem:[#allocation12 + $0x334] sm:$0xf0]  ;;  %v15818_v6 = vld [vmem:[#allocation12 + $0x22c] sm:$0xf]  ;;  %v11291_v38 = vld [vmem:[#allocation12 + $0x1e0] sm:$0xf] }
  0xf6   :  { %552 = vst [vmem:[#allocation3 + $0x10] sm:$0xff] %v540_v55  ;;  %v11000_v50 = vor.u32 %v15862_v24, %v10997_v25  ;;  %v541_v32 = vrot.slane %v539_v4, 4  ;;  %v10840_v61 = vor.u32 %v15822_v53, %v10837_v58  ;;  %v10820_v3 = vor.u32 %v15820_v27, %v10819_v2  ;;  %v10947_v4 = vld [vmem:[#allocation12 + $0x328] sm:$0xf]  ;;  %v15848_v20 = vld [vmem:[#allocation12 + $0x314] sm:$0xf0] }
  0xf7   :  { %v522_v22 = vmax.f32 %v514_v13, 0.0  ;;  %v523_v23 = vmax.f32 %v515_v14, 0.0  ;;  %1163 = vmatpush.bf16.msrb.mxu0 %v10872_v49  ;;  %1127 = vmatpush.bf16.msra.mxu2 %v10836_v47  ;;  %v10948_v8 = vor.u32 %v15852_v5, %v10947_v4  ;;  %v706_v54 = vpack.c.b16 %v17379_v51, %v696_v46  ;;  %v10803_v55 = vld [vmem:[#allocation12 + $0x208] sm:$0xf]  ;;  %v15816_v13 = vld [vmem:[#allocation12 + $0x214] sm:$0xf0] }
  0xf8   :  { %1182 = vmatpush.bf16.msrb.mxu1 %v11000_v50  ;;  %1146 = vmatpush.bf16.msra.mxu3 %v10964_v57  ;;  %v10931_v14 = vld [vmem:[#allocation12 + $0x308] sm:$0xf]  ;;  %v10824_v17 = vor.u32 %v15818_v6, %v10821_v9  ;;  %v10804_v19 = vor.u32 %v15816_v13, %v10803_v55  ;;  %v15814_v24 = vld [vmem:[#allocation12 + $0x20c] sm:$0xf]  ;;  %v10805_v25 = vld [vmem:[#allocation12 + $0x218] sm:$0xf0]  ;;  %v11164_v39 = vor.u32 %v15779_v37, %v11163_v36 }
  0xf9   :  { %v529_v26 = vpack.c.bf16 %v523_v23, %v522_v22  ;;  %v10932_v23 = vor.u32 %v15848_v20, %v10931_v14  ;;  %v10933_v49 = vld [vmem:[#allocation12 + $0x318] sm:$0xf0]  ;;  %v712_v50 = vrot.slane %v706_v54, 1  ;;  %v15811_v40 = vld [vmem:[#allocation12 + $0x1ec] sm:$0xf0]  ;;  %v11148_v53 = vor.u32 %v15775_v0, %v11147_v48 }
  0xfa   :  { %v11293_v45 = vld [vmem:[#allocation12 + $0x1f0] sm:$0xf0]  ;;  %v15807_v58 = vld [vmem:[#allocation12 + $0x1cc] sm:$0xf0]  ;;  %v15773_v60 = vld [vmem:[#allocation12 + $0xc4] sm:$0xf] }
  0xfb   :  { %v542_v33 = vrot.slane %v529_v26, 7  ;;  %1164 = vmatpush.bf16.msrb.mxu0 %v10856_v43  ;;  %1128 = vmatpush.bf16.msra.mxu2 %v10820_v3  ;;  %v15846_v26 = vld [vmem:[#allocation12 + $0x30c] sm:$0xf]  ;;  %v11165_v43 = vld [vmem:[#allocation12 + $0xf0] sm:$0xf0]  ;;  %v11276_v1 = vor.u32 %v15807_v58, %v11275_v59 }
  0xfc   :  { %1183 = vmatpush.bf16.msrb.mxu1 %v10984_v44  ;;  %1147 = vmatpush.bf16.msra.mxu3 %v10948_v8  ;;  %v15809_v44 = vld [vmem:[#allocation12 + $0x1e4] sm:$0xf]  ;;  %v11131_v3 = vld [vmem:[#allocation12 + $0xa0] sm:$0xf]  ;;  %v15771_v5 = vld [vmem:[#allocation12 + $0xac] sm:$0xf0] }
  0xfd   :  { %v543_v41 = vsel %vm17302_vm5, %v541_v32, %v542_v33  ;;  %v544_v42 = vrot.slane %v542_v33, 4  ;;  %v10787_v7 = vld [vmem:[#allocation3 + $0x10] sm:$0xf]  ;;  %v15747_v31 = vld [vmem:[#allocation3 + $0x14] sm:$0xf]  ;;  %v10808_v32 = vor.u32 %v15814_v24, %v10805_v25  ;;  %v10936_v33 = vor.u32 %v15846_v26, %v10933_v49 }
  0xfe   :  { %553 = vst [vmem:[#allocation3 + $0x18] sm:$0xff] %v543_v41  ;;  %v15777_v41 = vld [vmem:[#allocation12 + $0xe4] sm:$0xf]  ;;  %v11296_v57 = vor.u32 %v15809_v44, %v11293_v45  ;;  %v11259_v6 = vld [vmem:[#allocation12 + $0x1a0] sm:$0xf]  ;;  %v11132_v54 = vor.u32 %v15771_v5, %v11131_v3 }
  0xff   :  { %554 = vst [vmem:[#allocation3 + $0x20] sm:$0x11] %v544_v42  ;;  %1165 = vmatpush.bf16.msrb.mxu0 %v10840_v61  ;;  %1129 = vmatpush.bf16.msra.mxu2 %v10804_v19  ;;  %v11292_v42 = vor.u32 %v15811_v40, %v11291_v38  ;;  %v11168_v47 = vor.u32 %v15777_v41, %v11165_v43  ;;  %v11149_v61 = vld [vmem:[#allocation12 + $0xd0] sm:$0xf0]  ;;  %v15805_v27 = vld [vmem:[#allocation12 + $0x1c4] sm:$0xf] }
 0x100   :  { %1184 = vmatpush.bf16.msrb.mxu1 %v10968_v28  ;;  %1148 = vmatpush.bf16.msra.mxu3 %v10932_v23  ;;  %v11152_v2 = vor.u32 %v15773_v60, %v11149_v61  ;;  %v11277_v28 = vld [vmem:[#allocation12 + $0x1d0] sm:$0xf0]  ;;  %v15769_v9 = vld [vmem:[#allocation12 + $0xa4] sm:$0xf]  ;;  %v11115_v13 = vld [vmem:[#allocation12 + $0x80] sm:$0xf] }
 0x101   :  { %v11280_v4 = vor.u32 %v15805_v27, %v11277_v28  ;;  %v11261_v55 = vld [vmem:[#allocation12 + $0x1b0] sm:$0xf0]  ;;  %v11136_v14 = vor.u32 %v15769_v9, %v11133_v10  ;;  %v15765_v23 = vld [vmem:[#allocation12 + $0x84] sm:$0xf]  ;;  %v11099_v36 = vld [vmem:[#allocation12 + $0x60] sm:$0xf] }
 0x102   :  { %v11117_v26 = vld [vmem:[#allocation12 + $0x90] sm:$0xf0]  ;;  %v15797_v49 = vld [vmem:[#allocation12 + $0x184] sm:$0xf]  ;;  %v15763_v37 = vld [vmem:[#allocation12 + $0x6c] sm:$0xf0] }
 0x103   :  { %1166 = vmatpush.bf16.msrb.mxu0 %v10824_v17  ;;  %v15799_v17 = vld [vmem:[#allocation12 + $0x18c] sm:$0xf0]  ;;  %v11227_v38 = vld [vmem:[#allocation12 + $0x160] sm:$0xf]  ;;  %v15761_v41 = vld [vmem:[#allocation12 + $0x64] sm:$0xf] }
 0x104   :  { %1185 = vmatpush.bf16.msrb.mxu1 %v10952_v18  ;;  %v11264_v18 = vor.u32 %v15801_v11, %v11261_v55  ;;  %v15795_v40 = vld [vmem:[#allocation12 + $0x16c] sm:$0xf0]  ;;  %v11229_v43 = vld [vmem:[#allocation12 + $0x170] sm:$0xf0]  ;;  %v11083_v44 = vld [vmem:[#allocation12 + $0x40] sm:$0xf] }
 0x105   :  { %v15748_v15 = vld [vmem:[#allocation3 + $0x14] sm:$0xf0]  ;;  %v10789_v16 = vld [vmem:[#allocation3 + $0x18] sm:$0xf0]  ;;  %v15789_v58 = vld [vmem:[#allocation12 + $0x144] sm:$0xf] }
 0x106   :  { %v17386_v21 = vor.u32 %v15748_v15, %v10787_v7  ;;  %v17388_v22 = vor.u32 %v15747_v31, %v10789_v16  ;;  %v625_v30 = vld [vmem:[#allocation3 + $0x20] sm:$0x11]  ;;  %v15803_v7 = vld [vmem:[#allocation12 + $0x1ac] sm:$0xf0]  ;;  %v11243_v16 = vld [vmem:[#allocation12 + $0x180] sm:$0xf] }
 0x107   :  { %v704_v56 = vunpack.c.l.b16 %v625_v30  ;;  %v705_v46 = vunpack.c.h.b16 %v625_v30  ;;  %1167 = vmatpush.bf16.msrb.mxu0 %v10808_v32  ;;  %v11260_v12 = vor.u32 %v15803_v7, %v11259_v6  ;;  %v15767_v15 = vld [vmem:[#allocation12 + $0x8c] sm:$0xf0]  ;;  %v11244_v25 = vor.u32 %v15799_v17, %v11243_v16  ;;  %v11213_v60 = vld [vmem:[#allocation12 + $0x150] sm:$0xf0]  ;;  %v11067_v61 = vld [vmem:[#allocation12 + $0x20] sm:$0xf] }
 0x108   :  { %v713_v62 = vrot.slane %v17386_v21, 1  ;;  %v716_v63 = vrot.slane %v17388_v22, 1  ;;  %1186 = vmatpush.bf16.msrb.mxu1 %v10936_v33  ;;  %v11116_v24 = vor.u32 %v15767_v15, %v11115_v13  ;;  %v15791_v48 = vld [vmem:[#allocation12 + $0x14c] sm:$0xf0]  ;;  %v11216_v3 = vor.u32 %v15789_v58, %v11213_v60  ;;  %v11069_v5 = vld [vmem:[#allocation12 + $0x30] sm:$0xf0] }
 0x109   :  { %v710_v31 = vpack.c.b16 %v704_v56, %v704_v56  ;;  %v711_v8 = vpack.c.b16 %v705_v46, %v705_v46  ;;  %v15759_v46 = vld [vmem:[#allocation12 + $0x4c] sm:$0xf0]  ;;  %v11051_v9 = vld [vmem:[#allocation12] sm:$0xf]  ;;  %v15749_v13 = vld [vmem:[#allocation12 + $0x4] sm:$0xf] }
 0x10a   :  { %v17395_v34 = vsel %vm210_vm7, %v712_v50, %v713_v62  ;;  %v17400_v35 = vsel %vm210_vm7, %v715_v29, %v716_v63  ;;  %v11245_v50 = vld [vmem:[#allocation12 + $0x190] sm:$0xf0]  ;;  %v11120_v29 = vor.u32 %v15765_v23, %v11117_v26  ;;  %v11084_v0 = vor.u32 %v15759_v46, %v11083_v44  ;;  %v15787_v27 = vld [vmem:[#allocation12 + $0x12c] sm:$0xf0]  ;;  %v11179_v11 = vld [vmem:[#allocation12 + $0x100] sm:$0xf] }
 0x10b   :  { %1054 = vmatmul.bf16.vlgmr.msrb.gmra.mxu2 %v17395_v34  ;;  %1073 = vmatmul.bf16.vlgmr.msrb.gmra.mxu3 %v17400_v35  ;;  %v718_v19 = vrot.slane %v710_v31, 1  ;;  %v720_v20 = vrot.slane %v711_v8, 1  ;;  %v11248_v30 = vor.u32 %v15797_v49, %v11245_v50  ;;  %v15785_v31 = vld [vmem:[#allocation12 + $0x124] sm:$0xf]  ;;  %v11197_v8 = vld [vmem:[#allocation12 + $0x130] sm:$0xf0] }
 0x10c   :  { %1092 = vmatmul.bf16.vlgmr.msra.gmra.mxu0 %v17395_v34  ;;  %1111 = vmatmul.bf16.vlgmr.msra.gmra.mxu1 %v17400_v35  ;;  %v15751_v10 = vld [vmem:[#allocation12 + $0xc] sm:$0xf0]  ;;  %v11200_v55 = vor.u32 %v15785_v31, %v11197_v8  ;;  %v11053_v16 = vld [vmem:[#allocation12 + $0x10] sm:$0xf0]  ;;  %v15781_v17 = vld [vmem:[#allocation12 + $0x104] sm:$0xf] }
 0x10d   :  { %1527 = vmatpush.bf16.msrb.mxu2 %v11164_v39  ;;  %1546 = vmatpush.bf16.msrb.mxu3 %v11292_v42  ;;  %v17409_v32 = vsel %vm210_vm7, %v713_v62, %v718_v19  ;;  %v17414_v33 = vsel %vm210_vm7, %v716_v63, %v720_v20  ;;  %v11100_v39 = vor.u32 %v15763_v37, %v11099_v36  ;;  %v11101_v42 = vld [vmem:[#allocation12 + $0x70] sm:$0xf0]  ;;  %v15793_v63 = vld [vmem:[#allocation12 + $0x164] sm:$0xf]  ;;  %v11171_v23 = vld [vmem:[#allocation12 + $0xe8] sm:$0xf] }
 0x10e   :  { %1565 = vmatpush.bf16.msra.mxu0 %v11168_v47  ;;  %1584 = vmatpush.bf16.msra.mxu1 %v11296_v57  ;;  %v11228_v62 = vor.u32 %v15795_v40, %v11227_v38  ;;  %v11104_v45 = vor.u32 %v15761_v41, %v11101_v42  ;;  %v11232_v56 = vor.u32 %v15793_v63, %v11229_v43  ;;  %v11211_v47 = vld [vmem:[#allocation12 + $0x140] sm:$0xf]  ;;  %v15757_v57 = vld [vmem:[#allocation12 + $0x44] sm:$0xf]  ;;  %v15812_v49 = vld [vmem:[#allocation12 + $0x1f4] sm:$0xf0] }
 0x10f   :  { %v11212_v59 = vor.u32 %v15791_v48, %v11211_v47  ;;  %v11056_v19 = vor.u32 %v15749_v13, %v11053_v16  ;;  %v15778_v50 = vld [vmem:[#allocation12 + $0xec] sm:$0xf]  ;;  %v11301_v38 = vld [vmem:[#allocation12 + $0x1f8] sm:$0xf0]  ;;  %v15776_v41 = vld [vmem:[#allocation12 + $0xd4] sm:$0xf0] }
 0x110   :  { %v15810_v37 = vld [vmem:[#allocation12 + $0x1ec] sm:$0xf]  ;;  %v15808_v42 = vld [vmem:[#allocation12 + $0x1d4] sm:$0xf0]  ;;  %v11157_v43 = vld [vmem:[#allocation12 + $0xd8] sm:$0xf0] }
 0x111   :  { %1528 = vmatpush.bf16.msrb.mxu2 %v11148_v53  ;;  %1547 = vmatpush.bf16.msrb.mxu3 %v11276_v1  ;;  %v11085_v53 = vld [vmem:[#allocation12 + $0x50] sm:$0xf0]  ;;  %v15755_v1 = vld [vmem:[#allocation12 + $0x2c] sm:$0xf0]  ;;  %v11304_v40 = vor.u32 %v15810_v37, %v11301_v38  ;;  %v15774_v63 = vld [vmem:[#allocation12 + $0xcc] sm:$0xf] }
 0x112   :  { %1566 = vmatpush.bf16.msra.mxu0 %v11152_v2  ;;  %1585 = vmatpush.bf16.msra.mxu1 %v11280_v4  ;;  %v11195_v2 = vld [vmem:[#allocation12 + $0x120] sm:$0xf]  ;;  %v11088_v28 = vor.u32 %v15757_v57, %v11085_v53  ;;  %v15753_v4 = vld [vmem:[#allocation12 + $0x24] sm:$0xf]  ;;  %v11068_v6 = vor.u32 %v15755_v1, %v11067_v61  ;;  %v15806_v44 = vld [vmem:[#allocation12 + $0x1cc] sm:$0xf] }
 0x113   :  { %v11196_v7 = vor.u32 %v15787_v27, %v11195_v2  ;;  %v11139_v46 = vld [vmem:[#allocation12 + $0xa8] sm:$0xf]  ;;  %v15772_v47 = vld [vmem:[#allocation12 + $0xb4] sm:$0xf0]  ;;  %v15770_v57 = vld [vmem:[#allocation12 + $0xac] sm:$0xf] }
 0x114   :  { %v11140_v53 = vor.u32 %v15772_v47, %v11139_v46  ;;  %v11141_v58 = vld [vmem:[#allocation12 + $0xb8] sm:$0xf0]  ;;  %v15802_v60 = vld [vmem:[#allocation12 + $0x1ac] sm:$0xf]  ;;  %v11235_v13 = vld [vmem:[#allocation12 + $0x168] sm:$0xf] }
 0x115   :  { %1529 = vmatpush.bf16.msrb.mxu2 %v11132_v54  ;;  %1548 = vmatpush.bf16.msrb.mxu3 %v11260_v12  ;;  %v15783_v54 = vld [vmem:[#allocation12 + $0x10c] sm:$0xf0]  ;;  %v11072_v12 = vor.u32 %v15753_v4, %v11069_v5  ;;  %v11269_v61 = vld [vmem:[#allocation12 + $0x1b8] sm:$0xf0]  ;;  %v11144_v2 = vor.u32 %v15770_v57, %v11141_v58  ;;  %v11251_v4 = vld [vmem:[#allocation12 + $0x188] sm:$0xf] }
 0x116   :  { %1567 = vmatpush.bf16.msra.mxu0 %v11136_v14  ;;  %1586 = vmatpush.bf16.msra.mxu1 %v11264_v18  ;;  %v11052_v14 = vor.u32 %v15751_v10, %v11051_v9  ;;  %v11180_v15 = vor.u32 %v15783_v54, %v11179_v11  ;;  %v11181_v18 = vld [vmem:[#allocation12 + $0x110] sm:$0xf0]  ;;  %v11272_v27 = vor.u32 %v15802_v60, %v11269_v61  ;;  %v15800_v5 = vld [vmem:[#allocation12 + $0x194] sm:$0xf0]  ;;  %v15798_v31 = vld [vmem:[#allocation12 + $0x18c] sm:$0xf] }
 0x117   :  { %v11184_v20 = vor.u32 %v15781_v17, %v11181_v18  ;;  %v11253_v8 = vld [vmem:[#allocation12 + $0x198] sm:$0xf0]  ;;  %v11252_v10 = vor.u32 %v15800_v5, %v11251_v4  ;;  %v15762_v16 = vld [vmem:[#allocation12 + $0x6c] sm:$0xf]  ;;  %v15784_v58 = vld [vmem:[#allocation12 + $0x114] sm:$0xf0] }
 0x118   :  { %v11256_v54 = vor.u32 %v15798_v31, %v11253_v8  ;;  %v11109_v17 = vld [vmem:[#allocation12 + $0x78] sm:$0xf0]  ;;  %v15750_v60 = vld [vmem:[#allocation12 + $0xc] sm:$0xf]  ;;  %v15907_v31 = vld [vmem:[#allocation12 + $0x4ec] sm:$0xf0] }
 0x119   :  { %1530 = vmatpush.bf16.msrb.mxu2 %v11116_v24  ;;  %1549 = vmatpush.bf16.msrb.mxu3 %v11244_v25  ;;  %v15780_v24 = vld [vmem:[#allocation12 + $0xf4] sm:$0xf0]  ;;  %v11299_v25 = vld [vmem:[#allocation12 + $0x1e8] sm:$0xf]  ;;  %v11221_v38 = vld [vmem:[#allocation12 + $0x158] sm:$0xf0] }
 0x11a   :  { %1568 = vmatpush.bf16.msra.mxu0 %v11120_v29  ;;  %1587 = vmatpush.bf16.msra.mxu1 %v11248_v30  ;;  %v11172_v26 = vor.u32 %v15780_v24, %v11171_v23  ;;  %v11173_v29 = vld [vmem:[#allocation12 + $0xf8] sm:$0xf0]  ;;  %v11300_v30 = vor.u32 %v15812_v49, %v11299_v25  ;;  %v11091_v24 = vld [vmem:[#allocation12 + $0x48] sm:$0xf]  ;;  %v15792_v49 = vld [vmem:[#allocation12 + $0x154] sm:$0xf0] }
 0x11b   :  { %1059 = vmatmul.bf16.gmra.mxu2 %v17409_v32  ;;  %1078 = vmatmul.bf16.gmra.mxu3 %v17414_v33  ;;  %v11176_v36 = vor.u32 %v15778_v50, %v11173_v29  ;;  %v11237_v23 = vld [vmem:[#allocation12 + $0x178] sm:$0xf0]  ;;  %v15758_v50 = vld [vmem:[#allocation12 + $0x4c] sm:$0xf]  ;;  %v11547_v8 = vld [vmem:[#allocation12 + $0x5e0] sm:$0xf] }
 0x11c   :  { %1097 = vmatmul.bf16.gmra.mxu0 %v17409_v32  ;;  %1116 = vmatmul.bf16.gmra.mxu1 %v17414_v33  ;;  %v556_v25 = vld [vmem:[#allocation3] sm:$0xff] }
 0x11d   :  { %1531 = vmatpush.bf16.msrb.mxu2 %v11100_v39  ;;  %1550 = vmatpush.bf16.msrb.mxu3 %v11228_v62  ;;  %v11155_v39 = vld [vmem:[#allocation12 + $0xc8] sm:$0xf]  ;;  %v11093_v29 = vld [vmem:[#allocation12 + $0x58] sm:$0xf0] }
 0x11e   :  { %1569 = vmatpush.bf16.msra.mxu0 %v11104_v45  ;;  %1588 = vmatpush.bf16.msra.mxu1 %v11232_v56  ;;  %v11160_v45 = vor.u32 %v15774_v63, %v11157_v43  ;;  %v11285_v56 = vld [vmem:[#allocation12 + $0x1d8] sm:$0xf0]  ;;  %v15786_v43 = vld [vmem:[#allocation12 + $0x12c] sm:$0xf] }
 0x11f   :  { %v11288_v48 = vor.u32 %v15806_v44, %v11285_v56  ;;  %v11077_v63 = vld [vmem:[#allocation12 + $0x38] sm:$0xf0]  ;;  %v1200_v56 = vunpack.c.h.b16 %v556_v25 }
 0x120   :  { %v11205_v44 = vld [vmem:[#allocation12 + $0x138] sm:$0xf0] }
 0x121   :  { %1532 = vmatpush.bf16.msrb.mxu2 %v11084_v0  ;;  %1551 = vmatpush.bf16.msrb.mxu3 %v11212_v59  ;;  %v11267_v0 = vld [vmem:[#allocation12 + $0x1a8] sm:$0xf]  ;;  %v15804_v59 = vld [vmem:[#allocation12 + $0x1b4] sm:$0xf0]  ;;  %v11208_v57 = vor.u32 %v15786_v43, %v11205_v44  ;;  %v11061_v61 = vld [vmem:[#allocation12 + $0x18] sm:$0xf0] }
 0x122   :  { %1570 = vmatpush.bf16.msra.mxu0 %v11088_v28  ;;  %1589 = vmatpush.bf16.msra.mxu1 %v11216_v3  ;;  %v11268_v1 = vor.u32 %v15804_v59, %v11267_v0  ;;  %v11123_v28 = vld [vmem:[#allocation12 + $0x88] sm:$0xf]  ;;  %v15768_v3 = vld [vmem:[#allocation12 + $0x94] sm:$0xf0]  ;;  %v11064_v5 = vor.u32 %v15750_v60, %v11061_v61  ;;  %v11499_v43 = vld [vmem:[#allocation12 + $0x580] sm:$0xf] }
 0x123   :  { %v11124_v9 = vor.u32 %v15768_v3, %v11123_v28  ;;  %v15752_v0 = vld [vmem:[#allocation12 + $0x14] sm:$0xf0]  ;;  %v17432_v28 = vpack.c.b16 %v17382_v52, %v1200_v56  ;;  %v15927_v44 = vld [vmem:[#allocation12 + $0x58c] sm:$0xf0]  ;;  %v11373_v56 = vld [vmem:[#allocation12 + $0x490] sm:$0xf0] }
 0x124   :  { %v11483_v60 = vld [vmem:[#allocation12 + $0x560] sm:$0xf] }
 0x125   :  { %1533 = vmatpush.bf16.msrb.mxu2 %v11068_v6  ;;  %1552 = vmatpush.bf16.msrb.mxu3 %v11196_v7  ;;  %v15766_v6 = vld [vmem:[#allocation12 + $0x8c] sm:$0xf]  ;;  %v11125_v7 = vld [vmem:[#allocation12 + $0x98] sm:$0xf0] }
 0x126   :  { %1571 = vmatpush.bf16.msra.mxu0 %v11072_v12  ;;  %1590 = vmatpush.bf16.msra.mxu1 %v11200_v55  ;;  %v11128_v11 = vor.u32 %v15766_v6, %v11125_v7  ;;  %v11107_v12 = vld [vmem:[#allocation12 + $0x68] sm:$0xf]  ;;  %v15764_v55 = vld [vmem:[#allocation12 + $0x74] sm:$0xf0]  ;;  %v11419_v7 = vld [vmem:[#allocation12 + $0x4e0] sm:$0xf] }
 0x129   :  { %1534 = vmatpush.bf16.msrb.mxu2 %v11052_v14  ;;  %1553 = vmatpush.bf16.msrb.mxu3 %v11180_v15  ;;  %v11108_v14 = vor.u32 %v15764_v55, %v11107_v12  ;;  %v15796_v15 = vld [vmem:[#allocation12 + $0x174] sm:$0xf0] }
 0x12a   :  { %1572 = vmatpush.bf16.msra.mxu0 %v11056_v19  ;;  %1591 = vmatpush.bf16.msra.mxu1 %v11184_v20  ;;  %v11236_v18 = vor.u32 %v15796_v15, %v11235_v13  ;;  %v11112_v19 = vor.u32 %v15762_v16, %v11109_v17  ;;  %v15794_v20 = vld [vmem:[#allocation12 + $0x16c] sm:$0xf]  ;;  %v15937_v13 = vld [vmem:[#allocation12 + $0x5e4] sm:$0xf]  ;;  %v11403_v15 = vld [vmem:[#allocation12 + $0x4c0] sm:$0xf] }
 0x12b   :  { %1130 = vmatmul.bf16.vlgmr.msra.gmra.mxu2 %v17395_v34  ;;  %1149 = vmatmul.bf16.vlgmr.msra.gmra.mxu3 %v17400_v35  ;;  %v15903_v17 = vld [vmem:[#allocation12 + $0x4cc] sm:$0xf0] }
 0x12c   :  { %1168 = vmatmul.bf16.vlgmr.msrb.gmra.mxu0 %v17395_v34  ;;  %1187 = vmatmul.bf16.vlgmr.msrb.gmra.mxu1 %v17400_v35  ;;  %v11283_v34 = vld [vmem:[#allocation12 + $0x1c8] sm:$0xf]  ;;  %v11156_v35 = vor.u32 %v15776_v41, %v11155_v39  ;;  %v11096_v41 = vor.u32 %v15758_v50, %v11093_v29  ;;  %v15899_v50 = vld [vmem:[#allocation12 + $0x4ac] sm:$0xf0] }
 0x12d   :  { %1603 = vmatpush.bf16.msra.mxu2 %v11172_v26  ;;  %1622 = vmatpush.bf16.msra.mxu3 %v11300_v30  ;;  %v11284_v62 = vor.u32 %v15808_v42, %v11283_v34  ;;  %v15760_v26 = vld [vmem:[#allocation12 + $0x54] sm:$0xf0]  ;;  %v15790_v30 = vld [vmem:[#allocation12 + $0x14c] sm:$0xf]  ;;  %v11075_v39 = vld [vmem:[#allocation12 + $0x28] sm:$0xf] }
 0x12e   :  { %1641 = vmatpush.bf16.msrb.mxu0 %v11176_v36  ;;  %1660 = vmatpush.bf16.msrb.mxu1 %v11304_v40  ;;  %v11092_v36 = vor.u32 %v15760_v26, %v11091_v24  ;;  %v15756_v40 = vld [vmem:[#allocation12 + $0x34] sm:$0xf0]  ;;  %v11224_v34 = vor.u32 %v15790_v30, %v11221_v38  ;;  %v11203_v42 = vld [vmem:[#allocation12 + $0x128] sm:$0xf]  ;;  %v15901_v24 = vld [vmem:[#allocation12 + $0x4c4] sm:$0xf] }
 0x12f   :  { %v11076_v46 = vor.u32 %v15756_v40, %v11075_v39  ;;  %v11515_v30 = vld [vmem:[#allocation12 + $0x5a0] sm:$0xf]  ;;  %v11389_v39 = vld [vmem:[#allocation12 + $0x4b0] sm:$0xf0]  ;;  %v15929_v40 = vld [vmem:[#allocation12 + $0x5a4] sm:$0xf] }
 0x131   :  { %1604 = vmatpush.bf16.msra.mxu2 %v11156_v35  ;;  %1623 = vmatpush.bf16.msra.mxu3 %v11284_v62  ;;  %v15788_v35 = vld [vmem:[#allocation12 + $0x134] sm:$0xf0]  ;;  %v15754_v62 = vld [vmem:[#allocation12 + $0x2c] sm:$0xf] }
 0x132   :  { %1642 = vmatpush.bf16.msrb.mxu0 %v11160_v45  ;;  %1661 = vmatpush.bf16.msrb.mxu1 %v11288_v48  ;;  %v1199_v45 = vunpack.c.l.b16 %v556_v25  ;;  %v11204_v47 = vor.u32 %v15788_v35, %v11203_v42  ;;  %v11059_v48 = vld [vmem:[#allocation12 + $0x8] sm:$0xf]  ;;  %v11080_v59 = vor.u32 %v15754_v62, %v11077_v63  ;;  %v11405_v25 = vld [vmem:[#allocation12 + $0x4d0] sm:$0xf0]  ;;  %v11371_v62 = vld [vmem:[#allocation12 + $0x480] sm:$0xf] }
 0x133   :  { %v11060_v3 = vor.u32 %v15752_v0, %v11059_v48  ;;  %v11408_v26 = vor.u32 %v15901_v24, %v11405_v25  ;;  %v15895_v63 = vld [vmem:[#allocation12 + $0x48c] sm:$0xf0]  ;;  %v11500_v0 = vor.u32 %v15927_v44, %v11499_v43  ;;  %v15881_v24 = vld [vmem:[#allocation12 + $0x424] sm:$0xf]  ;;  %v11325_v25 = vld [vmem:[#allocation12 + $0x430] sm:$0xf0] }
 0x134   :  { %v11372_v48 = vor.u32 %v15895_v63, %v11371_v62  ;;  %v11437_v62 = vld [vmem:[#allocation12 + $0x510] sm:$0xf0]  ;;  %v11427_v43 = vld [vmem:[#allocation12 + $0x4e8] sm:$0xf]  ;;  %v15908_v44 = vld [vmem:[#allocation12 + $0x4f4] sm:$0xf0] }
 0x135   :  { %1605 = vmatpush.bf16.msra.mxu2 %v11140_v53  ;;  %1624 = vmatpush.bf16.msra.mxu3 %v11268_v1  ;;  %v11187_v53 = vld [vmem:[#allocation12 + $0x108] sm:$0xf]  ;;  %v15782_v1 = vld [vmem:[#allocation12 + $0x10c] sm:$0xf] }
 0x136   :  { %1643 = vmatpush.bf16.msrb.mxu0 %v11144_v2  ;;  %1662 = vmatpush.bf16.msrb.mxu1 %v11272_v27  ;;  %v11189_v2 = vld [vmem:[#allocation12 + $0x118] sm:$0xf0]  ;;  %v17429_v27 = vpack.c.b16 %v17379_v51, %v1199_v45  ;;  %v11188_v4 = vor.u32 %v15784_v58, %v11187_v53  ;;  %v15893_v45 = vld [vmem:[#allocation12 + $0x484] sm:$0xf]  ;;  %v11355_v53 = vld [vmem:[#allocation12 + $0x460] sm:$0xf] }
 0x137   :  { %v11192_v6 = vor.u32 %v15782_v1, %v11189_v2  ;;  %v15891_v58 = vld [vmem:[#allocation12 + $0x46c] sm:$0xf0]  ;;  %v15889_v2 = vld [vmem:[#allocation12 + $0x464] sm:$0xf] }
 0x138   :  { %v11356_v61 = vor.u32 %v15891_v58, %v11355_v53  ;;  %v15923_v1 = vld [vmem:[#allocation12 + $0x56c] sm:$0xf0]  ;;  %v11557_v53 = vld [vmem:[#allocation12 + $0x5f8] sm:$0xf0]  ;;  %v11411_v58 = vld [vmem:[#allocation12 + $0x4c8] sm:$0xf] }
 0x139   :  { %1606 = vmatpush.bf16.msra.mxu2 %v11124_v9  ;;  %1625 = vmatpush.bf16.msra.mxu3 %v11252_v10  ;;  %v11420_v9 = vor.u32 %v15907_v31, %v11419_v7  ;;  %v15939_v10 = vld [vmem:[#allocation12 + $0x5ec] sm:$0xf0]  ;;  %v11485_v7 = vld [vmem:[#allocation12 + $0x570] sm:$0xf0]  ;;  %v11339_v31 = vld [vmem:[#allocation12 + $0x440] sm:$0xf] }
 0x13a   :  { %1644 = vmatpush.bf16.msrb.mxu0 %v11128_v11  ;;  %1663 = vmatpush.bf16.msrb.mxu1 %v11256_v54  ;;  %v15905_v11 = vld [vmem:[#allocation12 + $0x4e4] sm:$0xf]  ;;  %v11421_v54 = vld [vmem:[#allocation12 + $0x4f0] sm:$0xf0]  ;;  %v11548_v12 = vor.u32 %v15939_v10, %v11547_v8  ;;  %v11467_v10 = vld [vmem:[#allocation12 + $0x540] sm:$0xf] }
 0x13b   :  { %1135 = vmatmul.bf16.gmra.mxu2 %v17409_v32  ;;  %1154 = vmatmul.bf16.gmra.mxu3 %v17414_v33  ;;  %v11424_v55 = vor.u32 %v15905_v11, %v11421_v54  ;;  %v15919_v11 = vld [vmem:[#allocation12 + $0x54c] sm:$0xf0]  ;;  %v15885_v54 = vld [vmem:[#allocation12 + $0x444] sm:$0xf] }
 0x13c   :  { %1173 = vmatmul.bf16.gmra.mxu0 %v17409_v32  ;;  %1192 = vmatmul.bf16.gmra.mxu1 %v17414_v33  ;;  %v11240_v32 = vor.u32 %v15794_v20, %v11237_v23  ;;  %v11219_v33 = vld [vmem:[#allocation12 + $0x148] sm:$0xf]  ;;  %v11404_v20 = vor.u32 %v15903_v17, %v11403_v15  ;;  %v11469_v15 = vld [vmem:[#allocation12 + $0x550] sm:$0xf0]  ;;  %v15883_v17 = vld [vmem:[#allocation12 + $0x42c] sm:$0xf0] }
 0x13d   :  { %1607 = vmatpush.bf16.msra.mxu2 %v11108_v14  ;;  %1626 = vmatpush.bf16.msra.mxu3 %v11236_v18  ;;  %v11220_v37 = vor.u32 %v15792_v49, %v11219_v33  ;;  %v11549_v14 = vld [vmem:[#allocation12 + $0x5f0] sm:$0xf0]  ;;  %v11531_v18 = vld [vmem:[#allocation12 + $0x5c0] sm:$0xf] }
 0x13e   :  { %1645 = vmatpush.bf16.msrb.mxu0 %v11112_v19  ;;  %1664 = vmatpush.bf16.msrb.mxu1 %v11240_v32  ;;  %v11552_v16 = vor.u32 %v15937_v13, %v11549_v14  ;;  %v15935_v19 = vld [vmem:[#allocation12 + $0x5cc] sm:$0xf0]  ;;  %v15933_v32 = vld [vmem:[#allocation12 + $0x5c4] sm:$0xf]  ;;  %v11533_v33 = vld [vmem:[#allocation12 + $0x5d0] sm:$0xf0]  ;;  %v11468_v14 = vor.u32 %v15919_v11, %v11467_v10 }
 0x13f   :  { %v11532_v23 = vor.u32 %v15935_v19, %v11531_v18  ;;  %v11387_v49 = vld [vmem:[#allocation12 + $0x4a0] sm:$0xf]  ;;  %v11536_v29 = vor.u32 %v15933_v32, %v11533_v33  ;;  %v15913_v32 = vld [vmem:[#allocation12 + $0x524] sm:$0xf]  ;;  %v11523_v11 = vld [vmem:[#allocation12 + $0x5a8] sm:$0xf] }
 0x140   :  { %v11388_v38 = vor.u32 %v15899_v50, %v11387_v49  ;;  %v11307_v50 = vld [vmem:[#allocation12 + $0x400] sm:$0xf] }
 0x141   :  { %1608 = vmatpush.bf16.msra.mxu2 %v11092_v36  ;;  %1627 = vmatpush.bf16.msra.mxu3 %v11220_v37  ;;  %v15931_v36 = vld [vmem:[#allocation12 + $0x5ac] sm:$0xf0]  ;;  %v15897_v37 = vld [vmem:[#allocation12 + $0x4a4] sm:$0xf] }
 0x142   :  { %1646 = vmatpush.bf16.msrb.mxu0 %v11096_v41  ;;  %1665 = vmatpush.bf16.msrb.mxu1 %v11224_v34  ;;  %v11517_v41 = vld [vmem:[#allocation12 + $0x5b0] sm:$0xf0]  ;;  %v11516_v34 = vor.u32 %v15931_v36, %v11515_v30  ;;  %v11392_v42 = vor.u32 %v15897_v37, %v11389_v39  ;;  %v15879_v36 = vld [vmem:[#allocation12 + $0x40c] sm:$0xf0]  ;;  %v11435_v37 = vld [vmem:[#allocation12 + $0x500] sm:$0xf] }
 0x143   :  { %v11520_v35 = vor.u32 %v15929_v40, %v11517_v41  ;;  %v11308_v39 = vor.u32 %v15879_v36, %v11307_v50  ;;  %v15877_v41 = vld [vmem:[#allocation12 + $0x404] sm:$0xf]  ;;  %v11363_v36 = vld [vmem:[#allocation12 + $0x468] sm:$0xf] }
 0x145   :  { %1609 = vmatpush.bf16.msra.mxu2 %v11076_v46  ;;  %1628 = vmatpush.bf16.msra.mxu3 %v11204_v47  ;;  %v15925_v46 = vld [vmem:[#allocation12 + $0x584] sm:$0xf]  ;;  %v11501_v47 = vld [vmem:[#allocation12 + $0x590] sm:$0xf0] }
 0x146   :  { %1647 = vmatpush.bf16.msrb.mxu0 %v11080_v59  ;;  %1666 = vmatpush.bf16.msrb.mxu1 %v11208_v57  ;;  %v11376_v59 = vor.u32 %v15893_v45, %v11373_v56  ;;  %v11504_v57 = vor.u32 %v15925_v46, %v11501_v47  ;;  %v11555_v45 = vld [vmem:[#allocation12 + $0x5e8] sm:$0xf]  ;;  %v11428_v56 = vor.u32 %v15908_v44, %v11427_v43  ;;  %v15940_v46 = vld [vmem:[#allocation12 + $0x5f4] sm:$0xf0]  ;;  %v15906_v47 = vld [vmem:[#allocation12 + $0x4ec] sm:$0xf] }
 0x147   :  { %v11347_v44 = vld [vmem:[#allocation12 + $0x448] sm:$0xf] }
 0x149   :  { %1610 = vmatpush.bf16.msra.mxu2 %v11060_v3  ;;  %1629 = vmatpush.bf16.msra.mxu3 %v11188_v4  ;;  %v11357_v3 = vld [vmem:[#allocation12 + $0x470] sm:$0xf0]  ;;  %v11484_v4 = vor.u32 %v15923_v1, %v11483_v60  ;;  %v11539_v60 = vld [vmem:[#allocation12 + $0x5c8] sm:$0xf]  ;;  %v15936_v1 = vld [vmem:[#allocation12 + $0x5d4] sm:$0xf0] }
 0x14a   :  { %1648 = vmatpush.bf16.msrb.mxu0 %v11064_v5  ;;  %1667 = vmatpush.bf16.msrb.mxu1 %v11192_v6  ;;  %v11360_v5 = vor.u32 %v15889_v2, %v11357_v3  ;;  %v15921_v6 = vld [vmem:[#allocation12 + $0x564] sm:$0xf]  ;;  %v11540_v2 = vor.u32 %v15936_v1, %v11539_v60  ;;  %v15902_v3 = vld [vmem:[#allocation12 + $0x4cc] sm:$0xf]  ;;  %v11331_v60 = vld [vmem:[#allocation12 + $0x428] sm:$0xf] }
 0x14b   :  { %1535 = vmatmul.bf16.vlgmr.msrb.gmra.mxu2 %v17429_v27  ;;  %1554 = vmatmul.bf16.vlgmr.msrb.gmra.mxu3 %v17432_v28  ;;  %v11488_v8 = vor.u32 %v15921_v6, %v11485_v7  ;;  %v11541_v7 = vld [vmem:[#allocation12 + $0x5d8] sm:$0xf0] }
 0x14c   :  { %1573 = vmatmul.bf16.vlgmr.msra.gmra.mxu0 %v17429_v27  ;;  %1592 = vmatmul.bf16.vlgmr.msra.gmra.mxu1 %v17432_v28 }
 0x14d   :  { %2090 = vmatpush.bf16.msrb.mxu2 %v11420_v9  ;;  %2109 = vmatpush.bf16.msrb.mxu3 %v11548_v12  ;;  %v15887_v9 = vld [vmem:[#allocation12 + $0x44c] sm:$0xf0]  ;;  %v11341_v12 = vld [vmem:[#allocation12 + $0x450] sm:$0xf0] }
 0x14e   :  { %2128 = vmatpush.bf16.msra.mxu0 %v11424_v55  ;;  %2147 = vmatpush.bf16.msra.mxu1 %v11552_v16  ;;  %v15917_v55 = vld [vmem:[#allocation12 + $0x544] sm:$0xf]  ;;  %v11340_v13 = vor.u32 %v15887_v9, %v11339_v31  ;;  %v11323_v16 = vld [vmem:[#allocation12 + $0x420] sm:$0xf]  ;;  %v11344_v18 = vor.u32 %v15885_v54, %v11341_v12  ;;  %v11395_v31 = vld [vmem:[#allocation12 + $0x4a8] sm:$0xf] }
 0x14f   :  { %v11472_v19 = vor.u32 %v15917_v55, %v11469_v15  ;;  %v11324_v33 = vor.u32 %v15883_v17, %v11323_v16  ;;  %v15932_v54 = vld [vmem:[#allocation12 + $0x5b4] sm:$0xf0]  ;;  %v15898_v12 = vld [vmem:[#allocation12 + $0x4ac] sm:$0xf]  ;;  %v11525_v15 = vld [vmem:[#allocation12 + $0x5b8] sm:$0xf0] }
 0x150   :  { %v11524_v55 = vor.u32 %v15932_v54, %v11523_v11  ;;  %v1757_v11 = vrot.slane %v17386_v21, 2  ;;  %v1760_v54 = vrot.slane %v17388_v22, 2 }
 0x151   :  { %2091 = vmatpush.bf16.msrb.mxu2 %v11404_v20  ;;  %2110 = vmatpush.bf16.msrb.mxu3 %v11532_v23  ;;  %v11451_v20 = vld [vmem:[#allocation12 + $0x520] sm:$0xf]  ;;  %v15915_v23 = vld [vmem:[#allocation12 + $0x52c] sm:$0xf0] }
 0x152   :  { %2129 = vmatpush.bf16.msra.mxu0 %v11408_v26  ;;  %2148 = vmatpush.bf16.msra.mxu1 %v11536_v29  ;;  %v11453_v26 = vld [vmem:[#allocation12 + $0x530] sm:$0xf0]  ;;  %v11452_v49 = vor.u32 %v15915_v23, %v11451_v20  ;;  %v11328_v29 = vor.u32 %v15881_v24, %v11325_v25  ;;  %v11507_v20 = vld [vmem:[#allocation12 + $0x588] sm:$0xf]  ;;  %v15928_v23 = vld [vmem:[#allocation12 + $0x594] sm:$0xf0] }
 0x153   :  { %v11456_v30 = vor.u32 %v15913_v32, %v11453_v26  ;;  %v11508_v25 = vor.u32 %v15928_v23, %v11507_v20  ;;  %v15894_v32 = vld [vmem:[#allocation12 + $0x48c] sm:$0xf]  ;;  %v11381_v26 = vld [vmem:[#allocation12 + $0x498] sm:$0xf0] }
 0x154   :  { %v11384_v50 = vor.u32 %v15894_v32, %v11381_v26  ;;  %v15910_v32 = vld [vmem:[#allocation12 + $0x50c] sm:$0xf]  ;;  %v1680_v26 = vld [vmem:[#allocation3 + $0x20] sm:$0x33] }
 0x155   :  { %2092 = vmatpush.bf16.msrb.mxu2 %v11388_v38  ;;  %2111 = vmatpush.bf16.msrb.mxu3 %v11516_v34  ;;  %v15911_v38 = vld [vmem:[#allocation12 + $0x50c] sm:$0xf0]  ;;  %v11309_v34 = vld [vmem:[#allocation12 + $0x410] sm:$0xf0] }
 0x156   :  { %2130 = vmatpush.bf16.msra.mxu0 %v11392_v42  ;;  %2149 = vmatpush.bf16.msra.mxu1 %v11520_v35  ;;  %v11436_v40 = vor.u32 %v15911_v38, %v11435_v37  ;;  %v15909_v42 = vld [vmem:[#allocation12 + $0x504] sm:$0xf]  ;;  %v11312_v35 = vor.u32 %v15877_v41, %v11309_v34  ;;  %v15892_v37 = vld [vmem:[#allocation12 + $0x474] sm:$0xf0]  ;;  %v11491_v38 = vld [vmem:[#allocation12 + $0x568] sm:$0xf] }
 0x157   :  { %v11440_v63 = vor.u32 %v15909_v42, %v11437_v62  ;;  %v15890_v41 = vld [vmem:[#allocation12 + $0x46c] sm:$0xf]  ;;  %v11365_v34 = vld [vmem:[#allocation12 + $0x478] sm:$0xf0] }
 0x158   :  { %v15922_v62 = vld [vmem:[#allocation12 + $0x56c] sm:$0xf] }
 0x159   :  { %2093 = vmatpush.bf16.msrb.mxu2 %v11372_v48  ;;  %2112 = vmatpush.bf16.msrb.mxu3 %v11500_v0  ;;  %v11429_v48 = vld [vmem:[#allocation12 + $0x4f8] sm:$0xf0]  ;;  %v11556_v0 = vor.u32 %v15940_v46, %v11555_v45  ;;  %v15888_v45 = vld [vmem:[#allocation12 + $0x454] sm:$0xf0] }
 0x15a   :  { %2131 = vmatpush.bf16.msra.mxu0 %v11376_v59  ;;  %2150 = vmatpush.bf16.msra.mxu1 %v11504_v57  ;;  %v11432_v59 = vor.u32 %v15906_v47, %v11429_v48  ;;  %v15938_v57 = vld [vmem:[#allocation12 + $0x5ec] sm:$0xf]  ;;  %v15920_v48 = vld [vmem:[#allocation12 + $0x554] sm:$0xf0] }
 0x15b   :  { %1540 = vmatmul.bf16.gmra.mxu2 %v17386_v21  ;;  %1559 = vmatmul.bf16.gmra.mxu3 %v17388_v22 }
 0x15c   :  { %1578 = vmatmul.bf16.gmra.mxu0 %v17386_v21  ;;  %1597 = vmatmul.bf16.gmra.mxu1 %v17388_v22 }
 0x15d   :  { %2094 = vmatpush.bf16.msrb.mxu2 %v11356_v61  ;;  %2113 = vmatpush.bf16.msrb.mxu3 %v11484_v4  ;;  %v11413_v4 = vld [vmem:[#allocation12 + $0x4d8] sm:$0xf0] }
 0x15e   :  { %2132 = vmatpush.bf16.msra.mxu0 %v11360_v5  ;;  %2151 = vmatpush.bf16.msra.mxu1 %v11488_v8  ;;  %v15934_v5 = vld [vmem:[#allocation12 + $0x5cc] sm:$0xf]  ;;  %v11416_v6 = vor.u32 %v15902_v3, %v11413_v4  ;;  %v15900_v8 = vld [vmem:[#allocation12 + $0x4b4] sm:$0xf0]  ;;  %v11459_v4 = vld [vmem:[#allocation12 + $0x528] sm:$0xf] }
 0x15f   :  { %v11544_v9 = vor.u32 %v15934_v5, %v11541_v7  ;;  %v11396_v10 = vor.u32 %v15900_v8, %v11395_v31  ;;  %v15916_v5 = vld [vmem:[#allocation12 + $0x534] sm:$0xf0]  ;;  %v11333_v8 = vld [vmem:[#allocation12 + $0x438] sm:$0xf0] }
 0x160   :  { %v11460_v31 = vor.u32 %v15916_v5, %v11459_v4 }
 0x161   :  { %2095 = vmatpush.bf16.msrb.mxu2 %v11340_v13  ;;  %2114 = vmatpush.bf16.msrb.mxu3 %v11468_v14  ;;  %v11397_v13 = vld [vmem:[#allocation12 + $0x4b8] sm:$0xf0]  ;;  %v15930_v14 = vld [vmem:[#allocation12 + $0x5ac] sm:$0xf] }
 0x162   :  { %2133 = vmatpush.bf16.msra.mxu0 %v11344_v18  ;;  %2152 = vmatpush.bf16.msra.mxu1 %v11472_v19  ;;  %v11400_v16 = vor.u32 %v15898_v12, %v11397_v13  ;;  %v11528_v17 = vor.u32 %v15930_v14, %v11525_v15  ;;  %v11379_v18 = vld [vmem:[#allocation12 + $0x488] sm:$0xf]  ;;  %v15896_v19 = vld [vmem:[#allocation12 + $0x494] sm:$0xf0] }
 0x163   :  { %v11380_v24 = vor.u32 %v15896_v19, %v11379_v18  ;;  %v11443_v13 = vld [vmem:[#allocation12 + $0x508] sm:$0xf] }
 0x165   :  { %2096 = vmatpush.bf16.msrb.mxu2 %v11324_v33  ;;  %2115 = vmatpush.bf16.msrb.mxu3 %v11452_v49  ;;  %v15926_v33 = vld [vmem:[#allocation12 + $0x58c] sm:$0xf]  ;;  %v1679_v49 = vld [vmem:[#allocation3] sm:$0xcc] }
 0x166   :  { %2134 = vmatpush.bf16.msra.mxu0 %v11328_v29  ;;  %2153 = vmatpush.bf16.msra.mxu1 %v11456_v30  ;;  %v11509_v29 = vld [vmem:[#allocation12 + $0x598] sm:$0xf0]  ;;  %v1748_v46 = vunpack.c.l.b16 %v1679_v49  ;;  %v1749_v47 = vunpack.c.h.b16 %v1679_v49 }
 0x167   :  { %v11512_v30 = vor.u32 %v15926_v33, %v11509_v29  ;;  %v11445_v49 = vld [vmem:[#allocation12 + $0x518] sm:$0xf0] }
 0x168   :  { %v1752_v1 = vpack.c.b16 %v17379_v51, %v1748_v46 }
 0x169   :  { %2097 = vmatpush.bf16.msrb.mxu2 %v11308_v39  ;;  %2116 = vmatpush.bf16.msrb.mxu3 %v11436_v40  ;;  %v11364_v39 = vor.u32 %v15892_v37, %v11363_v36  ;;  %v15924_v40 = vld [vmem:[#allocation12 + $0x574] sm:$0xf0]  ;;  %v1750_v36 = vunpack.c.l.b16 %v1680_v26  ;;  %v1751_v37 = vunpack.c.h.b16 %v1680_v26 }
 0x16a   :  { %2135 = vmatpush.bf16.msra.mxu0 %v11312_v35  ;;  %2154 = vmatpush.bf16.msra.mxu1 %v11440_v63  ;;  %v11492_v42 = vor.u32 %v15924_v40, %v11491_v38  ;;  %v11368_v35 = vor.u32 %v15890_v41, %v11365_v34  ;;  %v11493_v63 = vld [vmem:[#allocation12 + $0x578] sm:$0xf0]  ;;  %v1756_v14 = vrot.slane %v1752_v1, 2 }
 0x16b   :  { %1611 = vmatmul.bf16.vlgmr.msra.gmra.mxu2 %v17429_v27  ;;  %1630 = vmatmul.bf16.vlgmr.msra.gmra.mxu3 %v17432_v28  ;;  %v11496_v43 = vor.u32 %v15922_v62, %v11493_v63  ;;  %v1754_v34 = vpack.c.b16 %v1750_v36, %v1750_v36 }
 0x16c   :  { %1649 = vmatmul.bf16.vlgmr.msrb.gmra.mxu0 %v17429_v27  ;;  %1668 = vmatmul.bf16.vlgmr.msrb.gmra.mxu1 %v17432_v28  ;;  %v11560_v27 = vor.u32 %v15938_v57, %v11557_v53  ;;  %v15904_v28 = vld [vmem:[#allocation12 + $0x4d4] sm:$0xf0]  ;;  %v15886_v57 = vld [vmem:[#allocation12 + $0x44c] sm:$0xf]  ;;  %v11349_v53 = vld [vmem:[#allocation12 + $0x458] sm:$0xf0] }
 0x16d   :  { %2166 = vmatpush.bf16.msra.mxu2 %v11428_v56  ;;  %2185 = vmatpush.bf16.msra.mxu3 %v11556_v0  ;;  %v11412_v61 = vor.u32 %v15904_v28, %v11411_v58  ;;  %v11475_v56 = vld [vmem:[#allocation12 + $0x548] sm:$0xf]  ;;  %v11348_v0 = vor.u32 %v15888_v45, %v11347_v44  ;;  %v11352_v58 = vor.u32 %v15886_v57, %v11349_v53  ;;  %v11477_v28 = vld [vmem:[#allocation12 + $0x558] sm:$0xf0]  ;;  %v1762_v63 = vrot.slane %v1754_v34, 2 }
 0x16e   :  { %2204 = vmatpush.bf16.msrb.mxu0 %v11432_v59  ;;  %2223 = vmatpush.bf16.msrb.mxu1 %v11560_v27  ;;  %v11476_v59 = vor.u32 %v15920_v48, %v11475_v56  ;;  %v15918_v27 = vld [vmem:[#allocation12 + $0x54c] sm:$0xf] }
 0x16f   :  { %v11480_v3 = vor.u32 %v15918_v27, %v11477_v28 }
 0x171   :  { %2167 = vmatpush.bf16.msra.mxu2 %v11412_v61  ;;  %2186 = vmatpush.bf16.msra.mxu3 %v11540_v2  ;;  %v15884_v61 = vld [vmem:[#allocation12 + $0x434] sm:$0xf0]  ;;  %v1753_v2 = vpack.c.b16 %v17382_v52, %v1749_v47  ;;  %v11315_v52 = vld [vmem:[#allocation12 + $0x408] sm:$0xf]  ;;  %v1763_v47 = vsel %vm405_vm9, %v1757_v11, %v1762_v63 }
 0x172   :  { %2205 = vmatpush.bf16.msrb.mxu0 %v11416_v6  ;;  %2224 = vmatpush.bf16.msrb.mxu1 %v11544_v9  ;;  %v15882_v6 = vld [vmem:[#allocation12 + $0x42c] sm:$0xf]  ;;  %v11332_v7 = vor.u32 %v15884_v61, %v11331_v60 }
 0x173   :  { %v15914_v9 = vld [vmem:[#allocation12 + $0x52c] sm:$0xf]  ;;  %v11336_v51 = vor.u32 %v15882_v6, %v11333_v8  ;;  %v1759_v15 = vrot.slane %v1753_v2, 2 }
 0x175   :  { %2168 = vmatpush.bf16.msra.mxu2 %v11396_v10  ;;  %2187 = vmatpush.bf16.msra.mxu3 %v11524_v55  ;;  %v11461_v10 = vld [vmem:[#allocation12 + $0x538] sm:$0xf0]  ;;  %v15880_v55 = vld [vmem:[#allocation12 + $0x414] sm:$0xf0] }
 0x176   :  { %2206 = vmatpush.bf16.msrb.mxu0 %v11400_v16  ;;  %2225 = vmatpush.bf16.msrb.mxu1 %v11528_v17  ;;  %v11464_v12 = vor.u32 %v15914_v9, %v11461_v10  ;;  %v15912_v16 = vld [vmem:[#allocation12 + $0x514] sm:$0xf0]  ;;  %v11316_v19 = vor.u32 %v15880_v55, %v11315_v52 }
 0x177   :  { %v11444_v20 = vor.u32 %v15912_v16, %v11443_v13 }
 0x179   :  { %2169 = vmatpush.bf16.msra.mxu2 %v11380_v24  ;;  %2188 = vmatpush.bf16.msra.mxu3 %v11508_v25  ;;  %v15878_v24 = vld [vmem:[#allocation12 + $0x40c] sm:$0xf]  ;;  %v11317_v25 = vld [vmem:[#allocation12 + $0x418] sm:$0xf0] }
 0x17a   :  { %2207 = vmatpush.bf16.msrb.mxu0 %v11384_v50  ;;  %2226 = vmatpush.bf16.msrb.mxu1 %v11512_v30  ;;  %v11320_v33 = vor.u32 %v15878_v24, %v11317_v25  ;;  %v11448_v50 = vor.u32 %v15910_v32, %v11445_v49 }
 0x17b   :  { %1616 = vmatmul.bf16.gmra.mxu2 %v17386_v21  ;;  %1635 = vmatmul.bf16.gmra.mxu3 %v17388_v22 }
 0x17c   :  { %1654 = vmatmul.bf16.gmra.mxu0 %v17386_v21  ;;  %1673 = vmatmul.bf16.gmra.mxu1 %v17388_v22  ;;  %v1758_v21 = vsel %vm405_vm9, %v1756_v14, %v1757_v11  ;;  %v1761_v22 = vsel %vm405_vm9, %v1759_v15, %v1760_v54 }
 0x17d   :  { %2170 = vmatpush.bf16.msra.mxu2 %v11364_v39  ;;  %2189 = vmatpush.bf16.msra.mxu3 %v11492_v42  ;;  %v1755_v42 = vpack.c.b16 %v1751_v37, %v1751_v37 }
 0x17e   :  { %2208 = vmatpush.bf16.msrb.mxu0 %v11368_v35  ;;  %2227 = vmatpush.bf16.msrb.mxu1 %v11496_v43 }
 0x17f   :  { %v1764_v43 = vrot.slane %v1755_v42, 2 }
 0x181   :  { %2171 = vmatpush.bf16.msra.mxu2 %v11348_v0  ;;  %2190 = vmatpush.bf16.msra.mxu3 %v11476_v59  ;;  %v1765_v48 = vsel %vm405_vm9, %v1760_v54, %v1764_v43 }
 0x182   :  { %2209 = vmatpush.bf16.msrb.mxu0 %v11352_v58  ;;  %2228 = vmatpush.bf16.msrb.mxu1 %v11480_v3 }
 0x185   :  { %2172 = vmatpush.bf16.msra.mxu2 %v11332_v7  ;;  %2191 = vmatpush.bf16.msra.mxu3 %v11460_v31 }
 0x186   :  { %2210 = vmatpush.bf16.msrb.mxu0 %v11336_v51  ;;  %2229 = vmatpush.bf16.msrb.mxu1 %v11464_v12 }
 0x189   :  { %v1093_v17 = vpop.f32.mrf.mxu0  ;;  %v1112_v18 = vpop.f32.mrf.mxu1  ;;  %2173 = vmatpush.bf16.msra.mxu2 %v11316_v19  ;;  %2192 = vmatpush.bf16.msra.mxu3 %v11444_v20 }
 0x18a   :  { %v17454_v23 = vadd.f32 %v1112_v18, %v1093_v17  ;;  %2211 = vmatpush.bf16.msrb.mxu0 %v11320_v33  ;;  %2230 = vmatpush.bf16.msrb.mxu1 %v11448_v50 }
 0x18b   :  { %2098 = vmatmul.bf16.vlgmr.msrb.gmra.mxu2 %v1758_v21  ;;  %2117 = vmatmul.bf16.vlgmr.msrb.gmra.mxu3 %v1761_v22 }
 0x18c   :  { %2136 = vmatmul.bf16.vlgmr.msra.gmra.mxu0 %v1758_v21  ;;  %2155 = vmatmul.bf16.vlgmr.msra.gmra.mxu1 %v1761_v22 }
 0x18e   :  { %v1055_v29 = vpop.f32.mrf.mxu2  ;;  %v1074_v30 = vpop.f32.mrf.mxu3 }
 0x18f   :  { %v17458_v38 = vadd.f32 %v1074_v30, %v1055_v29 }
 0x191   :  { %v1095_v39 = vpop.f32.mrf.mxu0  ;;  %v1114_v40 = vpop.f32.mrf.mxu1 }
 0x192   :  { %v17460_v41 = vadd.f32 %v1114_v40, %v1095_v39 }
 0x196   :  { %v1057_v35 = vpop.f32.mrf.mxu2  ;;  %v1076_v62 = vpop.f32.mrf.mxu3 }
 0x197   :  { %v17462_v44 = vadd.f32 %v1076_v62, %v1057_v35 }
 0x199   :  { %v1098_v45 = vpop.f32.mrf.mxu0  ;;  %v1117_v56 = vpop.f32.mrf.mxu1 }
 0x19a   :  { %v17464_v46 = vadd.f32 %v1117_v56, %v1098_v45 }
 0x19b   :  { %2103 = vmatmul.bf16.gmra.mxu2 %v1763_v47  ;;  %2122 = vmatmul.bf16.gmra.mxu3 %v1765_v48 }
 0x19c   :  { %2141 = vmatmul.bf16.gmra.mxu0 %v1763_v47  ;;  %2160 = vmatmul.bf16.gmra.mxu1 %v1765_v48 }
 0x19e   :  { %v1060_v0 = vpop.f32.mrf.mxu2  ;;  %v1079_v59 = vpop.f32.mrf.mxu3 }
 0x19f   :  { %v17468_v57 = vadd.f32 %v1079_v59, %v1060_v0 }
 0x1a1   :  { %v1100_v53 = vpop.f32.mrf.mxu0  ;;  %v1119_v27 = vpop.f32.mrf.mxu1 }
 0x1a2   :  { %v17470_v58 = vadd.f32 %v1119_v27, %v1100_v53 }
 0x1a6   :  { %v1062_v28 = vpop.f32.mrf.mxu2  ;;  %v1081_v60 = vpop.f32.mrf.mxu3 }
 0x1a7   :  { %v17472_v61 = vadd.f32 %v1081_v60, %v1062_v28 }
 0x1a9   :  { %v1169_v1 = vpop.f32.mrf.mxu0  ;;  %v1188_v2 = vpop.f32.mrf.mxu1 }
 0x1aa   :  { %v17474_v3 = vadd.f32 %v1188_v2, %v1169_v1 }
 0x1ab   :  { %2174 = vmatmul.bf16.vlgmr.msra.gmra.mxu2 %v1758_v21  ;;  %2193 = vmatmul.bf16.vlgmr.msra.gmra.mxu3 %v1761_v22 }
 0x1ac   :  { %2212 = vmatmul.bf16.vlgmr.msrb.gmra.mxu0 %v1758_v21  ;;  %2231 = vmatmul.bf16.vlgmr.msrb.gmra.mxu1 %v1761_v22 }
 0x1ae   :  { %v1131_v4 = vpop.f32.mrf.mxu2  ;;  %v1150_v5 = vpop.f32.mrf.mxu3 }
 0x1af   :  { %v17476_v6 = vadd.f32 %v1150_v5, %v1131_v4 }
 0x1b1   :  { %v1171_v7 = vpop.f32.mrf.mxu0  ;;  %v1190_v31 = vpop.f32.mrf.mxu1 }
 0x1b2   :  { %v17478_v8 = vadd.f32 %v1190_v31, %v1171_v7 }
 0x1b6   :  { %v1133_v9 = vpop.f32.mrf.mxu2  ;;  %v1152_v10 = vpop.f32.mrf.mxu3 }
 0x1b7   :  { %v17480_v11 = vadd.f32 %v1152_v10, %v1133_v9 }
 0x1b9   :  { %v1174_v54 = vpop.f32.mrf.mxu0  ;;  %v1193_v51 = vpop.f32.mrf.mxu1 }
 0x1ba   :  { %v17482_v12 = vadd.f32 %v1193_v51, %v1174_v54 }
 0x1bb   :  { %2179 = vmatmul.bf16.gmra.mxu2 %v1763_v47  ;;  %2198 = vmatmul.bf16.gmra.mxu3 %v1765_v48 }
 0x1bc   :  { %2217 = vmatmul.bf16.gmra.mxu0 %v1763_v47  ;;  %2236 = vmatmul.bf16.gmra.mxu1 %v1765_v48 }
 0x1be   :  { %v1136_v52 = vpop.f32.mrf.mxu2  ;;  %v1155_v55 = vpop.f32.mrf.mxu3 }
 0x1bf   :  { %v17484_v13 = vadd.f32 %v1155_v55, %v1136_v52 }
 0x1c1   :  { %v1176_v14 = vpop.f32.mrf.mxu0  ;;  %v1195_v15 = vpop.f32.mrf.mxu1 }
 0x1c2   :  { %v17486_v16 = vadd.f32 %v1195_v15, %v1176_v14 }
 0x1c6   :  { %v1138_v17 = vpop.f32.mrf.mxu2  ;;  %v1157_v18 = vpop.f32.mrf.mxu3 }
 0x1c7   :  { %v17488_v19 = vadd.f32 %v1157_v18, %v1138_v17 }
 0x1c9   :  { %v1574_v20 = vpop.f32.mrf.mxu0  ;;  %v1593_v21 = vpop.f32.mrf.mxu1 }
 0x1ca   :  { %v1575_v22 = vadd.f32 %v1574_v20, %v17454_v23 }
 0x1cc   :  { %v17491_v24 = vadd.f32 %v1593_v21, %v1575_v22 }
 0x1ce   :  { %v1536_v25 = vpop.f32.mrf.mxu2  ;;  %v1555_v32 = vpop.f32.mrf.mxu3 }
 0x1cf   :  { %v1537_v26 = vadd.f32 %v1536_v25, %v17458_v38 }
 0x1d1   :  { %v17494_v33 = vadd.f32 %v1555_v32, %v1537_v26  ;;  %v1576_v49 = vpop.f32.mrf.mxu0  ;;  %v1595_v50 = vpop.f32.mrf.mxu1  ;;  %v17541_v26 = vld [vmem:[#allocation13] sm:$0xf] }
 0x1d2   :  { %v1577_v29 = vadd.f32 %v1576_v49, %v17460_v41 }
 0x1d4   :  { %v17500_v23 = vadd.f32 %v1595_v50, %v1577_v29  ;;  %v2260_v50 = vperm.slane %v17541_v26, 1 }
 0x1d6   :  { %v1538_v30 = vpop.f32.mrf.mxu2  ;;  %v1557_v36 = vpop.f32.mrf.mxu3 }
 0x1d7   :  { %v1539_v37 = vadd.f32 %v1538_v30, %v17462_v44 }
 0x1d9   :  { %v17503_v38 = vadd.f32 %v1557_v36, %v1539_v37  ;;  %v1579_v39 = vpop.f32.mrf.mxu0  ;;  %v1598_v40 = vpop.f32.mrf.mxu1  ;;  %v2259_v36 = vperm.slane %v17541_v26, 0 }
 0x1da   :  { %v1580_v34 = vadd.f32 %v1579_v39, %v17464_v46 }
 0x1dc   :  { %v17506_v42 = vadd.f32 %v1598_v40, %v1580_v34 }
 0x1de   :  { %v1541_v41 = vpop.f32.mrf.mxu2  ;;  %v1560_v35 = vpop.f32.mrf.mxu3 }
 0x1df   :  { %v1542_v62 = vadd.f32 %v1541_v41, %v17468_v57 }
 0x1e1   :  { %v17509_v63 = vadd.f32 %v1560_v35, %v1542_v62  ;;  %v1581_v43 = vpop.f32.mrf.mxu0  ;;  %v1600_v45 = vpop.f32.mrf.mxu1 }
 0x1e2   :  { %v1582_v56 = vadd.f32 %v1581_v43, %v17470_v58 }
 0x1e4   :  { %v17512_v47 = vadd.f32 %v1600_v45, %v1582_v56 }
 0x1e6   :  { %v1543_v44 = vpop.f32.mrf.mxu2  ;;  %v1562_v48 = vpop.f32.mrf.mxu3 }
 0x1e7   :  { %v1544_v0 = vadd.f32 %v1543_v44, %v17472_v61 }
 0x1e9   :  { %v17515_v59 = vadd.f32 %v1562_v48, %v1544_v0  ;;  %v1650_v46 = vpop.f32.mrf.mxu0  ;;  %v1669_v53 = vpop.f32.mrf.mxu1 }
 0x1ea   :  { %v1651_v27 = vadd.f32 %v1650_v46, %v17474_v3 }
 0x1ec   :  { %v17518_v28 = vadd.f32 %v1669_v53, %v1651_v27 }
 0x1ee   :  { %v1612_v57 = vpop.f32.mrf.mxu2  ;;  %v1631_v60 = vpop.f32.mrf.mxu3 }
 0x1ef   :  { %v1613_v1 = vadd.f32 %v1612_v57, %v17476_v6 }
 0x1f1   :  { %v17521_v2 = vadd.f32 %v1631_v60, %v1613_v1  ;;  %v1652_v58 = vpop.f32.mrf.mxu0  ;;  %v1671_v4 = vpop.f32.mrf.mxu1 }
 0x1f2   :  { %v1653_v5 = vadd.f32 %v1652_v58, %v17478_v8 }
 0x1f4   :  { %v17524_v7 = vadd.f32 %v1671_v4, %v1653_v5 }
 0x1f6   :  { %v1614_v61 = vpop.f32.mrf.mxu2  ;;  %v1633_v31 = vpop.f32.mrf.mxu3 }
 0x1f7   :  { %v1615_v9 = vadd.f32 %v1614_v61, %v17480_v11 }
 0x1f9   :  { %v17527_v10 = vadd.f32 %v1633_v31, %v1615_v9  ;;  %v1655_v3 = vpop.f32.mrf.mxu0  ;;  %v1674_v54 = vpop.f32.mrf.mxu1 }
 0x1fa   :  { %v1656_v51 = vadd.f32 %v1655_v3, %v17482_v12 }
 0x1fc   :  { %v17530_v52 = vadd.f32 %v1674_v54, %v1656_v51 }
 0x1fe   :  { %v1617_v6 = vpop.f32.mrf.mxu2  ;;  %v1636_v55 = vpop.f32.mrf.mxu3 }
 0x1ff   :  { %v1618_v14 = vadd.f32 %v1617_v6, %v17484_v13 }
 0x201   :  { %v17533_v15 = vadd.f32 %v1636_v55, %v1618_v14  ;;  %v1657_v8 = vpop.f32.mrf.mxu0  ;;  %v1676_v17 = vpop.f32.mrf.mxu1 }
 0x202   :  { %v1658_v18 = vadd.f32 %v1657_v8, %v17486_v16 }
 0x204   :  { %v17536_v20 = vadd.f32 %v1676_v17, %v1658_v18 }
 0x206   :  { %v1619_v11 = vpop.f32.mrf.mxu2  ;;  %v1638_v21 = vpop.f32.mrf.mxu3 }
 0x207   :  { %v1620_v22 = vadd.f32 %v1619_v11, %v17488_v19 }
 0x209   :  { %v17539_v25 = vadd.f32 %v1638_v21, %v1620_v22  ;;  %v2137_v12 = vpop.f32.mrf.mxu0  ;;  %v2156_v32 = vpop.f32.mrf.mxu1 }
 0x20a   :  { %v2157_v49 = vadd.f32 %v2156_v32, %v2137_v12 }
 0x20c   :  { %v2243_v13 = vadd.f32 %v2157_v49, %v17491_v24 }
 0x20e   :  { %v2099_v29 = vpop.f32.mrf.mxu2  ;;  %v2118_v30 = vpop.f32.mrf.mxu3  ;;  %v2268_v37 = vadd.f32 %v2260_v50, %v2243_v13 }
 0x20f   :  { %v2119_v16 = vadd.f32 %v2118_v30, %v2099_v29  ;;  %v2262_v29 = vperm.slane %v17541_v26, 3 }
 0x210   :  { %v2284_v35 = vmax.f32 %v2268_v37, 0.0 }
 0x211   :  { %v2242_v39 = vadd.f32 %v2119_v16, %v17494_v33  ;;  %v2139_v19 = vpop.f32.mrf.mxu0  ;;  %v2158_v40 = vpop.f32.mrf.mxu1 }
 0x212   :  { %v2159_v34 = vadd.f32 %v2158_v40, %v2139_v19 }
 0x213   :  { %v2267_v41 = vadd.f32 %v2259_v36, %v2242_v39  ;;  %v2261_v39 = vperm.slane %v17541_v26, 2 }
 0x214   :  { %v2247_v43 = vadd.f32 %v2159_v34, %v17500_v23 }
 0x215   :  { %v2283_v62 = vmax.f32 %v2267_v41, 0.0 }
 0x216   :  { %v2101_v45 = vpop.f32.mrf.mxu2  ;;  %v2120_v24 = vpop.f32.mrf.mxu3  ;;  %v2272_v48 = vadd.f32 %v2260_v50, %v2247_v43 }
 0x217   :  { %v2299_v56 = vpack.c.bf16 %v2284_v35, %v2283_v62  ;;  %v2121_v44 = vadd.f32 %v2120_v24, %v2101_v45 }
 0x218   :  { %v2288_v57 = vmax.f32 %v2272_v48, 0.0 }
 0x219   :  { %2307 = vst [vmem:[#allocation4 + $0x30] sm:$0xff] %v2299_v56  ;;  %v2246_v0 = vadd.f32 %v2121_v44, %v17503_v38  ;;  %v2142_v46 = vpop.f32.mrf.mxu0  ;;  %v2161_v53 = vpop.f32.mrf.mxu1 }
 0x21a   :  { %v2162_v27 = vadd.f32 %v2161_v53, %v2142_v46 }
 0x21b   :  { %v2271_v33 = vadd.f32 %v2259_v36, %v2246_v0 }
 0x21c   :  { %v2251_v1 = vadd.f32 %v2162_v27, %v17506_v42 }
 0x21d   :  { %v2287_v60 = vmax.f32 %v2271_v33, 0.0 }
 0x21e   :  { %v2104_v58 = vpop.f32.mrf.mxu2  ;;  %v2123_v4 = vpop.f32.mrf.mxu3  ;;  %v2276_v61 = vadd.f32 %v2260_v50, %v2251_v1 }
 0x21f   :  { %v2301_v5 = vpack.c.bf16 %v2288_v57, %v2287_v60  ;;  %v2124_v23 = vadd.f32 %v2123_v4, %v2104_v58 }
 0x220   :  { %v2292_v51 = vmax.f32 %v2276_v61, 0.0 }
 0x221   :  { %2309 = vst [vmem:[#allocation4 + $0x18] sm:$0xff] %v2301_v5  ;;  %v2250_v31 = vadd.f32 %v2124_v23, %v17509_v63  ;;  %v2144_v9 = vpop.f32.mrf.mxu0  ;;  %v2163_v3 = vpop.f32.mrf.mxu1 }
 0x222   :  { %v2164_v54 = vadd.f32 %v2163_v3, %v2144_v9 }
 0x223   :  { %v2275_v38 = vadd.f32 %v2259_v36, %v2250_v31 }
 0x224   :  { %v2255_v55 = vadd.f32 %v2164_v54, %v17512_v47 }
 0x225   :  { %v2291_v6 = vmax.f32 %v2275_v38, 0.0 }
 0x226   :  { %v2106_v14 = vpop.f32.mrf.mxu2  ;;  %v2125_v8 = vpop.f32.mrf.mxu3  ;;  %v2280_v18 = vadd.f32 %v2260_v50, %v2255_v55 }
 0x227   :  { %v2303_v17 = vpack.c.bf16 %v2292_v51, %v2291_v6  ;;  %v2126_v42 = vadd.f32 %v2125_v8, %v2106_v14 }
 0x228   :  { %v2296_v32 = vmax.f32 %v2280_v18, 0.0 }
 0x229   :  { %2311 = vst [vmem:[#allocation4 + $0x8] sm:$0xff] %v2303_v17  ;;  %v2254_v11 = vadd.f32 %v2126_v42, %v17515_v59  ;;  %v2213_v21 = vpop.f32.mrf.mxu0  ;;  %v2232_v22 = vpop.f32.mrf.mxu1 }
 0x22a   :  { %v2233_v12 = vadd.f32 %v2232_v22, %v2213_v21 }
 0x22b   :  { %v2279_v63 = vadd.f32 %v2259_v36, %v2254_v11 }
 0x22c   :  { %v2245_v13 = vadd.f32 %v2233_v12, %v17518_v28 }
 0x22d   :  { %v2295_v49 = vmax.f32 %v2279_v63, 0.0 }
 0x22e   :  { %v2175_v30 = vpop.f32.mrf.mxu2  ;;  %v2194_v47 = vpop.f32.mrf.mxu3  ;;  %v2270_v50 = vadd.f32 %v2262_v29, %v2245_v13 }
 0x22f   :  { %v2305_v16 = vpack.c.bf16 %v2296_v32, %v2295_v49  ;;  %v2195_v37 = vadd.f32 %v2194_v47, %v2175_v30 }
 0x230   :  { %v2286_v41 = vmax.f32 %v2270_v50, 0.0 }
 0x231   :  { %2313 = vst [vmem:[#allocation4 + $0x28] sm:$0xff] %v2305_v16  ;;  %v2244_v59 = vadd.f32 %v2195_v37, %v17521_v2  ;;  %v2215_v19 = vpop.f32.mrf.mxu0  ;;  %v2234_v40 = vpop.f32.mrf.mxu1 }
 0x232   :  { %v2235_v34 = vadd.f32 %v2234_v40, %v2215_v19 }
 0x233   :  { %v2269_v36 = vadd.f32 %v2261_v39, %v2244_v59 }
 0x234   :  { %v2249_v28 = vadd.f32 %v2235_v34, %v17524_v7 }
 0x235   :  { %v2285_v35 = vmax.f32 %v2269_v36, 0.0 }
 0x236   :  { %v2177_v62 = vpop.f32.mrf.mxu2  ;;  %v2196_v43 = vpop.f32.mrf.mxu3  ;;  %v2274_v56 = vadd.f32 %v2262_v29, %v2249_v28 }
 0x237   :  { %v2300_v45 = vpack.c.bf16 %v2286_v41, %v2285_v35  ;;  %v2197_v24 = vadd.f32 %v2196_v43, %v2177_v62 }
 0x238   :  { %v2290_v46 = vmax.f32 %v2274_v56, 0.0 }
 0x239   :  { %2308 = vst [vmem:[#allocation4] sm:$0xff] %v2300_v45  ;;  %v2248_v26 = vadd.f32 %v2197_v24, %v17527_v10  ;;  %v2218_v44 = vpop.f32.mrf.mxu0  ;;  %v2237_v48 = vpop.f32.mrf.mxu1 }
 0x23a   :  { %v2238_v0 = vadd.f32 %v2237_v48, %v2218_v44 }
 0x23b   :  { %v2273_v2 = vadd.f32 %v2261_v39, %v2248_v26 }
 0x23c   :  { %v2253_v27 = vadd.f32 %v2238_v0, %v17530_v52 }
 0x23d   :  { %v2289_v53 = vmax.f32 %v2273_v2, 0.0 }
 0x23e   :  { %v2180_v33 = vpop.f32.mrf.mxu2  ;;  %v2199_v57 = vpop.f32.mrf.mxu3  ;;  %v2278_v1 = vadd.f32 %v2262_v29, %v2253_v27 }
 0x23f   :  { %v2302_v60 = vpack.c.bf16 %v2290_v46, %v2289_v53  ;;  %v2200_v7 = vadd.f32 %v2199_v57, %v2180_v33 }
 0x240   :  { %v2294_v61 = vmax.f32 %v2278_v1, 0.0 }
 0x241   :  { %2310 = vst [vmem:[#allocation4 + $0x10] sm:$0xff] %v2302_v60  ;;  %v2252_v58 = vadd.f32 %v2200_v7, %v17533_v15  ;;  %v2220_v4 = vpop.f32.mrf.mxu0  ;;  %v2239_v5 = vpop.f32.mrf.mxu1 }
 0x242   :  { %v2240_v23 = vadd.f32 %v2239_v5, %v2220_v4 }
 0x243   :  { %v2277_v10 = vadd.f32 %v2261_v39, %v2252_v58 }
 0x244   :  { %v2257_v9 = vadd.f32 %v2240_v23, %v17536_v20 }
 0x245   :  { %v2293_v31 = vmax.f32 %v2277_v10, 0.0 }
 0x246   :  { %v2182_v3 = vpop.f32.mrf.mxu2  ;;  %v2201_v54 = vpop.f32.mrf.mxu3  ;;  %v2282_v51 = vadd.f32 %v2262_v29, %v2257_v9 }
 0x247   :  { %v2304_v38 = vpack.c.bf16 %v2294_v61, %v2293_v31  ;;  %v2202_v52 = vadd.f32 %v2201_v54, %v2182_v3 }
 0x248   :  { %v2298_v14 = vmax.f32 %v2282_v51, 0.0 }
 0x249   :  { %2312 = vst [vmem:[#allocation4 + $0x20] sm:$0xff] %v2304_v38  ;;  %v2256_v6 = vadd.f32 %v2202_v52, %v17539_v25 }
 0x24b   :  { %v2281_v55 = vadd.f32 %v2261_v39, %v2256_v6 }
 0x24d   :  { %v2297_v8 = vmax.f32 %v2281_v55, 0.0 }
 0x24f   :  { %v2306_v15 = vpack.c.bf16 %v2298_v14, %v2297_v8 }
 0x251   :  { %2314 = vst [vmem:[#allocation4 + $0x38] sm:$0xff] %v2306_v15 }
 0x252   :  { %17199 = dma.done.wait [#allocation6], 131072 }
 0x253   :  { %17200 = vsyncadd [#allocation6], 4294836224  ;;  %v11619_v17 = vld [vmem:[#allocation5 + $0x270] sm:$0xf]  ;;  %v16020_v42 = vld [vmem:[#allocation5 + $0x274] sm:$0xf0] }
 0x254   :  { %v11683_v18 = vld [vmem:[#allocation5 + $0x2f0] sm:$0xf]  ;;  %v11620_v11 = vor.u32 %v16020_v42, %v11619_v17  ;;  %v16036_v20 = vld [vmem:[#allocation5 + $0x2f4] sm:$0xf0]  ;;  %v11611_v13 = vld [vmem:[#allocation5 + $0x260] sm:$0xf] }
 0x255   :  { %v11747_v21 = vld [vmem:[#allocation5 + $0x370] sm:$0xf]  ;;  %v16052_v22 = vld [vmem:[#allocation5 + $0x374] sm:$0xf0]  ;;  %v11684_v12 = vor.u32 %v16036_v20, %v11683_v18  ;;  %v16018_v29 = vld [vmem:[#allocation5 + $0x264] sm:$0xf0] }
 0x256   :  { %v11748_v63 = vor.u32 %v16052_v22, %v11747_v21  ;;  %v11811_v32 = vld [vmem:[#allocation5 + $0x3f0] sm:$0xf]  ;;  %v16068_v49 = vld [vmem:[#allocation5 + $0x3f4] sm:$0xf0]  ;;  %2791 = vmatpush.bf16.msrb.mxu2 %v11620_v11  ;;  %v11675_v30 = vld [vmem:[#allocation5 + $0x2e0] sm:$0xf]  ;;  %v11612_v16 = vor.u32 %v16018_v29, %v11611_v13 }
 0x257   :  { %v11812_v25 = vor.u32 %v16068_v49, %v11811_v32  ;;  %v16034_v47 = vld [vmem:[#allocation5 + $0x2e4] sm:$0xf0]  ;;  %2804 = vmatpush.bf16.msrb.mxu3 %v11684_v12  ;;  %v11739_v39 = vld [vmem:[#allocation5 + $0x360] sm:$0xf]  ;;  %v11603_v34 = vld [vmem:[#allocation5 + $0x250] sm:$0xf] }
 0x258   :  { %2817 = vmatpush.bf16.msra.mxu0 %v11748_v63  ;;  %v11676_v37 = vor.u32 %v16034_v47, %v11675_v30  ;;  %v16050_v50 = vld [vmem:[#allocation5 + $0x364] sm:$0xf0]  ;;  %v11803_v59 = vld [vmem:[#allocation5 + $0x3e0] sm:$0xf]  ;;  %v16016_v36 = vld [vmem:[#allocation5 + $0x254] sm:$0xf0] }
 0x259   :  { %2830 = vmatpush.bf16.msra.mxu1 %v11812_v25  ;;  %v11740_v19 = vor.u32 %v16050_v50, %v11739_v39  ;;  %v16066_v40 = vld [vmem:[#allocation5 + $0x3e4] sm:$0xf0]  ;;  %v11667_v35 = vld [vmem:[#allocation5 + $0x2d0] sm:$0xf]  ;;  %v16032_v28 = vld [vmem:[#allocation5 + $0x2d4] sm:$0xf0]  ;;  %v11604_v43 = vor.u32 %v16016_v36, %v11603_v34 }
 0x25a   :  { %v11804_v41 = vor.u32 %v16066_v40, %v11803_v59  ;;  %v11731_v62 = vld [vmem:[#allocation5 + $0x350] sm:$0xf]  ;;  %2792 = vmatpush.bf16.msrb.mxu2 %v11612_v16  ;;  %v16048_v45 = vld [vmem:[#allocation5 + $0x354] sm:$0xf0]  ;;  %v11668_v26 = vor.u32 %v16032_v28, %v11667_v35  ;;  %v11595_v48 = vld [vmem:[#allocation5 + $0x240] sm:$0xf] }
 0x25b   :  { %v11795_v24 = vld [vmem:[#allocation5 + $0x3d0] sm:$0xf]  ;;  %v16064_v56 = vld [vmem:[#allocation5 + $0x3d4] sm:$0xf0]  ;;  %2805 = vmatpush.bf16.msrb.mxu3 %v11676_v37  ;;  %v11732_v44 = vor.u32 %v16048_v45, %v11731_v62  ;;  %v16014_v0 = vld [vmem:[#allocation5 + $0x244] sm:$0xf0] }
 0x25c   :  { %2818 = vmatpush.bf16.msra.mxu0 %v11740_v19  ;;  %v11659_v2 = vld [vmem:[#allocation5 + $0x2c0] sm:$0xf]  ;;  %v11796_v46 = vor.u32 %v16064_v56, %v11795_v24  ;;  %v16030_v53 = vld [vmem:[#allocation5 + $0x2c4] sm:$0xf0]  ;;  %v11596_v7 = vor.u32 %v16014_v0, %v11595_v48  ;;  %v11587_v4 = vld [vmem:[#allocation5 + $0x230] sm:$0xf] }
 0x25d   :  { %2831 = vmatpush.bf16.msra.mxu1 %v11804_v41  ;;  %v11723_v27 = vld [vmem:[#allocation5 + $0x340] sm:$0xf]  ;;  %v16046_v33 = vld [vmem:[#allocation5 + $0x344] sm:$0xf0]  ;;  %v11660_v1 = vor.u32 %v16030_v53, %v11659_v2  ;;  %v16012_v5 = vld [vmem:[#allocation5 + $0x234] sm:$0xf0] }
 0x25e   :  { %v11787_v57 = vld [vmem:[#allocation5 + $0x3c0] sm:$0xf]  ;;  %v16062_v60 = vld [vmem:[#allocation5 + $0x3c4] sm:$0xf0]  ;;  %2793 = vmatpush.bf16.msrb.mxu2 %v11604_v43  ;;  %v11724_v58 = vor.u32 %v16046_v33, %v11723_v27  ;;  %v11651_v23 = vld [vmem:[#allocation5 + $0x2b0] sm:$0xf]  ;;  %v11588_v38 = vor.u32 %v16012_v5, %v11587_v4 }
 0x25f   :  { %2806 = vmatpush.bf16.msrb.mxu3 %v11668_v26  ;;  %v11788_v10 = vor.u32 %v16062_v60, %v11787_v57  ;;  %v16028_v61 = vld [vmem:[#allocation5 + $0x2b4] sm:$0xf0]  ;;  %v11715_v31 = vld [vmem:[#allocation5 + $0x330] sm:$0xf]  ;;  %v11579_v6 = vld [vmem:[#allocation5 + $0x220] sm:$0xf] }
 0x260   :  { %2819 = vmatpush.bf16.msra.mxu0 %v11732_v44  ;;  %v16044_v9 = vld [vmem:[#allocation5 + $0x334] sm:$0xf0]  ;;  %v11779_v3 = vld [vmem:[#allocation5 + $0x3b0] sm:$0xf]  ;;  %v11652_v52 = vor.u32 %v16028_v61, %v11651_v23  ;;  %v16010_v55 = vld [vmem:[#allocation5 + $0x224] sm:$0xf0] }
 0x261   :  { %2832 = vmatpush.bf16.msra.mxu1 %v11796_v46  ;;  %v16060_v54 = vld [vmem:[#allocation5 + $0x3b4] sm:$0xf0]  ;;  %v11716_v51 = vor.u32 %v16044_v9, %v11715_v31  ;;  %v11643_v14 = vld [vmem:[#allocation5 + $0x2a0] sm:$0xf]  ;;  %v16026_v15 = vld [vmem:[#allocation5 + $0x2a4] sm:$0xf0]  ;;  %v11580_v20 = vor.u32 %v16010_v55, %v11579_v6 }
 0x262   :  { %2794 = vmatpush.bf16.msrb.mxu2 %v11596_v7  ;;  %v11780_v8 = vor.u32 %v16060_v54, %v11779_v3  ;;  %v11707_v17 = vld [vmem:[#allocation5 + $0x320] sm:$0xf]  ;;  %v16042_v42 = vld [vmem:[#allocation5 + $0x324] sm:$0xf0]  ;;  %v11644_v21 = vor.u32 %v16026_v15, %v11643_v14  ;;  %v11571_v12 = vld [vmem:[#allocation5 + $0x210] sm:$0xf] }
 0x263   :  { %2807 = vmatpush.bf16.msrb.mxu3 %v11660_v1  ;;  %v11771_v18 = vld [vmem:[#allocation5 + $0x3a0] sm:$0xf]  ;;  %v16058_v11 = vld [vmem:[#allocation5 + $0x3a4] sm:$0xf0]  ;;  %v11708_v22 = vor.u32 %v16042_v42, %v11707_v17  ;;  %v16008_v63 = vld [vmem:[#allocation5 + $0x214] sm:$0xf0] }
 0x264   :  { %2820 = vmatpush.bf16.msra.mxu0 %v11724_v58  ;;  %v11635_v32 = vld [vmem:[#allocation5 + $0x290] sm:$0xf]  ;;  %v11772_v49 = vor.u32 %v16058_v11, %v11771_v18  ;;  %v16024_v13 = vld [vmem:[#allocation5 + $0x294] sm:$0xf0]  ;;  %v11572_v16 = vor.u32 %v16008_v63, %v11571_v12  ;;  %v11563_v37 = vld [vmem:[#allocation5 + $0x200] sm:$0xf] }
 0x265   :  { %2833 = vmatpush.bf16.msra.mxu1 %v11788_v10  ;;  %v11699_v25 = vld [vmem:[#allocation5 + $0x310] sm:$0xf]  ;;  %v16040_v29 = vld [vmem:[#allocation5 + $0x314] sm:$0xf0]  ;;  %v16006_v39 = vld [vmem:[#allocation5 + $0x204] sm:$0xf0]  ;;  %v11636_v50 = vor.u32 %v16024_v13, %v11635_v32 }
 0x266   :  { %2795 = vmatpush.bf16.msrb.mxu2 %v11588_v38  ;;  %v11763_v30 = vld [vmem:[#allocation5 + $0x390] sm:$0xf]  ;;  %v16056_v47 = vld [vmem:[#allocation5 + $0x394] sm:$0xf0]  ;;  %v11700_v59 = vor.u32 %v16040_v29, %v11699_v25  ;;  %v11627_v19 = vld [vmem:[#allocation5 + $0x280] sm:$0xf]  ;;  %v11564_v24 = vor.u32 %v16006_v39, %v11563_v37 }
 0x267   :  { %2808 = vmatpush.bf16.msrb.mxu3 %v11652_v52  ;;  %v16022_v40 = vld [vmem:[#allocation5 + $0x284] sm:$0xf0]  ;;  %v11691_v34 = vld [vmem:[#allocation5 + $0x300] sm:$0xf]  ;;  %v11764_v36 = vor.u32 %v16056_v47, %v11763_v30  ;;  %v16019_v35 = vld [vmem:[#allocation5 + $0x274] sm:$0xf] }
 0x268   :  { %2821 = vmatpush.bf16.msra.mxu0 %v11716_v51  ;;  %v16038_v41 = vld [vmem:[#allocation5 + $0x304] sm:$0xf0]  ;;  %v11621_v28 = vld [vmem:[#allocation5 + $0x278] sm:$0xf0]  ;;  %v16035_v62 = vld [vmem:[#allocation5 + $0x2f4] sm:$0xf]  ;;  %v11628_v48 = vor.u32 %v16022_v40, %v11627_v19 }
 0x269   :  { %2834 = vmatpush.bf16.msra.mxu1 %v11780_v8  ;;  %v11685_v43 = vld [vmem:[#allocation5 + $0x2f8] sm:$0xf0]  ;;  %v16051_v45 = vld [vmem:[#allocation5 + $0x374] sm:$0xf]  ;;  %v11755_v26 = vld [vmem:[#allocation5 + $0x380] sm:$0xf]  ;;  %v11692_v0 = vor.u32 %v16038_v41, %v11691_v34  ;;  %v11624_v53 = vor.u32 %v16019_v35, %v11621_v28 }
 0x26a   :  { %2796 = vmatpush.bf16.msrb.mxu2 %v11580_v20  ;;  %v11749_v56 = vld [vmem:[#allocation5 + $0x378] sm:$0xf0]  ;;  %v16054_v44 = vld [vmem:[#allocation5 + $0x384] sm:$0xf0]  ;;  %v16067_v2 = vld [vmem:[#allocation5 + $0x3f4] sm:$0xf]  ;;  %v11688_v27 = vor.u32 %v16035_v62, %v11685_v43 }
 0x26b   :  { %2809 = vmatpush.bf16.msrb.mxu3 %v11644_v21  ;;  %v11813_v46 = vld [vmem:[#allocation5 + $0x3f8] sm:$0xf0]  ;;  %v16017_v33 = vld [vmem:[#allocation5 + $0x264] sm:$0xf]  ;;  %v11752_v57 = vor.u32 %v16051_v45, %v11749_v56  ;;  %v11756_v60 = vor.u32 %v16054_v44, %v11755_v26  ;;  %v11613_v7 = vld [vmem:[#allocation5 + $0x268] sm:$0xf0] }
 0x26c   :  { %2822 = vmatpush.bf16.msra.mxu0 %v11708_v22  ;;  %v16033_v1 = vld [vmem:[#allocation5 + $0x2e4] sm:$0xf]  ;;  %v11677_v58 = vld [vmem:[#allocation5 + $0x2e8] sm:$0xf0]  ;;  %v11816_v4 = vor.u32 %v16067_v2, %v11813_v46  ;;  %v11616_v31 = vor.u32 %v16017_v33, %v11613_v7  ;;  %v16015_v3 = vld [vmem:[#allocation5 + $0x254] sm:$0xf] }
 0x26d   :  { %2835 = vmatpush.bf16.msra.mxu1 %v11772_v49  ;;  %v16049_v5 = vld [vmem:[#allocation5 + $0x364] sm:$0xf]  ;;  %v11741_v23 = vld [vmem:[#allocation5 + $0x368] sm:$0xf0]  ;;  %v11680_v9 = vor.u32 %v16033_v1, %v11677_v58  ;;  %v11605_v38 = vld [vmem:[#allocation5 + $0x258] sm:$0xf0] }
 0x26e   :  { %2797 = vmatpush.bf16.msrb.mxu2 %v11572_v16  ;;  %v16065_v10 = vld [vmem:[#allocation5 + $0x3e4] sm:$0xf]  ;;  %v11805_v61 = vld [vmem:[#allocation5 + $0x3e8] sm:$0xf0]  ;;  %v11744_v54 = vor.u32 %v16049_v5, %v11741_v23  ;;  %v16031_v52 = vld [vmem:[#allocation5 + $0x2d4] sm:$0xf]  ;;  %v11608_v42 = vor.u32 %v16015_v3, %v11605_v38 }
 0x26f   :  { %2810 = vmatpush.bf16.msrb.mxu3 %v11636_v50  ;;  %v11669_v51 = vld [vmem:[#allocation5 + $0x2d8] sm:$0xf0]  ;;  %v11808_v6 = vor.u32 %v16065_v10, %v11805_v61  ;;  %v16047_v55 = vld [vmem:[#allocation5 + $0x354] sm:$0xf]  ;;  %v16013_v11 = vld [vmem:[#allocation5 + $0x244] sm:$0xf] }
 0x270   :  { %2823 = vmatpush.bf16.msra.mxu0 %v11700_v59  ;;  %v11733_v14 = vld [vmem:[#allocation5 + $0x358] sm:$0xf0]  ;;  %v16063_v8 = vld [vmem:[#allocation5 + $0x3d4] sm:$0xf]  ;;  %v11672_v18 = vor.u32 %v16031_v52, %v11669_v51  ;;  %v11597_v12 = vld [vmem:[#allocation5 + $0x248] sm:$0xf0] }
 0x271   :  { %2836 = vmatpush.bf16.msra.mxu1 %v11764_v36  ;;  %v11797_v15 = vld [vmem:[#allocation5 + $0x3d8] sm:$0xf0]  ;;  %v2386_v17 = vld [vmem:[#allocation4 + $0x30] sm:$0x22]  ;;  %v11736_v22 = vor.u32 %v16047_v55, %v11733_v14  ;;  %v16029_v63 = vld [vmem:[#allocation5 + $0x2c4] sm:$0xf]  ;;  %v11600_v37 = vor.u32 %v16013_v11, %v11597_v12 }
 0x272   :  { %2798 = vmatpush.bf16.msrb.mxu2 %v11564_v24  ;;  %v2455_v20 = vunpack.c.l.b16 %v2386_v17  ;;  %v2456_v21 = vunpack.c.h.b16 %v2386_v17  ;;  %v11661_v32 = vld [vmem:[#allocation5 + $0x2c8] sm:$0xf0]  ;;  %v11800_v49 = vor.u32 %v16063_v8, %v11797_v15  ;;  %v16045_v13 = vld [vmem:[#allocation5 + $0x344] sm:$0xf]  ;;  %v16011_v50 = vld [vmem:[#allocation5 + $0x234] sm:$0xf] }
 0x273   :  { %2811 = vmatpush.bf16.msrb.mxu3 %v11628_v48  ;;  %v11725_v25 = vld [vmem:[#allocation5 + $0x348] sm:$0xf0]  ;;  %v16061_v47 = vld [vmem:[#allocation5 + $0x3c4] sm:$0xf]  ;;  %v11664_v39 = vor.u32 %v16029_v63, %v11661_v32  ;;  %v11589_v59 = vld [vmem:[#allocation5 + $0x238] sm:$0xf0] }
 0x274   :  { %2824 = vmatpush.bf16.msra.mxu0 %v11692_v0  ;;  %v17563_v29 = vpack.c.b16 %v2455_v20, %v2455_v20  ;;  %v17565_v30 = vpack.c.b16 %v2456_v21, %v2456_v21  ;;  %v11789_v16 = vld [vmem:[#allocation5 + $0x3c8] sm:$0xf0]  ;;  %v11728_v34 = vor.u32 %v16045_v13, %v11725_v25  ;;  %v16027_v36 = vld [vmem:[#allocation5 + $0x2b4] sm:$0xf]  ;;  %v11653_v41 = vld [vmem:[#allocation5 + $0x2b8] sm:$0xf0]  ;;  %v11592_v44 = vor.u32 %v16011_v50, %v11589_v59 }
 0x275   :  { %2837 = vmatpush.bf16.msra.mxu1 %v11756_v60  ;;  %v2387_v35 = vld [vmem:[#allocation4] sm:$0x22]  ;;  %v11792_v28 = vor.u32 %v16061_v47, %v11789_v16  ;;  %v16043_v62 = vld [vmem:[#allocation5 + $0x334] sm:$0xf]  ;;  %v11717_v43 = vld [vmem:[#allocation5 + $0x338] sm:$0xf0]  ;;  %v11656_v48 = vor.u32 %v16027_v36, %v11653_v41 }
 0x276   :  { %2843 = vmatpush.bf16.msra.mxu2 %v11624_v53  ;;  %v2463_v19 = vrot.slane %v17563_v29, 1  ;;  %v2464_v40 = vrot.slane %v17565_v30, 1  ;;  %v2457_v45 = vunpack.c.l.b16 %v2387_v35  ;;  %v2458_v24 = vunpack.c.h.b16 %v2387_v35  ;;  %v16059_v56 = vld [vmem:[#allocation5 + $0x3b4] sm:$0xf]  ;;  %v11781_v26 = vld [vmem:[#allocation5 + $0x3b8] sm:$0xf0] }
 0x277   :  { %2856 = vmatpush.bf16.msra.mxu3 %v11688_v27  ;;  %v16009_v0 = vld [vmem:[#allocation5 + $0x224] sm:$0xf]  ;;  %v11720_v46 = vor.u32 %v16043_v62, %v11717_v43  ;;  %v11581_v53 = vld [vmem:[#allocation5 + $0x228] sm:$0xf0]  ;;  %v11784_v60 = vor.u32 %v16059_v56, %v11781_v26  ;;  %v11573_v3 = vld [vmem:[#allocation5 + $0x218] sm:$0xf0] }
 0x278   :  { %2869 = vmatpush.bf16.msrb.mxu0 %v11752_v57  ;;  %2799 = vmatmul.bf16.vlgmr.msrb.gmra.mxu2 %v2463_v19  ;;  %v17573_v2 = vpack.c.b16 %v2457_v45, %v2457_v45  ;;  %v16025_v27 = vld [vmem:[#allocation5 + $0x2a4] sm:$0xf]  ;;  %v11645_v33 = vld [vmem:[#allocation5 + $0x2a8] sm:$0xf0]  ;;  %v17575_v57 = vpack.c.b16 %v2458_v24, %v2458_v24  ;;  %v11584_v10 = vor.u32 %v16009_v0, %v11581_v53  ;;  %v11637_v38 = vld [vmem:[#allocation5 + $0x298] sm:$0xf0] }
 0x279   :  { %2882 = vmatpush.bf16.msrb.mxu1 %v11816_v4  ;;  %2812 = vmatmul.bf16.vlgmr.msrb.gmra.mxu3 %v2464_v40  ;;  %v16041_v7 = vld [vmem:[#allocation5 + $0x324] sm:$0xf]  ;;  %v11709_v1 = vld [vmem:[#allocation5 + $0x328] sm:$0xf0]  ;;  %v11648_v61 = vor.u32 %v16025_v27, %v11645_v33  ;;  %v16039_v51 = vld [vmem:[#allocation5 + $0x314] sm:$0xf] }
 0x27a   :  { %2844 = vmatpush.bf16.msra.mxu2 %v11616_v31  ;;  %v2465_v58 = vrot.slane %v17573_v2, 1  ;;  %v16057_v4 = vld [vmem:[#allocation5 + $0x3a4] sm:$0xf]  ;;  %v11773_v5 = vld [vmem:[#allocation5 + $0x3a8] sm:$0xf0]  ;;  %v2466_v23 = vrot.slane %v17575_v57, 1 }
 0x27b   :  { %2857 = vmatpush.bf16.msra.mxu3 %v11680_v9  ;;  %v16007_v31 = vld [vmem:[#allocation5 + $0x214] sm:$0xf]  ;;  %v11712_v9 = vor.u32 %v16041_v7, %v11709_v1  ;;  %v11776_v52 = vor.u32 %v16057_v4, %v11773_v5  ;;  %v11765_v14 = vld [vmem:[#allocation5 + $0x398] sm:$0xf0]  ;;  %v16005_v17 = vld [vmem:[#allocation5 + $0x204] sm:$0xf] }
 0x27c   :  { %2870 = vmatpush.bf16.msrb.mxu0 %v11744_v54  ;;  %v16023_v54 = vld [vmem:[#allocation5 + $0x294] sm:$0xf]  ;;  %2838 = vmatmul.bf16.vlgmr.msra.gmra.mxu1 %v2466_v23  ;;  %v11576_v8 = vor.u32 %v16007_v31, %v11573_v3  ;;  %v11629_v20 = vld [vmem:[#allocation5 + $0x288] sm:$0xf0]  ;;  %v16037_v21 = vld [vmem:[#allocation5 + $0x304] sm:$0xf] }
 0x27d   :  { %2883 = vmatpush.bf16.msrb.mxu1 %v11808_v6  ;;  %v11701_v6 = vld [vmem:[#allocation5 + $0x318] sm:$0xf0]  ;;  %2825 = vmatmul.bf16.vlgmr.msra.gmra.mxu0 %v2465_v58  ;;  %v16055_v55 = vld [vmem:[#allocation5 + $0x394] sm:$0xf]  ;;  %v11640_v15 = vor.u32 %v16023_v54, %v11637_v38  ;;  %v11875_v63 = vld [vmem:[#allocation5 + $0x70] sm:$0xf] }
 0x27e   :  { %2845 = vmatpush.bf16.msra.mxu2 %v11608_v42  ;;  %v11565_v42 = vld [vmem:[#allocation5 + $0x208] sm:$0xf0]  ;;  %v11704_v11 = vor.u32 %v16039_v51, %v11701_v6  ;;  %v11768_v12 = vor.u32 %v16055_v55, %v11765_v14  ;;  %v15956_v32 = vld [vmem:[#allocation5 + $0x74] sm:$0xf0]  ;;  %v12003_v25 = vld [vmem:[#allocation5 + $0x170] sm:$0xf] }
 0x27f   :  { %2858 = vmatpush.bf16.msra.mxu3 %v11672_v18  ;;  %v16021_v18 = vld [vmem:[#allocation5 + $0x284] sm:$0xf]  ;;  %v15972_v13 = vld [vmem:[#allocation5 + $0xf4] sm:$0xf0]  ;;  %v11568_v16 = vor.u32 %v16005_v17, %v11565_v42  ;;  %v11757_v50 = vld [vmem:[#allocation5 + $0x388] sm:$0xf0] }
 0x280   :  { %2871 = vmatpush.bf16.msrb.mxu0 %v11736_v22  ;;  %v11693_v22 = vld [vmem:[#allocation5 + $0x308] sm:$0xf0]  ;;  %v15988_v47 = vld [vmem:[#allocation5 + $0x174] sm:$0xf0]  ;;  %v12067_v36 = vld [vmem:[#allocation5 + $0x1f0] sm:$0xf] }
 0x281   :  { %2884 = vmatpush.bf16.msrb.mxu1 %v11800_v49  ;;  %v11939_v49 = vld [vmem:[#allocation5 + $0xf0] sm:$0xf]  ;;  %v11696_v59 = vor.u32 %v16037_v21, %v11693_v22  ;;  %v16004_v41 = vld [vmem:[#allocation5 + $0x1f4] sm:$0xf0]  ;;  %v11867_v62 = vld [vmem:[#allocation5 + $0x60] sm:$0xf] }
 0x282   :  { %2846 = vmatpush.bf16.msra.mxu2 %v11600_v37  ;;  %v11632_v37 = vor.u32 %v16021_v18, %v11629_v20  ;;  %v11940_v35 = vor.u32 %v15972_v13, %v11939_v49  ;;  %v15954_v43 = vld [vmem:[#allocation5 + $0x64] sm:$0xf0]  ;;  %v11931_v45 = vld [vmem:[#allocation5 + $0xe0] sm:$0xf]  ;;  %v15952_v7 = vld [vmem:[#allocation5 + $0x54] sm:$0xf0] }
 0x283   :  { %2859 = vmatpush.bf16.msra.mxu3 %v11664_v39  ;;  %v16053_v39 = vld [vmem:[#allocation5 + $0x384] sm:$0xf]  ;;  %v15970_v56 = vld [vmem:[#allocation5 + $0xe4] sm:$0xf0]  ;;  %v11995_v26 = vld [vmem:[#allocation5 + $0x160] sm:$0xf]  ;;  %v11868_v0 = vor.u32 %v15954_v43, %v11867_v62 }
 0x284   :  { %2872 = vmatpush.bf16.msrb.mxu0 %v11728_v34  ;;  %v11876_v34 = vor.u32 %v15956_v32, %v11875_v63  ;;  %v11760_v24 = vor.u32 %v16053_v39, %v11757_v50  ;;  %v16002_v53 = vld [vmem:[#allocation5 + $0x1e4] sm:$0xf0]  ;;  %v11932_v27 = vor.u32 %v15970_v56, %v11931_v45  ;;  %v11923_v1 = vld [vmem:[#allocation5 + $0xd0] sm:$0xf]  ;;  %v15968_v4 = vld [vmem:[#allocation5 + $0xd4] sm:$0xf0] }
 0x285   :  { %2885 = vmatpush.bf16.msrb.mxu1 %v11792_v28  ;;  %v12004_v28 = vor.u32 %v15988_v47, %v12003_v25  ;;  %v11987_v5 = vld [vmem:[#allocation5 + $0x150] sm:$0xf]  ;;  %v16000_v3 = vld [vmem:[#allocation5 + $0x1d4] sm:$0xf0]  ;;  %v11924_v54 = vor.u32 %v15968_v4, %v11923_v1  ;;  %v15950_v51 = vld [vmem:[#allocation5 + $0x44] sm:$0xf0] }
 0x286   :  { %2847 = vmatpush.bf16.msra.mxu2 %v11592_v44  ;;  %v15986_v44 = vld [vmem:[#allocation5 + $0x164] sm:$0xf0]  ;;  %v11915_v6 = vld [vmem:[#allocation5 + $0xc0] sm:$0xf]  ;;  %v11843_v42 = vld [vmem:[#allocation5 + $0x30] sm:$0xf] }
 0x287   :  { %2860 = vmatpush.bf16.msra.mxu3 %v11656_v48  ;;  %v12068_v48 = vor.u32 %v16004_v41, %v12067_v36  ;;  %v11996_v33 = vor.u32 %v15986_v44, %v11995_v26  ;;  %v15966_v55 = vld [vmem:[#allocation5 + $0xc4] sm:$0xf0]  ;;  %v11979_v14 = vld [vmem:[#allocation5 + $0x140] sm:$0xf]  ;;  %v15948_v18 = vld [vmem:[#allocation5 + $0x34] sm:$0xf0] }
 0x288   :  { %2873 = vmatpush.bf16.msrb.mxu0 %v11720_v46  ;;  %v12059_v46 = vld [vmem:[#allocation5 + $0x1e0] sm:$0xf]  ;;  %v15982_v29 = vld [vmem:[#allocation5 + $0x144] sm:$0xf0]  ;;  %v15964_v20 = vld [vmem:[#allocation5 + $0xb4] sm:$0xf0]  ;;  %v11844_v57 = vor.u32 %v15948_v18, %v11843_v42 }
 0x289   :  { %2886 = vmatpush.bf16.msrb.mxu1 %v11784_v60  ;;  %v11859_v60 = vld [vmem:[#allocation5 + $0x50] sm:$0xf]  ;;  %v11980_v17 = vor.u32 %v15982_v29, %v11979_v14  ;;  %v15980_v2 = vld [vmem:[#allocation5 + $0x134] sm:$0xf0]  ;;  %v11835_v32 = vld [vmem:[#allocation5 + $0x20] sm:$0xf] }
 0x28a   :  { %2848 = vmatpush.bf16.msra.mxu2 %v11584_v10  ;;  %v15984_v10 = vld [vmem:[#allocation5 + $0x154] sm:$0xf0]  ;;  %v11860_v31 = vor.u32 %v15952_v7, %v11859_v60  ;;  %v11971_v21 = vld [vmem:[#allocation5 + $0x130] sm:$0xf]  ;;  %v15946_v49 = vld [vmem:[#allocation5 + $0x24] sm:$0xf0] }
 0x28b   :  { %2861 = vmatpush.bf16.msra.mxu3 %v11648_v61  ;;  %v12060_v61 = vor.u32 %v16002_v53, %v12059_v46  ;;  %v11988_v38 = vor.u32 %v15984_v10, %v11987_v5  ;;  %v15996_v22 = vld [vmem:[#allocation5 + $0x1b4] sm:$0xf0]  ;;  %v11972_v63 = vor.u32 %v15980_v2, %v11971_v21  ;;  %v11899_v13 = vld [vmem:[#allocation5 + $0xa0] sm:$0xf]  ;;  %v15962_v25 = vld [vmem:[#allocation5 + $0xa4] sm:$0xf0]  ;;  %v11836_v39 = vor.u32 %v15946_v49, %v11835_v32 }
 0x28c   :  { %2874 = vmatpush.bf16.msrb.mxu0 %v11712_v9  ;;  %v12051_v9 = vld [vmem:[#allocation5 + $0x1d0] sm:$0xf]  ;;  %v11963_v47 = vld [vmem:[#allocation5 + $0x120] sm:$0xf]  ;;  %v11900_v36 = vor.u32 %v15962_v25, %v11899_v13  ;;  %v15960_v62 = vld [vmem:[#allocation5 + $0x94] sm:$0xf0] }
 0x28d   :  { %2887 = vmatpush.bf16.msrb.mxu1 %v11776_v52  ;;  %v11851_v52 = vld [vmem:[#allocation5 + $0x40] sm:$0xf]  ;;  %v12052_v30 = vor.u32 %v16000_v3, %v12051_v9  ;;  %v11955_v43 = vld [vmem:[#allocation5 + $0x110] sm:$0xf]  ;;  %v15976_v45 = vld [vmem:[#allocation5 + $0x114] sm:$0xf0] }
 0x28e   :  { %2849 = vmatpush.bf16.msra.mxu2 %v11576_v8  ;;  %v15998_v8 = vld [vmem:[#allocation5 + $0x1c4] sm:$0xf0]  ;;  %v12027_v50 = vld [vmem:[#allocation5 + $0x1a0] sm:$0xf]  ;;  %v15992_v26 = vld [vmem:[#allocation5 + $0x194] sm:$0xf0]  ;;  %v11956_v60 = vor.u32 %v15976_v45, %v11955_v43 }
 0x28f   :  { %2862 = vmatpush.bf16.msra.mxu3 %v11640_v15  ;;  %v11916_v15 = vor.u32 %v15966_v55, %v11915_v6  ;;  %v11819_v44 = vld [vmem:[#allocation5] sm:$0xf]  ;;  %v15958_v53 = vld [vmem:[#allocation5 + $0x84] sm:$0xf0]  ;;  %v15955_v1 = vld [vmem:[#allocation5 + $0x74] sm:$0xf] }
 0x290   :  { %2875 = vmatpush.bf16.msrb.mxu0 %v11704_v11  ;;  %v11907_v11 = vld [vmem:[#allocation5 + $0xb0] sm:$0xf]  ;;  %v11883_v46 = vld [vmem:[#allocation5 + $0x80] sm:$0xf]  ;;  %v15974_v7 = vld [vmem:[#allocation5 + $0x104] sm:$0xf0] }
 0x291   :  { %2888 = vmatpush.bf16.msrb.mxu1 %v11768_v12  ;;  %v11908_v12 = vor.u32 %v15964_v20, %v11907_v11  ;;  %v2320_v4 = vld [vmem:[#allocation4 + $0x30] sm:$0x11]  ;;  %v11877_v5 = vld [vmem:[#allocation5 + $0x78] sm:$0xf0]  ;;  %v11884_v55 = vor.u32 %v15958_v53, %v11883_v46  ;;  %v11869_v11 = vld [vmem:[#allocation5 + $0x68] sm:$0xf0] }
 0x292   :  { %2850 = vmatpush.bf16.msra.mxu2 %v11568_v16  ;;  %v15978_v16 = vld [vmem:[#allocation5 + $0x124] sm:$0xf0]  ;;  %v15971_v10 = vld [vmem:[#allocation5 + $0xf4] sm:$0xf]  ;;  %v11941_v9 = vld [vmem:[#allocation5 + $0xf8] sm:$0xf0]  ;;  %v2897_v6 = vunpack.c.l.b16 %v2320_v4 }
 0x293   :  { %2863 = vmatpush.bf16.msra.mxu3 %v11632_v37  ;;  %v11964_v41 = vor.u32 %v15978_v16, %v11963_v47  ;;  %v15987_v3 = vld [vmem:[#allocation5 + $0x174] sm:$0xf]  ;;  %v15969_v20 = vld [vmem:[#allocation5 + $0xe4] sm:$0xf]  ;;  %v11933_v21 = vld [vmem:[#allocation5 + $0xe8] sm:$0xf0] }
 0x294   :  { %2876 = vmatpush.bf16.msrb.mxu0 %v11696_v59  ;;  %v15994_v59 = vld [vmem:[#allocation5 + $0x1a4] sm:$0xf0]  ;;  %v16003_v29 = vld [vmem:[#allocation5 + $0x1f4] sm:$0xf]  ;;  %v12061_v32 = vld [vmem:[#allocation5 + $0x1e8] sm:$0xf0]  ;;  %v11936_v25 = vor.u32 %v15969_v20, %v11933_v21 }
 0x295   :  { %2889 = vmatpush.bf16.msrb.mxu1 %v11760_v24  ;;  %2851 = vmatmul.bf16.vlgmr.msra.gmra.mxu2 %v2463_v19  ;;  %v11852_v19 = vor.u32 %v15950_v51, %v11851_v52  ;;  %v12019_v24 = vld [vmem:[#allocation5 + $0x190] sm:$0xf]  ;;  %v12028_v56 = vor.u32 %v15994_v59, %v12027_v50  ;;  %v12011_v52 = vld [vmem:[#allocation5 + $0x180] sm:$0xf]  ;;  %v15990_v51 = vld [vmem:[#allocation5 + $0x184] sm:$0xf0] }
 0x296   :  { %3229 = vmatpush.bf16.msrb.mxu2 %v11876_v34  ;;  %2864 = vmatmul.bf16.vlgmr.msra.gmra.mxu3 %v2464_v40  ;;  %v12043_v40 = vld [vmem:[#allocation5 + $0x1c0] sm:$0xf]  ;;  %v11827_v34 = vld [vmem:[#allocation5 + $0x10] sm:$0xf]  ;;  %v12012_v18 = vor.u32 %v15990_v51, %v12011_v52  ;;  %v15951_v47 = vld [vmem:[#allocation5 + $0x54] sm:$0xf] }
 0x297   :  { %3242 = vmatpush.bf16.msrb.mxu3 %v11940_v35  ;;  %2877 = vmatmul.bf16.vlgmr.msrb.gmra.mxu0 %v2465_v58  ;;  %v12044_v58 = vor.u32 %v15998_v8, %v12043_v40  ;;  %v15944_v35 = vld [vmem:[#allocation5 + $0x14] sm:$0xf0]  ;;  %v11880_v8 = vor.u32 %v15955_v1, %v11877_v5  ;;  %v11925_v50 = vld [vmem:[#allocation5 + $0xd8] sm:$0xf0]  ;;  %v15949_v45 = vld [vmem:[#allocation5 + $0x44] sm:$0xf] }
 0x298   :  { %3255 = vmatpush.bf16.msra.mxu0 %v12004_v28  ;;  %2890 = vmatmul.bf16.vlgmr.msrb.gmra.mxu1 %v2466_v23  ;;  %v12035_v23 = vld [vmem:[#allocation5 + $0x1b0] sm:$0xf]  ;;  %v11981_v46 = vld [vmem:[#allocation5 + $0x148] sm:$0xf0]  ;;  %v15997_v53 = vld [vmem:[#allocation5 + $0x1c4] sm:$0xf] }
 0x299   :  { %3268 = vmatpush.bf16.msra.mxu1 %v12068_v48  ;;  %v12036_v37 = vor.u32 %v15996_v22, %v12035_v23  ;;  %v11891_v28 = vld [vmem:[#allocation5 + $0x90] sm:$0xf]  ;;  %v15942_v48 = vld [vmem:[#allocation5 + $0x4] sm:$0xf0]  ;;  %v15985_v23 = vld [vmem:[#allocation5 + $0x164] sm:$0xf] }
 0x29a   :  { %3230 = vmatpush.bf16.msrb.mxu2 %v11868_v0  ;;  %v11828_v0 = vor.u32 %v15944_v35, %v11827_v34  ;;  %v11997_v22 = vld [vmem:[#allocation5 + $0x168] sm:$0xf0]  ;;  %v15999_v35 = vld [vmem:[#allocation5 + $0x1d4] sm:$0xf]  ;;  %v15945_v51 = vld [vmem:[#allocation5 + $0x24] sm:$0xf] }
 0x29b   :  { %3243 = vmatpush.bf16.msrb.mxu3 %v11932_v27  ;;  %v11947_v27 = vld [vmem:[#allocation5 + $0x100] sm:$0xf]  ;;  %v12000_v16 = vor.u32 %v15985_v23, %v11997_v22  ;;  %v15963_v5 = vld [vmem:[#allocation5 + $0xb4] sm:$0xf]  ;;  %v11829_v20 = vld [vmem:[#allocation5 + $0x18] sm:$0xf0] }
 0x29c   :  { %3256 = vmatpush.bf16.msra.mxu0 %v11996_v33  ;;  %v11892_v33 = vor.u32 %v15960_v62, %v11891_v28  ;;  %v11948_v14 = vor.u32 %v15974_v7, %v11947_v27  ;;  %v12053_v28 = vld [vmem:[#allocation5 + $0x1d8] sm:$0xf0]  ;;  %v12045_v27 = vld [vmem:[#allocation5 + $0x1c8] sm:$0xf0]  ;;  %v15947_v7 = vld [vmem:[#allocation5 + $0x34] sm:$0xf] }
 0x29d   :  { %3269 = vmatpush.bf16.msra.mxu1 %v12060_v61  ;;  %v2321_v61 = vld [vmem:[#allocation4] sm:$0x11]  ;;  %v15959_v21 = vld [vmem:[#allocation5 + $0x94] sm:$0xf]  ;;  %v11957_v22 = vld [vmem:[#allocation5 + $0x118] sm:$0xf0] }
 0x29e   :  { %3231 = vmatpush.bf16.msrb.mxu2 %v11860_v31  ;;  %v12020_v31 = vor.u32 %v15992_v26, %v12019_v24  ;;  %v2899_v40 = vunpack.c.l.b16 %v2321_v61  ;;  %v2900_v2 = vunpack.c.h.b16 %v2321_v61  ;;  %v15965_v26 = vld [vmem:[#allocation5 + $0xc4] sm:$0xf]  ;;  %v12048_v61 = vor.u32 %v15997_v53, %v12045_v27  ;;  %v15975_v23 = vld [vmem:[#allocation5 + $0x114] sm:$0xf]  ;;  %v12323_v53 = vld [vmem:[#allocation5 + $0x5f0] sm:$0xf] }
 0x29f   :  { %3244 = vmatpush.bf16.msrb.mxu3 %v11924_v54  ;;  %v11820_v54 = vor.u32 %v15942_v48, %v11819_v44  ;;  %v11917_v44 = vld [vmem:[#allocation5 + $0xc8] sm:$0xf0]  ;;  %v12056_v48 = vor.u32 %v15999_v35, %v12053_v28  ;;  %v12131_v35 = vld [vmem:[#allocation5 + $0x470] sm:$0xf]  ;;  %v16084_v28 = vld [vmem:[#allocation5 + $0x474] sm:$0xf0] }
 0x2a0   :  { %3257 = vmatpush.bf16.msra.mxu0 %v11988_v38  ;;  %v12005_v38 = vld [vmem:[#allocation5 + $0x178] sm:$0xf0]  ;;  %v17595_v49 = vpack.c.b16 %v2899_v40, %v2899_v40  ;;  %v17597_v59 = vpack.c.b16 %v2900_v2, %v2900_v2  ;;  %v11965_v40 = vld [vmem:[#allocation5 + $0x128] sm:$0xf0]  ;;  %v16132_v27 = vld [vmem:[#allocation5 + $0x5f4] sm:$0xf0] }
 0x2a1   :  { %3270 = vmatpush.bf16.msra.mxu1 %v12052_v30  ;;  %v12069_v30 = vld [vmem:[#allocation5 + $0x1f8] sm:$0xf0]  ;;  %v12008_v42 = vor.u32 %v15987_v3, %v12005_v38  ;;  %v15995_v3 = vld [vmem:[#allocation5 + $0x1b4] sm:$0xf]  ;;  %s10654_s1 = sshll.u32 %s18101_s9, 4  ;;  %vm10645_vm10 = vcmask 58368   ;;  %s10655_s1 = int_to_ptr.hbm [resolvable:$true] %s10654_s1 }
 0x2a2   :  { %3232 = vmatpush.bf16.msrb.mxu2 %v11852_v19  ;;  %v2898_v19 = vunpack.c.h.b16 %v2320_v4  ;;  %v11845_v4 = vld [vmem:[#allocation5 + $0x38] sm:$0xf0] }
 0x2a3   :  { %3245 = vmatpush.bf16.msrb.mxu3 %v11916_v15  ;;  %v11944_v15 = vor.u32 %v15971_v10, %v11941_v9  ;;  %v11909_v10 = vld [vmem:[#allocation5 + $0xb8] sm:$0xf0]  ;;  %v11848_v38 = vor.u32 %v15947_v7, %v11845_v4  ;;  %v12123_v7 = vld [vmem:[#allocation5 + $0x460] sm:$0xf] }
 0x2a4   :  { %3258 = vmatpush.bf16.msra.mxu0 %v11980_v17  ;;  %v15953_v17 = vld [vmem:[#allocation5 + $0x64] sm:$0xf]  ;;  %v11973_v9 = vld [vmem:[#allocation5 + $0x138] sm:$0xf0]  ;;  %v11912_v52 = vor.u32 %v15963_v5, %v11909_v10  ;;  %v12187_v4 = vld [vmem:[#allocation5 + $0x4e0] sm:$0xf] }
 0x2a5   :  { %3271 = vmatpush.bf16.msra.mxu1 %v12044_v58  ;;  %v17591_v58 = vpack.c.b16 %v2897_v6, %v2897_v6  ;;  %v11872_v13 = vor.u32 %v15953_v17, %v11869_v11  ;;  %v11893_v2 = vld [vmem:[#allocation5 + $0x98] sm:$0xf0]  ;;  %v16098_v10 = vld [vmem:[#allocation5 + $0x4e4] sm:$0xf0] }
 0x2a6   :  { %3233 = vmatpush.bf16.msrb.mxu2 %v11844_v57  ;;  %v12072_v57 = vor.u32 %v16003_v29, %v12069_v30  ;;  %v11901_v29 = vld [vmem:[#allocation5 + $0xa8] sm:$0xf0] }
 0x2a7   :  { %3246 = vmatpush.bf16.msrb.mxu3 %v11908_v12  ;;  %v17593_v12 = vpack.c.b16 %v2898_v19, %v2898_v19  ;;  %v15977_v19 = vld [vmem:[#allocation5 + $0x124] sm:$0xf] }
 0x2a8   :  { %3259 = vmatpush.bf16.msra.mxu0 %v11972_v63  ;;  %v16001_v63 = vld [vmem:[#allocation5 + $0x1e4] sm:$0xf]  ;;  %v11968_v11 = vor.u32 %v15977_v19, %v11965_v40  ;;  %v16112_v19 = vld [vmem:[#allocation5 + $0x554] sm:$0xf0] }
 0x2a9   :  { %3272 = vmatpush.bf16.msra.mxu1 %v12036_v37  ;;  %v11861_v37 = vld [vmem:[#allocation5 + $0x58] sm:$0xf0]  ;;  %v12064_v34 = vor.u32 %v16001_v63, %v12061_v32  ;;  %v15991_v63 = vld [vmem:[#allocation5 + $0x194] sm:$0xf] }
 0x2aa   :  { %3234 = vmatpush.bf16.msrb.mxu2 %v11836_v39  ;;  %v15967_v39 = vld [vmem:[#allocation5 + $0xd4] sm:$0xf]  ;;  %v11864_v62 = vor.u32 %v15951_v47, %v11861_v37  ;;  %v12021_v32 = vld [vmem:[#allocation5 + $0x198] sm:$0xf0]  ;;  %v15941_v47 = vld [vmem:[#allocation5 + $0x4] sm:$0xf] }
 0x2ab   :  { %3247 = vmatpush.bf16.msrb.mxu3 %v11900_v36  ;;  %v15983_v36 = vld [vmem:[#allocation5 + $0x154] sm:$0xf]  ;;  %v11928_v43 = vor.u32 %v15967_v39, %v11925_v50  ;;  %v15957_v37 = vld [vmem:[#allocation5 + $0x84] sm:$0xf]  ;;  %v11960_v39 = vor.u32 %v15975_v23, %v11957_v22  ;;  %v11885_v50 = vld [vmem:[#allocation5 + $0x88] sm:$0xf0] }
 0x2ac   :  { %3260 = vmatpush.bf16.msra.mxu0 %v11964_v41  ;;  %v11989_v41 = vld [vmem:[#allocation5 + $0x158] sm:$0xf0]  ;;  %v12299_v22 = vld [vmem:[#allocation5 + $0x5c0] sm:$0xf] }
 0x2ad   :  { %3273 = vmatpush.bf16.msra.mxu1 %v12028_v56  ;;  %v11992_v24 = vor.u32 %v15983_v36, %v11989_v41  ;;  %v11853_v56 = vld [vmem:[#allocation5 + $0x48] sm:$0xf0]  ;;  %v12024_v41 = vor.u32 %v15991_v63, %v12021_v32  ;;  %v16126_v63 = vld [vmem:[#allocation5 + $0x5c4] sm:$0xf0] }
 0x2ae   :  { %3235 = vmatpush.bf16.msrb.mxu2 %v11828_v0  ;;  %v15981_v0 = vld [vmem:[#allocation5 + $0x144] sm:$0xf]  ;;  %v11949_v36 = vld [vmem:[#allocation5 + $0x108] sm:$0xf0] }
 0x2af   :  { %3248 = vmatpush.bf16.msrb.mxu3 %v11892_v33  ;;  %v11856_v33 = vor.u32 %v15949_v45, %v11853_v56  ;;  %v11984_v1 = vor.u32 %v15981_v0, %v11981_v46  ;;  %v12259_v45 = vld [vmem:[#allocation5 + $0x570] sm:$0xf]  ;;  %v12132_v46 = vor.u32 %v16084_v28, %v12131_v35  ;;  %v12091_v28 = vld [vmem:[#allocation5 + $0x420] sm:$0xf] }
 0x2b0   :  { %3261 = vmatpush.bf16.msra.mxu0 %v11956_v60  ;;  %v11920_v60 = vor.u32 %v15965_v26, %v11917_v44  ;;  %v11888_v26 = vor.u32 %v15957_v37, %v11885_v50  ;;  %v15989_v44 = vld [vmem:[#allocation5 + $0x184] sm:$0xf]  ;;  %v12227_v37 = vld [vmem:[#allocation5 + $0x530] sm:$0xf]  ;;  %v12300_v50 = vor.u32 %v16126_v63, %v12299_v22 }
 0x2b1   :  { %3274 = vmatpush.bf16.msra.mxu1 %v12020_v31  ;;  %v15979_v31 = vld [vmem:[#allocation5 + $0x134] sm:$0xf] }
 0x2b2   :  { %3236 = vmatpush.bf16.msrb.mxu2 %v11820_v54  ;;  %v12037_v54 = vld [vmem:[#allocation5 + $0x1b8] sm:$0xf0]  ;;  %v11976_v6 = vor.u32 %v15979_v31, %v11973_v9  ;;  %v16114_v31 = vld [vmem:[#allocation5 + $0x564] sm:$0xf0]  ;;  %v12324_v9 = vor.u32 %v16132_v27, %v12323_v53  ;;  %v16072_v53 = vld [vmem:[#allocation5 + $0x414] sm:$0xf0] }
 0x2b3   :  { %3249 = vmatpush.bf16.msrb.mxu3 %v11884_v55  ;;  %v11837_v55 = vld [vmem:[#allocation5 + $0x28] sm:$0xf0]  ;;  %v12040_v30 = vor.u32 %v15995_v3, %v12037_v54  ;;  %v12315_v54 = vld [vmem:[#allocation5 + $0x5e0] sm:$0xf] }
 0x2b4   :  { %3262 = vmatpush.bf16.msra.mxu0 %v11948_v14  ;;  %v15961_v14 = vld [vmem:[#allocation5 + $0xa4] sm:$0xf]  ;;  %v11840_v17 = vor.u32 %v15945_v51, %v11837_v55  ;;  %v16080_v55 = vld [vmem:[#allocation5 + $0x454] sm:$0xf0] }
 0x2b5   :  { %3275 = vmatpush.bf16.msra.mxu1 %v12012_v18  ;;  %3237 = vmatmul.bf16.vlgmr.msrb.gmra.mxu2 %v17591_v58  ;;  %v15943_v18 = vld [vmem:[#allocation5 + $0x14] sm:$0xf] }
 0x2b6   :  { %3281 = vmatpush.bf16.msra.mxu2 %v11880_v8  ;;  %3250 = vmatmul.bf16.vlgmr.msrb.gmra.mxu3 %v17593_v12  ;;  %v15993_v8 = vld [vmem:[#allocation5 + $0x1a4] sm:$0xf] }
 0x2b7   :  { %3294 = vmatpush.bf16.msra.mxu3 %v11944_v15  ;;  %3263 = vmatmul.bf16.vlgmr.msra.gmra.mxu0 %v17595_v49  ;;  %v12029_v15 = vld [vmem:[#allocation5 + $0x1a8] sm:$0xf0] }
 0x2b8   :  { %3307 = vmatpush.bf16.msrb.mxu0 %v12008_v42  ;;  %3276 = vmatmul.bf16.vlgmr.msra.gmra.mxu1 %v17597_v59  ;;  %v11904_v42 = vor.u32 %v15961_v14, %v11901_v29  ;;  %v12179_v14 = vld [vmem:[#allocation5 + $0x4d0] sm:$0xf]  ;;  %v16096_v29 = vld [vmem:[#allocation5 + $0x4d4] sm:$0xf0] }
 0x2b9   :  { %3320 = vmatpush.bf16.msrb.mxu1 %v12072_v57  ;;  %v12032_v57 = vor.u32 %v15993_v8, %v12029_v15  ;;  %v12307_v15 = vld [vmem:[#allocation5 + $0x5d0] sm:$0xf] }
 0x2ba   :  { %3282 = vmatpush.bf16.msra.mxu2 %v11872_v13  ;;  %v11832_v13 = vor.u32 %v15943_v18, %v11829_v20  ;;  %v16078_v20 = vld [vmem:[#allocation5 + $0x444] sm:$0xf0] }
 0x2bb   :  { %3295 = vmatpush.bf16.msra.mxu3 %v11936_v25  ;;  %v11896_v25 = vor.u32 %v15959_v21, %v11893_v2  ;;  %v16094_v21 = vld [vmem:[#allocation5 + $0x4c4] sm:$0xf0]  ;;  %v12235_v2 = vld [vmem:[#allocation5 + $0x540] sm:$0xf] }
 0x2bc   :  { %3308 = vmatpush.bf16.msrb.mxu0 %v12000_v16  ;;  %v11821_v16 = vld [vmem:[#allocation5 + $0x8] sm:$0xf0] }
 0x2bd   :  { %3321 = vmatpush.bf16.msrb.mxu1 %v12064_v34  ;;  %v15973_v34 = vld [vmem:[#allocation5 + $0x104] sm:$0xf]  ;;  %v11824_v56 = vor.u32 %v15941_v47, %v11821_v16  ;;  %v12163_v47 = vld [vmem:[#allocation5 + $0x4b0] sm:$0xf]  ;;  %v16092_v16 = vld [vmem:[#allocation5 + $0x4b4] sm:$0xf0] }
 0x2be   :  { %3283 = vmatpush.bf16.msra.mxu2 %v11864_v62  ;;  %v12195_v62 = vld [vmem:[#allocation5 + $0x4f0] sm:$0xf]  ;;  %v11952_v0 = vor.u32 %v15973_v34, %v11949_v36  ;;  %v16124_v36 = vld [vmem:[#allocation5 + $0x5b4] sm:$0xf0] }
 0x2bf   :  { %3296 = vmatpush.bf16.msra.mxu3 %v11928_v43  ;;  %v16100_v43 = vld [vmem:[#allocation5 + $0x4f4] sm:$0xf0]  ;;  %v12291_v34 = vld [vmem:[#allocation5 + $0x5b0] sm:$0xf] }
 0x2c0   :  { %3309 = vmatpush.bf16.msrb.mxu0 %v11992_v24  ;;  %v16116_v24 = vld [vmem:[#allocation5 + $0x574] sm:$0xf0] }
 0x2c1   :  { %3322 = vmatpush.bf16.msrb.mxu1 %v12056_v48  ;;  %v12013_v48 = vld [vmem:[#allocation5 + $0x188] sm:$0xf0] }
 0x2c2   :  { %3284 = vmatpush.bf16.msra.mxu2 %v11856_v33  ;;  %v12196_v33 = vor.u32 %v16100_v43, %v12195_v62  ;;  %v12016_v5 = vor.u32 %v15989_v44, %v12013_v48  ;;  %v16074_v62 = vld [vmem:[#allocation5 + $0x424] sm:$0xf0]  ;;  %v12155_v43 = vld [vmem:[#allocation5 + $0x4a0] sm:$0xf] }
 0x2c3   :  { %3297 = vmatpush.bf16.msra.mxu3 %v11920_v60  ;;  %v12260_v60 = vor.u32 %v16116_v24, %v12259_v45  ;;  %v16090_v45 = vld [vmem:[#allocation5 + $0x4a4] sm:$0xf0]  ;;  %v12219_v24 = vld [vmem:[#allocation5 + $0x520] sm:$0xf]  ;;  %v12092_v48 = vor.u32 %v16074_v62, %v12091_v28  ;;  %v16113_v28 = vld [vmem:[#allocation5 + $0x564] sm:$0xf] }
 0x2c4   :  { %3310 = vmatpush.bf16.msrb.mxu0 %v11984_v1  ;;  %v16082_v1 = vld [vmem:[#allocation5 + $0x464] sm:$0xf0]  ;;  %v12283_v44 = vld [vmem:[#allocation5 + $0x5a0] sm:$0xf]  ;;  %v12156_v27 = vor.u32 %v16090_v45, %v12155_v43  ;;  %v12253_v62 = vld [vmem:[#allocation5 + $0x568] sm:$0xf0] }
 0x2c5   :  { %3323 = vmatpush.bf16.msrb.mxu1 %v12048_v61  ;;  %v12251_v61 = vld [vmem:[#allocation5 + $0x560] sm:$0xf]  ;;  %v12124_v3 = vor.u32 %v16082_v1, %v12123_v7  ;;  %v16088_v7 = vld [vmem:[#allocation5 + $0x494] sm:$0xf0]  ;;  %v3333_v1 = vld [vmem:[#allocation4 + $0x30] sm:$0x44] }
 0x2c6   :  { %3285 = vmatpush.bf16.msra.mxu2 %v11848_v38  ;;  %v16130_v38 = vld [vmem:[#allocation5 + $0x5e4] sm:$0xf0]  ;;  %v12252_v51 = vor.u32 %v16114_v31, %v12251_v61  ;;  %v12275_v31 = vld [vmem:[#allocation5 + $0x590] sm:$0xf]  ;;  %v16129_v45 = vld [vmem:[#allocation5 + $0x5e4] sm:$0xf] }
 0x2c7   :  { %3298 = vmatpush.bf16.msra.mxu3 %v11912_v52  ;;  %v12188_v52 = vor.u32 %v16098_v10, %v12187_v4  ;;  %v12316_v40 = vor.u32 %v16130_v38, %v12315_v54  ;;  %v12211_v4 = vld [vmem:[#allocation5 + $0x510] sm:$0xf]  ;;  %v3334_v10 = vld [vmem:[#allocation4] sm:$0x44]  ;;  %v16070_v38 = vld [vmem:[#allocation5 + $0x404] sm:$0xf0] }
 0x2c8   :  { %3311 = vmatpush.bf16.msrb.mxu0 %v11976_v6  ;;  %v12115_v6 = vld [vmem:[#allocation5 + $0x450] sm:$0xf]  ;;  %v12075_v54 = vld [vmem:[#allocation5 + $0x400] sm:$0xf] }
 0x2c9   :  { %3324 = vmatpush.bf16.msrb.mxu1 %v12040_v30  ;;  %v12243_v30 = vld [vmem:[#allocation5 + $0x550] sm:$0xf]  ;;  %v12116_v8 = vor.u32 %v16080_v55, %v12115_v6 }
 0x2ca   :  { %3286 = vmatpush.bf16.msra.mxu2 %v11840_v17  ;;  %v16128_v17 = vld [vmem:[#allocation5 + $0x5d4] sm:$0xf0]  ;;  %v12244_v18 = vor.u32 %v16112_v19, %v12243_v30  ;;  %v12203_v30 = vld [vmem:[#allocation5 + $0x500] sm:$0xf]  ;;  %v3404_v19 = vunpack.c.l.b16 %v3334_v10 }
 0x2cb   :  { %3299 = vmatpush.bf16.msra.mxu3 %v11904_v42  ;;  %v12180_v42 = vor.u32 %v16096_v29, %v12179_v14  ;;  %v12139_v14 = vld [vmem:[#allocation5 + $0x480] sm:$0xf]  ;;  %v16086_v29 = vld [vmem:[#allocation5 + $0x484] sm:$0xf0] }
 0x2cc   :  { %3312 = vmatpush.bf16.msrb.mxu0 %v11968_v11  ;;  %v12107_v11 = vld [vmem:[#allocation5 + $0x440] sm:$0xf]  ;;  %v12140_v22 = vor.u32 %v16086_v29, %v12139_v14  ;;  %v16125_v29 = vld [vmem:[#allocation5 + $0x5c4] sm:$0xf] }
 0x2cd   :  { %3325 = vmatpush.bf16.msrb.mxu1 %v12032_v57  ;;  %v16110_v57 = vld [vmem:[#allocation5 + $0x544] sm:$0xf0]  ;;  %v12108_v23 = vor.u32 %v16078_v20, %v12107_v11  ;;  %v16115_v11 = vld [vmem:[#allocation5 + $0x574] sm:$0xf]  ;;  %v3405_v20 = vunpack.c.h.b16 %v3334_v10 }
 0x2ce   :  { %3287 = vmatpush.bf16.msra.mxu2 %v11832_v13  ;;  %v12236_v32 = vor.u32 %v16110_v57, %v12235_v2  ;;  %v12099_v13 = vld [vmem:[#allocation5 + $0x430] sm:$0xf]  ;;  %v12267_v2 = vld [vmem:[#allocation5 + $0x580] sm:$0xf]  ;;  %v16118_v57 = vld [vmem:[#allocation5 + $0x584] sm:$0xf0] }
 0x2cf   :  { %3300 = vmatpush.bf16.msra.mxu3 %v11896_v25  ;;  %v16076_v25 = vld [vmem:[#allocation5 + $0x434] sm:$0xf0]  ;;  %v16127_v10 = vld [vmem:[#allocation5 + $0x5d4] sm:$0xf] }
 0x2d0   :  { %3313 = vmatpush.bf16.msrb.mxu0 %v11960_v39  ;;  %v16108_v39 = vld [vmem:[#allocation5 + $0x534] sm:$0xf0] }
 0x2d1   :  { %3326 = vmatpush.bf16.msrb.mxu1 %v12024_v41  ;;  %v12164_v41 = vor.u32 %v16092_v16, %v12163_v47  ;;  %v12228_v35 = vor.u32 %v16108_v39, %v12227_v37  ;;  %v12325_v47 = vld [vmem:[#allocation5 + $0x5f8] sm:$0xf0]  ;;  %v16081_v16 = vld [vmem:[#allocation5 + $0x464] sm:$0xf]  ;;  %v12268_v39 = vor.u32 %v16118_v57, %v12267_v2 }
 0x2d2   :  { %3288 = vmatpush.bf16.msra.mxu2 %v11824_v56  ;;  %v16106_v56 = vld [vmem:[#allocation5 + $0x524] sm:$0xf0]  ;;  %v12293_v2 = vld [vmem:[#allocation5 + $0x5b8] sm:$0xf0]  ;;  %v16073_v57 = vld [vmem:[#allocation5 + $0x424] sm:$0xf] }
 0x2d3   :  { %3301 = vmatpush.bf16.msra.mxu3 %v11888_v26  ;;  %v12292_v26 = vor.u32 %v16124_v36, %v12291_v34  ;;  %v12189_v34 = vld [vmem:[#allocation5 + $0x4e8] sm:$0xf0]  ;;  %v17613_v36 = vpack.c.b16 %v3405_v20, %v3405_v20 }
 0x2d4   :  { %3314 = vmatpush.bf16.msrb.mxu0 %v11952_v0  ;;  %v16122_v0 = vld [vmem:[#allocation5 + $0x5a4] sm:$0xf0] }
 0x2d5   :  { %3327 = vmatpush.bf16.msrb.mxu1 %v12016_v5  ;;  %3289 = vmatmul.bf16.vlgmr.msra.gmra.mxu2 %v17591_v58  ;;  %v12171_v58 = vld [vmem:[#allocation5 + $0x4c0] sm:$0xf]  ;;  %v16104_v5 = vld [vmem:[#allocation5 + $0x514] sm:$0xf0]  ;;  %v12284_v61 = vor.u32 %v16122_v0, %v12283_v44  ;;  %v12317_v44 = vld [vmem:[#allocation5 + $0x5e8] sm:$0xf0] }
 0x2d6   :  { %3738 = vmatpush.bf16.msrb.mxu2 %v12132_v46  ;;  %3302 = vmatmul.bf16.vlgmr.msra.gmra.mxu3 %v17593_v12  ;;  %v12308_v12 = vor.u32 %v16128_v17, %v12307_v15  ;;  %v12083_v46 = vld [vmem:[#allocation5 + $0x410] sm:$0xf]  ;;  %v12212_v55 = vor.u32 %v16104_v5, %v12211_v4  ;;  %v12133_v15 = vld [vmem:[#allocation5 + $0x478] sm:$0xf0] }
 0x2d7   :  { %3751 = vmatpush.bf16.msrb.mxu3 %v12196_v33  ;;  %3315 = vmatmul.bf16.vlgmr.msrb.gmra.mxu0 %v17595_v49  ;;  %v12172_v49 = vor.u32 %v16094_v21, %v12171_v58  ;;  %v12220_v33 = vor.u32 %v16106_v56, %v12219_v24  ;;  %v12076_v58 = vor.u32 %v16070_v38, %v12075_v54  ;;  %v12261_v21 = vld [vmem:[#allocation5 + $0x578] sm:$0xf0]  ;;  %v16093_v54 = vld [vmem:[#allocation5 + $0x4c4] sm:$0xf]  ;;  %v12173_v38 = vld [vmem:[#allocation5 + $0x4c8] sm:$0xf0] }
 0x2d8   :  { %3764 = vmatpush.bf16.msra.mxu0 %v12260_v60  ;;  %3328 = vmatmul.bf16.vlgmr.msrb.gmra.mxu1 %v17597_v59  ;;  %v12100_v59 = vor.u32 %v16076_v25, %v12099_v13  ;;  %v12147_v60 = vld [vmem:[#allocation5 + $0x490] sm:$0xf]  ;;  %v16131_v25 = vld [vmem:[#allocation5 + $0x5f4] sm:$0xf]  ;;  %v12264_v37 = vor.u32 %v16115_v11, %v12261_v21  ;;  %v12117_v0 = vld [vmem:[#allocation5 + $0x458] sm:$0xf0]  ;;  %v12176_v14 = vor.u32 %v16093_v54, %v12173_v38 }
 0x2d9   :  { %3777 = vmatpush.bf16.msra.mxu1 %v12324_v9  ;;  %v12084_v9 = vor.u32 %v16072_v53, %v12083_v46  ;;  %v12148_v6 = vor.u32 %v16088_v7, %v12147_v60  ;;  %v12328_v43 = vor.u32 %v16131_v25, %v12325_v47  ;;  %v12256_v46 = vor.u32 %v16113_v28, %v12253_v62  ;;  %v16095_v53 = vld [vmem:[#allocation5 + $0x4d4] sm:$0xf]  ;;  %v12245_v7 = vld [vmem:[#allocation5 + $0x558] sm:$0xf0]  ;;  %v16105_v25 = vld [vmem:[#allocation5 + $0x524] sm:$0xf] }
 0x2da   :  { %3739 = vmatpush.bf16.msrb.mxu2 %v12124_v3  ;;  %v16120_v3 = vld [vmem:[#allocation5 + $0x594] sm:$0xf0]  ;;  %v16111_v60 = vld [vmem:[#allocation5 + $0x554] sm:$0xf]  ;;  %v12221_v47 = vld [vmem:[#allocation5 + $0x528] sm:$0xf0] }
 0x2db   :  { %3752 = vmatpush.bf16.msrb.mxu3 %v12188_v52  ;;  %v3402_v52 = vunpack.c.l.b16 %v3333_v1  ;;  %v12276_v17 = vor.u32 %v16120_v3, %v12275_v31  ;;  %v16077_v31 = vld [vmem:[#allocation5 + $0x444] sm:$0xf]  ;;  %v12109_v3 = vld [vmem:[#allocation5 + $0x448] sm:$0xf0]  ;;  %v16123_v21 = vld [vmem:[#allocation5 + $0x5b4] sm:$0xf]  ;;  %v12224_v28 = vor.u32 %v16105_v25, %v12221_v47 }
 0x2dc   :  { %3765 = vmatpush.bf16.msra.mxu0 %v12252_v51  ;;  %v3403_v51 = vunpack.c.h.b16 %v3333_v1  ;;  %v12320_v1 = vor.u32 %v16129_v45, %v12317_v44  ;;  %v12085_v62 = vld [vmem:[#allocation5 + $0x418] sm:$0xf0]  ;;  %v16164_v54 = vld [vmem:[#allocation5 + $0x6f4] sm:$0xf0]  ;;  %v12515_v38 = vld [vmem:[#allocation5 + $0x770] sm:$0xf] }
 0x2dd   :  { %3778 = vmatpush.bf16.msra.mxu1 %v12316_v40  ;;  %v16102_v40 = vld [vmem:[#allocation5 + $0x504] sm:$0xf0]  ;;  %v12149_v45 = vld [vmem:[#allocation5 + $0x498] sm:$0xf0] }
 0x2de   :  { %3740 = vmatpush.bf16.msrb.mxu2 %v12116_v8  ;;  %v16083_v8 = vld [vmem:[#allocation5 + $0x474] sm:$0xf]  ;;  %v12204_v63 = vor.u32 %v16102_v40, %v12203_v30  ;;  %v12301_v30 = vld [vmem:[#allocation5 + $0x5c8] sm:$0xf0] }
 0x2df   :  { %3753 = vmatpush.bf16.msrb.mxu3 %v12180_v42  ;;  %v16099_v42 = vld [vmem:[#allocation5 + $0x4f4] sm:$0xf]  ;;  %v12304_v11 = vor.u32 %v16125_v29, %v12301_v30  ;;  %v12269_v29 = vld [vmem:[#allocation5 + $0x588] sm:$0xf0] }
 0x2e0   :  { %3766 = vmatpush.bf16.msra.mxu0 %v12244_v18  ;;  %v12197_v18 = vld [vmem:[#allocation5 + $0x4f8] sm:$0xf0] }
 0x2e1   :  { %3779 = vmatpush.bf16.msra.mxu1 %v12308_v12  ;;  %v17607_v12 = vpack.c.b16 %v3402_v52, %v3402_v52  ;;  %v12200_v13 = vor.u32 %v16099_v42, %v12197_v18  ;;  %v16109_v52 = vld [vmem:[#allocation5 + $0x544] sm:$0xf]  ;;  %v16107_v42 = vld [vmem:[#allocation5 + $0x534] sm:$0xf]  ;;  %v12229_v18 = vld [vmem:[#allocation5 + $0x538] sm:$0xf0] }
 0x2e2   :  { %3741 = vmatpush.bf16.msrb.mxu2 %v12108_v23  ;;  %v17609_v23 = vpack.c.b16 %v3403_v51, %v3403_v51  ;;  %v12237_v51 = vld [vmem:[#allocation5 + $0x548] sm:$0xf0] }
 0x2e3   :  { %3754 = vmatpush.bf16.msrb.mxu3 %v12172_v49  ;;  %v17611_v49 = vpack.c.b16 %v3404_v19, %v3404_v19  ;;  %v16075_v19 = vld [vmem:[#allocation5 + $0x434] sm:$0xf]  ;;  %v12240_v40 = vor.u32 %v16109_v52, %v12237_v51  ;;  %v16180_v52 = vld [vmem:[#allocation5 + $0x774] sm:$0xf0] }
 0x2e4   :  { %3767 = vmatpush.bf16.msra.mxu0 %v12236_v32  ;;  %v12136_v32 = vor.u32 %v16083_v8, %v12133_v15  ;;  %v12101_v8 = vld [vmem:[#allocation5 + $0x438] sm:$0xf0]  ;;  %v16091_v15 = vld [vmem:[#allocation5 + $0x4b4] sm:$0xf] }
 0x2e5   :  { %3780 = vmatpush.bf16.msra.mxu1 %v12300_v50  ;;  %v12125_v50 = vld [vmem:[#allocation5 + $0x468] sm:$0xf0]  ;;  %v3412_v24 = vrot.slane %v17611_v49, 2  ;;  %v12104_v20 = vor.u32 %v16075_v19, %v12101_v8 }
 0x2e6   :  { %3742 = vmatpush.bf16.msrb.mxu2 %v12100_v59  ;;  %v16097_v59 = vld [vmem:[#allocation5 + $0x4e4] sm:$0xf]  ;;  %v12128_v56 = vor.u32 %v16081_v16, %v12125_v50  ;;  %v12296_v16 = vor.u32 %v16123_v21, %v12293_v2  ;;  %v16146_v21 = vld [vmem:[#allocation5 + $0x664] sm:$0xf0]  ;;  %v12443_v2 = vld [vmem:[#allocation5 + $0x6e0] sm:$0xf] }
 0x2e7   :  { %3755 = vmatpush.bf16.msrb.mxu3 %v12164_v41  ;;  %v3410_v41 = vrot.slane %v17607_v12, 2  ;;  %v16121_v50 = vld [vmem:[#allocation5 + $0x5a4] sm:$0xf] }
 0x2e8   :  { %3768 = vmatpush.bf16.msra.mxu0 %v12228_v35  ;;  %v3411_v35 = vrot.slane %v17609_v23, 2  ;;  %v12427_v23 = vld [vmem:[#allocation5 + $0x6c0] sm:$0xf] }
 0x2e9   :  { %3781 = vmatpush.bf16.msra.mxu1 %v12292_v26  ;;  %v12192_v26 = vor.u32 %v16097_v59, %v12189_v34  ;;  %v12285_v59 = vld [vmem:[#allocation5 + $0x5a8] sm:$0xf0]  ;;  %v16071_v34 = vld [vmem:[#allocation5 + $0x414] sm:$0xf] }
 0x2ea   :  { %3743 = vmatpush.bf16.msrb.mxu2 %v12092_v48  ;;  %v16079_v48 = vld [vmem:[#allocation5 + $0x454] sm:$0xf]  ;;  %v12288_v44 = vor.u32 %v16121_v50, %v12285_v59 }
 0x2eb   :  { %3756 = vmatpush.bf16.msrb.mxu3 %v12156_v27  ;;  %v12181_v27 = vld [vmem:[#allocation5 + $0x4d8] sm:$0xf0]  ;;  %v12120_v4 = vor.u32 %v16079_v48, %v12117_v0  ;;  %v16119_v48 = vld [vmem:[#allocation5 + $0x594] sm:$0xf] }
 0x2ec   :  { %3769 = vmatpush.bf16.msra.mxu0 %v12220_v33  ;;  %v3413_v33 = vrot.slane %v17613_v36, 2  ;;  %v12184_v5 = vor.u32 %v16095_v53, %v12181_v27  ;;  %v12277_v0 = vld [vmem:[#allocation5 + $0x598] sm:$0xf0]  ;;  %v16069_v27 = vld [vmem:[#allocation5 + $0x404] sm:$0xf] }
 0x2ed   :  { %3782 = vmatpush.bf16.msra.mxu1 %v12284_v61  ;;  %v12309_v61 = vld [vmem:[#allocation5 + $0x5d8] sm:$0xf0]  ;;  %v16172_v36 = vld [vmem:[#allocation5 + $0x734] sm:$0xf0] }
 0x2ee   :  { %3744 = vmatpush.bf16.msrb.mxu2 %v12084_v9  ;;  %v12248_v9 = vor.u32 %v16111_v60, %v12245_v7  ;;  %v12077_v60 = vld [vmem:[#allocation5 + $0x408] sm:$0xf0]  ;;  %v16085_v7 = vld [vmem:[#allocation5 + $0x484] sm:$0xf] }
 0x2ef   :  { %3757 = vmatpush.bf16.msrb.mxu3 %v12148_v6  ;;  %v12312_v6 = vor.u32 %v16127_v10, %v12309_v61  ;;  %v12205_v10 = vld [vmem:[#allocation5 + $0x508] sm:$0xf0]  ;;  %v12387_v61 = vld [vmem:[#allocation5 + $0x670] sm:$0xf] }
 0x2f0   :  { %3770 = vmatpush.bf16.msra.mxu0 %v12212_v55  ;;  %v12112_v55 = vor.u32 %v16077_v31, %v12109_v3  ;;  %v16148_v31 = vld [vmem:[#allocation5 + $0x674] sm:$0xf0]  ;;  %v12280_v3 = vor.u32 %v16119_v48, %v12277_v0 }
 0x2f1   :  { %3783 = vmatpush.bf16.msra.mxu1 %v12276_v17  ;;  %v12165_v17 = vld [vmem:[#allocation5 + $0x4b8] sm:$0xf0]  ;;  %v12388_v8 = vor.u32 %v16148_v31, %v12387_v61  ;;  %v16190_v61 = vld [vmem:[#allocation5 + $0x7c4] sm:$0xf0] }
 0x2f2   :  { %3745 = vmatpush.bf16.msrb.mxu2 %v12076_v58  ;;  %v12168_v58 = vor.u32 %v16091_v15, %v12165_v17  ;;  %v12579_v15 = vld [vmem:[#allocation5 + $0x7f0] sm:$0xf]  ;;  %v16196_v17 = vld [vmem:[#allocation5 + $0x7f4] sm:$0xf0] }
 0x2f3   :  { %3758 = vmatpush.bf16.msrb.mxu3 %v12140_v22  ;;  %v12232_v22 = vor.u32 %v16107_v42, %v12229_v18  ;;  %v12580_v25 = vor.u32 %v16196_v17, %v12579_v15 }
 0x2f4   :  { %3771 = vmatpush.bf16.msra.mxu0 %v12204_v63  ;;  %v12093_v63 = vld [vmem:[#allocation5 + $0x428] sm:$0xf0] }
 0x2f5   :  { %3784 = vmatpush.bf16.msra.mxu1 %v12268_v39  ;;  %3746 = vmatmul.bf16.vlgmr.msrb.gmra.mxu2 %v3410_v41 }
 0x2f6   :  { %3790 = vmatpush.bf16.msra.mxu2 %v12136_v32  ;;  %3759 = vmatmul.bf16.vlgmr.msrb.gmra.mxu3 %v3411_v35  ;;  %v16089_v32 = vld [vmem:[#allocation5 + $0x4a4] sm:$0xf] }
 0x2f7   :  { %3803 = vmatpush.bf16.msra.mxu3 %v12200_v13  ;;  %3772 = vmatmul.bf16.vlgmr.msra.gmra.mxu0 %v3412_v24  ;;  %v12157_v13 = vld [vmem:[#allocation5 + $0x4a8] sm:$0xf0] }
 0x2f8   :  { %3816 = vmatpush.bf16.msrb.mxu0 %v12264_v37  ;;  %3785 = vmatmul.bf16.vlgmr.msra.gmra.mxu1 %v3413_v33  ;;  %v12096_v37 = vor.u32 %v16073_v57, %v12093_v63  ;;  %v12160_v39 = vor.u32 %v16089_v32, %v12157_v13  ;;  %v12507_v63 = vld [vmem:[#allocation5 + $0x760] sm:$0xf]  ;;  %v16178_v32 = vld [vmem:[#allocation5 + $0x764] sm:$0xf0] }
 0x2f9   :  { %3829 = vmatpush.bf16.msrb.mxu1 %v12328_v43  ;;  %v16087_v43 = vld [vmem:[#allocation5 + $0x494] sm:$0xf]  ;;  %v2839_v19 = vpop.f32.mrf.mxu1  ;;  %v12508_v59 = vor.u32 %v16178_v32, %v12507_v63  ;;  %v16136_v63 = vld [vmem:[#allocation5 + $0x614] sm:$0xf0] }
 0x2fa   :  { %3791 = vmatpush.bf16.msra.mxu2 %v12128_v56  ;;  %v16103_v56 = vld [vmem:[#allocation5 + $0x514] sm:$0xf]  ;;  %v12152_v53 = vor.u32 %v16087_v43, %v12149_v45  ;;  %v2826_v18 = vpop.f32.mrf.mxu0  ;;  %v16160_v43 = vld [vmem:[#allocation5 + $0x6d4] sm:$0xf0]  ;;  %v12499_v45 = vld [vmem:[#allocation5 + $0x750] sm:$0xf] }
 0x2fb   :  { %3804 = vmatpush.bf16.msra.mxu3 %v12192_v26  ;;  %v12213_v26 = vld [vmem:[#allocation5 + $0x518] sm:$0xf0]  ;;  %v2800_v51 = vpop.f32.mrf.mxu2 }
 0x2fc   :  { %3817 = vmatpush.bf16.msrb.mxu0 %v12256_v46  ;;  %v12088_v46 = vor.u32 %v16071_v34, %v12085_v62  ;;  %v2813_v30 = vpop.f32.mrf.mxu3  ;;  %v12371_v34 = vld [vmem:[#allocation5 + $0x650] sm:$0xf] }
 0x2fd   :  { %3830 = vmatpush.bf16.msrb.mxu1 %v12320_v1  ;;  %v12216_v1 = vor.u32 %v16103_v56, %v12213_v26  ;;  %v2814_v42 = vadd.f32 %v2813_v30, %v2800_v51  ;;  %v12435_v62 = vld [vmem:[#allocation5 + $0x6d0] sm:$0xf]  ;;  %v16176_v56 = vld [vmem:[#allocation5 + $0x754] sm:$0xf0] }
 0x2fe   :  { %3792 = vmatpush.bf16.msra.mxu2 %v12120_v4  ;;  %v12141_v4 = vld [vmem:[#allocation5 + $0x488] sm:$0xf0]  ;;  %v12483_v51 = vld [vmem:[#allocation5 + $0x730] sm:$0xf] }
 0x2ff   :  { %3805 = vmatpush.bf16.msra.mxu3 %v12184_v5  ;;  %v16101_v5 = vld [vmem:[#allocation5 + $0x504] sm:$0xf]  ;;  %v2827_v13 = vadd.f32 %v2826_v18, %v2814_v42  ;;  %v12484_v30 = vor.u32 %v16172_v36, %v12483_v51  ;;  %v16154_v42 = vld [vmem:[#allocation5 + $0x6a4] sm:$0xf0]  ;;  %v12475_v18 = vld [vmem:[#allocation5 + $0x720] sm:$0xf] }
 0x300   :  { %3818 = vmatpush.bf16.msrb.mxu0 %v12248_v9  ;;  %v12451_v9 = vld [vmem:[#allocation5 + $0x6f0] sm:$0xf]  ;;  %v16182_v51 = vld [vmem:[#allocation5 + $0x784] sm:$0xf0] }
 0x301   :  { %3831 = vmatpush.bf16.msrb.mxu1 %v12312_v6  ;;  %v12080_v6 = vor.u32 %v16069_v27, %v12077_v60  ;;  %v2841_v0 = vpop.f32.mrf.mxu1  ;;  %v16192_v27 = vld [vmem:[#allocation5 + $0x7d4] sm:$0xf0]  ;;  %v12500_v60 = vor.u32 %v16176_v56, %v12499_v45 }
 0x302   :  { %3793 = vmatpush.bf16.msra.mxu2 %v12112_v55  ;;  %v12144_v55 = vor.u32 %v16085_v7, %v12141_v4  ;;  %v2828_v12 = vpop.f32.mrf.mxu0  ;;  %v12363_v7 = vld [vmem:[#allocation5 + $0x640] sm:$0xf] }
 0x303   :  { %3806 = vmatpush.bf16.msra.mxu3 %v12176_v14  ;;  %v16117_v14 = vld [vmem:[#allocation5 + $0x584] sm:$0xf]  ;;  %v2802_v26 = vpop.f32.mrf.mxu2  ;;  %v12491_v4 = vld [vmem:[#allocation5 + $0x740] sm:$0xf] }
 0x304   :  { %3819 = vmatpush.bf16.msrb.mxu0 %v12240_v40  ;;  %v12208_v40 = vor.u32 %v16101_v5, %v12205_v10  ;;  %v12272_v57 = vor.u32 %v16117_v14, %v12269_v29  ;;  %v2815_v48 = vpop.f32.mrf.mxu3  ;;  %v16174_v5 = vld [vmem:[#allocation5 + $0x744] sm:$0xf0]  ;;  %v16188_v14 = vld [vmem:[#allocation5 + $0x7b4] sm:$0xf0]  ;;  %v12395_v12 = vld [vmem:[#allocation5 + $0x680] sm:$0xf] }
 0x305   :  { %3832 = vmatpush.bf16.msrb.mxu1 %v12304_v11  ;;  %v12452_v11 = vor.u32 %v16164_v54, %v12451_v9  ;;  %v12492_v9 = vor.u32 %v16174_v5, %v12491_v4  ;;  %v16140_v54 = vld [vmem:[#allocation5 + $0x634] sm:$0xf0]  ;;  %v16134_v48 = vld [vmem:[#allocation5 + $0x604] sm:$0xf0]  ;;  %v16147_v5 = vld [vmem:[#allocation5 + $0x674] sm:$0xf] }
 0x306   :  { %3794 = vmatpush.bf16.msra.mxu2 %v12104_v20  ;;  %v12516_v20 = vor.u32 %v16180_v52, %v12515_v38  ;;  %v12419_v38 = vld [vmem:[#allocation5 + $0x6b0] sm:$0xf]  ;;  %v16156_v52 = vld [vmem:[#allocation5 + $0x6b4] sm:$0xf0]  ;;  %v16166_v4 = vld [vmem:[#allocation5 + $0x704] sm:$0xf0] }
 0x307   :  { %3807 = vmatpush.bf16.msra.mxu3 %v12168_v58  ;;  %v12379_v58 = vld [vmem:[#allocation5 + $0x660] sm:$0xf]  ;;  %v12420_v29 = vor.u32 %v16156_v52, %v12419_v38  ;;  %v16184_v26 = vld [vmem:[#allocation5 + $0x794] sm:$0xf0]  ;;  %v12517_v38 = vld [vmem:[#allocation5 + $0x778] sm:$0xf0] }
 0x308   :  { %3820 = vmatpush.bf16.msrb.mxu0 %v12232_v22  ;;  %v16162_v22 = vld [vmem:[#allocation5 + $0x6e4] sm:$0xf0]  ;;  %v12380_v47 = vor.u32 %v16146_v21, %v12379_v58  ;;  %v12539_v58 = vld [vmem:[#allocation5 + $0x7a0] sm:$0xf] }
 0x309   :  { %3833 = vmatpush.bf16.msrb.mxu1 %v12296_v16  ;;  %v12571_v16 = vld [vmem:[#allocation5 + $0x7e0] sm:$0xf]  ;;  %v12444_v50 = vor.u32 %v16162_v22, %v12443_v2  ;;  %v12339_v22 = vld [vmem:[#allocation5 + $0x610] sm:$0xf] }
 0x30a   :  { %3795 = vmatpush.bf16.msra.mxu2 %v12096_v37  ;;  %v16194_v37 = vld [vmem:[#allocation5 + $0x7e4] sm:$0xf0]  ;;  %v12340_v56 = vor.u32 %v16136_v63, %v12339_v22  ;;  %v12523_v52 = vld [vmem:[#allocation5 + $0x780] sm:$0xf]  ;;  %v12509_v22 = vld [vmem:[#allocation5 + $0x768] sm:$0xf0] }
 0x30b   :  { %3808 = vmatpush.bf16.msra.mxu3 %v12160_v39  ;;  %v17627_v39 = vadd.f32 %v2839_v19, %v2827_v13  ;;  %v12347_v19 = vld [vmem:[#allocation5 + $0x620] sm:$0xf] }
 0x30c   :  { %3821 = vmatpush.bf16.msrb.mxu0 %v12224_v28  ;;  %v16144_v28 = vld [vmem:[#allocation5 + $0x654] sm:$0xf0] }
 0x30d   :  { %3834 = vmatpush.bf16.msrb.mxu1 %v12288_v44  ;;  %v12572_v44 = vor.u32 %v16194_v37, %v12571_v16  ;;  %v16152_v16 = vld [vmem:[#allocation5 + $0x694] sm:$0xf0]  ;;  %v3844_v37 = vld [vmem:[#allocation4 + $0x30] sm:$0x88] }
 0x30e   :  { %3796 = vmatpush.bf16.msra.mxu2 %v12088_v46  ;;  %v12372_v46 = vor.u32 %v16144_v28, %v12371_v34  ;;  %v16168_v34 = vld [vmem:[#allocation5 + $0x714] sm:$0xf0]  ;;  %v3845_v28 = vld [vmem:[#allocation4] sm:$0x88]  ;;  %v3913_v0 = vunpack.c.l.b16 %v3844_v37 }
 0x30f   :  { %3809 = vmatpush.bf16.msra.mxu3 %v12152_v53  ;;  %v12563_v53 = vld [vmem:[#allocation5 + $0x7d0] sm:$0xf] }
 0x310   :  { %3822 = vmatpush.bf16.msrb.mxu0 %v12216_v1  ;;  %v16142_v1 = vld [vmem:[#allocation5 + $0x644] sm:$0xf0]  ;;  %v12564_v10 = vor.u32 %v16192_v27, %v12563_v53  ;;  %v17639_v36 = vpack.c.b16 %v3913_v0, %v3913_v0  ;;  %v12565_v0 = vld [vmem:[#allocation5 + $0x7d8] sm:$0xf0] }
 0x311   :  { %3835 = vmatpush.bf16.msrb.mxu1 %v12280_v3  ;;  %v12364_v49 = vor.u32 %v16142_v1, %v12363_v7  ;;  %v12355_v3 = vld [vmem:[#allocation5 + $0x630] sm:$0xf]  ;;  %v3915_v1 = vunpack.c.l.b16 %v3845_v28 }
 0x312   :  { %3797 = vmatpush.bf16.msra.mxu2 %v12080_v6  ;;  %v12356_v6 = vor.u32 %v16140_v54, %v12355_v3  ;;  %v3916_v3 = vunpack.c.h.b16 %v3845_v28  ;;  %v12437_v28 = vld [vmem:[#allocation5 + $0x6d8] sm:$0xf0] }
 0x313   :  { %3810 = vmatpush.bf16.msra.mxu3 %v12144_v55  ;;  %v12547_v55 = vld [vmem:[#allocation5 + $0x7b0] sm:$0xf] }
 0x314   :  { %3823 = vmatpush.bf16.msrb.mxu0 %v12208_v40  ;;  %v16138_v40 = vld [vmem:[#allocation5 + $0x624] sm:$0xf0]  ;;  %v2878_v15 = vpop.f32.mrf.mxu0 }
 0x315   :  { %3836 = vmatpush.bf16.msrb.mxu1 %v12272_v57  ;;  %3798 = vmatmul.bf16.vlgmr.msra.gmra.mxu2 %v3410_v41  ;;  %v12436_v41 = vor.u32 %v16160_v43, %v12435_v62  ;;  %v2891_v17 = vpop.f32.mrf.mxu1  ;;  %v12348_v2 = vor.u32 %v16138_v40, %v12347_v19  ;;  %v16186_v57 = vld [vmem:[#allocation5 + $0x7a4] sm:$0xf0]  ;;  %v12531_v43 = vld [vmem:[#allocation5 + $0x790] sm:$0xf]  ;;  %v16195_v40 = vld [vmem:[#allocation5 + $0x7f4] sm:$0xf] }
 0x316   :  { %4249 = vmatpush.bf16.msrb.mxu2 %v12388_v8  ;;  %3811 = vmatmul.bf16.vlgmr.msra.gmra.mxu3 %v3411_v35  ;;  %v16158_v35 = vld [vmem:[#allocation5 + $0x6c4] sm:$0xf0]  ;;  %v12411_v8 = vld [vmem:[#allocation5 + $0x6a0] sm:$0xf]  ;;  %v12540_v62 = vor.u32 %v16186_v57, %v12539_v58  ;;  %v17645_v58 = vpack.c.b16 %v3916_v3, %v3916_v3  ;;  %v16177_v57 = vld [vmem:[#allocation5 + $0x764] sm:$0xf] }
 0x317   :  { %4262 = vmatpush.bf16.msrb.mxu3 %v12452_v11  ;;  %3824 = vmatmul.bf16.vlgmr.msrb.gmra.mxu0 %v3412_v24  ;;  %v12555_v24 = vld [vmem:[#allocation5 + $0x7c0] sm:$0xf]  ;;  %v12428_v31 = vor.u32 %v16158_v35, %v12427_v23  ;;  %v16170_v11 = vld [vmem:[#allocation5 + $0x724] sm:$0xf0]  ;;  %v12412_v13 = vor.u32 %v16154_v42, %v12411_v8  ;;  %v12581_v8 = vld [vmem:[#allocation5 + $0x7f8] sm:$0xf0]  ;;  %v12524_v42 = vor.u32 %v16182_v51, %v12523_v52 }
 0x318   :  { %4275 = vmatpush.bf16.msra.mxu0 %v12516_v20  ;;  %3837 = vmatmul.bf16.vlgmr.msrb.gmra.mxu1 %v3413_v33  ;;  %v12556_v33 = vor.u32 %v16190_v61, %v12555_v24  ;;  %v12548_v20 = vor.u32 %v16188_v14, %v12547_v55  ;;  %v2852_v21 = vpop.f32.mrf.mxu2  ;;  %v16163_v24 = vld [vmem:[#allocation5 + $0x6f4] sm:$0xf]  ;;  %v12453_v61 = vld [vmem:[#allocation5 + $0x6f8] sm:$0xf0]  ;;  %v12584_v63 = vor.u32 %v16195_v40, %v12581_v8  ;;  %v12349_v8 = vld [vmem:[#allocation5 + $0x628] sm:$0xf0] }
 0x319   :  { %4288 = vmatpush.bf16.msra.mxu1 %v12580_v25  ;;  %v2865_v32 = vpop.f32.mrf.mxu3  ;;  %v12476_v25 = vor.u32 %v16170_v11, %v12475_v18  ;;  %v12456_v19 = vor.u32 %v16163_v24, %v12453_v61  ;;  %v12381_v18 = vld [vmem:[#allocation5 + $0x668] sm:$0xf0]  ;;  %v16161_v11 = vld [vmem:[#allocation5 + $0x6e4] sm:$0xf]  ;;  %v12357_v61 = vld [vmem:[#allocation5 + $0x638] sm:$0xf0] }
 0x31a   :  { %4250 = vmatpush.bf16.msrb.mxu2 %v12380_v47  ;;  %v12403_v47 = vld [vmem:[#allocation5 + $0x690] sm:$0xf]  ;;  %v16171_v3 = vld [vmem:[#allocation5 + $0x734] sm:$0xf] }
 0x31b   :  { %4263 = vmatpush.bf16.msrb.mxu3 %v12444_v50  ;;  %v2866_v50 = vadd.f32 %v2865_v32, %v2852_v21  ;;  %v12404_v53 = vor.u32 %v16152_v16, %v12403_v47  ;;  %v3921_v21 = vrot.slane %v17639_v36, 3  ;;  %v16193_v32 = vld [vmem:[#allocation5 + $0x7e4] sm:$0xf]  ;;  %v12573_v16 = vld [vmem:[#allocation5 + $0x7e8] sm:$0xf0] }
 0x31c   :  { %4276 = vmatpush.bf16.msra.mxu0 %v12508_v59  ;;  %v12467_v59 = vld [vmem:[#allocation5 + $0x710] sm:$0xf]  ;;  %v2880_v23 = vpop.f32.mrf.mxu0 }
 0x31d   :  { %4289 = vmatpush.bf16.msra.mxu1 %v12572_v44  ;;  %v2879_v45 = vadd.f32 %v2878_v15, %v2866_v50  ;;  %v12331_v44 = vld [vmem:[#allocation5 + $0x600] sm:$0xf]  ;;  %v12468_v27 = vor.u32 %v16168_v34, %v12467_v59  ;;  %v2893_v35 = vpop.f32.mrf.mxu1  ;;  %v16145_v15 = vld [vmem:[#allocation5 + $0x664] sm:$0xf]  ;;  %v12373_v50 = vld [vmem:[#allocation5 + $0x658] sm:$0xf0]  ;;  %v12512_v59 = vor.u32 %v16177_v57, %v12509_v22 }
 0x31e   :  { %4251 = vmatpush.bf16.msrb.mxu2 %v12372_v46  ;;  %v3914_v46 = vunpack.c.h.b16 %v3844_v37  ;;  %v12332_v54 = vor.u32 %v16134_v48, %v12331_v44  ;;  %v16143_v37 = vld [vmem:[#allocation5 + $0x654] sm:$0xf] }
 0x31f   :  { %4264 = vmatpush.bf16.msrb.mxu3 %v12436_v41  ;;  %v16150_v41 = vld [vmem:[#allocation5 + $0x684] sm:$0xf0]  ;;  %v17637_v7 = vadd.f32 %v2891_v17, %v2879_v45  ;;  %v16159_v34 = vld [vmem:[#allocation5 + $0x6d4] sm:$0xf]  ;;  %v12501_v45 = vld [vmem:[#allocation5 + $0x758] sm:$0xf0] }
 0x320   :  { %4277 = vmatpush.bf16.msra.mxu0 %v12500_v60  ;;  %v12459_v60 = vld [vmem:[#allocation5 + $0x700] sm:$0xf]  ;;  %v12396_v55 = vor.u32 %v16150_v41, %v12395_v12  ;;  %v12440_v44 = vor.u32 %v16159_v34, %v12437_v28  ;;  %v16191_v48 = vld [vmem:[#allocation5 + $0x7d4] sm:$0xf]  ;;  %v16157_v12 = vld [vmem:[#allocation5 + $0x6c4] sm:$0xf] }
 0x321   :  { %4290 = vmatpush.bf16.msra.mxu1 %v12564_v10  ;;  %v12389_v10 = vld [vmem:[#allocation5 + $0x678] sm:$0xf0]  ;;  %v12460_v14 = vor.u32 %v16166_v4, %v12459_v60  ;;  %v12429_v41 = vld [vmem:[#allocation5 + $0x6c8] sm:$0xf0]  ;;  %v16173_v60 = vld [vmem:[#allocation5 + $0x744] sm:$0xf]  ;;  %v12568_v23 = vor.u32 %v16191_v48, %v12565_v0 }
 0x322   :  { %4252 = vmatpush.bf16.msrb.mxu2 %v12364_v49  ;;  %v12532_v49 = vor.u32 %v16184_v26, %v12531_v43  ;;  %v16175_v43 = vld [vmem:[#allocation5 + $0x754] sm:$0xf]  ;;  %v12376_v26 = vor.u32 %v16143_v37, %v12373_v50  ;;  %v12432_v4 = vor.u32 %v16157_v12, %v12429_v41  ;;  %v12341_v50 = vld [vmem:[#allocation5 + $0x618] sm:$0xf0]  ;;  %v16149_v12 = vld [vmem:[#allocation5 + $0x684] sm:$0xf] }
 0x323   :  { %4265 = vmatpush.bf16.msrb.mxu3 %v12428_v31  ;;  %v16179_v31 = vld [vmem:[#allocation5 + $0x774] sm:$0xf]  ;;  %v12405_v34 = vld [vmem:[#allocation5 + $0x698] sm:$0xf0] }
 0x324   :  { %4278 = vmatpush.bf16.msra.mxu0 %v12492_v9  ;;  %v2854_v9 = vpop.f32.mrf.mxu2  ;;  %v12520_v17 = vor.u32 %v16179_v31, %v12517_v38  ;;  %v16155_v31 = vld [vmem:[#allocation5 + $0x6b4] sm:$0xf]  ;;  %v12533_v48 = vld [vmem:[#allocation5 + $0x798] sm:$0xf0] }
 0x325   :  { %4291 = vmatpush.bf16.msra.mxu1 %v12556_v33  ;;  %v17641_v33 = vpack.c.b16 %v3914_v46, %v3914_v46  ;;  %v16141_v46 = vld [vmem:[#allocation5 + $0x644] sm:$0xf]  ;;  %v12421_v9 = vld [vmem:[#allocation5 + $0x6b8] sm:$0xf0] }
 0x326   :  { %4253 = vmatpush.bf16.msrb.mxu2 %v12356_v6  ;;  %v2867_v6 = vpop.f32.mrf.mxu3 }
 0x327   :  { %4266 = vmatpush.bf16.msrb.mxu3 %v12420_v29  ;;  %v17643_v29 = vpack.c.b16 %v3915_v1, %v3915_v1  ;;  %v12493_v1 = vld [vmem:[#allocation5 + $0x748] sm:$0xf0]  ;;  %v12424_v6 = vor.u32 %v16155_v31, %v12421_v9  ;;  %v12771_v31 = vld [vmem:[#allocation5 + $0x970] sm:$0xf]  ;;  %v16244_v9 = vld [vmem:[#allocation5 + $0x974] sm:$0xf0] }
 0x328   :  { %4279 = vmatpush.bf16.msra.mxu0 %v12484_v30  ;;  %v12392_v30 = vor.u32 %v16147_v5, %v12389_v10  ;;  %v16189_v5 = vld [vmem:[#allocation5 + $0x7c4] sm:$0xf]  ;;  %v12557_v10 = vld [vmem:[#allocation5 + $0x7c8] sm:$0xf0]  ;;  %v12496_v24 = vor.u32 %v16173_v60, %v12493_v1 }
 0x329   :  { %4292 = vmatpush.bf16.msra.mxu1 %v12548_v20  ;;  %v12445_v20 = vld [vmem:[#allocation5 + $0x6e8] sm:$0xf0]  ;;  %v12560_v52 = vor.u32 %v16189_v5, %v12557_v10  ;;  %v12643_v5 = vld [vmem:[#allocation5 + $0x870] sm:$0xf]  ;;  %v16212_v10 = vld [vmem:[#allocation5 + $0x874] sm:$0xf0] }
 0x32a   :  { %4254 = vmatpush.bf16.msrb.mxu2 %v12348_v2  ;;  %v3922_v2 = vrot.slane %v17641_v33, 3  ;;  %v12448_v47 = vor.u32 %v16161_v11, %v12445_v20  ;;  %v12397_v1 = vld [vmem:[#allocation5 + $0x688] sm:$0xf0]  ;;  %v16222_v33 = vld [vmem:[#allocation5 + $0x8c4] sm:$0xf0] }
 0x32b   :  { %4267 = vmatpush.bf16.msrb.mxu3 %v12412_v13  ;;  %v3923_v13 = vrot.slane %v17643_v29, 3 }
 0x32c   :  { %4280 = vmatpush.bf16.msra.mxu0 %v12476_v25  ;;  %v12384_v25 = vor.u32 %v16145_v15, %v12381_v18  ;;  %v16153_v15 = vld [vmem:[#allocation5 + $0x6a4] sm:$0xf]  ;;  %v12477_v18 = vld [vmem:[#allocation5 + $0x728] sm:$0xf0] }
 0x32d   :  { %4293 = vmatpush.bf16.msra.mxu1 %v12540_v62  ;;  %v3924_v62 = vrot.slane %v17645_v58, 3  ;;  %v16236_v58 = vld [vmem:[#allocation5 + $0x934] sm:$0xf0] }
 0x32e   :  { %4255 = vmatpush.bf16.msrb.mxu2 %v12340_v56  ;;  %v12576_v56 = vor.u32 %v16193_v32, %v12573_v16  ;;  %v16135_v16 = vld [vmem:[#allocation5 + $0x614] sm:$0xf] }
 0x32f   :  { %4268 = vmatpush.bf16.msrb.mxu3 %v12404_v53  ;;  %v12504_v53 = vor.u32 %v16175_v43, %v12501_v45  ;;  %v16167_v43 = vld [vmem:[#allocation5 + $0x714] sm:$0xf]  ;;  %v12469_v45 = vld [vmem:[#allocation5 + $0x718] sm:$0xf0]  ;;  %v12344_v0 = vor.u32 %v16135_v16, %v12341_v50  ;;  %v16208_v50 = vld [vmem:[#allocation5 + $0x854] sm:$0xf0] }
 0x330   :  { %4281 = vmatpush.bf16.msra.mxu0 %v12468_v27  ;;  %v12365_v27 = vld [vmem:[#allocation5 + $0x648] sm:$0xf0]  ;;  %v12472_v60 = vor.u32 %v16167_v43, %v12469_v45  ;;  %v16240_v43 = vld [vmem:[#allocation5 + $0x954] sm:$0xf0] }
 0x331   :  { %4294 = vmatpush.bf16.msra.mxu1 %v12532_v49  ;;  %v12368_v35 = vor.u32 %v16141_v46, %v12365_v27  ;;  %v16139_v49 = vld [vmem:[#allocation5 + $0x634] sm:$0xf]  ;;  %v12333_v27 = vld [vmem:[#allocation5 + $0x608] sm:$0xf0] }
 0x332   :  { %4256 = vmatpush.bf16.msrb.mxu2 %v12332_v54  ;;  %v12485_v54 = vld [vmem:[#allocation5 + $0x738] sm:$0xf0]  ;;  %v12360_v51 = vor.u32 %v16139_v49, %v12357_v61  ;;  %v12707_v49 = vld [vmem:[#allocation5 + $0x8f0] sm:$0xf]  ;;  %v16228_v61 = vld [vmem:[#allocation5 + $0x8f4] sm:$0xf0] }
 0x333   :  { %4269 = vmatpush.bf16.msrb.mxu3 %v12396_v55  ;;  %v16187_v55 = vld [vmem:[#allocation5 + $0x7b4] sm:$0xf]  ;;  %v12488_v40 = vor.u32 %v16171_v3, %v12485_v54 }
 0x334   :  { %4282 = vmatpush.bf16.msra.mxu0 %v12460_v14  ;;  %v3264_v38 = vpop.f32.mrf.mxu0  ;;  %v12549_v14 = vld [vmem:[#allocation5 + $0x7b8] sm:$0xf0] }
 0x335   :  { %4295 = vmatpush.bf16.msra.mxu1 %v12524_v42  ;;  %4257 = vmatmul.bf16.vlgmr.msrb.gmra.mxu2 %v3921_v21  ;;  %v16169_v42 = vld [vmem:[#allocation5 + $0x724] sm:$0xf]  ;;  %v12552_v20 = vor.u32 %v16187_v55, %v12549_v14  ;;  %v12644_v14 = vor.u32 %v16212_v10, %v12643_v5  ;;  %v12739_v5 = vld [vmem:[#allocation5 + $0x930] sm:$0xf] }
 0x336   :  { %4301 = vmatpush.bf16.msra.mxu2 %v12392_v30  ;;  %4270 = vmatmul.bf16.vlgmr.msrb.gmra.mxu3 %v3922_v2  ;;  %v16137_v30 = vld [vmem:[#allocation5 + $0x624] sm:$0xf]  ;;  %v12480_v37 = vor.u32 %v16169_v42, %v12477_v18  ;;  %v12699_v42 = vld [vmem:[#allocation5 + $0x8e0] sm:$0xf] }
 0x337   :  { %4314 = vmatpush.bf16.msra.mxu3 %v12456_v19  ;;  %4283 = vmatmul.bf16.vlgmr.msra.gmra.mxu0 %v3923_v13  ;;  %v3277_v19 = vpop.f32.mrf.mxu1 }
 0x338   :  { %4327 = vmatpush.bf16.msrb.mxu0 %v12520_v17  ;;  %4296 = vmatmul.bf16.vlgmr.msra.gmra.mxu1 %v3924_v62  ;;  %v12413_v17 = vld [vmem:[#allocation5 + $0x6a8] sm:$0xf0]  ;;  %v3238_v11 = vpop.f32.mrf.mxu2 }
 0x339   :  { %4340 = vmatpush.bf16.msrb.mxu1 %v12584_v63  ;;  %v3239_v57 = vadd.f32 %v3238_v11, %v17627_v39  ;;  %v3251_v22 = vpop.f32.mrf.mxu3  ;;  %v12352_v63 = vor.u32 %v16137_v30, %v12349_v8  ;;  %v12416_v32 = vor.u32 %v16153_v15, %v12413_v17  ;;  %v12835_v30 = vld [vmem:[#allocation5 + $0x9f0] sm:$0xf]  ;;  %v12772_v8 = vor.u32 %v16244_v9, %v12771_v31  ;;  %v12635_v15 = vld [vmem:[#allocation5 + $0x860] sm:$0xf]  ;;  %v16210_v17 = vld [vmem:[#allocation5 + $0x864] sm:$0xf0] }
 0x33a   :  { %4302 = vmatpush.bf16.msra.mxu2 %v12384_v25  ;;  %v16185_v25 = vld [vmem:[#allocation5 + $0x7a4] sm:$0xf]  ;;  %v16226_v11 = vld [vmem:[#allocation5 + $0x8e4] sm:$0xf0]  ;;  %v12740_v9 = vor.u32 %v16236_v58, %v12739_v5 }
 0x33b   :  { %4315 = vmatpush.bf16.msra.mxu3 %v12448_v47  ;;  %v12541_v47 = vld [vmem:[#allocation5 + $0x7a8] sm:$0xf0]  ;;  %v3252_v28 = vadd.f32 %v3251_v22, %v3239_v57  ;;  %v16242_v57 = vld [vmem:[#allocation5 + $0x964] sm:$0xf0] }
 0x33c   :  { %4328 = vmatpush.bf16.msrb.mxu0 %v12512_v59  ;;  %v16151_v59 = vld [vmem:[#allocation5 + $0x694] sm:$0xf] }
 0x33d   :  { %4341 = vmatpush.bf16.msrb.mxu1 %v12576_v56  ;;  %v3266_v56 = vpop.f32.mrf.mxu0  ;;  %v3265_v39 = vadd.f32 %v3264_v38, %v3252_v28  ;;  %v12408_v46 = vor.u32 %v16151_v59, %v12405_v34  ;;  %v12400_v38 = vor.u32 %v16149_v12, %v12397_v1  ;;  %v12691_v59 = vld [vmem:[#allocation5 + $0x8d0] sm:$0xf]  ;;  %v16224_v34 = vld [vmem:[#allocation5 + $0x8d4] sm:$0xf0] }
 0x33e   :  { %4303 = vmatpush.bf16.msra.mxu2 %v12376_v26  ;;  %v12544_v26 = vor.u32 %v16185_v25, %v12541_v47  ;;  %v16258_v25 = vld [vmem:[#allocation5 + $0x9e4] sm:$0xf0]  ;;  %v12700_v47 = vor.u32 %v16226_v11, %v12699_v42  ;;  %v12755_v28 = vld [vmem:[#allocation5 + $0x950] sm:$0xf]  ;;  %v16204_v1 = vld [vmem:[#allocation5 + $0x834] sm:$0xf0] }
 0x33f   :  { %4316 = vmatpush.bf16.msra.mxu3 %v12440_v44  ;;  %v16183_v44 = vld [vmem:[#allocation5 + $0x794] sm:$0xf]  ;;  %v3279_v41 = vpop.f32.mrf.mxu1  ;;  %v12756_v36 = vor.u32 %v16240_v43, %v12755_v28  ;;  %v12595_v11 = vld [vmem:[#allocation5 + $0x810] sm:$0xf]  ;;  %v16198_v28 = vld [vmem:[#allocation5 + $0x804] sm:$0xf0] }
 0x340   :  { %4329 = vmatpush.bf16.msrb.mxu0 %v12504_v53  ;;  %v16133_v53 = vld [vmem:[#allocation5 + $0x604] sm:$0xf]  ;;  %v3240_v3 = vpop.f32.mrf.mxu2  ;;  %v12651_v43 = vld [vmem:[#allocation5 + $0x880] sm:$0xf] }
 0x341   :  { %4342 = vmatpush.bf16.msrb.mxu1 %v12568_v23  ;;  %v16165_v23 = vld [vmem:[#allocation5 + $0x704] sm:$0xf]  ;;  %v12336_v54 = vor.u32 %v16133_v53, %v12333_v27  ;;  %v16254_v27 = vld [vmem:[#allocation5 + $0x9c4] sm:$0xf0]  ;;  %v12603_v3 = vld [vmem:[#allocation5 + $0x820] sm:$0xf] }
 0x342   :  { %4304 = vmatpush.bf16.msra.mxu2 %v12368_v35  ;;  %v12461_v35 = vld [vmem:[#allocation5 + $0x708] sm:$0xf0] }
 0x343   :  { %4317 = vmatpush.bf16.msra.mxu3 %v12432_v4  ;;  %v17660_v4 = vadd.f32 %v3277_v19, %v3265_v39  ;;  %v12464_v55 = vor.u32 %v16165_v23, %v12461_v35  ;;  %v16260_v19 = vld [vmem:[#allocation5 + $0x9f4] sm:$0xf0]  ;;  %v16206_v39 = vld [vmem:[#allocation5 + $0x844] sm:$0xf0]  ;;  %v12675_v23 = vld [vmem:[#allocation5 + $0x8b0] sm:$0xf] }
 0x344   :  { %4330 = vmatpush.bf16.msrb.mxu0 %v12496_v24  ;;  %v12536_v24 = vor.u32 %v16183_v44, %v12533_v48  ;;  %v12836_v22 = vor.u32 %v16260_v19, %v12835_v30  ;;  %v16256_v44 = vld [vmem:[#allocation5 + $0x9d4] sm:$0xf0]  ;;  %v12692_v48 = vor.u32 %v16224_v34, %v12691_v59 }
 0x345   :  { %4343 = vmatpush.bf16.msrb.mxu1 %v12560_v52  ;;  %v16181_v52 = vld [vmem:[#allocation5 + $0x784] sm:$0xf]  ;;  %v16220_v35 = vld [vmem:[#allocation5 + $0x8b4] sm:$0xf0] }
 0x346   :  { %4305 = vmatpush.bf16.msra.mxu2 %v12360_v51  ;;  %v12525_v51 = vld [vmem:[#allocation5 + $0x788] sm:$0xf0]  ;;  %v12676_v31 = vor.u32 %v16220_v35, %v12675_v23 }
 0x347   :  { %4318 = vmatpush.bf16.msra.mxu3 %v12424_v6  ;;  %v3253_v6 = vpop.f32.mrf.mxu3  ;;  %v12528_v18 = vor.u32 %v16181_v52, %v12525_v51  ;;  %v16218_v51 = vld [vmem:[#allocation5 + $0x8a4] sm:$0xf0] }
 0x348   :  { %4331 = vmatpush.bf16.msrb.mxu0 %v12488_v40  ;;  %v12708_v40 = vor.u32 %v16228_v61, %v12707_v49  ;;  %v16252_v61 = vld [vmem:[#allocation5 + $0x9b4] sm:$0xf0]  ;;  %v12731_v6 = vld [vmem:[#allocation5 + $0x920] sm:$0xf] }
 0x349   :  { %4344 = vmatpush.bf16.msrb.mxu1 %v12552_v20  ;;  %v12763_v20 = vld [vmem:[#allocation5 + $0x960] sm:$0xf] }
 0x34a   :  { %4306 = vmatpush.bf16.msra.mxu2 %v12352_v63  ;;  %v12636_v63 = vor.u32 %v16210_v17, %v12635_v15  ;;  %v12764_v16 = vor.u32 %v16242_v57, %v12763_v20  ;;  %v12795_v15 = vld [vmem:[#allocation5 + $0x9a0] sm:$0xf]  ;;  %v16250_v17 = vld [vmem:[#allocation5 + $0x9a4] sm:$0xf0]  ;;  %v16200_v20 = vld [vmem:[#allocation5 + $0x814] sm:$0xf0] }
 0x34b   :  { %4319 = vmatpush.bf16.msra.mxu3 %v12416_v32  ;;  %v12827_v32 = vld [vmem:[#allocation5 + $0x9e0] sm:$0xf]  ;;  %v12659_v57 = vld [vmem:[#allocation5 + $0x890] sm:$0xf]  ;;  %v12596_v34 = vor.u32 %v16200_v20, %v12595_v11  ;;  %v16207_v11 = vld [vmem:[#allocation5 + $0x854] sm:$0xf] }
 0x34c   :  { %4332 = vmatpush.bf16.msrb.mxu0 %v12480_v37  ;;  %v12627_v37 = vld [vmem:[#allocation5 + $0x850] sm:$0xf]  ;;  %v12828_v45 = vor.u32 %v16258_v25, %v12827_v32  ;;  %v16232_v25 = vld [vmem:[#allocation5 + $0x914] sm:$0xf0] }
 0x34d   :  { %4345 = vmatpush.bf16.msrb.mxu1 %v12544_v26  ;;  %v12628_v56 = vor.u32 %v16208_v50, %v12627_v37  ;;  %v12819_v26 = vld [vmem:[#allocation5 + $0x9d0] sm:$0xf]  ;;  %v16248_v37 = vld [vmem:[#allocation5 + $0x994] sm:$0xf0] }
 0x34e   :  { %4307 = vmatpush.bf16.msra.mxu2 %v12344_v0  ;;  %v12683_v0 = vld [vmem:[#allocation5 + $0x8c0] sm:$0xf]  ;;  %v12820_v53 = vor.u32 %v16256_v44, %v12819_v26  ;;  %v12723_v32 = vld [vmem:[#allocation5 + $0x910] sm:$0xf] }
 0x34f   :  { %4320 = vmatpush.bf16.msra.mxu3 %v12408_v46  ;;  %v16238_v46 = vld [vmem:[#allocation5 + $0x944] sm:$0xf0]  ;;  %v12684_v12 = vor.u32 %v16222_v33, %v12683_v0  ;;  %v12724_v26 = vor.u32 %v16232_v25, %v12723_v32  ;;  %v12715_v44 = vld [vmem:[#allocation5 + $0x900] sm:$0xf]  ;;  %v16211_v0 = vld [vmem:[#allocation5 + $0x874] sm:$0xf] }
 0x350   :  { %4333 = vmatpush.bf16.msrb.mxu0 %v12472_v60  ;;  %v12611_v60 = vld [vmem:[#allocation5 + $0x830] sm:$0xf]  ;;  %v12645_v33 = vld [vmem:[#allocation5 + $0x878] sm:$0xf0]  ;;  %v16239_v25 = vld [vmem:[#allocation5 + $0x954] sm:$0xf] }
 0x351   :  { %4346 = vmatpush.bf16.msrb.mxu1 %v12536_v24  ;;  %v12612_v49 = vor.u32 %v16204_v1, %v12611_v60  ;;  %v12803_v24 = vld [vmem:[#allocation5 + $0x9b0] sm:$0xf]  ;;  %v12779_v60 = vld [vmem:[#allocation5 + $0x980] sm:$0xf]  ;;  %v16246_v1 = vld [vmem:[#allocation5 + $0x984] sm:$0xf0] }
 0x352   :  { %4308 = vmatpush.bf16.msra.mxu2 %v12336_v54  ;;  %v16202_v54 = vld [vmem:[#allocation5 + $0x824] sm:$0xf0]  ;;  %v12804_v30 = vor.u32 %v16252_v61, %v12803_v24  ;;  %v16259_v61 = vld [vmem:[#allocation5 + $0x9f4] sm:$0xf] }
 0x353   :  { %4321 = vmatpush.bf16.msra.mxu3 %v12400_v38  ;;  %v12667_v38 = vld [vmem:[#allocation5 + $0x8a0] sm:$0xf] }
 0x354   :  { %4334 = vmatpush.bf16.msrb.mxu0 %v12464_v55  ;;  %v3316_v10 = vpop.f32.mrf.mxu0  ;;  %v16234_v55 = vld [vmem:[#allocation5 + $0x924] sm:$0xf0]  ;;  %v12668_v42 = vor.u32 %v16218_v51, %v12667_v38  ;;  %v12637_v38 = vld [vmem:[#allocation5 + $0x868] sm:$0xf0] }
 0x355   :  { %4347 = vmatpush.bf16.msrb.mxu1 %v12528_v18  ;;  %4309 = vmatmul.bf16.vlgmr.msra.gmra.mxu2 %v3921_v21  ;;  %v12619_v21 = vld [vmem:[#allocation5 + $0x840] sm:$0xf]  ;;  %v3329_v52 = vpop.f32.mrf.mxu1  ;;  %v12732_v18 = vor.u32 %v16234_v55, %v12731_v6  ;;  %v12701_v51 = vld [vmem:[#allocation5 + $0x8e8] sm:$0xf0] }
 0x356   :  { %4756 = vmatpush.bf16.msrb.mxu2 %v12644_v14  ;;  %4322 = vmatmul.bf16.vlgmr.msra.gmra.mxu3 %v3922_v2  ;;  %v12747_v2 = vld [vmem:[#allocation5 + $0x940] sm:$0xf]  ;;  %v12620_v29 = vor.u32 %v16206_v39, %v12619_v21 }
 0x357   :  { %4769 = vmatpush.bf16.msrb.mxu3 %v12708_v40  ;;  %4335 = vmatmul.bf16.vlgmr.msrb.gmra.mxu0 %v3923_v13  ;;  %v12811_v13 = vld [vmem:[#allocation5 + $0x9c0] sm:$0xf]  ;;  %v12748_v41 = vor.u32 %v16238_v46, %v12747_v2  ;;  %v4356_v2 = vld [vmem:[#allocation4 + $0x10] sm:$0x11] }
 0x358   :  { %4782 = vmatpush.bf16.msra.mxu0 %v12772_v8  ;;  %4348 = vmatmul.bf16.vlgmr.msrb.gmra.mxu1 %v3924_v62  ;;  %v12812_v62 = vor.u32 %v16254_v27, %v12811_v13  ;;  %v3290_v14 = vpop.f32.mrf.mxu2  ;;  %v12604_v8 = vor.u32 %v16202_v54, %v12603_v3  ;;  %v16243_v13 = vld [vmem:[#allocation5 + $0x974] sm:$0xf]  ;;  %v12780_v54 = vor.u32 %v16246_v1, %v12779_v60  ;;  %v4427_v6 = vunpack.c.h.b16 %v4356_v2 }
 0x359   :  { %4795 = vmatpush.bf16.msra.mxu1 %v12836_v22  ;;  %v3291_v19 = vadd.f32 %v3290_v14, %v17637_v7  ;;  %v3303_v40 = vpop.f32.mrf.mxu3  ;;  %v12587_v7 = vld [vmem:[#allocation5 + $0x800] sm:$0xf] }
 0x35a   :  { %4757 = vmatpush.bf16.msrb.mxu2 %v12636_v63  ;;  %v16216_v63 = vld [vmem:[#allocation5 + $0x894] sm:$0xf0]  ;;  %v17679_v32 = vpack.c.b16 %v4427_v6, %v4427_v6 }
 0x35b   :  { %4770 = vmatpush.bf16.msrb.mxu3 %v12700_v47  ;;  %v3304_v22 = vadd.f32 %v3303_v40, %v3291_v19  ;;  %v12796_v47 = vor.u32 %v16250_v17, %v12795_v15  ;;  %v12765_v19 = vld [vmem:[#allocation5 + $0x968] sm:$0xf0] }
 0x35c   :  { %4783 = vmatpush.bf16.msra.mxu0 %v12764_v16  ;;  %v12787_v16 = vld [vmem:[#allocation5 + $0x990] sm:$0xf]  ;;  %v3318_v50 = vpop.f32.mrf.mxu0 }
 0x35d   :  { %4796 = vmatpush.bf16.msra.mxu1 %v12828_v45  ;;  %v3317_v59 = vadd.f32 %v3316_v10, %v3304_v22  ;;  %v16214_v45 = vld [vmem:[#allocation5 + $0x884] sm:$0xf0]  ;;  %v3331_v21 = vpop.f32.mrf.mxu1  ;;  %v12788_v46 = vor.u32 %v16248_v37, %v12787_v16  ;;  %v4426_v10 = vunpack.c.l.b16 %v4356_v2  ;;  %v16223_v22 = vld [vmem:[#allocation5 + $0x8d4] sm:$0xf] }
 0x35e   :  { %4758 = vmatpush.bf16.msrb.mxu2 %v12628_v56  ;;  %v12660_v56 = vor.u32 %v16216_v63, %v12659_v57  ;;  %v12652_v58 = vor.u32 %v16214_v45, %v12651_v43  ;;  %v12629_v57 = vld [vmem:[#allocation5 + $0x858] sm:$0xf0]  ;;  %v16255_v50 = vld [vmem:[#allocation5 + $0x9d4] sm:$0xf]  ;;  %v12621_v43 = vld [vmem:[#allocation5 + $0x848] sm:$0xf0] }
 0x35f   :  { %4771 = vmatpush.bf16.msrb.mxu3 %v12692_v48  ;;  %v16230_v48 = vld [vmem:[#allocation5 + $0x904] sm:$0xf0]  ;;  %v17671_v39 = vadd.f32 %v3329_v52, %v3317_v59  ;;  %v16225_v52 = vld [vmem:[#allocation5 + $0x8e4] sm:$0xf]  ;;  %v12693_v63 = vld [vmem:[#allocation5 + $0x8d8] sm:$0xf0]  ;;  %v12632_v37 = vor.u32 %v16207_v11, %v12629_v57 }
 0x360   :  { %4784 = vmatpush.bf16.msra.mxu0 %v12756_v36  ;;  %v4355_v36 = vld [vmem:[#allocation4 + $0x18] sm:$0x11]  ;;  %v3292_v27 = vpop.f32.mrf.mxu2  ;;  %v12704_v17 = vor.u32 %v16225_v52, %v12701_v51  ;;  %v16221_v45 = vld [vmem:[#allocation5 + $0x8c4] sm:$0xf]  ;;  %v16203_v2 = vld [vmem:[#allocation5 + $0x834] sm:$0xf] }
 0x361   :  { %4797 = vmatpush.bf16.msra.mxu1 %v12820_v53  ;;  %v16227_v53 = vld [vmem:[#allocation5 + $0x8f4] sm:$0xf]  ;;  %v4424_v23 = vunpack.c.l.b16 %v4355_v36  ;;  %v4425_v35 = vunpack.c.h.b16 %v4355_v36  ;;  %v3305_v5 = vpop.f32.mrf.mxu3  ;;  %v12821_v59 = vld [vmem:[#allocation5 + $0x9d8] sm:$0xf0] }
 0x362   :  { %4759 = vmatpush.bf16.msrb.mxu2 %v12620_v29  ;;  %v12709_v29 = vld [vmem:[#allocation5 + $0x8f8] sm:$0xf0]  ;;  %v16235_v27 = vld [vmem:[#allocation5 + $0x934] sm:$0xf] }
 0x363   :  { %4772 = vmatpush.bf16.msrb.mxu3 %v12684_v12  ;;  %v12588_v12 = vor.u32 %v16198_v28, %v12587_v7  ;;  %v12712_v24 = vor.u32 %v16227_v53, %v12709_v29  ;;  %v17673_v55 = vpack.c.b16 %v4424_v23, %v4424_v23  ;;  %v17675_v14 = vpack.c.b16 %v4425_v35, %v4425_v35  ;;  %v12613_v53 = vld [vmem:[#allocation5 + $0x838] sm:$0xf0]  ;;  %v16219_v29 = vld [vmem:[#allocation5 + $0x8b4] sm:$0xf] }
 0x364   :  { %4785 = vmatpush.bf16.msra.mxu0 %v12748_v41  ;;  %v12773_v41 = vld [vmem:[#allocation5 + $0x978] sm:$0xf0]  ;;  %v12696_v7 = vor.u32 %v16223_v22, %v12693_v63  ;;  %v12616_v1 = vor.u32 %v16203_v2, %v12613_v53  ;;  %v16251_v35 = vld [vmem:[#allocation5 + $0x9b4] sm:$0xf]  ;;  %v13027_v2 = vld [vmem:[#allocation5 + $0xb70] sm:$0xf] }
 0x365   :  { %4798 = vmatpush.bf16.msra.mxu1 %v12812_v62  ;;  %v12716_v62 = vor.u32 %v16230_v48, %v12715_v44  ;;  %v12776_v3 = vor.u32 %v16243_v13, %v12773_v41  ;;  %v12749_v44 = vld [vmem:[#allocation5 + $0x948] sm:$0xf0]  ;;  %v12824_v48 = vor.u32 %v16255_v50, %v12821_v59  ;;  %v12677_v13 = vld [vmem:[#allocation5 + $0x8b8] sm:$0xf0]  ;;  %v16197_v50 = vld [vmem:[#allocation5 + $0x804] sm:$0xf] }
 0x366   :  { %4760 = vmatpush.bf16.msrb.mxu2 %v12612_v49  ;;  %v12648_v49 = vor.u32 %v16211_v0, %v12645_v33  ;;  %v16253_v0 = vld [vmem:[#allocation5 + $0x9c4] sm:$0xf]  ;;  %v12813_v33 = vld [vmem:[#allocation5 + $0x9c8] sm:$0xf0]  ;;  %v12680_v23 = vor.u32 %v16219_v29, %v12677_v13  ;;  %v12805_v5 = vld [vmem:[#allocation5 + $0x9b8] sm:$0xf0] }
 0x367   :  { %4773 = vmatpush.bf16.msrb.mxu3 %v12676_v31  ;;  %v12837_v31 = vld [vmem:[#allocation5 + $0x9f8] sm:$0xf0]  ;;  %v12816_v60 = vor.u32 %v16253_v0, %v12813_v33  ;;  %v12589_v59 = vld [vmem:[#allocation5 + $0x808] sm:$0xf0]  ;;  %v16292_v33 = vld [vmem:[#allocation5 + $0xaf4] sm:$0xf0] }
 0x368   :  { %4786 = vmatpush.bf16.msra.mxu0 %v12740_v9  ;;  %v16209_v9 = vld [vmem:[#allocation5 + $0x864] sm:$0xf]  ;;  %v12840_v40 = vor.u32 %v16259_v61, %v12837_v31  ;;  %v12669_v61 = vld [vmem:[#allocation5 + $0x8a8] sm:$0xf0]  ;;  %v12725_v57 = vld [vmem:[#allocation5 + $0x918] sm:$0xf0]  ;;  %v12592_v13 = vor.u32 %v16197_v50, %v12589_v59 }
 0x369   :  { %4799 = vmatpush.bf16.msra.mxu1 %v12804_v30  ;;  %v16241_v30 = vld [vmem:[#allocation5 + $0x964] sm:$0xf]  ;;  %v12640_v15 = vor.u32 %v16209_v9, %v12637_v38  ;;  %v12733_v9 = vld [vmem:[#allocation5 + $0x928] sm:$0xf0]  ;;  %v12808_v38 = vor.u32 %v16251_v35, %v12805_v5  ;;  %v13067_v50 = vld [vmem:[#allocation5 + $0xbc0] sm:$0xf] }
 0x36a   :  { %4761 = vmatpush.bf16.msrb.mxu2 %v12604_v8  ;;  %v17677_v8 = vpack.c.b16 %v4426_v10, %v4426_v10  ;;  %v12768_v20 = vor.u32 %v16241_v30, %v12765_v19  ;;  %v16233_v31 = vld [vmem:[#allocation5 + $0x924] sm:$0xf]  ;;  %v12797_v19 = vld [vmem:[#allocation5 + $0x9a8] sm:$0xf0] }
 0x36b   :  { %4774 = vmatpush.bf16.msrb.mxu3 %v12668_v42  ;;  %v16257_v42 = vld [vmem:[#allocation5 + $0x9e4] sm:$0xf] }
 0x36c   :  { %4787 = vmatpush.bf16.msra.mxu0 %v12732_v18  ;;  %v12829_v18 = vld [vmem:[#allocation5 + $0x9e8] sm:$0xf0]  ;;  %v16249_v30 = vld [vmem:[#allocation5 + $0x9a4] sm:$0xf] }
 0x36d   :  { %4800 = vmatpush.bf16.msra.mxu1 %v12796_v47  ;;  %v12757_v47 = vld [vmem:[#allocation5 + $0x958] sm:$0xf0]  ;;  %v12832_v16 = vor.u32 %v16257_v42, %v12829_v18  ;;  %v16215_v42 = vld [vmem:[#allocation5 + $0x894] sm:$0xf]  ;;  %v12800_v63 = vor.u32 %v16249_v30, %v12797_v19  ;;  %v16272_v30 = vld [vmem:[#allocation5 + $0xa54] sm:$0xf0] }
 0x36e   :  { %4762 = vmatpush.bf16.msrb.mxu2 %v12596_v34  ;;  %v16205_v34 = vld [vmem:[#allocation5 + $0x844] sm:$0xf]  ;;  %v12760_v28 = vor.u32 %v16239_v25, %v12757_v47  ;;  %v12661_v18 = vld [vmem:[#allocation5 + $0x898] sm:$0xf0]  ;;  %v16247_v25 = vld [vmem:[#allocation5 + $0x994] sm:$0xf] }
 0x36f   :  { %4775 = vmatpush.bf16.msrb.mxu3 %v12660_v56  ;;  %v12685_v56 = vld [vmem:[#allocation5 + $0x8c8] sm:$0xf0]  ;;  %v12624_v36 = vor.u32 %v16205_v34, %v12621_v43  ;;  %v12789_v47 = vld [vmem:[#allocation5 + $0x998] sm:$0xf0]  ;;  %v16213_v34 = vld [vmem:[#allocation5 + $0x884] sm:$0xf] }
 0x370   :  { %4788 = vmatpush.bf16.msra.mxu0 %v12724_v26  ;;  %v16237_v26 = vld [vmem:[#allocation5 + $0x944] sm:$0xf]  ;;  %v12688_v21 = vor.u32 %v16221_v45, %v12685_v56  ;;  %v12653_v45 = vld [vmem:[#allocation5 + $0x888] sm:$0xf0]  ;;  %v12792_v0 = vor.u32 %v16247_v25, %v12789_v47  ;;  %v12947_v19 = vld [vmem:[#allocation5 + $0xad0] sm:$0xf] }
 0x371   :  { %4801 = vmatpush.bf16.msra.mxu1 %v12788_v46  ;;  %v12752_v46 = vor.u32 %v16237_v26, %v12749_v44  ;;  %v16229_v56 = vld [vmem:[#allocation5 + $0x904] sm:$0xf]  ;;  %v12717_v26 = vld [vmem:[#allocation5 + $0x908] sm:$0xf0]  ;;  %v16270_v25 = vld [vmem:[#allocation5 + $0xa44] sm:$0xf0] }
 0x372   :  { %4763 = vmatpush.bf16.msrb.mxu2 %v12588_v12  ;;  %v12741_v12 = vld [vmem:[#allocation5 + $0x938] sm:$0xf0]  ;;  %v16286_v47 = vld [vmem:[#allocation5 + $0xac4] sm:$0xf0] }
 0x373   :  { %4776 = vmatpush.bf16.msrb.mxu3 %v12652_v58  ;;  %v16201_v58 = vld [vmem:[#allocation5 + $0x824] sm:$0xf]  ;;  %v12744_v10 = vor.u32 %v16235_v27, %v12741_v12  ;;  %v12656_v27 = vor.u32 %v16213_v34, %v12653_v45  ;;  %v12931_v45 = vld [vmem:[#allocation5 + $0xab0] sm:$0xf] }
 0x374   :  { %4789 = vmatpush.bf16.msra.mxu0 %v12716_v62  ;;  %v3773_v41 = vpop.f32.mrf.mxu0  ;;  %v16245_v12 = vld [vmem:[#allocation5 + $0x984] sm:$0xf] }
 0x375   :  { %4802 = vmatpush.bf16.msra.mxu1 %v12780_v54  ;;  %4764 = vmatmul.bf16.vlgmr.msrb.gmra.mxu2 %v17673_v55  ;;  %v3786_v62 = vpop.f32.mrf.mxu1 }
 0x376   :  { %4808 = vmatpush.bf16.msra.mxu2 %v12648_v49  ;;  %4777 = vmatmul.bf16.vlgmr.msrb.gmra.mxu3 %v17675_v14  ;;  %v12605_v49 = vld [vmem:[#allocation5 + $0x828] sm:$0xf0] }
 0x377   :  { %4821 = vmatpush.bf16.msra.mxu3 %v12712_v24  ;;  %4790 = vmatmul.bf16.vlgmr.msra.gmra.mxu0 %v17677_v8  ;;  %v16217_v24 = vld [vmem:[#allocation5 + $0x8a4] sm:$0xf]  ;;  %v12608_v51 = vor.u32 %v16201_v58, %v12605_v49  ;;  %v12891_v58 = vld [vmem:[#allocation5 + $0xa60] sm:$0xf] }
 0x378   :  { %4834 = vmatpush.bf16.msrb.mxu0 %v12776_v3  ;;  %4803 = vmatmul.bf16.vlgmr.msra.gmra.mxu1 %v17679_v32  ;;  %v3747_v3 = vpop.f32.mrf.mxu2  ;;  %v12672_v6 = vor.u32 %v16217_v24, %v12669_v61  ;;  %v16290_v24 = vld [vmem:[#allocation5 + $0xae4] sm:$0xf0]  ;;  %v13019_v61 = vld [vmem:[#allocation5 + $0xb60] sm:$0xf] }
 0x379   :  { %4847 = vmatpush.bf16.msrb.mxu1 %v12840_v40  ;;  %v3760_v54 = vpop.f32.mrf.mxu3  ;;  %v16199_v40 = vld [vmem:[#allocation5 + $0x814] sm:$0xf] }
 0x37a   :  { %4809 = vmatpush.bf16.msra.mxu2 %v12640_v15  ;;  %v3761_v52 = vadd.f32 %v3760_v54, %v3747_v3  ;;  %v12736_v15 = vor.u32 %v16233_v31, %v12733_v9  ;;  %v16306_v31 = vld [vmem:[#allocation5 + $0xb64] sm:$0xf0]  ;;  %v13083_v54 = vld [vmem:[#allocation5 + $0xbe0] sm:$0xf] }
 0x37b   :  { %4822 = vmatpush.bf16.msra.mxu3 %v12704_v17  ;;  %v12597_v17 = vld [vmem:[#allocation5 + $0x818] sm:$0xf0] }
 0x37c   :  { %4835 = vmatpush.bf16.msrb.mxu0 %v12768_v20  ;;  %v3774_v11 = vadd.f32 %v3773_v41, %v3761_v52  ;;  %v16231_v20 = vld [vmem:[#allocation5 + $0x914] sm:$0xf]  ;;  %v3775_v22 = vpop.f32.mrf.mxu0  ;;  %v12781_v41 = vld [vmem:[#allocation5 + $0x988] sm:$0xf0] }
 0x37d   :  { %4848 = vmatpush.bf16.msrb.mxu1 %v12832_v16  ;;  %v12728_v43 = vor.u32 %v16231_v20, %v12725_v57  ;;  %v12784_v49 = vor.u32 %v16245_v12, %v12781_v41  ;;  %v16320_v20 = vld [vmem:[#allocation5 + $0xbd4] sm:$0xf0]  ;;  %v16282_v12 = vld [vmem:[#allocation5 + $0xaa4] sm:$0xf0]  ;;  %v12987_v41 = vld [vmem:[#allocation5 + $0xb20] sm:$0xf] }
 0x37e   :  { %4810 = vmatpush.bf16.msra.mxu2 %v12632_v37  ;;  %v3787_v16 = vadd.f32 %v3786_v62, %v3774_v11  ;;  %v12600_v37 = vor.u32 %v16199_v40, %v12597_v17  ;;  %v16274_v62 = vld [vmem:[#allocation5 + $0xa64] sm:$0xf0]  ;;  %v16288_v40 = vld [vmem:[#allocation5 + $0xad4] sm:$0xf0]  ;;  %v13075_v11 = vld [vmem:[#allocation5 + $0xbd0] sm:$0xf] }
 0x37f   :  { %4823 = vmatpush.bf16.msra.mxu3 %v12696_v7  ;;  %v12664_v7 = vor.u32 %v16215_v42, %v12661_v18  ;;  %v12892_v3 = vor.u32 %v16274_v62, %v12891_v58  ;;  %v16304_v17 = vld [vmem:[#allocation5 + $0xb54] sm:$0xf0]  ;;  %v12948_v57 = vor.u32 %v16288_v40, %v12947_v19  ;;  %v16314_v58 = vld [vmem:[#allocation5 + $0xba4] sm:$0xf0]  ;;  %v12851_v62 = vld [vmem:[#allocation5 + $0xa10] sm:$0xf] }
 0x380   :  { %4836 = vmatpush.bf16.msrb.mxu0 %v12760_v28  ;;  %v3788_v28 = vpop.f32.mrf.mxu1  ;;  %v17686_v44 = vadd.f32 %v3787_v16, %v17660_v4  ;;  %v3749_v53 = vpop.f32.mrf.mxu2  ;;  %v13003_v16 = vld [vmem:[#allocation5 + $0xb40] sm:$0xf] }
 0x381   :  { %4849 = vmatpush.bf16.msrb.mxu1 %v12824_v48  ;;  %v12899_v48 = vld [vmem:[#allocation5 + $0xa70] sm:$0xf]  ;;  %v3762_v29 = vpop.f32.mrf.mxu3  ;;  %v12859_v53 = vld [vmem:[#allocation5 + $0xa20] sm:$0xf] }
 0x382   :  { %4811 = vmatpush.bf16.msra.mxu2 %v12624_v36  ;;  %v16276_v36 = vld [vmem:[#allocation5 + $0xa74] sm:$0xf0]  ;;  %v12867_v28 = vld [vmem:[#allocation5 + $0xa30] sm:$0xf]  ;;  %v16266_v29 = vld [vmem:[#allocation5 + $0xa24] sm:$0xf0] }
 0x383   :  { %4824 = vmatpush.bf16.msra.mxu3 %v12688_v21  ;;  %v12963_v21 = vld [vmem:[#allocation5 + $0xaf0] sm:$0xf]  ;;  %v12900_v4 = vor.u32 %v16276_v36, %v12899_v48  ;;  %v16300_v48 = vld [vmem:[#allocation5 + $0xb34] sm:$0xf0] }
 0x384   :  { %4837 = vmatpush.bf16.msrb.mxu0 %v12752_v46  ;;  %v16308_v46 = vld [vmem:[#allocation5 + $0xb74] sm:$0xf0]  ;;  %v12964_v35 = vor.u32 %v16292_v33, %v12963_v21 }
 0x385   :  { %4850 = vmatpush.bf16.msrb.mxu1 %v12816_v60  ;;  %v12720_v60 = vor.u32 %v16229_v56, %v12717_v26  ;;  %v13028_v5 = vor.u32 %v16308_v46, %v13027_v2  ;;  %v16284_v56 = vld [vmem:[#allocation5 + $0xab4] sm:$0xf0]  ;;  %v12995_v26 = vld [vmem:[#allocation5 + $0xb30] sm:$0xf] }
 0x386   :  { %4812 = vmatpush.bf16.msra.mxu2 %v12616_v1  ;;  %v13091_v1 = vld [vmem:[#allocation5 + $0xbf0] sm:$0xf]  ;;  %v16316_v33 = vld [vmem:[#allocation5 + $0xbb4] sm:$0xf0]  ;;  %v12932_v2 = vor.u32 %v16284_v56, %v12931_v45  ;;  %v12996_v46 = vor.u32 %v16300_v48, %v12995_v26  ;;  %v13029_v26 = vld [vmem:[#allocation5 + $0xb78] sm:$0xf0] }
 0x387   :  { %4825 = vmatpush.bf16.msra.mxu3 %v12680_v23  ;;  %v16324_v23 = vld [vmem:[#allocation5 + $0xbf4] sm:$0xf0]  ;;  %v13035_v48 = vld [vmem:[#allocation5 + $0xb80] sm:$0xf] }
 0x388   :  { %4838 = vmatpush.bf16.msrb.mxu0 %v12744_v10  ;;  %v12955_v10 = vld [vmem:[#allocation5 + $0xae0] sm:$0xf]  ;;  %v13092_v9 = vor.u32 %v16324_v23, %v13091_v1 }
 0x389   :  { %4851 = vmatpush.bf16.msrb.mxu1 %v12808_v38  ;;  %v16322_v38 = vld [vmem:[#allocation5 + $0xbe4] sm:$0xf0]  ;;  %v12956_v52 = vor.u32 %v16290_v24, %v12955_v10  ;;  %v13051_v23 = vld [vmem:[#allocation5 + $0xba0] sm:$0xf]  ;;  %v16264_v10 = vld [vmem:[#allocation5 + $0xa14] sm:$0xf0] }
 0x38a   :  { %4813 = vmatpush.bf16.msra.mxu2 %v12608_v51  ;;  %v13020_v51 = vor.u32 %v16306_v31, %v13019_v61  ;;  %v13084_v42 = vor.u32 %v16322_v38, %v13083_v54  ;;  %v12915_v31 = vld [vmem:[#allocation5 + $0xa90] sm:$0xf]  ;;  %v16296_v38 = vld [vmem:[#allocation5 + $0xb14] sm:$0xf0]  ;;  %v12852_v40 = vor.u32 %v16264_v10, %v12851_v62  ;;  %v13021_v62 = vld [vmem:[#allocation5 + $0xb68] sm:$0xf0] }
 0x38b   :  { %4826 = vmatpush.bf16.msra.mxu3 %v12672_v6  ;;  %v12883_v6 = vld [vmem:[#allocation5 + $0xa50] sm:$0xf] }
 0x38c   :  { %4839 = vmatpush.bf16.msrb.mxu0 %v12736_v15  ;;  %v13011_v15 = vld [vmem:[#allocation5 + $0xb50] sm:$0xf]  ;;  %v12884_v18 = vor.u32 %v16272_v30, %v12883_v6  ;;  %v13052_v6 = vor.u32 %v16314_v58, %v13051_v23  ;;  %v16305_v58 = vld [vmem:[#allocation5 + $0xb64] sm:$0xf] }
 0x38d   :  { %4852 = vmatpush.bf16.msrb.mxu1 %v12800_v63  ;;  %v13012_v22 = vor.u32 %v16304_v17, %v13011_v15  ;;  %v12875_v63 = vld [vmem:[#allocation5 + $0xa40] sm:$0xf]  ;;  %v12979_v54 = vld [vmem:[#allocation5 + $0xb10] sm:$0xf]  ;;  %v16312_v15 = vld [vmem:[#allocation5 + $0xb94] sm:$0xf0] }
 0x38e   :  { %4814 = vmatpush.bf16.msra.mxu2 %v12600_v37  ;;  %v13076_v37 = vor.u32 %v16320_v20, %v13075_v11  ;;  %v13043_v30 = vld [vmem:[#allocation5 + $0xb90] sm:$0xf]  ;;  %v12843_v17 = vld [vmem:[#allocation5 + $0xa00] sm:$0xf] }
 0x38f   :  { %4827 = vmatpush.bf16.msra.mxu3 %v12664_v7  ;;  %v12876_v7 = vor.u32 %v16270_v25, %v12875_v63  ;;  %v12907_v63 = vld [vmem:[#allocation5 + $0xa80] sm:$0xf]  ;;  %v16278_v25 = vld [vmem:[#allocation5 + $0xa84] sm:$0xf0] }
 0x390   :  { %4840 = vmatpush.bf16.msrb.mxu0 %v12728_v43  ;;  %v16268_v43 = vld [vmem:[#allocation5 + $0xa34] sm:$0xf0] }
 0x391   :  { %4853 = vmatpush.bf16.msrb.mxu1 %v12792_v0  ;;  %v12868_v21 = vor.u32 %v16268_v43, %v12867_v28  ;;  %v13059_v0 = vld [vmem:[#allocation5 + $0xbb0] sm:$0xf]  ;;  %v16307_v28 = vld [vmem:[#allocation5 + $0xb74] sm:$0xf] }
 0x392   :  { %4815 = vmatpush.bf16.msra.mxu2 %v12592_v13  ;;  %v12923_v13 = vld [vmem:[#allocation5 + $0xaa0] sm:$0xf]  ;;  %v13060_v1 = vor.u32 %v16316_v33, %v13059_v0 }
 0x393   :  { %4828 = vmatpush.bf16.msra.mxu3 %v12656_v27  ;;  %v12924_v24 = vor.u32 %v16282_v12, %v12923_v13  ;;  %v13093_v13 = vld [vmem:[#allocation5 + $0xbf8] sm:$0xf0]  ;;  %v13032_v12 = vor.u32 %v16307_v28, %v13029_v26  ;;  %v16283_v28 = vld [vmem:[#allocation5 + $0xab4] sm:$0xf] }
 0x394   :  { %4841 = vmatpush.bf16.msrb.mxu0 %v12720_v60  ;;  %v3825_v36 = vpop.f32.mrf.mxu0  ;;  %v16298_v60 = vld [vmem:[#allocation5 + $0xb24] sm:$0xf0] }
 0x395   :  { %4854 = vmatpush.bf16.msrb.mxu1 %v12784_v49  ;;  %4816 = vmatmul.bf16.vlgmr.msra.gmra.mxu2 %v17673_v55  ;;  %v12939_v55 = vld [vmem:[#allocation5 + $0xac0] sm:$0xf]  ;;  %v3838_v27 = vpop.f32.mrf.mxu1  ;;  %v12988_v61 = vor.u32 %v16298_v60, %v12987_v41  ;;  %v12893_v60 = vld [vmem:[#allocation5 + $0xa68] sm:$0xf0] }
 0x396   :  { %5267 = vmatpush.bf16.msrb.mxu2 %v12900_v4  ;;  %4829 = vmatmul.bf16.vlgmr.msra.gmra.mxu3 %v17675_v14  ;;  %v16302_v14 = vld [vmem:[#allocation5 + $0xb44] sm:$0xf0]  ;;  %v12940_v59 = vor.u32 %v16286_v47, %v12939_v55  ;;  %v12971_v55 = vld [vmem:[#allocation5 + $0xb00] sm:$0xf] }
 0x397   :  { %5280 = vmatpush.bf16.msrb.mxu3 %v12964_v35  ;;  %4842 = vmatmul.bf16.vlgmr.msrb.gmra.mxu0 %v17677_v8  ;;  %v16318_v8 = vld [vmem:[#allocation5 + $0xbc4] sm:$0xf0]  ;;  %v13004_v34 = vor.u32 %v16302_v14, %v13003_v16 }
 0x398   :  { %5293 = vmatpush.bf16.msra.mxu0 %v13028_v5  ;;  %4855 = vmatmul.bf16.vlgmr.msrb.gmra.mxu1 %v17679_v32  ;;  %v13068_v32 = vor.u32 %v16318_v8, %v13067_v50  ;;  %v3799_v4 = vpop.f32.mrf.mxu2  ;;  %v12860_v5 = vor.u32 %v16266_v29, %v12859_v53  ;;  %v16294_v14 = vld [vmem:[#allocation5 + $0xb04] sm:$0xf0]  ;;  %v13044_v8 = vor.u32 %v16312_v15, %v13043_v30  ;;  %v16323_v29 = vld [vmem:[#allocation5 + $0xbf4] sm:$0xf] }
 0x399   :  { %5306 = vmatpush.bf16.msra.mxu1 %v13092_v9  ;;  %v3812_v35 = vpop.f32.mrf.mxu3  ;;  %v16280_v9 = vld [vmem:[#allocation5 + $0xa94] sm:$0xf0]  ;;  %v12972_v33 = vor.u32 %v16294_v14, %v12971_v55  ;;  %v13096_v10 = vor.u32 %v16323_v29, %v13093_v13  ;;  %v16303_v30 = vld [vmem:[#allocation5 + $0xb54] sm:$0xf]  ;;  %v13005_v55 = vld [vmem:[#allocation5 + $0xb48] sm:$0xf0] }
 0x39a   :  { %5268 = vmatpush.bf16.msrb.mxu2 %v12892_v3  ;;  %v3813_v49 = vadd.f32 %v3812_v35, %v3799_v4  ;;  %v4862_v3 = vld [vmem:[#allocation4 + $0x18] sm:$0x22]  ;;  %v16289_v4 = vld [vmem:[#allocation5 + $0xae4] sm:$0xf]  ;;  %v12861_v13 = vld [vmem:[#allocation5 + $0xa28] sm:$0xf0] }
 0x39b   :  { %5281 = vmatpush.bf16.msrb.mxu3 %v12956_v52  ;;  %v4863_v52 = vld [vmem:[#allocation4 + $0x10] sm:$0x22]  ;;  %v4932_v11 = vunpack.c.h.b16 %v4862_v3 }
 0x39c   :  { %5294 = vmatpush.bf16.msra.mxu0 %v13020_v51  ;;  %v3826_v51 = vadd.f32 %v3825_v36, %v3813_v49  ;;  %v3827_v19 = vpop.f32.mrf.mxu0  ;;  %v4933_v47 = vunpack.c.l.b16 %v4863_v52  ;;  %v4934_v45 = vunpack.c.h.b16 %v4863_v52  ;;  %v16321_v49 = vld [vmem:[#allocation5 + $0xbe4] sm:$0xf]  ;;  %v16287_v52 = vld [vmem:[#allocation5 + $0xad4] sm:$0xf] }
 0x39d   :  { %5307 = vmatpush.bf16.msra.mxu1 %v13084_v42  ;;  %v16262_v42 = vld [vmem:[#allocation5 + $0xa04] sm:$0xf0]  ;;  %v3840_v16 = vpop.f32.mrf.mxu1  ;;  %v13013_v19 = vld [vmem:[#allocation5 + $0xb58] sm:$0xf0] }
 0x39e   :  { %5269 = vmatpush.bf16.msrb.mxu2 %v12884_v18  ;;  %v4931_v18 = vunpack.c.l.b16 %v4862_v3  ;;  %v3839_v20 = vadd.f32 %v3838_v27, %v3826_v51  ;;  %v12844_v56 = vor.u32 %v16262_v42, %v12843_v17  ;;  %v16273_v27 = vld [vmem:[#allocation5 + $0xa64] sm:$0xf]  ;;  %v17701_v23 = vpack.c.b16 %v4934_v45, %v4934_v45  ;;  %v16271_v3 = vld [vmem:[#allocation5 + $0xa54] sm:$0xf]  ;;  %v12949_v51 = vld [vmem:[#allocation5 + $0xad8] sm:$0xf0] }
 0x39f   :  { %5282 = vmatpush.bf16.msrb.mxu3 %v12948_v57  ;;  %v12916_v57 = vor.u32 %v16280_v9, %v12915_v31  ;;  %v13085_v9 = vld [vmem:[#allocation5 + $0xbe8] sm:$0xf0]  ;;  %v12952_v17 = vor.u32 %v16287_v52, %v12949_v51  ;;  %v16319_v42 = vld [vmem:[#allocation5 + $0xbd4] sm:$0xf]  ;;  %v12917_v52 = vld [vmem:[#allocation5 + $0xa98] sm:$0xf0] }
 0x3a0   :  { %5295 = vmatpush.bf16.msra.mxu0 %v13012_v22  ;;  %v12980_v22 = vor.u32 %v16296_v38, %v12979_v54  ;;  %v17693_v50 = vadd.f32 %v3839_v20, %v17671_v39  ;;  %v3801_v43 = vpop.f32.mrf.mxu2  ;;  %v17695_v36 = vpack.c.b16 %v4931_v18, %v4931_v18  ;;  %v12908_v39 = vor.u32 %v16278_v25, %v12907_v63  ;;  %v12885_v54 = vld [vmem:[#allocation5 + $0xa58] sm:$0xf0]  ;;  %v12941_v63 = vld [vmem:[#allocation5 + $0xac8] sm:$0xf0]  ;;  %v16301_v25 = vld [vmem:[#allocation5 + $0xb44] sm:$0xf] }
 0x3a1   :  { %5308 = vmatpush.bf16.msra.mxu1 %v13076_v37  ;;  %v16275_v37 = vld [vmem:[#allocation5 + $0xa74] sm:$0xf]  ;;  %v3814_v0 = vpop.f32.mrf.mxu3  ;;  %v13024_v38 = vor.u32 %v16305_v58, %v13021_v62  ;;  %v12888_v15 = vor.u32 %v16271_v3, %v12885_v54  ;;  %v13077_v18 = vld [vmem:[#allocation5 + $0xbd8] sm:$0xf0]  ;;  %v13016_v20 = vor.u32 %v16303_v30, %v13013_v19 }
 0x3a2   :  { %5270 = vmatpush.bf16.msrb.mxu2 %v12876_v7  ;;  %v12901_v7 = vld [vmem:[#allocation5 + $0xa78] sm:$0xf0]  ;;  %v4939_v35 = vrot.slane %v17695_v36, 1  ;;  %v16299_v45 = vld [vmem:[#allocation5 + $0xb34] sm:$0xf] }
 0x3a3   :  { %5283 = vmatpush.bf16.msrb.mxu3 %v12940_v59  ;;  %v16291_v59 = vld [vmem:[#allocation5 + $0xaf4] sm:$0xf]  ;;  %v12933_v43 = vld [vmem:[#allocation5 + $0xab8] sm:$0xf0] }
 0x3a4   :  { %5296 = vmatpush.bf16.msra.mxu0 %v13004_v34  ;;  %v12965_v34 = vld [vmem:[#allocation5 + $0xaf8] sm:$0xf0]  ;;  %v12936_v0 = vor.u32 %v16283_v28, %v12933_v43  ;;  %v16295_v30 = vld [vmem:[#allocation5 + $0xb14] sm:$0xf]  ;;  %v16356_v28 = vld [vmem:[#allocation5 + $0xcf4] sm:$0xf0] }
 0x3a5   :  { %5309 = vmatpush.bf16.msra.mxu1 %v13068_v32  ;;  %v16310_v32 = vld [vmem:[#allocation5 + $0xb84] sm:$0xf0]  ;;  %v12968_v53 = vor.u32 %v16291_v59, %v12965_v34  ;;  %v13008_v59 = vor.u32 %v16301_v25, %v13005_v55  ;;  %v12869_v34 = vld [vmem:[#allocation5 + $0xa38] sm:$0xf0]  ;;  %v13283_v43 = vld [vmem:[#allocation5 + $0xd70] sm:$0xf] }
 0x3a6   :  { %5271 = vmatpush.bf16.msrb.mxu2 %v12868_v21  ;;  %v17697_v21 = vpack.c.b16 %v4932_v11, %v4932_v11  ;;  %v13036_v41 = vor.u32 %v16310_v32, %v13035_v48  ;;  %v16269_v11 = vld [vmem:[#allocation5 + $0xa44] sm:$0xf]  ;;  %v12853_v54 = vld [vmem:[#allocation5 + $0xa18] sm:$0xf0] }
 0x3a7   :  { %5284 = vmatpush.bf16.msrb.mxu3 %v12932_v2  ;;  %v17699_v2 = vpack.c.b16 %v4933_v47, %v4933_v47  ;;  %v13080_v47 = vor.u32 %v16319_v42, %v13077_v18  ;;  %v12981_v19 = vld [vmem:[#allocation5 + $0xb18] sm:$0xf0] }
 0x3a8   :  { %5297 = vmatpush.bf16.msra.mxu0 %v12996_v46  ;;  %v12904_v46 = vor.u32 %v16275_v37, %v12901_v7  ;;  %v16317_v37 = vld [vmem:[#allocation5 + $0xbc4] sm:$0xf]  ;;  %v13069_v7 = vld [vmem:[#allocation5 + $0xbc8] sm:$0xf0]  ;;  %v13045_v42 = vld [vmem:[#allocation5 + $0xb98] sm:$0xf0]  ;;  %v12984_v55 = vor.u32 %v16295_v30, %v12981_v19 }
 0x3a9   :  { %5310 = vmatpush.bf16.msra.mxu1 %v13060_v1  ;;  %v12957_v1 = vld [vmem:[#allocation5 + $0xae8] sm:$0xf0]  ;;  %v13072_v48 = vor.u32 %v16317_v37, %v13069_v7  ;;  %v13155_v7 = vld [vmem:[#allocation5 + $0xc70] sm:$0xf]  ;;  %v16368_v30 = vld [vmem:[#allocation5 + $0xd54] sm:$0xf0] }
 0x3aa   :  { %5272 = vmatpush.bf16.msrb.mxu2 %v12860_v5  ;;  %v4940_v5 = vrot.slane %v17697_v21, 1  ;;  %v12960_v31 = vor.u32 %v16289_v4, %v12957_v1  ;;  %v16350_v21 = vld [vmem:[#allocation5 + $0xcc4] sm:$0xf0] }
 0x3ab   :  { %5285 = vmatpush.bf16.msrb.mxu3 %v12924_v24  ;;  %v4941_v24 = vrot.slane %v17699_v2, 1 }
 0x3ac   :  { %5298 = vmatpush.bf16.msra.mxu0 %v12988_v61  ;;  %v12896_v61 = vor.u32 %v16273_v27, %v12893_v60  ;;  %v16281_v27 = vld [vmem:[#allocation5 + $0xaa4] sm:$0xf]  ;;  %v12989_v60 = vld [vmem:[#allocation5 + $0xb28] sm:$0xf0] }
 0x3ad   :  { %5311 = vmatpush.bf16.msra.mxu1 %v13052_v6  ;;  %v4942_v6 = vrot.slane %v17701_v23, 1  ;;  %v16364_v23 = vld [vmem:[#allocation5 + $0xd34] sm:$0xf0] }
 0x3ae   :  { %5273 = vmatpush.bf16.msrb.mxu2 %v12852_v40  ;;  %v13088_v40 = vor.u32 %v16321_v49, %v13085_v9  ;;  %v16263_v9 = vld [vmem:[#allocation5 + $0xa14] sm:$0xf] }
 0x3af   :  { %5286 = vmatpush.bf16.msrb.mxu3 %v12916_v57  ;;  %v12877_v57 = vld [vmem:[#allocation5 + $0xa48] sm:$0xf0] }
 0x3b0   :  { %5299 = vmatpush.bf16.msra.mxu0 %v12980_v22  ;;  %v16285_v22 = vld [vmem:[#allocation5 + $0xac4] sm:$0xf]  ;;  %v12880_v16 = vor.u32 %v16269_v11, %v12877_v57  ;;  %v12856_v11 = vor.u32 %v16263_v9, %v12853_v54  ;;  %v16336_v54 = vld [vmem:[#allocation5 + $0xc54] sm:$0xf0] }
 0x3b1   :  { %5312 = vmatpush.bf16.msra.mxu1 %v13044_v8  ;;  %v12944_v14 = vor.u32 %v16285_v22, %v12941_v63  ;;  %v16267_v8 = vld [vmem:[#allocation5 + $0xa34] sm:$0xf]  ;;  %v16261_v57 = vld [vmem:[#allocation5 + $0xa04] sm:$0xf]  ;;  %v12845_v22 = vld [vmem:[#allocation5 + $0xa08] sm:$0xf0] }
 0x3b2   :  { %5274 = vmatpush.bf16.msrb.mxu2 %v12844_v56  ;;  %v12997_v56 = vld [vmem:[#allocation5 + $0xb38] sm:$0xf0]  ;;  %v12872_v32 = vor.u32 %v16267_v8, %v12869_v34  ;;  %v16277_v63 = vld [vmem:[#allocation5 + $0xa84] sm:$0xf]  ;;  %v16340_v8 = vld [vmem:[#allocation5 + $0xc74] sm:$0xf0] }
 0x3b3   :  { %5287 = vmatpush.bf16.msrb.mxu3 %v12908_v39  ;;  %v16315_v39 = vld [vmem:[#allocation5 + $0xbb4] sm:$0xf]  ;;  %v13000_v29 = vor.u32 %v16299_v45, %v12997_v56  ;;  %v16372_v45 = vld [vmem:[#allocation5 + $0xd74] sm:$0xf0] }
 0x3b4   :  { %5300 = vmatpush.bf16.msra.mxu0 %v12972_v33  ;;  %v4284_v26 = vpop.f32.mrf.mxu0  ;;  %v13061_v33 = vld [vmem:[#allocation5 + $0xbb8] sm:$0xf0] }
 0x3b5   :  { %5313 = vmatpush.bf16.msra.mxu1 %v13036_v41  ;;  %5275 = vmatmul.bf16.vlgmr.msrb.gmra.mxu2 %v4939_v35  ;;  %v16297_v41 = vld [vmem:[#allocation5 + $0xb24] sm:$0xf]  ;;  %v13064_v58 = vor.u32 %v16315_v39, %v13061_v33  ;;  %v13037_v39 = vld [vmem:[#allocation5 + $0xb88] sm:$0xf0] }
 0x3b6   :  { %5319 = vmatpush.bf16.msra.mxu2 %v12904_v46  ;;  %5288 = vmatmul.bf16.vlgmr.msrb.gmra.mxu3 %v4940_v5  ;;  %v16265_v46 = vld [vmem:[#allocation5 + $0xa24] sm:$0xf]  ;;  %v12992_v3 = vor.u32 %v16297_v41, %v12989_v60  ;;  %v13211_v41 = vld [vmem:[#allocation5 + $0xce0] sm:$0xf] }
 0x3b7   :  { %5332 = vmatpush.bf16.msra.mxu3 %v12968_v53  ;;  %5301 = vmatmul.bf16.vlgmr.msra.gmra.mxu0 %v4941_v24  ;;  %v4297_v53 = vpop.f32.mrf.mxu1 }
 0x3b8   :  { %5345 = vmatpush.bf16.msrb.mxu0 %v13032_v12  ;;  %5314 = vmatmul.bf16.vlgmr.msra.gmra.mxu1 %v4942_v6  ;;  %v12925_v12 = vld [vmem:[#allocation5 + $0xaa8] sm:$0xf0]  ;;  %v4258_v4 = vpop.f32.mrf.mxu2 }
 0x3b9   :  { %5358 = vmatpush.bf16.msrb.mxu1 %v13096_v10  ;;  %v4271_v1 = vpop.f32.mrf.mxu3  ;;  %v12864_v10 = vor.u32 %v16265_v46, %v12861_v13  ;;  %v12928_v49 = vor.u32 %v16281_v27, %v12925_v12  ;;  %v13347_v46 = vld [vmem:[#allocation5 + $0xdf0] sm:$0xf]  ;;  %v13284_v13 = vor.u32 %v16372_v45, %v13283_v43  ;;  %v13147_v27 = vld [vmem:[#allocation5 + $0xc60] sm:$0xf]  ;;  %v16338_v12 = vld [vmem:[#allocation5 + $0xc64] sm:$0xf0] }
 0x3ba   :  { %5320 = vmatpush.bf16.msra.mxu2 %v12896_v61  ;;  %v4272_v62 = vadd.f32 %v4271_v1, %v4258_v4  ;;  %v16313_v61 = vld [vmem:[#allocation5 + $0xba4] sm:$0xf]  ;;  %v16354_v4 = vld [vmem:[#allocation5 + $0xce4] sm:$0xf0]  ;;  %v13275_v1 = vld [vmem:[#allocation5 + $0xd60] sm:$0xf] }
 0x3bb   :  { %5333 = vmatpush.bf16.msra.mxu3 %v12960_v31  ;;  %v13053_v31 = vld [vmem:[#allocation5 + $0xba8] sm:$0xf0] }
 0x3bc   :  { %5346 = vmatpush.bf16.msrb.mxu0 %v13024_v38  ;;  %v16279_v38 = vld [vmem:[#allocation5 + $0xa94] sm:$0xf]  ;;  %v4285_v51 = vadd.f32 %v4284_v26, %v4272_v62 }
 0x3bd   :  { %5359 = vmatpush.bf16.msrb.mxu1 %v13088_v40  ;;  %v4286_v40 = vpop.f32.mrf.mxu0 }
 0x3be   :  { %5321 = vmatpush.bf16.msra.mxu2 %v12888_v15  ;;  %v13056_v15 = vor.u32 %v16313_v61, %v13053_v31  ;;  %v4298_v18 = vadd.f32 %v4297_v53, %v4285_v51  ;;  %v16388_v53 = vld [vmem:[#allocation5 + $0xdf4] sm:$0xf0]  ;;  %v16386_v61 = vld [vmem:[#allocation5 + $0xde4] sm:$0xf0]  ;;  %v13212_v31 = vor.u32 %v16354_v4, %v13211_v41  ;;  %v13267_v51 = vld [vmem:[#allocation5 + $0xd50] sm:$0xf] }
 0x3bf   :  { %5334 = vmatpush.bf16.msra.mxu3 %v12952_v17  ;;  %v16311_v17 = vld [vmem:[#allocation5 + $0xb94] sm:$0xf]  ;;  %v4299_v25 = vpop.f32.mrf.mxu1  ;;  %v13348_v62 = vor.u32 %v16388_v53, %v13347_v46  ;;  %v13268_v36 = vor.u32 %v16368_v30, %v13267_v51  ;;  %v13307_v53 = vld [vmem:[#allocation5 + $0xda0] sm:$0xf]  ;;  %v16328_v41 = vld [vmem:[#allocation5 + $0xc14] sm:$0xf0] }
 0x3c0   :  { %5347 = vmatpush.bf16.msrb.mxu0 %v13016_v20  ;;  %v12920_v20 = vor.u32 %v16279_v38, %v12917_v52  ;;  %v17716_v37 = vadd.f32 %v4298_v18, %v17686_v44  ;;  %v13048_v34 = vor.u32 %v16311_v17, %v13045_v42  ;;  %v4260_v56 = vpop.f32.mrf.mxu2  ;;  %v13156_v44 = vor.u32 %v16340_v8, %v13155_v7  ;;  %v13203_v38 = vld [vmem:[#allocation5 + $0xcd0] sm:$0xf]  ;;  %v16352_v52 = vld [vmem:[#allocation5 + $0xcd4] sm:$0xf0]  ;;  %v16334_v18 = vld [vmem:[#allocation5 + $0xc44] sm:$0xf0] }
 0x3c1   :  { %5360 = vmatpush.bf16.msrb.mxu1 %v13080_v47  ;;  %v12909_v47 = vld [vmem:[#allocation5 + $0xa88] sm:$0xf0]  ;;  %v4273_v26 = vpop.f32.mrf.mxu3  ;;  %v16384_v17 = vld [vmem:[#allocation5 + $0xdd4] sm:$0xf0]  ;;  %v13204_v42 = vor.u32 %v16352_v52, %v13203_v38  ;;  %v13251_v7 = vld [vmem:[#allocation5 + $0xd30] sm:$0xf] }
 0x3c2   :  { %5322 = vmatpush.bf16.msra.mxu2 %v12880_v16  ;;  %v16293_v16 = vld [vmem:[#allocation5 + $0xb04] sm:$0xf]  ;;  %v13252_v45 = vor.u32 %v16364_v23, %v13251_v7  ;;  %v13115_v56 = vld [vmem:[#allocation5 + $0xc20] sm:$0xf]  ;;  %v16330_v26 = vld [vmem:[#allocation5 + $0xc24] sm:$0xf0] }
 0x3c3   :  { %5335 = vmatpush.bf16.msra.mxu3 %v12944_v14  ;;  %v12973_v14 = vld [vmem:[#allocation5 + $0xb08] sm:$0xf0]  ;;  %v16376_v51 = vld [vmem:[#allocation5 + $0xd94] sm:$0xf0]  ;;  %v13099_v30 = vld [vmem:[#allocation5 + $0xc00] sm:$0xf] }
 0x3c4   :  { %5348 = vmatpush.bf16.msrb.mxu0 %v13008_v59  ;;  %v13219_v59 = vld [vmem:[#allocation5 + $0xcf0] sm:$0xf]  ;;  %v12976_v33 = vor.u32 %v16293_v16, %v12973_v14  ;;  %v16348_v14 = vld [vmem:[#allocation5 + $0xcb4] sm:$0xf0]  ;;  %v13285_v7 = vld [vmem:[#allocation5 + $0xd78] sm:$0xf0] }
 0x3c5   :  { %5361 = vmatpush.bf16.msrb.mxu1 %v13072_v48  ;;  %v12848_v48 = vor.u32 %v16261_v57, %v12845_v22  ;;  %v16382_v22 = vld [vmem:[#allocation5 + $0xdc4] sm:$0xf0]  ;;  %v13187_v16 = vld [vmem:[#allocation5 + $0xcb0] sm:$0xf]  ;;  %v13291_v23 = vld [vmem:[#allocation5 + $0xd80] sm:$0xf] }
 0x3c6   :  { %5323 = vmatpush.bf16.msra.mxu2 %v12872_v32  ;;  %v12912_v32 = vor.u32 %v16277_v63, %v12909_v47  ;;  %v16332_v47 = vld [vmem:[#allocation5 + $0xc34] sm:$0xf0]  ;;  %v13188_v43 = vor.u32 %v16348_v14, %v13187_v16 }
 0x3c7   :  { %5336 = vmatpush.bf16.msra.mxu3 %v12936_v0  ;;  %v16309_v0 = vld [vmem:[#allocation5 + $0xb84] sm:$0xf] }
 0x3c8   :  { %5349 = vmatpush.bf16.msrb.mxu0 %v13000_v29  ;;  %v13220_v29 = vor.u32 %v16356_v28, %v13219_v59  ;;  %v13040_v60 = vor.u32 %v16309_v0, %v13037_v39  ;;  %v16380_v28 = vld [vmem:[#allocation5 + $0xdb4] sm:$0xf0]  ;;  %v16346_v0 = vld [vmem:[#allocation5 + $0xca4] sm:$0xf0]  ;;  %v13243_v39 = vld [vmem:[#allocation5 + $0xd20] sm:$0xf] }
 0x3c9   :  { %5362 = vmatpush.bf16.msrb.mxu1 %v13064_v58  ;;  %v16370_v58 = vld [vmem:[#allocation5 + $0xd64] sm:$0xf0] }
 0x3ca   :  { %5324 = vmatpush.bf16.msra.mxu2 %v12864_v10  ;;  %v13148_v10 = vor.u32 %v16338_v12, %v13147_v27  ;;  %v13276_v9 = vor.u32 %v16370_v58, %v13275_v1  ;;  %v16378_v27 = vld [vmem:[#allocation5 + $0xda4] sm:$0xf0]  ;;  %v13107_v12 = vld [vmem:[#allocation5 + $0xc10] sm:$0xf] }
 0x3cb   :  { %5337 = vmatpush.bf16.msra.mxu3 %v12928_v49  ;;  %v13339_v49 = vld [vmem:[#allocation5 + $0xde0] sm:$0xf]  ;;  %v13171_v58 = vld [vmem:[#allocation5 + $0xc90] sm:$0xf]  ;;  %v13108_v52 = vor.u32 %v16328_v41, %v13107_v12  ;;  %v13277_v12 = vld [vmem:[#allocation5 + $0xd68] sm:$0xf0] }
 0x3cc   :  { %5350 = vmatpush.bf16.msrb.mxu0 %v12992_v3  ;;  %v13139_v3 = vld [vmem:[#allocation5 + $0xc50] sm:$0xf]  ;;  %v13340_v19 = vor.u32 %v16386_v61, %v13339_v49  ;;  %v16360_v61 = vld [vmem:[#allocation5 + $0xd14] sm:$0xf0] }
 0x3cd   :  { %5363 = vmatpush.bf16.msrb.mxu1 %v13056_v15  ;;  %v13140_v40 = vor.u32 %v16336_v54, %v13139_v3  ;;  %v13331_v15 = vld [vmem:[#allocation5 + $0xdd0] sm:$0xf]  ;;  %v13308_v3 = vor.u32 %v16378_v27, %v13307_v53  ;;  %v16369_v27 = vld [vmem:[#allocation5 + $0xd64] sm:$0xf] }
 0x3ce   :  { %5325 = vmatpush.bf16.msra.mxu2 %v12856_v11  ;;  %v13195_v11 = vld [vmem:[#allocation5 + $0xcc0] sm:$0xf]  ;;  %v13332_v57 = vor.u32 %v16384_v17, %v13331_v15  ;;  %v13235_v49 = vld [vmem:[#allocation5 + $0xd10] sm:$0xf] }
 0x3cf   :  { %5338 = vmatpush.bf16.msra.mxu3 %v12920_v20  ;;  %v16366_v20 = vld [vmem:[#allocation5 + $0xd44] sm:$0xf0]  ;;  %v13196_v63 = vor.u32 %v16350_v21, %v13195_v11  ;;  %v13299_v54 = vld [vmem:[#allocation5 + $0xd90] sm:$0xf]  ;;  %v13227_v11 = vld [vmem:[#allocation5 + $0xd00] sm:$0xf] }
 0x3d0   :  { %5351 = vmatpush.bf16.msrb.mxu0 %v12984_v55  ;;  %v13123_v55 = vld [vmem:[#allocation5 + $0xc30] sm:$0xf] }
 0x3d1   :  { %5364 = vmatpush.bf16.msrb.mxu1 %v13048_v34  ;;  %v13124_v59 = vor.u32 %v16332_v47, %v13123_v55  ;;  %v13315_v34 = vld [vmem:[#allocation5 + $0xdb0] sm:$0xf]  ;;  %v16371_v55 = vld [vmem:[#allocation5 + $0xd74] sm:$0xf] }
 0x3d2   :  { %5326 = vmatpush.bf16.msra.mxu2 %v12848_v48  ;;  %v13179_v48 = vld [vmem:[#allocation5 + $0xca0] sm:$0xf]  ;;  %v13316_v46 = vor.u32 %v16380_v28, %v13315_v34 }
 0x3d3   :  { %5339 = vmatpush.bf16.msra.mxu3 %v12912_v32  ;;  %v13180_v4 = vor.u32 %v16346_v0, %v13179_v48  ;;  %v13349_v48 = vld [vmem:[#allocation5 + $0xdf8] sm:$0xf0]  ;;  %v13288_v0 = vor.u32 %v16371_v55, %v13285_v7  ;;  %v16347_v55 = vld [vmem:[#allocation5 + $0xcb4] sm:$0xf] }
 0x3d4   :  { %5352 = vmatpush.bf16.msrb.mxu0 %v12976_v33  ;;  %v4336_v8 = vpop.f32.mrf.mxu0  ;;  %v16362_v33 = vld [vmem:[#allocation5 + $0xd24] sm:$0xf0] }
 0x3d5   :  { %5365 = vmatpush.bf16.msrb.mxu1 %v13040_v60  ;;  %5327 = vmatmul.bf16.vlgmr.msra.gmra.mxu2 %v4939_v35  ;;  %v13131_v35 = vld [vmem:[#allocation5 + $0xc40] sm:$0xf]  ;;  %v4349_v32 = vpop.f32.mrf.mxu1  ;;  %v13244_v1 = vor.u32 %v16362_v33, %v13243_v39  ;;  %v13149_v33 = vld [vmem:[#allocation5 + $0xc68] sm:$0xf0] }
 0x3d6   :  { %5778 = vmatpush.bf16.msrb.mxu2 %v13156_v44  ;;  %5340 = vmatmul.bf16.vlgmr.msra.gmra.mxu3 %v4940_v5  ;;  %v13259_v5 = vld [vmem:[#allocation5 + $0xd40] sm:$0xf]  ;;  %v13132_v2 = vor.u32 %v16334_v18, %v13131_v35  ;;  %v16342_v18 = vld [vmem:[#allocation5 + $0xc84] sm:$0xf0] }
 0x3d7   :  { %5791 = vmatpush.bf16.msrb.mxu3 %v13220_v29  ;;  %5353 = vmatmul.bf16.vlgmr.msrb.gmra.mxu0 %v4941_v24  ;;  %v13323_v24 = vld [vmem:[#allocation5 + $0xdc0] sm:$0xf]  ;;  %v13260_v25 = vor.u32 %v16366_v20, %v13259_v5  ;;  %v16358_v20 = vld [vmem:[#allocation5 + $0xd04] sm:$0xf0] }
 0x3d8   :  { %5804 = vmatpush.bf16.msra.mxu0 %v13284_v13  ;;  %5366 = vmatmul.bf16.vlgmr.msrb.gmra.mxu1 %v4942_v6  ;;  %v13324_v6 = vor.u32 %v16382_v22, %v13323_v24  ;;  %v4310_v44 = vpop.f32.mrf.mxu2  ;;  %v13116_v13 = vor.u32 %v16330_v26, %v13115_v56  ;;  %v13163_v35 = vld [vmem:[#allocation5 + $0xc80] sm:$0xf]  ;;  %v13300_v22 = vor.u32 %v16376_v51, %v13299_v54  ;;  %v16387_v26 = vld [vmem:[#allocation5 + $0xdf4] sm:$0xf] }
 0x3d9   :  { %5817 = vmatpush.bf16.msra.mxu1 %v13348_v62  ;;  %v4323_v29 = vpop.f32.mrf.mxu3  ;;  %v16344_v62 = vld [vmem:[#allocation5 + $0xc94] sm:$0xf0]  ;;  %v13228_v28 = vor.u32 %v16358_v20, %v13227_v11  ;;  %v13352_v41 = vor.u32 %v16387_v26, %v13349_v48  ;;  %v16367_v54 = vld [vmem:[#allocation5 + $0xd54] sm:$0xf]  ;;  %v13261_v11 = vld [vmem:[#allocation5 + $0xd48] sm:$0xf0] }
 0x3da   :  { %5779 = vmatpush.bf16.msrb.mxu2 %v13148_v10  ;;  %v4324_v60 = vadd.f32 %v4323_v29, %v4310_v44  ;;  %v5373_v10 = vld [vmem:[#allocation4 + $0x18] sm:$0x44]  ;;  %v16353_v44 = vld [vmem:[#allocation5 + $0xce4] sm:$0xf]  ;;  %v13117_v48 = vld [vmem:[#allocation5 + $0xc28] sm:$0xf0] }
 0x3db   :  { %5792 = vmatpush.bf16.msrb.mxu3 %v13212_v31  ;;  %v5374_v31 = vld [vmem:[#allocation4 + $0x10] sm:$0x44]  ;;  %v5443_v15 = vunpack.c.h.b16 %v5373_v10 }
 0x3dc   :  { %5805 = vmatpush.bf16.msra.mxu0 %v13276_v9  ;;  %v4337_v9 = vadd.f32 %v4336_v8, %v4324_v60  ;;  %v4338_v38 = vpop.f32.mrf.mxu0  ;;  %v5444_v21 = vunpack.c.l.b16 %v5374_v31  ;;  %v5445_v16 = vunpack.c.h.b16 %v5374_v31  ;;  %v16385_v60 = vld [vmem:[#allocation5 + $0xde4] sm:$0xf]  ;;  %v16351_v31 = vld [vmem:[#allocation5 + $0xcd4] sm:$0xf] }
 0x3dd   :  { %5818 = vmatpush.bf16.msra.mxu1 %v13340_v19  ;;  %v16326_v19 = vld [vmem:[#allocation5 + $0xc04] sm:$0xf0]  ;;  %v4351_v5 = vpop.f32.mrf.mxu1  ;;  %v13269_v38 = vld [vmem:[#allocation5 + $0xd58] sm:$0xf0] }
 0x3de   :  { %5780 = vmatpush.bf16.msrb.mxu2 %v13140_v40  ;;  %v5442_v40 = vunpack.c.l.b16 %v5373_v10  ;;  %v4350_v17 = vadd.f32 %v4349_v32, %v4337_v9  ;;  %v13100_v14 = vor.u32 %v16326_v19, %v13099_v30  ;;  %v16337_v32 = vld [vmem:[#allocation5 + $0xc64] sm:$0xf]  ;;  %v17735_v53 = vpack.c.b16 %v5445_v16, %v5445_v16  ;;  %v16335_v10 = vld [vmem:[#allocation5 + $0xc54] sm:$0xf]  ;;  %v13205_v9 = vld [vmem:[#allocation5 + $0xcd8] sm:$0xf0] }
 0x3df   :  { %5793 = vmatpush.bf16.msrb.mxu3 %v13204_v42  ;;  %v13172_v42 = vor.u32 %v16344_v62, %v13171_v58  ;;  %v13341_v62 = vld [vmem:[#allocation5 + $0xde8] sm:$0xf0]  ;;  %v13208_v30 = vor.u32 %v16351_v31, %v13205_v9  ;;  %v16383_v19 = vld [vmem:[#allocation5 + $0xdd4] sm:$0xf]  ;;  %v13173_v31 = vld [vmem:[#allocation5 + $0xc98] sm:$0xf0] }
 0x3e0   :  { %5806 = vmatpush.bf16.msra.mxu0 %v13268_v36  ;;  %v13236_v36 = vor.u32 %v16360_v61, %v13235_v49  ;;  %v17727_v24 = vadd.f32 %v4350_v17, %v17693_v50  ;;  %v4312_v47 = vpop.f32.mrf.mxu2  ;;  %v17729_v8 = vpack.c.b16 %v5442_v40, %v5442_v40  ;;  %v13164_v50 = vor.u32 %v16342_v18, %v13163_v35  ;;  %v13141_v49 = vld [vmem:[#allocation5 + $0xc58] sm:$0xf0]  ;;  %v13197_v35 = vld [vmem:[#allocation5 + $0xcc8] sm:$0xf0]  ;;  %v16365_v18 = vld [vmem:[#allocation5 + $0xd44] sm:$0xf] }
 0x3e1   :  { %5819 = vmatpush.bf16.msra.mxu1 %v13332_v57  ;;  %v16339_v57 = vld [vmem:[#allocation5 + $0xc74] sm:$0xf]  ;;  %v4325_v34 = vpop.f32.mrf.mxu3  ;;  %v13280_v61 = vor.u32 %v16369_v27, %v13277_v12  ;;  %v13144_v51 = vor.u32 %v16335_v10, %v13141_v49  ;;  %v13333_v40 = vld [vmem:[#allocation5 + $0xdd8] sm:$0xf0]  ;;  %v13272_v17 = vor.u32 %v16367_v54, %v13269_v38 }
 0x3e2   :  { %5781 = vmatpush.bf16.msrb.mxu2 %v13132_v2  ;;  %v13157_v2 = vld [vmem:[#allocation5 + $0xc78] sm:$0xf0]  ;;  %v5450_v29 = vrot.slane %v17729_v8, 2  ;;  %v16363_v16 = vld [vmem:[#allocation5 + $0xd34] sm:$0xf] }
 0x3e3   :  { %5794 = vmatpush.bf16.msrb.mxu3 %v13196_v63  ;;  %v16355_v63 = vld [vmem:[#allocation5 + $0xcf4] sm:$0xf]  ;;  %v13189_v47 = vld [vmem:[#allocation5 + $0xcb8] sm:$0xf0] }
 0x3e4   :  { %5807 = vmatpush.bf16.msra.mxu0 %v13260_v25  ;;  %v13221_v25 = vld [vmem:[#allocation5 + $0xcf8] sm:$0xf0]  ;;  %v13192_v34 = vor.u32 %v16347_v55, %v13189_v47  ;;  %v16359_v54 = vld [vmem:[#allocation5 + $0xd14] sm:$0xf]  ;;  %v16420_v55 = vld [vmem:[#allocation5 + $0xef4] sm:$0xf0] }
 0x3e5   :  { %5820 = vmatpush.bf16.msra.mxu1 %v13324_v6  ;;  %v16374_v6 = vld [vmem:[#allocation5 + $0xd84] sm:$0xf0]  ;;  %v13224_v56 = vor.u32 %v16355_v63, %v13221_v25  ;;  %v13264_v63 = vor.u32 %v16365_v18, %v13261_v11  ;;  %v13125_v25 = vld [vmem:[#allocation5 + $0xc38] sm:$0xf0]  ;;  %v13539_v47 = vld [vmem:[#allocation5 + $0xf70] sm:$0xf] }
 0x3e6   :  { %5782 = vmatpush.bf16.msrb.mxu2 %v13124_v59  ;;  %v17731_v59 = vpack.c.b16 %v5443_v15, %v5443_v15  ;;  %v13292_v39 = vor.u32 %v16374_v6, %v13291_v23  ;;  %v16333_v15 = vld [vmem:[#allocation5 + $0xc44] sm:$0xf]  ;;  %v13109_v49 = vld [vmem:[#allocation5 + $0xc18] sm:$0xf0] }
 0x3e7   :  { %5795 = vmatpush.bf16.msrb.mxu3 %v13188_v43  ;;  %v17733_v43 = vpack.c.b16 %v5444_v21, %v5444_v21  ;;  %v13336_v21 = vor.u32 %v16383_v19, %v13333_v40  ;;  %v13237_v38 = vld [vmem:[#allocation5 + $0xd18] sm:$0xf0] }
 0x3e8   :  { %5808 = vmatpush.bf16.msra.mxu0 %v13252_v45  ;;  %v13160_v45 = vor.u32 %v16339_v57, %v13157_v2  ;;  %v16381_v57 = vld [vmem:[#allocation5 + $0xdc4] sm:$0xf]  ;;  %v13325_v2 = vld [vmem:[#allocation5 + $0xdc8] sm:$0xf0]  ;;  %v13301_v19 = vld [vmem:[#allocation5 + $0xd98] sm:$0xf0]  ;;  %v13240_v11 = vor.u32 %v16359_v54, %v13237_v38 }
 0x3e9   :  { %5821 = vmatpush.bf16.msra.mxu1 %v13316_v46  ;;  %v13213_v46 = vld [vmem:[#allocation5 + $0xce8] sm:$0xf0]  ;;  %v13328_v23 = vor.u32 %v16381_v57, %v13325_v2  ;;  %v13411_v2 = vld [vmem:[#allocation5 + $0xe70] sm:$0xf]  ;;  %v16432_v54 = vld [vmem:[#allocation5 + $0xf54] sm:$0xf0] }
 0x3ea   :  { %5783 = vmatpush.bf16.msrb.mxu2 %v13116_v13  ;;  %v5451_v13 = vrot.slane %v17731_v59, 2  ;;  %v13216_v58 = vor.u32 %v16353_v44, %v13213_v46  ;;  %v16414_v59 = vld [vmem:[#allocation5 + $0xec4] sm:$0xf0] }
 0x3eb   :  { %5796 = vmatpush.bf16.msrb.mxu3 %v13180_v4  ;;  %v5452_v4 = vrot.slane %v17733_v43, 2 }
 0x3ec   :  { %5809 = vmatpush.bf16.msra.mxu0 %v13244_v1  ;;  %v13152_v1 = vor.u32 %v16337_v32, %v13149_v33  ;;  %v16345_v32 = vld [vmem:[#allocation5 + $0xca4] sm:$0xf]  ;;  %v13245_v33 = vld [vmem:[#allocation5 + $0xd28] sm:$0xf0] }
 0x3ed   :  { %5822 = vmatpush.bf16.msra.mxu1 %v13308_v3  ;;  %v5453_v3 = vrot.slane %v17735_v53, 2  ;;  %v16428_v53 = vld [vmem:[#allocation5 + $0xf34] sm:$0xf0] }
 0x3ee   :  { %5784 = vmatpush.bf16.msrb.mxu2 %v13108_v52  ;;  %v13344_v52 = vor.u32 %v16385_v60, %v13341_v62  ;;  %v16327_v62 = vld [vmem:[#allocation5 + $0xc14] sm:$0xf] }
 0x3ef   :  { %5797 = vmatpush.bf16.msrb.mxu3 %v13172_v42  ;;  %v13133_v42 = vld [vmem:[#allocation5 + $0xc48] sm:$0xf0] }
 0x3f0   :  { %5810 = vmatpush.bf16.msra.mxu0 %v13236_v36  ;;  %v16349_v36 = vld [vmem:[#allocation5 + $0xcc4] sm:$0xf]  ;;  %v13136_v5 = vor.u32 %v16333_v15, %v13133_v42  ;;  %v13112_v15 = vor.u32 %v16327_v62, %v13109_v49  ;;  %v16400_v49 = vld [vmem:[#allocation5 + $0xe54] sm:$0xf0] }
 0x3f1   :  { %5823 = vmatpush.bf16.msra.mxu1 %v13300_v22  ;;  %v13200_v20 = vor.u32 %v16349_v36, %v13197_v35  ;;  %v16331_v22 = vld [vmem:[#allocation5 + $0xc34] sm:$0xf]  ;;  %v16325_v42 = vld [vmem:[#allocation5 + $0xc04] sm:$0xf]  ;;  %v13101_v36 = vld [vmem:[#allocation5 + $0xc08] sm:$0xf0] }
 0x3f2   :  { %5785 = vmatpush.bf16.msrb.mxu2 %v13100_v14  ;;  %v13253_v14 = vld [vmem:[#allocation5 + $0xd38] sm:$0xf0]  ;;  %v13128_v6 = vor.u32 %v16331_v22, %v13125_v25  ;;  %v16341_v35 = vld [vmem:[#allocation5 + $0xc84] sm:$0xf]  ;;  %v16404_v22 = vld [vmem:[#allocation5 + $0xe74] sm:$0xf0] }
 0x3f3   :  { %5798 = vmatpush.bf16.msrb.mxu3 %v13164_v50  ;;  %v16379_v50 = vld [vmem:[#allocation5 + $0xdb4] sm:$0xf]  ;;  %v13256_v26 = vor.u32 %v16363_v16, %v13253_v14  ;;  %v16436_v16 = vld [vmem:[#allocation5 + $0xf74] sm:$0xf0] }
 0x3f4   :  { %5811 = vmatpush.bf16.msra.mxu0 %v13228_v28  ;;  %v4791_v7 = vpop.f32.mrf.mxu0  ;;  %v13317_v28 = vld [vmem:[#allocation5 + $0xdb8] sm:$0xf0] }
 0x3f5   :  { %5824 = vmatpush.bf16.msra.mxu1 %v13292_v39  ;;  %5786 = vmatmul.bf16.vlgmr.msrb.gmra.mxu2 %v5450_v29  ;;  %v16361_v39 = vld [vmem:[#allocation5 + $0xd24] sm:$0xf]  ;;  %v13320_v27 = vor.u32 %v16379_v50, %v13317_v28  ;;  %v13293_v50 = vld [vmem:[#allocation5 + $0xd88] sm:$0xf0] }
 0x3f6   :  { %5830 = vmatpush.bf16.msra.mxu2 %v13160_v45  ;;  %5799 = vmatmul.bf16.vlgmr.msrb.gmra.mxu3 %v5451_v13  ;;  %v16329_v45 = vld [vmem:[#allocation5 + $0xc24] sm:$0xf]  ;;  %v13248_v10 = vor.u32 %v16361_v39, %v13245_v33  ;;  %v13467_v39 = vld [vmem:[#allocation5 + $0xee0] sm:$0xf] }
 0x3f7   :  { %5843 = vmatpush.bf16.msra.mxu3 %v13224_v56  ;;  %5812 = vmatmul.bf16.vlgmr.msra.gmra.mxu0 %v5452_v4  ;;  %v4804_v56 = vpop.f32.mrf.mxu1 }
 0x3f8   :  { %5856 = vmatpush.bf16.msrb.mxu0 %v13288_v0  ;;  %5825 = vmatmul.bf16.vlgmr.msra.gmra.mxu1 %v5453_v3  ;;  %v13181_v0 = vld [vmem:[#allocation5 + $0xca8] sm:$0xf0]  ;;  %v4765_v44 = vpop.f32.mrf.mxu2 }
 0x3f9   :  { %5869 = vmatpush.bf16.msrb.mxu1 %v13352_v41  ;;  %v4778_v46 = vpop.f32.mrf.mxu3  ;;  %v13120_v41 = vor.u32 %v16329_v45, %v13117_v48  ;;  %v13184_v60 = vor.u32 %v16345_v32, %v13181_v0  ;;  %v13603_v45 = vld [vmem:[#allocation5 + $0xff0] sm:$0xf]  ;;  %v13540_v48 = vor.u32 %v16436_v16, %v13539_v47  ;;  %v13403_v32 = vld [vmem:[#allocation5 + $0xe60] sm:$0xf]  ;;  %v16402_v0 = vld [vmem:[#allocation5 + $0xe64] sm:$0xf0] }
 0x3fa   :  { %5831 = vmatpush.bf16.msra.mxu2 %v13152_v1  ;;  %v4779_v12 = vadd.f32 %v4778_v46, %v4765_v44  ;;  %v16377_v1 = vld [vmem:[#allocation5 + $0xda4] sm:$0xf]  ;;  %v16418_v44 = vld [vmem:[#allocation5 + $0xee4] sm:$0xf0]  ;;  %v13531_v46 = vld [vmem:[#allocation5 + $0xf60] sm:$0xf] }
 0x3fb   :  { %5844 = vmatpush.bf16.msra.mxu3 %v13216_v58  ;;  %v13309_v58 = vld [vmem:[#allocation5 + $0xda8] sm:$0xf0] }
 0x3fc   :  { %5857 = vmatpush.bf16.msrb.mxu0 %v13280_v61  ;;  %v16343_v61 = vld [vmem:[#allocation5 + $0xc94] sm:$0xf]  ;;  %v4792_v9 = vadd.f32 %v4791_v7, %v4779_v12 }
 0x3fd   :  { %5870 = vmatpush.bf16.msrb.mxu1 %v13344_v52  ;;  %v4793_v52 = vpop.f32.mrf.mxu0 }
 0x3fe   :  { %5832 = vmatpush.bf16.msra.mxu2 %v13144_v51  ;;  %v13312_v51 = vor.u32 %v16377_v1, %v13309_v58  ;;  %v4805_v40 = vadd.f32 %v4804_v56, %v4792_v9  ;;  %v16452_v56 = vld [vmem:[#allocation5 + $0xff4] sm:$0xf0]  ;;  %v16450_v1 = vld [vmem:[#allocation5 + $0xfe4] sm:$0xf0]  ;;  %v13468_v58 = vor.u32 %v16418_v44, %v13467_v39  ;;  %v13523_v9 = vld [vmem:[#allocation5 + $0xf50] sm:$0xf] }
 0x3ff   :  { %5845 = vmatpush.bf16.msra.mxu3 %v13208_v30  ;;  %v16375_v30 = vld [vmem:[#allocation5 + $0xd94] sm:$0xf]  ;;  %v4806_v18 = vpop.f32.mrf.mxu1  ;;  %v13604_v12 = vor.u32 %v16452_v56, %v13603_v45  ;;  %v13524_v8 = vor.u32 %v16432_v54, %v13523_v9  ;;  %v13563_v56 = vld [vmem:[#allocation5 + $0xfa0] sm:$0xf]  ;;  %v16392_v39 = vld [vmem:[#allocation5 + $0xe14] sm:$0xf0] }
 0x400   :  { %5858 = vmatpush.bf16.msrb.mxu0 %v13272_v17  ;;  %v13176_v17 = vor.u32 %v16343_v61, %v13173_v31  ;;  %v17750_v57 = vadd.f32 %v4805_v40, %v17716_v37  ;;  %v13304_v25 = vor.u32 %v16375_v30, %v13301_v19  ;;  %v4767_v14 = vpop.f32.mrf.mxu2  ;;  %v13412_v37 = vor.u32 %v16404_v22, %v13411_v2  ;;  %v13459_v61 = vld [vmem:[#allocation5 + $0xed0] sm:$0xf]  ;;  %v16416_v31 = vld [vmem:[#allocation5 + $0xed4] sm:$0xf0]  ;;  %v16398_v40 = vld [vmem:[#allocation5 + $0xe44] sm:$0xf0] }
 0x401   :  { %5871 = vmatpush.bf16.msrb.mxu1 %v13336_v21  ;;  %v13165_v21 = vld [vmem:[#allocation5 + $0xc88] sm:$0xf0]  ;;  %v4780_v7 = vpop.f32.mrf.mxu3  ;;  %v16448_v30 = vld [vmem:[#allocation5 + $0xfd4] sm:$0xf0]  ;;  %v13460_v19 = vor.u32 %v16416_v31, %v13459_v61  ;;  %v13507_v2 = vld [vmem:[#allocation5 + $0xf30] sm:$0xf] }
 0x402   :  { %5833 = vmatpush.bf16.msra.mxu2 %v13136_v5  ;;  %v16357_v5 = vld [vmem:[#allocation5 + $0xd04] sm:$0xf]  ;;  %v13508_v16 = vor.u32 %v16428_v53, %v13507_v2  ;;  %v13371_v14 = vld [vmem:[#allocation5 + $0xe20] sm:$0xf]  ;;  %v16394_v7 = vld [vmem:[#allocation5 + $0xe24] sm:$0xf0] }
 0x403   :  { %5846 = vmatpush.bf16.msra.mxu3 %v13200_v20  ;;  %v13229_v20 = vld [vmem:[#allocation5 + $0xd08] sm:$0xf0]  ;;  %v16440_v9 = vld [vmem:[#allocation5 + $0xf94] sm:$0xf0]  ;;  %v13355_v54 = vld [vmem:[#allocation5 + $0xe00] sm:$0xf] }
 0x404   :  { %5859 = vmatpush.bf16.msrb.mxu0 %v13264_v63  ;;  %v13475_v63 = vld [vmem:[#allocation5 + $0xef0] sm:$0xf]  ;;  %v13232_v28 = vor.u32 %v16357_v5, %v13229_v20  ;;  %v16412_v20 = vld [vmem:[#allocation5 + $0xeb4] sm:$0xf0]  ;;  %v13541_v2 = vld [vmem:[#allocation5 + $0xf78] sm:$0xf0] }
 0x405   :  { %5872 = vmatpush.bf16.msrb.mxu1 %v13328_v23  ;;  %v13104_v23 = vor.u32 %v16325_v42, %v13101_v36  ;;  %v16446_v36 = vld [vmem:[#allocation5 + $0xfc4] sm:$0xf0]  ;;  %v13443_v5 = vld [vmem:[#allocation5 + $0xeb0] sm:$0xf]  ;;  %v13547_v53 = vld [vmem:[#allocation5 + $0xf80] sm:$0xf] }
 0x406   :  { %5834 = vmatpush.bf16.msra.mxu2 %v13128_v6  ;;  %v13168_v6 = vor.u32 %v16341_v35, %v13165_v21  ;;  %v16396_v21 = vld [vmem:[#allocation5 + $0xe34] sm:$0xf0]  ;;  %v13444_v47 = vor.u32 %v16412_v20, %v13443_v5 }
 0x407   :  { %5847 = vmatpush.bf16.msra.mxu3 %v13192_v34  ;;  %v16373_v34 = vld [vmem:[#allocation5 + $0xd84] sm:$0xf] }
 0x408   :  { %5860 = vmatpush.bf16.msrb.mxu0 %v13256_v26  ;;  %v13476_v26 = vor.u32 %v16420_v55, %v13475_v63  ;;  %v13296_v33 = vor.u32 %v16373_v34, %v13293_v50  ;;  %v16444_v55 = vld [vmem:[#allocation5 + $0xfb4] sm:$0xf0]  ;;  %v16410_v34 = vld [vmem:[#allocation5 + $0xea4] sm:$0xf0]  ;;  %v13499_v50 = vld [vmem:[#allocation5 + $0xf20] sm:$0xf] }
 0x409   :  { %5873 = vmatpush.bf16.msrb.mxu1 %v13320_v27  ;;  %v16434_v27 = vld [vmem:[#allocation5 + $0xf64] sm:$0xf0] }
 0x40a   :  { %5835 = vmatpush.bf16.msra.mxu2 %v13120_v41  ;;  %v13404_v41 = vor.u32 %v16402_v0, %v13403_v32  ;;  %v13532_v62 = vor.u32 %v16434_v27, %v13531_v46  ;;  %v16442_v32 = vld [vmem:[#allocation5 + $0xfa4] sm:$0xf0]  ;;  %v13363_v0 = vld [vmem:[#allocation5 + $0xe10] sm:$0xf] }
 0x40b   :  { %5848 = vmatpush.bf16.msra.mxu3 %v13184_v60  ;;  %v13595_v60 = vld [vmem:[#allocation5 + $0xfe0] sm:$0xf]  ;;  %v13427_v27 = vld [vmem:[#allocation5 + $0xe90] sm:$0xf]  ;;  %v13364_v31 = vor.u32 %v16392_v39, %v13363_v0  ;;  %v13533_v0 = vld [vmem:[#allocation5 + $0xf68] sm:$0xf0] }
 0x40c   :  { %5861 = vmatpush.bf16.msrb.mxu0 %v13248_v10  ;;  %v13395_v10 = vld [vmem:[#allocation5 + $0xe50] sm:$0xf]  ;;  %v13596_v38 = vor.u32 %v16450_v1, %v13595_v60  ;;  %v16424_v1 = vld [vmem:[#allocation5 + $0xf14] sm:$0xf0] }
 0x40d   :  { %5874 = vmatpush.bf16.msrb.mxu1 %v13312_v51  ;;  %v13396_v52 = vor.u32 %v16400_v49, %v13395_v10  ;;  %v13587_v51 = vld [vmem:[#allocation5 + $0xfd0] sm:$0xf]  ;;  %v13564_v10 = vor.u32 %v16442_v32, %v13563_v56  ;;  %v16433_v32 = vld [vmem:[#allocation5 + $0xf64] sm:$0xf] }
 0x40e   :  { %5836 = vmatpush.bf16.msra.mxu2 %v13112_v15  ;;  %v13451_v15 = vld [vmem:[#allocation5 + $0xec0] sm:$0xf]  ;;  %v13588_v42 = vor.u32 %v16448_v30, %v13587_v51  ;;  %v13491_v60 = vld [vmem:[#allocation5 + $0xf10] sm:$0xf] }
 0x40f   :  { %5849 = vmatpush.bf16.msra.mxu3 %v13176_v17  ;;  %v16430_v17 = vld [vmem:[#allocation5 + $0xf44] sm:$0xf0]  ;;  %v13452_v35 = vor.u32 %v16414_v59, %v13451_v15  ;;  %v13555_v49 = vld [vmem:[#allocation5 + $0xf90] sm:$0xf]  ;;  %v13483_v15 = vld [vmem:[#allocation5 + $0xf00] sm:$0xf] }
 0x410   :  { %5862 = vmatpush.bf16.msrb.mxu0 %v13240_v11  ;;  %v13379_v11 = vld [vmem:[#allocation5 + $0xe30] sm:$0xf] }
 0x411   :  { %5875 = vmatpush.bf16.msrb.mxu1 %v13304_v25  ;;  %v13380_v63 = vor.u32 %v16396_v21, %v13379_v11  ;;  %v13571_v25 = vld [vmem:[#allocation5 + $0xfb0] sm:$0xf]  ;;  %v16435_v11 = vld [vmem:[#allocation5 + $0xf74] sm:$0xf] }
 0x412   :  { %5837 = vmatpush.bf16.msra.mxu2 %v13104_v23  ;;  %v13435_v23 = vld [vmem:[#allocation5 + $0xea0] sm:$0xf]  ;;  %v13572_v45 = vor.u32 %v16444_v55, %v13571_v25 }
 0x413   :  { %5850 = vmatpush.bf16.msra.mxu3 %v13168_v6  ;;  %v13436_v44 = vor.u32 %v16410_v34, %v13435_v23  ;;  %v13605_v23 = vld [vmem:[#allocation5 + $0xff8] sm:$0xf0]  ;;  %v13544_v34 = vor.u32 %v16435_v11, %v13541_v2  ;;  %v16411_v11 = vld [vmem:[#allocation5 + $0xeb4] sm:$0xf] }
 0x414   :  { %5863 = vmatpush.bf16.msrb.mxu0 %v13232_v28  ;;  %v4843_v22 = vpop.f32.mrf.mxu0  ;;  %v16426_v28 = vld [vmem:[#allocation5 + $0xf24] sm:$0xf0] }
 0x415   :  { %5876 = vmatpush.bf16.msrb.mxu1 %v13296_v33  ;;  %5838 = vmatmul.bf16.vlgmr.msra.gmra.mxu2 %v5450_v29  ;;  %v13387_v29 = vld [vmem:[#allocation5 + $0xe40] sm:$0xf]  ;;  %v4856_v6 = vpop.f32.mrf.mxu1  ;;  %v13500_v46 = vor.u32 %v16426_v28, %v13499_v50  ;;  %v13405_v28 = vld [vmem:[#allocation5 + $0xe68] sm:$0xf0] }
 0x416   :  { %6289 = vmatpush.bf16.msrb.mxu2 %v13412_v37  ;;  %5851 = vmatmul.bf16.vlgmr.msra.gmra.mxu3 %v5451_v13  ;;  %v13515_v13 = vld [vmem:[#allocation5 + $0xf40] sm:$0xf]  ;;  %v13388_v43 = vor.u32 %v16398_v40, %v13387_v29  ;;  %v16406_v40 = vld [vmem:[#allocation5 + $0xe84] sm:$0xf0] }
 0x417   :  { %6302 = vmatpush.bf16.msrb.mxu3 %v13476_v26  ;;  %5864 = vmatmul.bf16.vlgmr.msrb.gmra.mxu0 %v5452_v4  ;;  %v13579_v4 = vld [vmem:[#allocation5 + $0xfc0] sm:$0xf]  ;;  %v13516_v18 = vor.u32 %v16430_v17, %v13515_v13  ;;  %v16422_v17 = vld [vmem:[#allocation5 + $0xf04] sm:$0xf0] }
 0x418   :  { %6315 = vmatpush.bf16.msra.mxu0 %v13540_v48  ;;  %5877 = vmatmul.bf16.vlgmr.msrb.gmra.mxu1 %v5453_v3  ;;  %v13580_v3 = vor.u32 %v16446_v36, %v13579_v4  ;;  %v4817_v37 = vpop.f32.mrf.mxu2  ;;  %v13372_v48 = vor.u32 %v16394_v7, %v13371_v14  ;;  %v13419_v29 = vld [vmem:[#allocation5 + $0xe80] sm:$0xf]  ;;  %v13556_v36 = vor.u32 %v16440_v9, %v13555_v49  ;;  %v16451_v7 = vld [vmem:[#allocation5 + $0xff4] sm:$0xf] }
 0x419   :  { %6328 = vmatpush.bf16.msra.mxu1 %v13604_v12  ;;  %v4830_v26 = vpop.f32.mrf.mxu3  ;;  %v16408_v12 = vld [vmem:[#allocation5 + $0xe94] sm:$0xf0]  ;;  %v13484_v55 = vor.u32 %v16422_v17, %v13483_v15  ;;  %v13608_v39 = vor.u32 %v16451_v7, %v13605_v23  ;;  %v16431_v49 = vld [vmem:[#allocation5 + $0xf54] sm:$0xf]  ;;  %v13517_v15 = vld [vmem:[#allocation5 + $0xf48] sm:$0xf0] }
 0x41a   :  { %6290 = vmatpush.bf16.msrb.mxu2 %v13404_v41  ;;  %v4831_v33 = vadd.f32 %v4830_v26, %v4817_v37  ;;  %v5884_v41 = vld [vmem:[#allocation4 + $0x18] sm:$0x88]  ;;  %v16417_v37 = vld [vmem:[#allocation5 + $0xee4] sm:$0xf]  ;;  %v13373_v23 = vld [vmem:[#allocation5 + $0xe28] sm:$0xf0] }
 0x41b   :  { %6303 = vmatpush.bf16.msrb.mxu3 %v13468_v58  ;;  %v5885_v58 = vld [vmem:[#allocation4 + $0x10] sm:$0x88]  ;;  %v5954_v51 = vunpack.c.h.b16 %v5884_v41 }
 0x41c   :  { %6316 = vmatpush.bf16.msra.mxu0 %v13532_v62  ;;  %v4844_v62 = vadd.f32 %v4843_v22, %v4831_v33  ;;  %v4845_v61 = vpop.f32.mrf.mxu0  ;;  %v5955_v59 = vunpack.c.l.b16 %v5885_v58  ;;  %v5956_v5 = vunpack.c.h.b16 %v5885_v58  ;;  %v16449_v33 = vld [vmem:[#allocation5 + $0xfe4] sm:$0xf]  ;;  %v16415_v58 = vld [vmem:[#allocation5 + $0xed4] sm:$0xf] }
 0x41d   :  { %6329 = vmatpush.bf16.msra.mxu1 %v13596_v38  ;;  %v16390_v38 = vld [vmem:[#allocation5 + $0xe04] sm:$0xf0]  ;;  %v4858_v13 = vpop.f32.mrf.mxu1  ;;  %v13525_v61 = vld [vmem:[#allocation5 + $0xf58] sm:$0xf0] }
 0x41e   :  { %6291 = vmatpush.bf16.msrb.mxu2 %v13396_v52  ;;  %v5953_v52 = vunpack.c.l.b16 %v5884_v41  ;;  %v4857_v30 = vadd.f32 %v4856_v6, %v4844_v62  ;;  %v13356_v20 = vor.u32 %v16390_v38, %v13355_v54  ;;  %v16401_v6 = vld [vmem:[#allocation5 + $0xe64] sm:$0xf]  ;;  %v17769_v56 = vpack.c.b16 %v5956_v5, %v5956_v5  ;;  %v16399_v41 = vld [vmem:[#allocation5 + $0xe54] sm:$0xf]  ;;  %v13461_v62 = vld [vmem:[#allocation5 + $0xed8] sm:$0xf0] }
 0x41f   :  { %6304 = vmatpush.bf16.msrb.mxu3 %v13460_v19  ;;  %v13428_v19 = vor.u32 %v16408_v12, %v13427_v27  ;;  %v13597_v12 = vld [vmem:[#allocation5 + $0xfe8] sm:$0xf0]  ;;  %v13464_v54 = vor.u32 %v16415_v58, %v13461_v62  ;;  %v16447_v38 = vld [vmem:[#allocation5 + $0xfd4] sm:$0xf]  ;;  %v13429_v58 = vld [vmem:[#allocation5 + $0xe98] sm:$0xf0] }
 0x420   :  { %6317 = vmatpush.bf16.msra.mxu0 %v13524_v8  ;;  %v13492_v8 = vor.u32 %v16424_v1, %v13491_v60  ;;  %v17761_v4 = vadd.f32 %v4857_v30, %v17727_v24  ;;  %v4819_v21 = vpop.f32.mrf.mxu2  ;;  %v17763_v22 = vpack.c.b16 %v5953_v52, %v5953_v52  ;;  %v13420_v24 = vor.u32 %v16406_v40, %v13419_v29  ;;  %v13397_v60 = vld [vmem:[#allocation5 + $0xe58] sm:$0xf0]  ;;  %v13453_v29 = vld [vmem:[#allocation5 + $0xec8] sm:$0xf0]  ;;  %v16429_v40 = vld [vmem:[#allocation5 + $0xf44] sm:$0xf] }
 0x421   :  { %6330 = vmatpush.bf16.msra.mxu1 %v13588_v42  ;;  %v16403_v42 = vld [vmem:[#allocation5 + $0xe74] sm:$0xf]  ;;  %v4832_v25 = vpop.f32.mrf.mxu3  ;;  %v13536_v1 = vor.u32 %v16433_v32, %v13533_v0  ;;  %v13400_v9 = vor.u32 %v16399_v41, %v13397_v60  ;;  %v13589_v52 = vld [vmem:[#allocation5 + $0xfd8] sm:$0xf0]  ;;  %v13528_v30 = vor.u32 %v16431_v49, %v13525_v61 }
 0x422   :  { %6292 = vmatpush.bf16.msrb.mxu2 %v13388_v43  ;;  %v13413_v43 = vld [vmem:[#allocation5 + $0xe78] sm:$0xf0]  ;;  %v5961_v26 = vrot.slane %v17763_v22, 3  ;;  %v16427_v5 = vld [vmem:[#allocation5 + $0xf34] sm:$0xf] }
 0x423   :  { %6305 = vmatpush.bf16.msrb.mxu3 %v13452_v35  ;;  %v16419_v35 = vld [vmem:[#allocation5 + $0xef4] sm:$0xf]  ;;  %v13445_v21 = vld [vmem:[#allocation5 + $0xeb8] sm:$0xf0] }
 0x424   :  { %6318 = vmatpush.bf16.msra.mxu0 %v13516_v18  ;;  %v13477_v18 = vld [vmem:[#allocation5 + $0xef8] sm:$0xf0]  ;;  %v13448_v25 = vor.u32 %v16411_v11, %v13445_v21  ;;  %v16423_v49 = vld [vmem:[#allocation5 + $0xf14] sm:$0xf]  ;;  %v16484_v11 = vld [vmem:[#allocation5 + $0x10f4] sm:$0xf0] }
 0x425   :  { %6331 = vmatpush.bf16.msra.mxu1 %v13580_v3  ;;  %v16438_v3 = vld [vmem:[#allocation5 + $0xf84] sm:$0xf0]  ;;  %v13480_v14 = vor.u32 %v16419_v35, %v13477_v18  ;;  %v13520_v35 = vor.u32 %v16429_v40, %v13517_v15  ;;  %v13381_v18 = vld [vmem:[#allocation5 + $0xe38] sm:$0xf0]  ;;  %v13795_v21 = vld [vmem:[#allocation5 + $0x1170] sm:$0xf] }
 0x426   :  { %6293 = vmatpush.bf16.msrb.mxu2 %v13380_v63  ;;  %v17765_v63 = vpack.c.b16 %v5954_v51, %v5954_v51  ;;  %v13548_v50 = vor.u32 %v16438_v3, %v13547_v53  ;;  %v16397_v51 = vld [vmem:[#allocation5 + $0xe44] sm:$0xf]  ;;  %v13365_v60 = vld [vmem:[#allocation5 + $0xe18] sm:$0xf0] }
 0x427   :  { %6306 = vmatpush.bf16.msrb.mxu3 %v13444_v47  ;;  %v17767_v47 = vpack.c.b16 %v5955_v59, %v5955_v59  ;;  %v13592_v59 = vor.u32 %v16447_v38, %v13589_v52  ;;  %v13493_v61 = vld [vmem:[#allocation5 + $0xf18] sm:$0xf0] }
 0x428   :  { %6319 = vmatpush.bf16.msra.mxu0 %v13508_v16  ;;  %v13416_v16 = vor.u32 %v16403_v42, %v13413_v43  ;;  %v16445_v42 = vld [vmem:[#allocation5 + $0xfc4] sm:$0xf]  ;;  %v13581_v43 = vld [vmem:[#allocation5 + $0xfc8] sm:$0xf0]  ;;  %v13557_v38 = vld [vmem:[#allocation5 + $0xf98] sm:$0xf0]  ;;  %v13496_v15 = vor.u32 %v16423_v49, %v13493_v61 }
 0x429   :  { %6332 = vmatpush.bf16.msra.mxu1 %v13572_v45  ;;  %v13469_v45 = vld [vmem:[#allocation5 + $0xee8] sm:$0xf0]  ;;  %v13584_v53 = vor.u32 %v16445_v42, %v13581_v43  ;;  %v13667_v43 = vld [vmem:[#allocation5 + $0x1070] sm:$0xf]  ;;  %v16496_v49 = vld [vmem:[#allocation5 + $0x1154] sm:$0xf0] }
 0x42a   :  { %6294 = vmatpush.bf16.msrb.mxu2 %v13372_v48  ;;  %v5962_v48 = vrot.slane %v17765_v63, 3  ;;  %v13472_v27 = vor.u32 %v16417_v37, %v13469_v45  ;;  %v16478_v63 = vld [vmem:[#allocation5 + $0x10c4] sm:$0xf0] }
 0x42b   :  { %6307 = vmatpush.bf16.msrb.mxu3 %v13436_v44  ;;  %v5963_v44 = vrot.slane %v17767_v47, 3 }
 0x42c   :  { %6320 = vmatpush.bf16.msra.mxu0 %v13500_v46  ;;  %v13408_v46 = vor.u32 %v16401_v6, %v13405_v28  ;;  %v16409_v6 = vld [vmem:[#allocation5 + $0xea4] sm:$0xf]  ;;  %v13501_v28 = vld [vmem:[#allocation5 + $0xf28] sm:$0xf0] }
 0x42d   :  { %6333 = vmatpush.bf16.msra.mxu1 %v13564_v10  ;;  %v5964_v10 = vrot.slane %v17769_v56, 3  ;;  %v16492_v56 = vld [vmem:[#allocation5 + $0x1134] sm:$0xf0] }
 0x42e   :  { %6295 = vmatpush.bf16.msrb.mxu2 %v13364_v31  ;;  %v13600_v31 = vor.u32 %v16449_v33, %v13597_v12  ;;  %v16391_v12 = vld [vmem:[#allocation5 + $0xe14] sm:$0xf] }
 0x42f   :  { %6308 = vmatpush.bf16.msrb.mxu3 %v13428_v19  ;;  %v13389_v19 = vld [vmem:[#allocation5 + $0xe48] sm:$0xf0] }
 0x430   :  { %6321 = vmatpush.bf16.msra.mxu0 %v13492_v8  ;;  %v16413_v8 = vld [vmem:[#allocation5 + $0xec4] sm:$0xf]  ;;  %v13392_v13 = vor.u32 %v16397_v51, %v13389_v19  ;;  %v13368_v51 = vor.u32 %v16391_v12, %v13365_v60  ;;  %v16464_v60 = vld [vmem:[#allocation5 + $0x1054] sm:$0xf0] }
 0x431   :  { %6334 = vmatpush.bf16.msra.mxu1 %v13556_v36  ;;  %v13456_v17 = vor.u32 %v16413_v8, %v13453_v29  ;;  %v16395_v36 = vld [vmem:[#allocation5 + $0xe34] sm:$0xf]  ;;  %v16389_v19 = vld [vmem:[#allocation5 + $0xe04] sm:$0xf]  ;;  %v13357_v8 = vld [vmem:[#allocation5 + $0xe08] sm:$0xf0] }
 0x432   :  { %6296 = vmatpush.bf16.msrb.mxu2 %v13356_v20  ;;  %v13509_v20 = vld [vmem:[#allocation5 + $0xf38] sm:$0xf0]  ;;  %v13384_v3 = vor.u32 %v16395_v36, %v13381_v18  ;;  %v16405_v29 = vld [vmem:[#allocation5 + $0xe84] sm:$0xf]  ;;  %v16468_v36 = vld [vmem:[#allocation5 + $0x1074] sm:$0xf0] }
 0x433   :  { %6309 = vmatpush.bf16.msrb.mxu3 %v13420_v24  ;;  %v16443_v24 = vld [vmem:[#allocation5 + $0xfb4] sm:$0xf]  ;;  %v13512_v7 = vor.u32 %v16427_v5, %v13509_v20  ;;  %v16500_v5 = vld [vmem:[#allocation5 + $0x1174] sm:$0xf0] }
 0x434   :  { %6322 = vmatpush.bf16.msra.mxu0 %v13484_v55  ;;  %v5302_v2 = vpop.f32.mrf.mxu0  ;;  %v13573_v55 = vld [vmem:[#allocation5 + $0xfb8] sm:$0xf0] }
 0x435   :  { %6335 = vmatpush.bf16.msra.mxu1 %v13548_v50  ;;  %6297 = vmatmul.bf16.vlgmr.msrb.gmra.mxu2 %v5961_v26  ;;  %v16425_v50 = vld [vmem:[#allocation5 + $0xf24] sm:$0xf]  ;;  %v13576_v32 = vor.u32 %v16443_v24, %v13573_v55  ;;  %v13549_v24 = vld [vmem:[#allocation5 + $0xf88] sm:$0xf0] }
 0x436   :  { %6341 = vmatpush.bf16.msra.mxu2 %v13416_v16  ;;  %6310 = vmatmul.bf16.vlgmr.msrb.gmra.mxu3 %v5962_v48  ;;  %v16393_v16 = vld [vmem:[#allocation5 + $0xe24] sm:$0xf]  ;;  %v13504_v41 = vor.u32 %v16425_v50, %v13501_v28  ;;  %v13723_v50 = vld [vmem:[#allocation5 + $0x10e0] sm:$0xf] }
 0x437   :  { %6354 = vmatpush.bf16.msra.mxu3 %v13480_v14  ;;  %6323 = vmatmul.bf16.vlgmr.msra.gmra.mxu0 %v5963_v44  ;;  %v5315_v14 = vpop.f32.mrf.mxu1 }
 0x438   :  { %6367 = vmatpush.bf16.msrb.mxu0 %v13544_v34  ;;  %6336 = vmatmul.bf16.vlgmr.msra.gmra.mxu1 %v5964_v10  ;;  %v13437_v34 = vld [vmem:[#allocation5 + $0xea8] sm:$0xf0]  ;;  %v5276_v37 = vpop.f32.mrf.mxu2 }
 0x439   :  { %6380 = vmatpush.bf16.msrb.mxu1 %v13608_v39  ;;  %v5289_v45 = vpop.f32.mrf.mxu3  ;;  %v13376_v39 = vor.u32 %v16393_v16, %v13373_v23  ;;  %v13440_v33 = vor.u32 %v16409_v6, %v13437_v34  ;;  %v13859_v16 = vld [vmem:[#allocation5 + $0x11f0] sm:$0xf]  ;;  %v13796_v23 = vor.u32 %v16500_v5, %v13795_v21  ;;  %v13659_v6 = vld [vmem:[#allocation5 + $0x1060] sm:$0xf]  ;;  %v16466_v34 = vld [vmem:[#allocation5 + $0x1064] sm:$0xf0] }
 0x43a   :  { %6342 = vmatpush.bf16.msra.mxu2 %v13408_v46  ;;  %v5290_v0 = vadd.f32 %v5289_v45, %v5276_v37  ;;  %v16441_v46 = vld [vmem:[#allocation5 + $0xfa4] sm:$0xf]  ;;  %v16482_v37 = vld [vmem:[#allocation5 + $0x10e4] sm:$0xf0]  ;;  %v13787_v45 = vld [vmem:[#allocation5 + $0x1160] sm:$0xf] }
 0x43b   :  { %6355 = vmatpush.bf16.msra.mxu3 %v13472_v27  ;;  %v13565_v27 = vld [vmem:[#allocation5 + $0xfa8] sm:$0xf0] }
 0x43c   :  { %6368 = vmatpush.bf16.msrb.mxu0 %v13536_v1  ;;  %v16407_v1 = vld [vmem:[#allocation5 + $0xe94] sm:$0xf]  ;;  %v5303_v62 = vadd.f32 %v5302_v2, %v5290_v0 }
 0x43d   :  { %6381 = vmatpush.bf16.msrb.mxu1 %v13600_v31  ;;  %v5304_v31 = vpop.f32.mrf.mxu0 }
 0x43e   :  { %6343 = vmatpush.bf16.msra.mxu2 %v13400_v9  ;;  %v13568_v9 = vor.u32 %v16441_v46, %v13565_v27  ;;  %v5316_v52 = vadd.f32 %v5315_v14, %v5303_v62  ;;  %v16516_v14 = vld [vmem:[#allocation5 + $0x11f4] sm:$0xf0]  ;;  %v16514_v46 = vld [vmem:[#allocation5 + $0x11e4] sm:$0xf0]  ;;  %v13724_v27 = vor.u32 %v16482_v37, %v13723_v50  ;;  %v13779_v62 = vld [vmem:[#allocation5 + $0x1150] sm:$0xf] }
 0x43f   :  { %6356 = vmatpush.bf16.msra.mxu3 %v13464_v54  ;;  %v16439_v54 = vld [vmem:[#allocation5 + $0xf94] sm:$0xf]  ;;  %v5317_v40 = vpop.f32.mrf.mxu1  ;;  %v13860_v0 = vor.u32 %v16516_v14, %v13859_v16  ;;  %v13780_v22 = vor.u32 %v16496_v49, %v13779_v62  ;;  %v13619_v37 = vld [vmem:[#allocation5 + $0x1010] sm:$0xf]  ;;  %v16454_v62 = vld [vmem:[#allocation5 + $0x1004] sm:$0xf0] }
 0x440   :  { %6369 = vmatpush.bf16.msrb.mxu0 %v13528_v30  ;;  %v13432_v30 = vor.u32 %v16407_v1, %v13429_v58  ;;  %v17784_v42 = vadd.f32 %v5316_v52, %v17750_v57  ;;  %v13560_v18 = vor.u32 %v16439_v54, %v13557_v38  ;;  %v5278_v20 = vpop.f32.mrf.mxu2  ;;  %v13668_v57 = vor.u32 %v16468_v36, %v13667_v43  ;;  %v13715_v1 = vld [vmem:[#allocation5 + $0x10d0] sm:$0xf]  ;;  %v16480_v58 = vld [vmem:[#allocation5 + $0x10d4] sm:$0xf0]  ;;  %v16462_v52 = vld [vmem:[#allocation5 + $0x1044] sm:$0xf0] }
 0x441   :  { %6382 = vmatpush.bf16.msrb.mxu1 %v13592_v59  ;;  %v13421_v59 = vld [vmem:[#allocation5 + $0xe88] sm:$0xf0]  ;;  %v5291_v2 = vpop.f32.mrf.mxu3  ;;  %v16512_v54 = vld [vmem:[#allocation5 + $0x11d4] sm:$0xf0]  ;;  %v13716_v38 = vor.u32 %v16480_v58, %v13715_v1  ;;  %v13763_v43 = vld [vmem:[#allocation5 + $0x1130] sm:$0xf] }
 0x442   :  { %6344 = vmatpush.bf16.msra.mxu2 %v13392_v13  ;;  %v16421_v13 = vld [vmem:[#allocation5 + $0xf04] sm:$0xf]  ;;  %v13764_v5 = vor.u32 %v16492_v56, %v13763_v43  ;;  %v13627_v20 = vld [vmem:[#allocation5 + $0x1020] sm:$0xf]  ;;  %v16458_v2 = vld [vmem:[#allocation5 + $0x1024] sm:$0xf0] }
 0x443   :  { %6357 = vmatpush.bf16.msra.mxu3 %v13456_v17  ;;  %v13485_v17 = vld [vmem:[#allocation5 + $0xf08] sm:$0xf0]  ;;  %v13675_v49 = vld [vmem:[#allocation5 + $0x1080] sm:$0xf] }
 0x444   :  { %6370 = vmatpush.bf16.msrb.mxu0 %v13520_v35  ;;  %v13731_v35 = vld [vmem:[#allocation5 + $0x10f0] sm:$0xf]  ;;  %v13488_v55 = vor.u32 %v16421_v13, %v13485_v17  ;;  %v16476_v17 = vld [vmem:[#allocation5 + $0x10b4] sm:$0xf0] }
 0x445   :  { %6383 = vmatpush.bf16.msrb.mxu1 %v13584_v53  ;;  %v13360_v53 = vor.u32 %v16389_v19, %v13357_v8  ;;  %v16510_v8 = vld [vmem:[#allocation5 + $0x11c4] sm:$0xf0]  ;;  %v13699_v13 = vld [vmem:[#allocation5 + $0x10b0] sm:$0xf] }
 0x446   :  { %6345 = vmatpush.bf16.msra.mxu2 %v13384_v3  ;;  %v13424_v3 = vor.u32 %v16405_v29, %v13421_v59  ;;  %v16460_v59 = vld [vmem:[#allocation5 + $0x1034] sm:$0xf0]  ;;  %v13700_v21 = vor.u32 %v16476_v17, %v13699_v13  ;;  %v16502_v13 = vld [vmem:[#allocation5 + $0x1184] sm:$0xf0] }
 0x447   :  { %6358 = vmatpush.bf16.msra.mxu3 %v13448_v25  ;;  %v16437_v25 = vld [vmem:[#allocation5 + $0xf84] sm:$0xf] }
 0x448   :  { %6371 = vmatpush.bf16.msrb.mxu0 %v13512_v7  ;;  %v13732_v7 = vor.u32 %v16484_v11, %v13731_v35  ;;  %v13552_v28 = vor.u32 %v16437_v25, %v13549_v24  ;;  %v16508_v11 = vld [vmem:[#allocation5 + $0x11b4] sm:$0xf0]  ;;  %v16474_v25 = vld [vmem:[#allocation5 + $0x10a4] sm:$0xf0]  ;;  %v13755_v24 = vld [vmem:[#allocation5 + $0x1120] sm:$0xf] }
 0x449   :  { %6384 = vmatpush.bf16.msrb.mxu1 %v13576_v32  ;;  %v16498_v32 = vld [vmem:[#allocation5 + $0x1164] sm:$0xf0] }
 0x44a   :  { %6346 = vmatpush.bf16.msra.mxu2 %v13376_v39  ;;  %v13660_v39 = vor.u32 %v16466_v34, %v13659_v6  ;;  %v13788_v12 = vor.u32 %v16498_v32, %v13787_v45  ;;  %v16506_v6 = vld [vmem:[#allocation5 + $0x11a4] sm:$0xf0]  ;;  %v16456_v45 = vld [vmem:[#allocation5 + $0x1014] sm:$0xf0]  ;;  %v13683_v32 = vld [vmem:[#allocation5 + $0x1090] sm:$0xf] }
 0x44b   :  { %6359 = vmatpush.bf16.msra.mxu3 %v13440_v33  ;;  %v13851_v33 = vld [vmem:[#allocation5 + $0x11e0] sm:$0xf]  ;;  %v13620_v58 = vor.u32 %v16456_v45, %v13619_v37  ;;  %v16463_v37 = vld [vmem:[#allocation5 + $0x1054] sm:$0xf] }
 0x44c   :  { %6372 = vmatpush.bf16.msrb.mxu0 %v13504_v41  ;;  %v13651_v41 = vld [vmem:[#allocation5 + $0x1050] sm:$0xf]  ;;  %v13852_v61 = vor.u32 %v16514_v46, %v13851_v33  ;;  %v16488_v33 = vld [vmem:[#allocation5 + $0x1114] sm:$0xf0] }
 0x44d   :  { %6385 = vmatpush.bf16.msrb.mxu1 %v13568_v9  ;;  %v13652_v31 = vor.u32 %v16464_v60, %v13651_v41  ;;  %v13843_v9 = vld [vmem:[#allocation5 + $0x11d0] sm:$0xf]  ;;  %v16504_v41 = vld [vmem:[#allocation5 + $0x1194] sm:$0xf0]  ;;  %v13611_v60 = vld [vmem:[#allocation5 + $0x1000] sm:$0xf] }
 0x44e   :  { %6347 = vmatpush.bf16.msra.mxu2 %v13368_v51  ;;  %v13707_v51 = vld [vmem:[#allocation5 + $0x10c0] sm:$0xf]  ;;  %v13844_v19 = vor.u32 %v16512_v54, %v13843_v9 }
 0x44f   :  { %6360 = vmatpush.bf16.msra.mxu3 %v13432_v30  ;;  %v16494_v30 = vld [vmem:[#allocation5 + $0x1144] sm:$0xf0]  ;;  %v13708_v29 = vor.u32 %v16478_v63, %v13707_v51  ;;  %v16467_v51 = vld [vmem:[#allocation5 + $0x1074] sm:$0xf]  ;;  %v13669_v63 = vld [vmem:[#allocation5 + $0x1078] sm:$0xf0] }
 0x450   :  { %6373 = vmatpush.bf16.msrb.mxu0 %v13496_v15  ;;  %v13635_v15 = vld [vmem:[#allocation5 + $0x1030] sm:$0xf] }
 0x451   :  { %6386 = vmatpush.bf16.msrb.mxu1 %v13560_v18  ;;  %v13636_v35 = vor.u32 %v16460_v59, %v13635_v15  ;;  %v13827_v18 = vld [vmem:[#allocation5 + $0x11b0] sm:$0xf]  ;;  %v13797_v15 = vld [vmem:[#allocation5 + $0x1178] sm:$0xf0]  ;;  %v13803_v59 = vld [vmem:[#allocation5 + $0x1180] sm:$0xf] }
 0x452   :  { %6348 = vmatpush.bf16.msra.mxu2 %v13360_v53  ;;  %v13691_v53 = vld [vmem:[#allocation5 + $0x10a0] sm:$0xf]  ;;  %v13828_v16 = vor.u32 %v16508_v11, %v13827_v18  ;;  %v16515_v11 = vld [vmem:[#allocation5 + $0x11f4] sm:$0xf] }
 0x453   :  { %6361 = vmatpush.bf16.msra.mxu3 %v13424_v3  ;;  %v13692_v50 = vor.u32 %v16474_v25, %v13691_v53  ;;  %v13661_v53 = vld [vmem:[#allocation5 + $0x1068] sm:$0xf0] }
 0x454   :  { %6374 = vmatpush.bf16.msrb.mxu0 %v13488_v55  ;;  %v5354_v36 = vpop.f32.mrf.mxu0  ;;  %v16490_v55 = vld [vmem:[#allocation5 + $0x1124] sm:$0xf0]  ;;  %v13725_v25 = vld [vmem:[#allocation5 + $0x10e8] sm:$0xf0] }
 0x455   :  { %6387 = vmatpush.bf16.msrb.mxu1 %v13552_v28  ;;  %6349 = vmatmul.bf16.vlgmr.msra.gmra.mxu2 %v5961_v26  ;;  %v13643_v26 = vld [vmem:[#allocation5 + $0x1040] sm:$0xf]  ;;  %v5367_v3 = vpop.f32.mrf.mxu1  ;;  %v13756_v28 = vor.u32 %v16490_v55, %v13755_v24 }
 0x456   :  { %6796 = vmatpush.bf16.msrb.mxu2 %v13668_v57  ;;  %6362 = vmatmul.bf16.vlgmr.msra.gmra.mxu3 %v5962_v48  ;;  %v13771_v48 = vld [vmem:[#allocation5 + $0x1140] sm:$0xf]  ;;  %v13644_v47 = vor.u32 %v16462_v52, %v13643_v26  ;;  %v6395_v26 = vld [vmem:[#allocation4 + $0x8] sm:$0x11] }
 0x457   :  { %6809 = vmatpush.bf16.msrb.mxu3 %v13732_v7  ;;  %6375 = vmatmul.bf16.vlgmr.msrb.gmra.mxu0 %v5963_v44  ;;  %v13835_v44 = vld [vmem:[#allocation5 + $0x11c0] sm:$0xf]  ;;  %v13772_v40 = vor.u32 %v16494_v30, %v13771_v48  ;;  %v13628_v7 = vor.u32 %v16458_v2, %v13627_v20  ;;  %v6464_v17 = vunpack.c.l.b16 %v6395_v26  ;;  %v6465_v43 = vunpack.c.h.b16 %v6395_v26 }
 0x458   :  { %6822 = vmatpush.bf16.msra.mxu0 %v13796_v23  ;;  %6388 = vmatmul.bf16.vlgmr.msrb.gmra.mxu1 %v5964_v10  ;;  %v13836_v10 = vor.u32 %v16510_v8, %v13835_v44  ;;  %v5328_v57 = vpop.f32.mrf.mxu2  ;;  %v13819_v23 = vld [vmem:[#allocation5 + $0x11a0] sm:$0xf]  ;;  %v13733_v44 = vld [vmem:[#allocation5 + $0x10f8] sm:$0xf0]  ;;  %v16499_v8 = vld [vmem:[#allocation5 + $0x1174] sm:$0xf]  ;;  %v13804_v2 = vor.u32 %v16502_v13, %v13803_v59 }
 0x459   :  { %6835 = vmatpush.bf16.msra.mxu1 %v13860_v0  ;;  %v5341_v14 = vpop.f32.mrf.mxu3  ;;  %v16472_v0 = vld [vmem:[#allocation5 + $0x1094] sm:$0xf0]  ;;  %v6396_v48 = vld [vmem:[#allocation4 + $0x20] sm:$0x11]  ;;  %v13800_v20 = vor.u32 %v16499_v8, %v13797_v15  ;;  %v17797_v55 = vpack.c.b16 %v6464_v17, %v6464_v17  ;;  %v13701_v8 = vld [vmem:[#allocation5 + $0x10b8] sm:$0xf0] }
 0x45a   :  { %6797 = vmatpush.bf16.msrb.mxu2 %v13660_v39  ;;  %v5342_v34 = vadd.f32 %v5341_v14, %v5328_v57  ;;  %v13747_v39 = vld [vmem:[#allocation5 + $0x1110] sm:$0xf]  ;;  %v13684_v9 = vor.u32 %v16472_v0, %v13683_v32  ;;  %v6467_v24 = vunpack.c.h.b16 %v6396_v48  ;;  %v17799_v57 = vpack.c.b16 %v6465_v43, %v6465_v43  ;;  %v13789_v14 = vld [vmem:[#allocation5 + $0x1168] sm:$0xf0]  ;;  %v13653_v32 = vld [vmem:[#allocation5 + $0x1058] sm:$0xf0] }
 0x45b   :  { %6810 = vmatpush.bf16.msrb.mxu3 %v13724_v27  ;;  %v13820_v27 = vor.u32 %v16506_v6, %v13819_v23  ;;  %v13748_v54 = vor.u32 %v16488_v33, %v13747_v39  ;;  %v16479_v0 = vld [vmem:[#allocation5 + $0x10d4] sm:$0xf]  ;;  %v13717_v39 = vld [vmem:[#allocation5 + $0x10d8] sm:$0xf0] }
 0x45c   :  { %6823 = vmatpush.bf16.msra.mxu0 %v13788_v12  ;;  %v5355_v46 = vadd.f32 %v5354_v36, %v5342_v34  ;;  %v13811_v12 = vld [vmem:[#allocation5 + $0x1190] sm:$0xf]  ;;  %v5356_v1 = vpop.f32.mrf.mxu0  ;;  %v17803_v33 = vpack.c.b16 %v6467_v24, %v6467_v24  ;;  %v16507_v43 = vld [vmem:[#allocation5 + $0x11b4] sm:$0xf] }
 0x45d   :  { %6836 = vmatpush.bf16.msra.mxu1 %v13852_v61  ;;  %v16470_v61 = vld [vmem:[#allocation5 + $0x1084] sm:$0xf0]  ;;  %v5369_v52 = vpop.f32.mrf.mxu1  ;;  %v16511_v1 = vld [vmem:[#allocation5 + $0x11d4] sm:$0xf] }
 0x45e   :  { %6798 = vmatpush.bf16.msrb.mxu2 %v13652_v31  ;;  %v5368_v31 = vadd.f32 %v5367_v3, %v5355_v46  ;;  %v16481_v3 = vld [vmem:[#allocation5 + $0x10e4] sm:$0xf]  ;;  %v16495_v46 = vld [vmem:[#allocation5 + $0x1154] sm:$0xf] }
 0x45f   :  { %6811 = vmatpush.bf16.msrb.mxu3 %v13716_v38  ;;  %v13739_v38 = vld [vmem:[#allocation5 + $0x1100] sm:$0xf]  ;;  %v13728_v34 = vor.u32 %v16481_v3, %v13725_v25 }
 0x460   :  { %6824 = vmatpush.bf16.msra.mxu0 %v13780_v22  ;;  %v16486_v22 = vld [vmem:[#allocation5 + $0x1104] sm:$0xf0]  ;;  %v17795_v30 = vadd.f32 %v5368_v31, %v17761_v4  ;;  %v6466_v4 = vunpack.c.l.b16 %v6396_v48  ;;  %v16477_v31 = vld [vmem:[#allocation5 + $0x10c4] sm:$0xf]  ;;  %v16459_v48 = vld [vmem:[#allocation5 + $0x1034] sm:$0xf] }
 0x461   :  { %6837 = vmatpush.bf16.msra.mxu1 %v13844_v19  ;;  %v13812_v19 = vor.u32 %v16504_v41, %v13811_v12  ;;  %v5343_v56 = vpop.f32.mrf.mxu3  ;;  %v13740_v36 = vor.u32 %v16486_v22, %v13739_v38  ;;  %v13656_v41 = vor.u32 %v16463_v37, %v13653_v32  ;;  %v13773_v38 = vld [vmem:[#allocation5 + $0x1148] sm:$0xf0]  ;;  %v13749_v32 = vld [vmem:[#allocation5 + $0x1118] sm:$0xf0] }
 0x462   :  { %6799 = vmatpush.bf16.msrb.mxu2 %v13644_v47  ;;  %v16483_v47 = vld [vmem:[#allocation5 + $0x10f4] sm:$0xf]  ;;  %v17801_v23 = vpack.c.b16 %v6466_v4, %v6466_v4  ;;  %v13829_v56 = vld [vmem:[#allocation5 + $0x11b8] sm:$0xf0] }
 0x463   :  { %6812 = vmatpush.bf16.msrb.mxu3 %v13708_v29  ;;  %v5330_v29 = vpop.f32.mrf.mxu2  ;;  %v13736_v18 = vor.u32 %v16483_v47, %v13733_v44  ;;  %v13637_v47 = vld [vmem:[#allocation5 + $0x1038] sm:$0xf0]  ;;  %v16475_v44 = vld [vmem:[#allocation5 + $0x10b4] sm:$0xf] }
 0x464   :  { %6825 = vmatpush.bf16.msra.mxu0 %v13772_v40  ;;  %v13612_v40 = vor.u32 %v16454_v62, %v13611_v60  ;;  %v13720_v60 = vor.u32 %v16479_v0, %v13717_v39  ;;  %v16461_v62 = vld [vmem:[#allocation5 + $0x1044] sm:$0xf]  ;;  %v16491_v29 = vld [vmem:[#allocation5 + $0x1134] sm:$0xf]  ;;  %v13640_v13 = vor.u32 %v16459_v48, %v13637_v47  ;;  %v13704_v17 = vor.u32 %v16475_v44, %v13701_v8  ;;  %v14051_v48 = vld [vmem:[#allocation5 + $0x1370] sm:$0xf] }
 0x465   :  { %6838 = vmatpush.bf16.msra.mxu1 %v13836_v10  ;;  %v13676_v10 = vor.u32 %v16470_v61, %v13675_v49  ;;  %v13645_v61 = vld [vmem:[#allocation5 + $0x1048] sm:$0xf0] }
 0x466   :  { %6800 = vmatpush.bf16.msrb.mxu2 %v13636_v35  ;;  %v13672_v35 = vor.u32 %v16467_v51, %v13669_v63  ;;  %v13648_v26 = vor.u32 %v16461_v62, %v13645_v61  ;;  %v16509_v51 = vld [vmem:[#allocation5 + $0x11c4] sm:$0xf]  ;;  %v13837_v63 = vld [vmem:[#allocation5 + $0x11c8] sm:$0xf0] }
 0x467   :  { %6813 = vmatpush.bf16.msrb.mxu3 %v13700_v21  ;;  %v13861_v21 = vld [vmem:[#allocation5 + $0x11f8] sm:$0xf0]  ;;  %v13840_v59 = vor.u32 %v16509_v51, %v13837_v63  ;;  %v16469_v62 = vld [vmem:[#allocation5 + $0x1084] sm:$0xf]  ;;  %v16548_v63 = vld [vmem:[#allocation5 + $0x12f4] sm:$0xf0] }
 0x468   :  { %6826 = vmatpush.bf16.msra.mxu0 %v13764_v5  ;;  %v16465_v5 = vld [vmem:[#allocation5 + $0x1064] sm:$0xf] }
 0x469   :  { %6839 = vmatpush.bf16.msra.mxu1 %v13828_v16  ;;  %v16497_v16 = vld [vmem:[#allocation5 + $0x1164] sm:$0xf]  ;;  %v13664_v6 = vor.u32 %v16465_v5, %v13661_v53  ;;  %v13757_v5 = vld [vmem:[#allocation5 + $0x1128] sm:$0xf0]  ;;  %v13832_v53 = vor.u32 %v16507_v43, %v13829_v56 }
 0x46a   :  { %6801 = vmatpush.bf16.msrb.mxu2 %v13628_v7  ;;  %v13864_v7 = vor.u32 %v16515_v11, %v13861_v21  ;;  %v13792_v45 = vor.u32 %v16497_v16, %v13789_v14  ;;  %v13693_v11 = vld [vmem:[#allocation5 + $0x10a8] sm:$0xf0]  ;;  %v16489_v21 = vld [vmem:[#allocation5 + $0x1124] sm:$0xf] }
 0x46b   :  { %6814 = vmatpush.bf16.msrb.mxu3 %v13692_v50  ;;  %v16513_v50 = vld [vmem:[#allocation5 + $0x11e4] sm:$0xf]  ;;  %v13821_v14 = vld [vmem:[#allocation5 + $0x11a8] sm:$0xf0] }
 0x46c   :  { %6827 = vmatpush.bf16.msra.mxu0 %v13756_v28  ;;  %v13853_v28 = vld [vmem:[#allocation5 + $0x11e8] sm:$0xf0]  ;;  %v16505_v16 = vld [vmem:[#allocation5 + $0x11a4] sm:$0xf] }
 0x46d   :  { %6840 = vmatpush.bf16.msra.mxu1 %v13820_v27  ;;  %v13781_v27 = vld [vmem:[#allocation5 + $0x1158] sm:$0xf0]  ;;  %v13856_v12 = vor.u32 %v16513_v50, %v13853_v28  ;;  %v16471_v50 = vld [vmem:[#allocation5 + $0x1094] sm:$0xf]  ;;  %v13824_v39 = vor.u32 %v16505_v16, %v13821_v14  ;;  %v16528_v16 = vld [vmem:[#allocation5 + $0x1254] sm:$0xf0] }
 0x46e   :  { %6802 = vmatpush.bf16.msrb.mxu2 %v13620_v58  ;;  %v13845_v58 = vld [vmem:[#allocation5 + $0x11d8] sm:$0xf0]  ;;  %v13784_v49 = vor.u32 %v16495_v46, %v13781_v27  ;;  %v16503_v46 = vld [vmem:[#allocation5 + $0x1194] sm:$0xf]  ;;  %v13971_v14 = vld [vmem:[#allocation5 + $0x12d0] sm:$0xf] }
 0x46f   :  { %6815 = vmatpush.bf16.msrb.mxu3 %v13684_v9  ;;  %v13709_v9 = vld [vmem:[#allocation5 + $0x10c8] sm:$0xf0]  ;;  %v13848_v22 = vor.u32 %v16511_v1, %v13845_v58  ;;  %v13685_v28 = vld [vmem:[#allocation5 + $0x1098] sm:$0xf0]  ;;  %v16453_v1 = vld [vmem:[#allocation5 + $0x1004] sm:$0xf] }
 0x470   :  { %6828 = vmatpush.bf16.msra.mxu0 %v13748_v54  ;;  %v16493_v54 = vld [vmem:[#allocation5 + $0x1144] sm:$0xf]  ;;  %v13712_v52 = vor.u32 %v16477_v31, %v13709_v9  ;;  %v13813_v27 = vld [vmem:[#allocation5 + $0x1198] sm:$0xf0]  ;;  %v13613_v58 = vld [vmem:[#allocation5 + $0x1008] sm:$0xf0] }
 0x471   :  { %6841 = vmatpush.bf16.msra.mxu1 %v13812_v19  ;;  %v13776_v19 = vor.u32 %v16493_v54, %v13773_v38  ;;  %v13677_v31 = vld [vmem:[#allocation5 + $0x1088] sm:$0xf0]  ;;  %v16485_v9 = vld [vmem:[#allocation5 + $0x1104] sm:$0xf]  ;;  %v13816_v51 = vor.u32 %v16503_v46, %v13813_v27  ;;  %v13616_v8 = vor.u32 %v16453_v1, %v13613_v58  ;;  %v16526_v46 = vld [vmem:[#allocation5 + $0x1244] sm:$0xf0] }
 0x472   :  { %6803 = vmatpush.bf16.msrb.mxu2 %v13612_v40  ;;  %v13765_v40 = vld [vmem:[#allocation5 + $0x1138] sm:$0xf0]  ;;  %v13741_v54 = vld [vmem:[#allocation5 + $0x1108] sm:$0xf0]  ;;  %v16542_v27 = vld [vmem:[#allocation5 + $0x12c4] sm:$0xf0] }
 0x473   :  { %6816 = vmatpush.bf16.msrb.mxu3 %v13676_v10  ;;  %v16457_v10 = vld [vmem:[#allocation5 + $0x1024] sm:$0xf]  ;;  %v13768_v4 = vor.u32 %v16491_v29, %v13765_v40  ;;  %v13680_v29 = vor.u32 %v16469_v62, %v13677_v31  ;;  %v14091_v1 = vld [vmem:[#allocation5 + $0x13c0] sm:$0xf]  ;;  %v13955_v31 = vld [vmem:[#allocation5 + $0x12b0] sm:$0xf] }
 0x474   :  { %6829 = vmatpush.bf16.msra.mxu0 %v13740_v36  ;;  %v5813_v15 = vpop.f32.mrf.mxu0  ;;  %v16501_v40 = vld [vmem:[#allocation5 + $0x1184] sm:$0xf] }
 0x475   :  { %6842 = vmatpush.bf16.msra.mxu1 %v13804_v2  ;;  %6804 = vmatmul.bf16.vlgmr.msrb.gmra.mxu2 %v17797_v55  ;;  %v5826_v36 = vpop.f32.mrf.mxu1 }
 0x476   :  { %6848 = vmatpush.bf16.msra.mxu2 %v13672_v35  ;;  %6817 = vmatmul.bf16.vlgmr.msrb.gmra.mxu3 %v17799_v57  ;;  %v13629_v35 = vld [vmem:[#allocation5 + $0x1028] sm:$0xf0] }
 0x477   :  { %6861 = vmatpush.bf16.msra.mxu3 %v13736_v18  ;;  %6830 = vmatmul.bf16.vlgmr.msra.gmra.mxu0 %v17801_v23  ;;  %v16473_v18 = vld [vmem:[#allocation5 + $0x10a4] sm:$0xf]  ;;  %v13632_v25 = vor.u32 %v16457_v10, %v13629_v35  ;;  %v13915_v10 = vld [vmem:[#allocation5 + $0x1260] sm:$0xf] }
 0x478   :  { %6874 = vmatpush.bf16.msrb.mxu0 %v13800_v20  ;;  %6843 = vmatmul.bf16.vlgmr.msra.gmra.mxu1 %v17803_v33  ;;  %v5787_v20 = vpop.f32.mrf.mxu2  ;;  %v13696_v24 = vor.u32 %v16473_v18, %v13693_v11  ;;  %v16546_v18 = vld [vmem:[#allocation5 + $0x12e4] sm:$0xf0]  ;;  %v14043_v11 = vld [vmem:[#allocation5 + $0x1360] sm:$0xf] }
 0x479   :  { %6887 = vmatpush.bf16.msrb.mxu1 %v13864_v7  ;;  %v5800_v2 = vpop.f32.mrf.mxu3  ;;  %v16455_v7 = vld [vmem:[#allocation5 + $0x1014] sm:$0xf] }
 0x47a   :  { %6849 = vmatpush.bf16.msra.mxu2 %v13664_v6  ;;  %v5801_v3 = vadd.f32 %v5800_v2, %v5787_v20  ;;  %v13760_v6 = vor.u32 %v16489_v21, %v13757_v5  ;;  %v16562_v21 = vld [vmem:[#allocation5 + $0x1364] sm:$0xf0]  ;;  %v14107_v2 = vld [vmem:[#allocation5 + $0x13e0] sm:$0xf] }
 0x47b   :  { %6862 = vmatpush.bf16.msra.mxu3 %v13728_v34  ;;  %v13621_v34 = vld [vmem:[#allocation5 + $0x1018] sm:$0xf0] }
 0x47c   :  { %6875 = vmatpush.bf16.msrb.mxu0 %v13792_v45  ;;  %v5814_v37 = vadd.f32 %v5813_v15, %v5801_v3  ;;  %v16487_v45 = vld [vmem:[#allocation5 + $0x1114] sm:$0xf]  ;;  %v5815_v0 = vpop.f32.mrf.mxu0  ;;  %v13805_v15 = vld [vmem:[#allocation5 + $0x1188] sm:$0xf0] }
 0x47d   :  { %6888 = vmatpush.bf16.msrb.mxu1 %v13856_v12  ;;  %v13752_v61 = vor.u32 %v16487_v45, %v13749_v32  ;;  %v13808_v35 = vor.u32 %v16501_v40, %v13805_v15  ;;  %v16576_v45 = vld [vmem:[#allocation5 + $0x13d4] sm:$0xf0]  ;;  %v16538_v40 = vld [vmem:[#allocation5 + $0x12a4] sm:$0xf0]  ;;  %v14011_v15 = vld [vmem:[#allocation5 + $0x1320] sm:$0xf] }
 0x47e   :  { %6850 = vmatpush.bf16.msra.mxu2 %v13656_v41  ;;  %v5827_v12 = vadd.f32 %v5826_v36, %v5814_v37  ;;  %v13624_v41 = vor.u32 %v16455_v7, %v13621_v34  ;;  %v16530_v36 = vld [vmem:[#allocation5 + $0x1264] sm:$0xf0]  ;;  %v16544_v7 = vld [vmem:[#allocation5 + $0x12d4] sm:$0xf0]  ;;  %v14099_v37 = vld [vmem:[#allocation5 + $0x13d0] sm:$0xf] }
 0x47f   :  { %6863 = vmatpush.bf16.msra.mxu3 %v13720_v60  ;;  %v13688_v60 = vor.u32 %v16471_v50, %v13685_v28  ;;  %v13916_v20 = vor.u32 %v16530_v36, %v13915_v10  ;;  %v16560_v34 = vld [vmem:[#allocation5 + $0x1354] sm:$0xf0]  ;;  %v13972_v32 = vor.u32 %v16544_v7, %v13971_v14  ;;  %v16570_v10 = vld [vmem:[#allocation5 + $0x13a4] sm:$0xf0]  ;;  %v13875_v36 = vld [vmem:[#allocation5 + $0x1210] sm:$0xf] }
 0x480   :  { %6876 = vmatpush.bf16.msrb.mxu0 %v13784_v49  ;;  %v5828_v49 = vpop.f32.mrf.mxu1  ;;  %v17810_v38 = vadd.f32 %v5827_v12, %v17784_v42  ;;  %v5789_v47 = vpop.f32.mrf.mxu2  ;;  %v14027_v12 = vld [vmem:[#allocation5 + $0x1340] sm:$0xf] }
 0x481   :  { %6889 = vmatpush.bf16.msrb.mxu1 %v13848_v22  ;;  %v13923_v22 = vld [vmem:[#allocation5 + $0x1270] sm:$0xf]  ;;  %v5802_v44 = vpop.f32.mrf.mxu3  ;;  %v13883_v47 = vld [vmem:[#allocation5 + $0x1220] sm:$0xf] }
 0x482   :  { %6851 = vmatpush.bf16.msra.mxu2 %v13648_v26  ;;  %v16532_v26 = vld [vmem:[#allocation5 + $0x1274] sm:$0xf0]  ;;  %v13891_v49 = vld [vmem:[#allocation5 + $0x1230] sm:$0xf]  ;;  %v16522_v44 = vld [vmem:[#allocation5 + $0x1224] sm:$0xf0] }
 0x483   :  { %6864 = vmatpush.bf16.msra.mxu3 %v13712_v52  ;;  %v13987_v52 = vld [vmem:[#allocation5 + $0x12f0] sm:$0xf]  ;;  %v13924_v42 = vor.u32 %v16532_v26, %v13923_v22  ;;  %v16556_v22 = vld [vmem:[#allocation5 + $0x1334] sm:$0xf0] }
 0x484   :  { %6877 = vmatpush.bf16.msrb.mxu0 %v13776_v19  ;;  %v16564_v19 = vld [vmem:[#allocation5 + $0x1374] sm:$0xf0]  ;;  %v13988_v43 = vor.u32 %v16548_v63, %v13987_v52 }
 0x485   :  { %6890 = vmatpush.bf16.msrb.mxu1 %v13840_v59  ;;  %v13744_v59 = vor.u32 %v16485_v9, %v13741_v54  ;;  %v14052_v56 = vor.u32 %v16564_v19, %v14051_v48  ;;  %v16540_v9 = vld [vmem:[#allocation5 + $0x12b4] sm:$0xf0]  ;;  %v14019_v54 = vld [vmem:[#allocation5 + $0x1330] sm:$0xf] }
 0x486   :  { %6852 = vmatpush.bf16.msra.mxu2 %v13640_v13  ;;  %v14115_v13 = vld [vmem:[#allocation5 + $0x13f0] sm:$0xf]  ;;  %v16572_v63 = vld [vmem:[#allocation5 + $0x13b4] sm:$0xf0]  ;;  %v13956_v48 = vor.u32 %v16540_v9, %v13955_v31  ;;  %v14020_v19 = vor.u32 %v16556_v22, %v14019_v54  ;;  %v14053_v54 = vld [vmem:[#allocation5 + $0x1378] sm:$0xf0] }
 0x487   :  { %6865 = vmatpush.bf16.msra.mxu3 %v13704_v17  ;;  %v16580_v17 = vld [vmem:[#allocation5 + $0x13f4] sm:$0xf0]  ;;  %v14059_v22 = vld [vmem:[#allocation5 + $0x1380] sm:$0xf] }
 0x488   :  { %6878 = vmatpush.bf16.msrb.mxu0 %v13768_v4  ;;  %v13979_v4 = vld [vmem:[#allocation5 + $0x12e0] sm:$0xf]  ;;  %v14116_v5 = vor.u32 %v16580_v17, %v14115_v13 }
 0x489   :  { %6891 = vmatpush.bf16.msrb.mxu1 %v13832_v53  ;;  %v16578_v53 = vld [vmem:[#allocation5 + $0x13e4] sm:$0xf0]  ;;  %v13980_v3 = vor.u32 %v16546_v18, %v13979_v4  ;;  %v14075_v17 = vld [vmem:[#allocation5 + $0x13a0] sm:$0xf]  ;;  %v16520_v4 = vld [vmem:[#allocation5 + $0x1214] sm:$0xf0] }
 0x48a   :  { %6853 = vmatpush.bf16.msra.mxu2 %v13632_v25  ;;  %v14044_v25 = vor.u32 %v16562_v21, %v14043_v11  ;;  %v14108_v50 = vor.u32 %v16578_v53, %v14107_v2  ;;  %v13939_v21 = vld [vmem:[#allocation5 + $0x1290] sm:$0xf]  ;;  %v16552_v53 = vld [vmem:[#allocation5 + $0x1314] sm:$0xf0]  ;;  %v13876_v7 = vor.u32 %v16520_v4, %v13875_v36  ;;  %v14045_v36 = vld [vmem:[#allocation5 + $0x1368] sm:$0xf0] }
 0x48b   :  { %6866 = vmatpush.bf16.msra.mxu3 %v13696_v24  ;;  %v13907_v24 = vld [vmem:[#allocation5 + $0x1250] sm:$0xf] }
 0x48c   :  { %6879 = vmatpush.bf16.msrb.mxu0 %v13760_v6  ;;  %v14035_v6 = vld [vmem:[#allocation5 + $0x1350] sm:$0xf]  ;;  %v13908_v28 = vor.u32 %v16528_v16, %v13907_v24  ;;  %v14076_v24 = vor.u32 %v16570_v10, %v14075_v17  ;;  %v16561_v10 = vld [vmem:[#allocation5 + $0x1364] sm:$0xf] }
 0x48d   :  { %6892 = vmatpush.bf16.msrb.mxu1 %v13824_v39  ;;  %v14036_v0 = vor.u32 %v16560_v34, %v14035_v6  ;;  %v13899_v39 = vld [vmem:[#allocation5 + $0x1240] sm:$0xf]  ;;  %v14003_v2 = vld [vmem:[#allocation5 + $0x1310] sm:$0xf]  ;;  %v16568_v6 = vld [vmem:[#allocation5 + $0x1394] sm:$0xf0] }
 0x48e   :  { %6854 = vmatpush.bf16.msra.mxu2 %v13624_v41  ;;  %v14100_v41 = vor.u32 %v16576_v45, %v14099_v37  ;;  %v14067_v16 = vld [vmem:[#allocation5 + $0x1390] sm:$0xf]  ;;  %v13867_v34 = vld [vmem:[#allocation5 + $0x1200] sm:$0xf] }
 0x48f   :  { %6867 = vmatpush.bf16.msra.mxu3 %v13688_v60  ;;  %v13900_v60 = vor.u32 %v16526_v46, %v13899_v39  ;;  %v13931_v39 = vld [vmem:[#allocation5 + $0x1280] sm:$0xf]  ;;  %v16534_v46 = vld [vmem:[#allocation5 + $0x1284] sm:$0xf0] }
 0x490   :  { %6880 = vmatpush.bf16.msrb.mxu0 %v13752_v61  ;;  %v16524_v61 = vld [vmem:[#allocation5 + $0x1234] sm:$0xf0] }
 0x491   :  { %6893 = vmatpush.bf16.msrb.mxu1 %v13816_v51  ;;  %v13892_v52 = vor.u32 %v16524_v61, %v13891_v49  ;;  %v14083_v51 = vld [vmem:[#allocation5 + $0x13b0] sm:$0xf]  ;;  %v16563_v49 = vld [vmem:[#allocation5 + $0x1374] sm:$0xf] }
 0x492   :  { %6855 = vmatpush.bf16.msra.mxu2 %v13616_v8  ;;  %v13947_v8 = vld [vmem:[#allocation5 + $0x12a0] sm:$0xf]  ;;  %v14084_v13 = vor.u32 %v16572_v63, %v14083_v51 }
 0x493   :  { %6868 = vmatpush.bf16.msra.mxu3 %v13680_v29  ;;  %v13948_v18 = vor.u32 %v16538_v40, %v13947_v8  ;;  %v14117_v8 = vld [vmem:[#allocation5 + $0x13f8] sm:$0xf0]  ;;  %v14056_v40 = vor.u32 %v16563_v49, %v14053_v54  ;;  %v16539_v49 = vld [vmem:[#allocation5 + $0x12b4] sm:$0xf] }
 0x494   :  { %6881 = vmatpush.bf16.msrb.mxu0 %v13744_v59  ;;  %v5865_v26 = vpop.f32.mrf.mxu0  ;;  %v16554_v59 = vld [vmem:[#allocation5 + $0x1324] sm:$0xf0] }
 0x495   :  { %6894 = vmatpush.bf16.msrb.mxu1 %v13808_v35  ;;  %6856 = vmatmul.bf16.vlgmr.msra.gmra.mxu2 %v17797_v55  ;;  %v13963_v55 = vld [vmem:[#allocation5 + $0x12c0] sm:$0xf]  ;;  %v5878_v29 = vpop.f32.mrf.mxu1  ;;  %v14012_v11 = vor.u32 %v16554_v59, %v14011_v15  ;;  %v13917_v59 = vld [vmem:[#allocation5 + $0x1268] sm:$0xf0] }
 0x496   :  { %7307 = vmatpush.bf16.msrb.mxu2 %v13924_v42  ;;  %6869 = vmatmul.bf16.vlgmr.msra.gmra.mxu3 %v17799_v57  ;;  %v16558_v57 = vld [vmem:[#allocation5 + $0x1344] sm:$0xf0]  ;;  %v13964_v58 = vor.u32 %v16542_v27, %v13963_v55  ;;  %v13995_v55 = vld [vmem:[#allocation5 + $0x1300] sm:$0xf] }
 0x497   :  { %7320 = vmatpush.bf16.msrb.mxu3 %v13988_v43  ;;  %6882 = vmatmul.bf16.vlgmr.msrb.gmra.mxu0 %v17801_v23  ;;  %v16574_v23 = vld [vmem:[#allocation5 + $0x13c4] sm:$0xf0]  ;;  %v14028_v62 = vor.u32 %v16558_v57, %v14027_v12 }
 0x498   :  { %7333 = vmatpush.bf16.msra.mxu0 %v14052_v56  ;;  %6895 = vmatmul.bf16.vlgmr.msrb.gmra.mxu1 %v17803_v33  ;;  %v14092_v33 = vor.u32 %v16574_v23, %v14091_v1  ;;  %v5839_v42 = vpop.f32.mrf.mxu2  ;;  %v13884_v56 = vor.u32 %v16522_v44, %v13883_v47  ;;  %v16550_v57 = vld [vmem:[#allocation5 + $0x1304] sm:$0xf0]  ;;  %v14068_v23 = vor.u32 %v16568_v6, %v14067_v16  ;;  %v16579_v44 = vld [vmem:[#allocation5 + $0x13f4] sm:$0xf] }
 0x499   :  { %7346 = vmatpush.bf16.msra.mxu1 %v14116_v5  ;;  %v5852_v43 = vpop.f32.mrf.mxu3  ;;  %v16536_v5 = vld [vmem:[#allocation5 + $0x1294] sm:$0xf0]  ;;  %v13996_v63 = vor.u32 %v16550_v57, %v13995_v55  ;;  %v14120_v4 = vor.u32 %v16579_v44, %v14117_v8  ;;  %v16559_v16 = vld [vmem:[#allocation5 + $0x1354] sm:$0xf]  ;;  %v14029_v55 = vld [vmem:[#allocation5 + $0x1348] sm:$0xf0] }
 0x49a   :  { %7308 = vmatpush.bf16.msrb.mxu2 %v13916_v20  ;;  %v5853_v35 = vadd.f32 %v5852_v43, %v5839_v42  ;;  %v6902_v20 = vld [vmem:[#allocation4 + $0x8] sm:$0x22]  ;;  %v16545_v42 = vld [vmem:[#allocation5 + $0x12e4] sm:$0xf] }
 0x49b   :  { %7321 = vmatpush.bf16.msrb.mxu3 %v13980_v3  ;;  %v6903_v3 = vld [vmem:[#allocation4 + $0x20] sm:$0x22]  ;;  %v6972_v37 = vunpack.c.h.b16 %v6902_v20  ;;  %v13885_v8 = vld [vmem:[#allocation5 + $0x1228] sm:$0xf0] }
 0x49c   :  { %7334 = vmatpush.bf16.msra.mxu0 %v14044_v25  ;;  %v5866_v25 = vadd.f32 %v5865_v26, %v5853_v35  ;;  %v5867_v14 = vpop.f32.mrf.mxu0  ;;  %v6973_v27 = vunpack.c.l.b16 %v6903_v3  ;;  %v6974_v31 = vunpack.c.h.b16 %v6903_v3  ;;  %v16577_v35 = vld [vmem:[#allocation5 + $0x13e4] sm:$0xf]  ;;  %v16543_v3 = vld [vmem:[#allocation5 + $0x12d4] sm:$0xf] }
 0x49d   :  { %7347 = vmatpush.bf16.msra.mxu1 %v14108_v50  ;;  %v16518_v50 = vld [vmem:[#allocation5 + $0x1204] sm:$0xf0]  ;;  %v5880_v12 = vpop.f32.mrf.mxu1  ;;  %v14037_v14 = vld [vmem:[#allocation5 + $0x1358] sm:$0xf0] }
 0x49e   :  { %7309 = vmatpush.bf16.msrb.mxu2 %v13908_v28  ;;  %v6971_v28 = vunpack.c.l.b16 %v6902_v20  ;;  %v5879_v45 = vadd.f32 %v5878_v29, %v5866_v25  ;;  %v13868_v9 = vor.u32 %v16518_v50, %v13867_v34  ;;  %v16529_v29 = vld [vmem:[#allocation5 + $0x1264] sm:$0xf]  ;;  %v17825_v17 = vpack.c.b16 %v6974_v31, %v6974_v31  ;;  %v16527_v20 = vld [vmem:[#allocation5 + $0x1254] sm:$0xf]  ;;  %v13973_v25 = vld [vmem:[#allocation5 + $0x12d8] sm:$0xf0] }
 0x49f   :  { %7322 = vmatpush.bf16.msrb.mxu3 %v13972_v32  ;;  %v13940_v32 = vor.u32 %v16536_v5, %v13939_v21  ;;  %v14109_v5 = vld [vmem:[#allocation5 + $0x13e8] sm:$0xf0]  ;;  %v13976_v34 = vor.u32 %v16543_v3, %v13973_v25  ;;  %v16575_v50 = vld [vmem:[#allocation5 + $0x13d4] sm:$0xf]  ;;  %v13941_v3 = vld [vmem:[#allocation5 + $0x1298] sm:$0xf0] }
 0x4a0   :  { %7335 = vmatpush.bf16.msra.mxu0 %v14036_v0  ;;  %v14004_v0 = vor.u32 %v16552_v53, %v14003_v2  ;;  %v17817_v1 = vadd.f32 %v5879_v45, %v17795_v30  ;;  %v5841_v61 = vpop.f32.mrf.mxu2  ;;  %v17819_v26 = vpack.c.b16 %v6971_v28, %v6971_v28  ;;  %v13932_v30 = vor.u32 %v16534_v46, %v13931_v39  ;;  %v13909_v2 = vld [vmem:[#allocation5 + $0x1258] sm:$0xf0]  ;;  %v13965_v39 = vld [vmem:[#allocation5 + $0x12c8] sm:$0xf0]  ;;  %v16557_v46 = vld [vmem:[#allocation5 + $0x1344] sm:$0xf] }
 0x4a1   :  { %7348 = vmatpush.bf16.msra.mxu1 %v14100_v41  ;;  %v16531_v41 = vld [vmem:[#allocation5 + $0x1274] sm:$0xf]  ;;  %v5854_v51 = vpop.f32.mrf.mxu3  ;;  %v14048_v53 = vor.u32 %v16561_v10, %v14045_v36  ;;  %v13912_v6 = vor.u32 %v16527_v20, %v13909_v2  ;;  %v14101_v28 = vld [vmem:[#allocation5 + $0x13d8] sm:$0xf0]  ;;  %v14040_v45 = vor.u32 %v16559_v16, %v14037_v14 }
 0x4a2   :  { %7310 = vmatpush.bf16.msrb.mxu2 %v13900_v60  ;;  %v13925_v60 = vld [vmem:[#allocation5 + $0x1278] sm:$0xf0]  ;;  %v6979_v43 = vrot.slane %v17819_v26, 1  ;;  %v16555_v31 = vld [vmem:[#allocation5 + $0x1334] sm:$0xf] }
 0x4a3   :  { %7323 = vmatpush.bf16.msrb.mxu3 %v13964_v58  ;;  %v16547_v58 = vld [vmem:[#allocation5 + $0x12f4] sm:$0xf]  ;;  %v13957_v61 = vld [vmem:[#allocation5 + $0x12b8] sm:$0xf0] }
 0x4a4   :  { %7336 = vmatpush.bf16.msra.mxu0 %v14028_v62  ;;  %v13989_v62 = vld [vmem:[#allocation5 + $0x12f8] sm:$0xf0]  ;;  %v13960_v51 = vor.u32 %v16539_v49, %v13957_v61  ;;  %v16551_v16 = vld [vmem:[#allocation5 + $0x1314] sm:$0xf]  ;;  %v16612_v49 = vld [vmem:[#allocation5 + $0x14f4] sm:$0xf0] }
 0x4a5   :  { %7349 = vmatpush.bf16.msra.mxu1 %v14092_v33  ;;  %v16566_v33 = vld [vmem:[#allocation5 + $0x1384] sm:$0xf0]  ;;  %v13992_v47 = vor.u32 %v16547_v58, %v13989_v62  ;;  %v14032_v58 = vor.u32 %v16557_v46, %v14029_v55  ;;  %v13893_v62 = vld [vmem:[#allocation5 + $0x1238] sm:$0xf0]  ;;  %v14307_v61 = vld [vmem:[#allocation5 + $0x1570] sm:$0xf] }
 0x4a6   :  { %7311 = vmatpush.bf16.msrb.mxu2 %v13892_v52  ;;  %v17821_v52 = vpack.c.b16 %v6972_v37, %v6972_v37  ;;  %v14060_v15 = vor.u32 %v16566_v33, %v14059_v22  ;;  %v16525_v37 = vld [vmem:[#allocation5 + $0x1244] sm:$0xf]  ;;  %v13877_v2 = vld [vmem:[#allocation5 + $0x1218] sm:$0xf0] }
 0x4a7   :  { %7324 = vmatpush.bf16.msrb.mxu3 %v13956_v48  ;;  %v17823_v48 = vpack.c.b16 %v6973_v27, %v6973_v27  ;;  %v14104_v27 = vor.u32 %v16575_v50, %v14101_v28  ;;  %v14005_v14 = vld [vmem:[#allocation5 + $0x1318] sm:$0xf0] }
 0x4a8   :  { %7337 = vmatpush.bf16.msra.mxu0 %v14020_v19  ;;  %v13928_v19 = vor.u32 %v16531_v41, %v13925_v60  ;;  %v16573_v41 = vld [vmem:[#allocation5 + $0x13c4] sm:$0xf]  ;;  %v14093_v60 = vld [vmem:[#allocation5 + $0x13c8] sm:$0xf0]  ;;  %v14069_v50 = vld [vmem:[#allocation5 + $0x1398] sm:$0xf0]  ;;  %v14008_v55 = vor.u32 %v16551_v16, %v14005_v14 }
 0x4a9   :  { %7350 = vmatpush.bf16.msra.mxu1 %v14084_v13  ;;  %v13981_v13 = vld [vmem:[#allocation5 + $0x12e8] sm:$0xf0]  ;;  %v14096_v22 = vor.u32 %v16573_v41, %v14093_v60  ;;  %v14179_v60 = vld [vmem:[#allocation5 + $0x1470] sm:$0xf]  ;;  %v16624_v16 = vld [vmem:[#allocation5 + $0x1554] sm:$0xf0] }
 0x4aa   :  { %7312 = vmatpush.bf16.msrb.mxu2 %v13884_v56  ;;  %v6980_v56 = vrot.slane %v17821_v52, 1  ;;  %v13984_v21 = vor.u32 %v16545_v42, %v13981_v13  ;;  %v16606_v52 = vld [vmem:[#allocation5 + $0x14c4] sm:$0xf0] }
 0x4ab   :  { %7325 = vmatpush.bf16.msrb.mxu3 %v13948_v18  ;;  %v6981_v18 = vrot.slane %v17823_v48, 1 }
 0x4ac   :  { %7338 = vmatpush.bf16.msra.mxu0 %v14012_v11  ;;  %v13920_v11 = vor.u32 %v16529_v29, %v13917_v59  ;;  %v16537_v29 = vld [vmem:[#allocation5 + $0x12a4] sm:$0xf]  ;;  %v14013_v59 = vld [vmem:[#allocation5 + $0x1328] sm:$0xf0] }
 0x4ad   :  { %7351 = vmatpush.bf16.msra.mxu1 %v14076_v24  ;;  %v6982_v24 = vrot.slane %v17825_v17, 1  ;;  %v16620_v17 = vld [vmem:[#allocation5 + $0x1534] sm:$0xf0] }
 0x4ae   :  { %7313 = vmatpush.bf16.msrb.mxu2 %v13876_v7  ;;  %v14112_v7 = vor.u32 %v16577_v35, %v14109_v5  ;;  %v16519_v5 = vld [vmem:[#allocation5 + $0x1214] sm:$0xf] }
 0x4af   :  { %7326 = vmatpush.bf16.msrb.mxu3 %v13940_v32  ;;  %v13901_v32 = vld [vmem:[#allocation5 + $0x1248] sm:$0xf0] }
 0x4b0   :  { %7339 = vmatpush.bf16.msra.mxu0 %v14004_v0  ;;  %v16541_v0 = vld [vmem:[#allocation5 + $0x12c4] sm:$0xf]  ;;  %v13904_v12 = vor.u32 %v16525_v37, %v13901_v32  ;;  %v13880_v37 = vor.u32 %v16519_v5, %v13877_v2  ;;  %v16592_v2 = vld [vmem:[#allocation5 + $0x1454] sm:$0xf0] }
 0x4b1   :  { %7352 = vmatpush.bf16.msra.mxu1 %v14068_v23  ;;  %v13968_v57 = vor.u32 %v16541_v0, %v13965_v39  ;;  %v16523_v23 = vld [vmem:[#allocation5 + $0x1234] sm:$0xf]  ;;  %v16517_v32 = vld [vmem:[#allocation5 + $0x1204] sm:$0xf]  ;;  %v13869_v0 = vld [vmem:[#allocation5 + $0x1208] sm:$0xf0] }
 0x4b2   :  { %7314 = vmatpush.bf16.msrb.mxu2 %v13868_v9  ;;  %v14021_v9 = vld [vmem:[#allocation5 + $0x1338] sm:$0xf0]  ;;  %v13896_v33 = vor.u32 %v16523_v23, %v13893_v62  ;;  %v16533_v39 = vld [vmem:[#allocation5 + $0x1284] sm:$0xf]  ;;  %v16596_v23 = vld [vmem:[#allocation5 + $0x1474] sm:$0xf0] }
 0x4b3   :  { %7327 = vmatpush.bf16.msrb.mxu3 %v13932_v30  ;;  %v16571_v30 = vld [vmem:[#allocation5 + $0x13b4] sm:$0xf]  ;;  %v14024_v44 = vor.u32 %v16555_v31, %v14021_v9  ;;  %v16628_v31 = vld [vmem:[#allocation5 + $0x1574] sm:$0xf0] }
 0x4b4   :  { %7340 = vmatpush.bf16.msra.mxu0 %v13996_v63  ;;  %v6324_v54 = vpop.f32.mrf.mxu0  ;;  %v14085_v63 = vld [vmem:[#allocation5 + $0x13b8] sm:$0xf0] }
 0x4b5   :  { %7353 = vmatpush.bf16.msra.mxu1 %v14060_v15  ;;  %7315 = vmatmul.bf16.vlgmr.msrb.gmra.mxu2 %v6979_v43  ;;  %v16553_v15 = vld [vmem:[#allocation5 + $0x1324] sm:$0xf]  ;;  %v14088_v10 = vor.u32 %v16571_v30, %v14085_v63  ;;  %v14061_v30 = vld [vmem:[#allocation5 + $0x1388] sm:$0xf0] }
 0x4b6   :  { %7359 = vmatpush.bf16.msra.mxu2 %v13928_v19  ;;  %7328 = vmatmul.bf16.vlgmr.msrb.gmra.mxu3 %v6980_v56  ;;  %v16521_v19 = vld [vmem:[#allocation5 + $0x1224] sm:$0xf]  ;;  %v14016_v20 = vor.u32 %v16553_v15, %v14013_v59  ;;  %v14235_v15 = vld [vmem:[#allocation5 + $0x14e0] sm:$0xf] }
 0x4b7   :  { %7372 = vmatpush.bf16.msra.mxu3 %v13992_v47  ;;  %7341 = vmatmul.bf16.vlgmr.msra.gmra.mxu0 %v6981_v18  ;;  %v6337_v47 = vpop.f32.mrf.mxu1 }
 0x4b8   :  { %7385 = vmatpush.bf16.msrb.mxu0 %v14056_v40  ;;  %7354 = vmatmul.bf16.vlgmr.msra.gmra.mxu1 %v6982_v24  ;;  %v13949_v40 = vld [vmem:[#allocation5 + $0x12a8] sm:$0xf0]  ;;  %v6298_v42 = vpop.f32.mrf.mxu2 }
 0x4b9   :  { %7398 = vmatpush.bf16.msrb.mxu1 %v14120_v4  ;;  %v6311_v13 = vpop.f32.mrf.mxu3  ;;  %v13888_v4 = vor.u32 %v16521_v19, %v13885_v8  ;;  %v13952_v35 = vor.u32 %v16537_v29, %v13949_v40  ;;  %v14371_v19 = vld [vmem:[#allocation5 + $0x15f0] sm:$0xf]  ;;  %v14308_v8 = vor.u32 %v16628_v31, %v14307_v61  ;;  %v14171_v29 = vld [vmem:[#allocation5 + $0x1460] sm:$0xf]  ;;  %v16594_v40 = vld [vmem:[#allocation5 + $0x1464] sm:$0xf0] }
 0x4ba   :  { %7360 = vmatpush.bf16.msra.mxu2 %v13920_v11  ;;  %v6312_v36 = vadd.f32 %v6311_v13, %v6298_v42  ;;  %v16569_v11 = vld [vmem:[#allocation5 + $0x13a4] sm:$0xf]  ;;  %v16610_v42 = vld [vmem:[#allocation5 + $0x14e4] sm:$0xf0]  ;;  %v14299_v13 = vld [vmem:[#allocation5 + $0x1560] sm:$0xf] }
 0x4bb   :  { %7373 = vmatpush.bf16.msra.mxu3 %v13984_v21  ;;  %v14077_v21 = vld [vmem:[#allocation5 + $0x13a8] sm:$0xf0] }
 0x4bc   :  { %7386 = vmatpush.bf16.msrb.mxu0 %v14048_v53  ;;  %v16535_v53 = vld [vmem:[#allocation5 + $0x1294] sm:$0xf]  ;;  %v6325_v25 = vadd.f32 %v6324_v54, %v6312_v36 }
 0x4bd   :  { %7399 = vmatpush.bf16.msrb.mxu1 %v14112_v7  ;;  %v6326_v7 = vpop.f32.mrf.mxu0 }
 0x4be   :  { %7361 = vmatpush.bf16.msra.mxu2 %v13912_v6  ;;  %v14080_v6 = vor.u32 %v16569_v11, %v14077_v21  ;;  %v6338_v28 = vadd.f32 %v6337_v47, %v6325_v25  ;;  %v16644_v47 = vld [vmem:[#allocation5 + $0x15f4] sm:$0xf0]  ;;  %v16642_v11 = vld [vmem:[#allocation5 + $0x15e4] sm:$0xf0]  ;;  %v14236_v21 = vor.u32 %v16610_v42, %v14235_v15  ;;  %v14291_v25 = vld [vmem:[#allocation5 + $0x1550] sm:$0xf] }
 0x4bf   :  { %7374 = vmatpush.bf16.msra.mxu3 %v13976_v34  ;;  %v16567_v34 = vld [vmem:[#allocation5 + $0x1394] sm:$0xf]  ;;  %v6339_v46 = vpop.f32.mrf.mxu1  ;;  %v14372_v36 = vor.u32 %v16644_v47, %v14371_v19  ;;  %v14292_v26 = vor.u32 %v16624_v16, %v14291_v25  ;;  %v14331_v47 = vld [vmem:[#allocation5 + $0x15a0] sm:$0xf]  ;;  %v16584_v15 = vld [vmem:[#allocation5 + $0x1414] sm:$0xf0] }
 0x4c0   :  { %7387 = vmatpush.bf16.msrb.mxu0 %v14040_v45  ;;  %v13944_v45 = vor.u32 %v16535_v53, %v13941_v3  ;;  %v17840_v41 = vadd.f32 %v6338_v28, %v17810_v38  ;;  %v14072_v62 = vor.u32 %v16567_v34, %v14069_v50  ;;  %v6300_v9 = vpop.f32.mrf.mxu2  ;;  %v14180_v38 = vor.u32 %v16596_v23, %v14179_v60  ;;  %v14227_v53 = vld [vmem:[#allocation5 + $0x14d0] sm:$0xf]  ;;  %v16608_v3 = vld [vmem:[#allocation5 + $0x14d4] sm:$0xf0]  ;;  %v16590_v28 = vld [vmem:[#allocation5 + $0x1444] sm:$0xf0] }
 0x4c1   :  { %7400 = vmatpush.bf16.msrb.mxu1 %v14104_v27  ;;  %v13933_v27 = vld [vmem:[#allocation5 + $0x1288] sm:$0xf0]  ;;  %v6313_v54 = vpop.f32.mrf.mxu3  ;;  %v16640_v34 = vld [vmem:[#allocation5 + $0x15d4] sm:$0xf0]  ;;  %v14228_v50 = vor.u32 %v16608_v3, %v14227_v53  ;;  %v14275_v60 = vld [vmem:[#allocation5 + $0x1530] sm:$0xf] }
 0x4c2   :  { %7362 = vmatpush.bf16.msra.mxu2 %v13904_v12  ;;  %v16549_v12 = vld [vmem:[#allocation5 + $0x1304] sm:$0xf]  ;;  %v14276_v31 = vor.u32 %v16620_v17, %v14275_v60  ;;  %v14139_v9 = vld [vmem:[#allocation5 + $0x1420] sm:$0xf]  ;;  %v16586_v54 = vld [vmem:[#allocation5 + $0x1424] sm:$0xf0] }
 0x4c3   :  { %7375 = vmatpush.bf16.msra.mxu3 %v13968_v57  ;;  %v13997_v57 = vld [vmem:[#allocation5 + $0x1308] sm:$0xf0]  ;;  %v16632_v25 = vld [vmem:[#allocation5 + $0x1594] sm:$0xf0]  ;;  %v14123_v16 = vld [vmem:[#allocation5 + $0x1400] sm:$0xf] }
 0x4c4   :  { %7388 = vmatpush.bf16.msrb.mxu0 %v14032_v58  ;;  %v14243_v58 = vld [vmem:[#allocation5 + $0x14f0] sm:$0xf]  ;;  %v14000_v63 = vor.u32 %v16549_v12, %v13997_v57  ;;  %v16604_v57 = vld [vmem:[#allocation5 + $0x14b4] sm:$0xf0]  ;;  %v14309_v60 = vld [vmem:[#allocation5 + $0x1578] sm:$0xf0] }
 0x4c5   :  { %7401 = vmatpush.bf16.msrb.mxu1 %v14096_v22  ;;  %v13872_v22 = vor.u32 %v16517_v32, %v13869_v0  ;;  %v16638_v0 = vld [vmem:[#allocation5 + $0x15c4] sm:$0xf0]  ;;  %v14211_v12 = vld [vmem:[#allocation5 + $0x14b0] sm:$0xf]  ;;  %v14315_v17 = vld [vmem:[#allocation5 + $0x1580] sm:$0xf] }
 0x4c6   :  { %7363 = vmatpush.bf16.msra.mxu2 %v13896_v33  ;;  %v13936_v33 = vor.u32 %v16533_v39, %v13933_v27  ;;  %v16588_v27 = vld [vmem:[#allocation5 + $0x1434] sm:$0xf0]  ;;  %v14212_v61 = vor.u32 %v16604_v57, %v14211_v12 }
 0x4c7   :  { %7376 = vmatpush.bf16.msra.mxu3 %v13960_v51  ;;  %v16565_v51 = vld [vmem:[#allocation5 + $0x1384] sm:$0xf] }
 0x4c8   :  { %7389 = vmatpush.bf16.msrb.mxu0 %v14024_v44  ;;  %v14244_v44 = vor.u32 %v16612_v49, %v14243_v58  ;;  %v14064_v59 = vor.u32 %v16565_v51, %v14061_v30  ;;  %v16636_v49 = vld [vmem:[#allocation5 + $0x15b4] sm:$0xf0]  ;;  %v16602_v51 = vld [vmem:[#allocation5 + $0x14a4] sm:$0xf0]  ;;  %v14267_v30 = vld [vmem:[#allocation5 + $0x1520] sm:$0xf] }
 0x4c9   :  { %7402 = vmatpush.bf16.msrb.mxu1 %v14088_v10  ;;  %v16626_v10 = vld [vmem:[#allocation5 + $0x1564] sm:$0xf0] }
 0x4ca   :  { %7364 = vmatpush.bf16.msra.mxu2 %v13888_v4  ;;  %v14172_v4 = vor.u32 %v16594_v40, %v14171_v29  ;;  %v14300_v5 = vor.u32 %v16626_v10, %v14299_v13  ;;  %v16634_v29 = vld [vmem:[#allocation5 + $0x15a4] sm:$0xf0]  ;;  %v14131_v40 = vld [vmem:[#allocation5 + $0x1410] sm:$0xf] }
 0x4cb   :  { %7377 = vmatpush.bf16.msra.mxu3 %v13952_v35  ;;  %v14363_v35 = vld [vmem:[#allocation5 + $0x15e0] sm:$0xf]  ;;  %v14195_v10 = vld [vmem:[#allocation5 + $0x1490] sm:$0xf]  ;;  %v14132_v3 = vor.u32 %v16584_v15, %v14131_v40  ;;  %v14301_v40 = vld [vmem:[#allocation5 + $0x1568] sm:$0xf0] }
 0x4cc   :  { %7390 = vmatpush.bf16.msrb.mxu0 %v14016_v20  ;;  %v14163_v20 = vld [vmem:[#allocation5 + $0x1450] sm:$0xf]  ;;  %v14364_v14 = vor.u32 %v16642_v11, %v14363_v35  ;;  %v16616_v11 = vld [vmem:[#allocation5 + $0x1514] sm:$0xf0] }
 0x4cd   :  { %7403 = vmatpush.bf16.msrb.mxu1 %v14080_v6  ;;  %v14164_v7 = vor.u32 %v16592_v2, %v14163_v20  ;;  %v14355_v6 = vld [vmem:[#allocation5 + $0x15d0] sm:$0xf]  ;;  %v14332_v20 = vor.u32 %v16634_v29, %v14331_v47  ;;  %v16625_v29 = vld [vmem:[#allocation5 + $0x1564] sm:$0xf] }
 0x4ce   :  { %7365 = vmatpush.bf16.msra.mxu2 %v13880_v37  ;;  %v14219_v37 = vld [vmem:[#allocation5 + $0x14c0] sm:$0xf]  ;;  %v14356_v32 = vor.u32 %v16640_v34, %v14355_v6  ;;  %v14259_v35 = vld [vmem:[#allocation5 + $0x1510] sm:$0xf] }
 0x4cf   :  { %7378 = vmatpush.bf16.msra.mxu3 %v13944_v45  ;;  %v16622_v45 = vld [vmem:[#allocation5 + $0x1544] sm:$0xf0]  ;;  %v14220_v39 = vor.u32 %v16606_v52, %v14219_v37  ;;  %v14323_v2 = vld [vmem:[#allocation5 + $0x1590] sm:$0xf]  ;;  %v14251_v37 = vld [vmem:[#allocation5 + $0x1500] sm:$0xf] }
 0x4d0   :  { %7391 = vmatpush.bf16.msrb.mxu0 %v14008_v55  ;;  %v14147_v55 = vld [vmem:[#allocation5 + $0x1430] sm:$0xf] }
 0x4d1   :  { %7404 = vmatpush.bf16.msrb.mxu1 %v14072_v62  ;;  %v14148_v58 = vor.u32 %v16588_v27, %v14147_v55  ;;  %v14339_v62 = vld [vmem:[#allocation5 + $0x15b0] sm:$0xf]  ;;  %v16627_v55 = vld [vmem:[#allocation5 + $0x1574] sm:$0xf] }
 0x4d2   :  { %7366 = vmatpush.bf16.msra.mxu2 %v13872_v22  ;;  %v14203_v22 = vld [vmem:[#allocation5 + $0x14a0] sm:$0xf]  ;;  %v14340_v19 = vor.u32 %v16636_v49, %v14339_v62 }
 0x4d3   :  { %7379 = vmatpush.bf16.msra.mxu3 %v13936_v33  ;;  %v14204_v42 = vor.u32 %v16602_v51, %v14203_v22  ;;  %v14373_v22 = vld [vmem:[#allocation5 + $0x15f8] sm:$0xf0]  ;;  %v14312_v51 = vor.u32 %v16627_v55, %v14309_v60  ;;  %v16603_v55 = vld [vmem:[#allocation5 + $0x14b4] sm:$0xf] }
 0x4d4   :  { %7392 = vmatpush.bf16.msrb.mxu0 %v14000_v63  ;;  %v6376_v23 = vpop.f32.mrf.mxu0  ;;  %v16618_v63 = vld [vmem:[#allocation5 + $0x1524] sm:$0xf0] }
 0x4d5   :  { %7405 = vmatpush.bf16.msrb.mxu1 %v14064_v59  ;;  %7367 = vmatmul.bf16.vlgmr.msra.gmra.mxu2 %v6979_v43  ;;  %v14155_v43 = vld [vmem:[#allocation5 + $0x1440] sm:$0xf]  ;;  %v6389_v33 = vpop.f32.mrf.mxu1  ;;  %v14268_v13 = vor.u32 %v16618_v63, %v14267_v30  ;;  %v14173_v63 = vld [vmem:[#allocation5 + $0x1468] sm:$0xf0] }
 0x4d6   :  { %7818 = vmatpush.bf16.msrb.mxu2 %v14180_v38  ;;  %7380 = vmatmul.bf16.vlgmr.msra.gmra.mxu3 %v6980_v56  ;;  %v14283_v56 = vld [vmem:[#allocation5 + $0x1540] sm:$0xf]  ;;  %v14156_v48 = vor.u32 %v16590_v28, %v14155_v43  ;;  %v16598_v28 = vld [vmem:[#allocation5 + $0x1484] sm:$0xf0] }
 0x4d7   :  { %7831 = vmatpush.bf16.msrb.mxu3 %v14244_v44  ;;  %7393 = vmatmul.bf16.vlgmr.msrb.gmra.mxu0 %v6981_v18  ;;  %v14347_v18 = vld [vmem:[#allocation5 + $0x15c0] sm:$0xf]  ;;  %v14284_v46 = vor.u32 %v16622_v45, %v14283_v56  ;;  %v16614_v45 = vld [vmem:[#allocation5 + $0x1504] sm:$0xf0] }
 0x4d8   :  { %7844 = vmatpush.bf16.msra.mxu0 %v14308_v8  ;;  %7406 = vmatmul.bf16.vlgmr.msrb.gmra.mxu1 %v6982_v24  ;;  %v14348_v24 = vor.u32 %v16638_v0, %v14347_v18  ;;  %v6350_v38 = vpop.f32.mrf.mxu2  ;;  %v14140_v8 = vor.u32 %v16586_v54, %v14139_v9  ;;  %v14187_v43 = vld [vmem:[#allocation5 + $0x1480] sm:$0xf]  ;;  %v14324_v0 = vor.u32 %v16632_v25, %v14323_v2  ;;  %v16643_v54 = vld [vmem:[#allocation5 + $0x15f4] sm:$0xf] }
 0x4d9   :  { %7857 = vmatpush.bf16.msra.mxu1 %v14372_v36  ;;  %v6363_v44 = vpop.f32.mrf.mxu3  ;;  %v16600_v36 = vld [vmem:[#allocation5 + $0x1494] sm:$0xf0]  ;;  %v14252_v49 = vor.u32 %v16614_v45, %v14251_v37  ;;  %v14376_v15 = vor.u32 %v16643_v54, %v14373_v22  ;;  %v16623_v2 = vld [vmem:[#allocation5 + $0x1554] sm:$0xf]  ;;  %v14285_v37 = vld [vmem:[#allocation5 + $0x1548] sm:$0xf0] }
 0x4da   :  { %7819 = vmatpush.bf16.msrb.mxu2 %v14172_v4  ;;  %v6364_v59 = vadd.f32 %v6363_v44, %v6350_v38  ;;  %v7413_v4 = vld [vmem:[#allocation4 + $0x8] sm:$0x44]  ;;  %v16609_v38 = vld [vmem:[#allocation5 + $0x14e4] sm:$0xf] }
 0x4db   :  { %7832 = vmatpush.bf16.msrb.mxu3 %v14236_v21  ;;  %v7414_v21 = vld [vmem:[#allocation4 + $0x20] sm:$0x44]  ;;  %v7483_v6 = vunpack.c.h.b16 %v7413_v4  ;;  %v14141_v22 = vld [vmem:[#allocation5 + $0x1428] sm:$0xf0] }
 0x4dc   :  { %7845 = vmatpush.bf16.msra.mxu0 %v14300_v5  ;;  %v6377_v5 = vadd.f32 %v6376_v23, %v6364_v59  ;;  %v6378_v53 = vpop.f32.mrf.mxu0  ;;  %v7484_v52 = vunpack.c.l.b16 %v7414_v21  ;;  %v7485_v12 = vunpack.c.h.b16 %v7414_v21  ;;  %v16641_v59 = vld [vmem:[#allocation5 + $0x15e4] sm:$0xf]  ;;  %v16607_v21 = vld [vmem:[#allocation5 + $0x14d4] sm:$0xf] }
 0x4dd   :  { %7858 = vmatpush.bf16.msra.mxu1 %v14364_v14  ;;  %v16582_v14 = vld [vmem:[#allocation5 + $0x1404] sm:$0xf0]  ;;  %v6391_v56 = vpop.f32.mrf.mxu1  ;;  %v14293_v53 = vld [vmem:[#allocation5 + $0x1558] sm:$0xf0] }
 0x4de   :  { %7820 = vmatpush.bf16.msrb.mxu2 %v14164_v7  ;;  %v7482_v7 = vunpack.c.l.b16 %v7413_v4  ;;  %v6390_v34 = vadd.f32 %v6389_v33, %v6377_v5  ;;  %v14124_v57 = vor.u32 %v16582_v14, %v14123_v16  ;;  %v16593_v33 = vld [vmem:[#allocation5 + $0x1464] sm:$0xf]  ;;  %v17859_v47 = vpack.c.b16 %v7485_v12, %v7485_v12  ;;  %v16591_v4 = vld [vmem:[#allocation5 + $0x1454] sm:$0xf]  ;;  %v14229_v5 = vld [vmem:[#allocation5 + $0x14d8] sm:$0xf0] }
 0x4df   :  { %7833 = vmatpush.bf16.msrb.mxu3 %v14228_v50  ;;  %v14196_v50 = vor.u32 %v16600_v36, %v14195_v10  ;;  %v14365_v36 = vld [vmem:[#allocation5 + $0x15e8] sm:$0xf0]  ;;  %v14232_v16 = vor.u32 %v16607_v21, %v14229_v5  ;;  %v16639_v14 = vld [vmem:[#allocation5 + $0x15d4] sm:$0xf]  ;;  %v14197_v21 = vld [vmem:[#allocation5 + $0x1498] sm:$0xf0] }
 0x4e0   :  { %7846 = vmatpush.bf16.msra.mxu0 %v14292_v26  ;;  %v14260_v26 = vor.u32 %v16616_v11, %v14259_v35  ;;  %v17851_v18 = vadd.f32 %v6390_v34, %v17817_v1  ;;  %v6352_v27 = vpop.f32.mrf.mxu2  ;;  %v17853_v23 = vpack.c.b16 %v7482_v7, %v7482_v7  ;;  %v14188_v1 = vor.u32 %v16598_v28, %v14187_v43  ;;  %v14165_v35 = vld [vmem:[#allocation5 + $0x1458] sm:$0xf0]  ;;  %v14221_v43 = vld [vmem:[#allocation5 + $0x14c8] sm:$0xf0]  ;;  %v16621_v28 = vld [vmem:[#allocation5 + $0x1544] sm:$0xf] }
 0x4e1   :  { %7859 = vmatpush.bf16.msra.mxu1 %v14356_v32  ;;  %v16595_v32 = vld [vmem:[#allocation5 + $0x1474] sm:$0xf]  ;;  %v6365_v62 = vpop.f32.mrf.mxu3  ;;  %v14304_v11 = vor.u32 %v16625_v29, %v14301_v40  ;;  %v14168_v25 = vor.u32 %v16591_v4, %v14165_v35  ;;  %v14357_v7 = vld [vmem:[#allocation5 + $0x15d8] sm:$0xf0]  ;;  %v14296_v34 = vor.u32 %v16623_v2, %v14293_v53 }
 0x4e2   :  { %7821 = vmatpush.bf16.msrb.mxu2 %v14156_v48  ;;  %v14181_v48 = vld [vmem:[#allocation5 + $0x1478] sm:$0xf0]  ;;  %v7490_v44 = vrot.slane %v17853_v23, 2  ;;  %v16619_v12 = vld [vmem:[#allocation5 + $0x1534] sm:$0xf] }
 0x4e3   :  { %7834 = vmatpush.bf16.msrb.mxu3 %v14220_v39  ;;  %v16611_v39 = vld [vmem:[#allocation5 + $0x14f4] sm:$0xf]  ;;  %v14213_v27 = vld [vmem:[#allocation5 + $0x14b8] sm:$0xf0] }
 0x4e4   :  { %7847 = vmatpush.bf16.msra.mxu0 %v14284_v46  ;;  %v14245_v46 = vld [vmem:[#allocation5 + $0x14f8] sm:$0xf0]  ;;  %v14216_v62 = vor.u32 %v16603_v55, %v14213_v27  ;;  %v16615_v2 = vld [vmem:[#allocation5 + $0x1514] sm:$0xf]  ;;  %v16676_v55 = vld [vmem:[#allocation5 + $0x16f4] sm:$0xf0] }
 0x4e5   :  { %7860 = vmatpush.bf16.msra.mxu1 %v14348_v24  ;;  %v16630_v24 = vld [vmem:[#allocation5 + $0x1584] sm:$0xf0]  ;;  %v14248_v9 = vor.u32 %v16611_v39, %v14245_v46  ;;  %v14288_v39 = vor.u32 %v16621_v28, %v14285_v37  ;;  %v14149_v46 = vld [vmem:[#allocation5 + $0x1438] sm:$0xf0]  ;;  %v14563_v27 = vld [vmem:[#allocation5 + $0x1770] sm:$0xf] }
 0x4e6   :  { %7822 = vmatpush.bf16.msrb.mxu2 %v14148_v58  ;;  %v17855_v58 = vpack.c.b16 %v7483_v6, %v7483_v6  ;;  %v14316_v30 = vor.u32 %v16630_v24, %v14315_v17  ;;  %v16589_v6 = vld [vmem:[#allocation5 + $0x1444] sm:$0xf]  ;;  %v14133_v35 = vld [vmem:[#allocation5 + $0x1418] sm:$0xf0] }
 0x4e7   :  { %7835 = vmatpush.bf16.msrb.mxu3 %v14212_v61  ;;  %v17857_v61 = vpack.c.b16 %v7484_v52, %v7484_v52  ;;  %v14360_v52 = vor.u32 %v16639_v14, %v14357_v7  ;;  %v14261_v53 = vld [vmem:[#allocation5 + $0x1518] sm:$0xf0] }
 0x4e8   :  { %7848 = vmatpush.bf16.msra.mxu0 %v14276_v31  ;;  %v14184_v31 = vor.u32 %v16595_v32, %v14181_v48  ;;  %v16637_v32 = vld [vmem:[#allocation5 + $0x15c4] sm:$0xf]  ;;  %v14349_v48 = vld [vmem:[#allocation5 + $0x15c8] sm:$0xf0]  ;;  %v14325_v14 = vld [vmem:[#allocation5 + $0x1598] sm:$0xf0]  ;;  %v14264_v37 = vor.u32 %v16615_v2, %v14261_v53 }
 0x4e9   :  { %7861 = vmatpush.bf16.msra.mxu1 %v14340_v19  ;;  %v14237_v19 = vld [vmem:[#allocation5 + $0x14e8] sm:$0xf0]  ;;  %v14352_v17 = vor.u32 %v16637_v32, %v14349_v48  ;;  %v14435_v48 = vld [vmem:[#allocation5 + $0x1670] sm:$0xf]  ;;  %v16688_v2 = vld [vmem:[#allocation5 + $0x1754] sm:$0xf0] }
 0x4ea   :  { %7823 = vmatpush.bf16.msrb.mxu2 %v14140_v8  ;;  %v7491_v8 = vrot.slane %v17855_v58, 2  ;;  %v14240_v10 = vor.u32 %v16609_v38, %v14237_v19  ;;  %v16670_v58 = vld [vmem:[#allocation5 + $0x16c4] sm:$0xf0] }
 0x4eb   :  { %7836 = vmatpush.bf16.msrb.mxu3 %v14204_v42  ;;  %v7492_v42 = vrot.slane %v17857_v61, 2 }
 0x4ec   :  { %7849 = vmatpush.bf16.msra.mxu0 %v14268_v13  ;;  %v14176_v13 = vor.u32 %v16593_v33, %v14173_v63  ;;  %v16601_v33 = vld [vmem:[#allocation5 + $0x14a4] sm:$0xf]  ;;  %v14269_v63 = vld [vmem:[#allocation5 + $0x1528] sm:$0xf0] }
 0x4ed   :  { %7862 = vmatpush.bf16.msra.mxu1 %v14332_v20  ;;  %v7493_v20 = vrot.slane %v17859_v47, 2  ;;  %v16684_v47 = vld [vmem:[#allocation5 + $0x1734] sm:$0xf0] }
 0x4ee   :  { %7824 = vmatpush.bf16.msrb.mxu2 %v14132_v3  ;;  %v14368_v3 = vor.u32 %v16641_v59, %v14365_v36  ;;  %v16583_v36 = vld [vmem:[#allocation5 + $0x1414] sm:$0xf] }
 0x4ef   :  { %7837 = vmatpush.bf16.msrb.mxu3 %v14196_v50  ;;  %v14157_v50 = vld [vmem:[#allocation5 + $0x1448] sm:$0xf0] }
 0x4f0   :  { %7850 = vmatpush.bf16.msra.mxu0 %v14260_v26  ;;  %v16605_v26 = vld [vmem:[#allocation5 + $0x14c4] sm:$0xf]  ;;  %v14160_v56 = vor.u32 %v16589_v6, %v14157_v50  ;;  %v14136_v6 = vor.u32 %v16583_v36, %v14133_v35  ;;  %v16656_v35 = vld [vmem:[#allocation5 + $0x1654] sm:$0xf0] }
 0x4f1   :  { %7863 = vmatpush.bf16.msra.mxu1 %v14324_v0  ;;  %v14224_v45 = vor.u32 %v16605_v26, %v14221_v43  ;;  %v16587_v0 = vld [vmem:[#allocation5 + $0x1434] sm:$0xf]  ;;  %v16581_v50 = vld [vmem:[#allocation5 + $0x1404] sm:$0xf]  ;;  %v14125_v26 = vld [vmem:[#allocation5 + $0x1408] sm:$0xf0] }
 0x4f2   :  { %7825 = vmatpush.bf16.msrb.mxu2 %v14124_v57  ;;  %v14277_v57 = vld [vmem:[#allocation5 + $0x1538] sm:$0xf0]  ;;  %v14152_v24 = vor.u32 %v16587_v0, %v14149_v46  ;;  %v16597_v43 = vld [vmem:[#allocation5 + $0x1484] sm:$0xf]  ;;  %v16660_v0 = vld [vmem:[#allocation5 + $0x1674] sm:$0xf0] }
 0x4f3   :  { %7838 = vmatpush.bf16.msrb.mxu3 %v14188_v1  ;;  %v16635_v1 = vld [vmem:[#allocation5 + $0x15b4] sm:$0xf]  ;;  %v14280_v54 = vor.u32 %v16619_v12, %v14277_v57  ;;  %v16692_v12 = vld [vmem:[#allocation5 + $0x1774] sm:$0xf0] }
 0x4f4   :  { %7851 = vmatpush.bf16.msra.mxu0 %v14252_v49  ;;  %v6831_v60 = vpop.f32.mrf.mxu0  ;;  %v14341_v49 = vld [vmem:[#allocation5 + $0x15b8] sm:$0xf0] }
 0x4f5   :  { %7864 = vmatpush.bf16.msra.mxu1 %v14316_v30  ;;  %7826 = vmatmul.bf16.vlgmr.msrb.gmra.mxu2 %v7490_v44  ;;  %v16617_v30 = vld [vmem:[#allocation5 + $0x1524] sm:$0xf]  ;;  %v14344_v29 = vor.u32 %v16635_v1, %v14341_v49  ;;  %v14317_v1 = vld [vmem:[#allocation5 + $0x1588] sm:$0xf0] }
 0x4f6   :  { %7870 = vmatpush.bf16.msra.mxu2 %v14184_v31  ;;  %7839 = vmatmul.bf16.vlgmr.msrb.gmra.mxu3 %v7491_v8  ;;  %v16585_v31 = vld [vmem:[#allocation5 + $0x1424] sm:$0xf]  ;;  %v14272_v4 = vor.u32 %v16617_v30, %v14269_v63  ;;  %v14491_v30 = vld [vmem:[#allocation5 + $0x16e0] sm:$0xf] }
 0x4f7   :  { %7883 = vmatpush.bf16.msra.mxu3 %v14248_v9  ;;  %7852 = vmatmul.bf16.vlgmr.msra.gmra.mxu0 %v7492_v42  ;;  %v6844_v9 = vpop.f32.mrf.mxu1 }
 0x4f8   :  { %7896 = vmatpush.bf16.msrb.mxu0 %v14312_v51  ;;  %7865 = vmatmul.bf16.vlgmr.msra.gmra.mxu1 %v7493_v20  ;;  %v14205_v51 = vld [vmem:[#allocation5 + $0x14a8] sm:$0xf0]  ;;  %v6805_v38 = vpop.f32.mrf.mxu2 }
 0x4f9   :  { %7909 = vmatpush.bf16.msrb.mxu1 %v14376_v15  ;;  %v6818_v19 = vpop.f32.mrf.mxu3  ;;  %v14144_v15 = vor.u32 %v16585_v31, %v14141_v22  ;;  %v14208_v59 = vor.u32 %v16601_v33, %v14205_v51  ;;  %v14627_v31 = vld [vmem:[#allocation5 + $0x17f0] sm:$0xf]  ;;  %v14564_v22 = vor.u32 %v16692_v12, %v14563_v27  ;;  %v14427_v33 = vld [vmem:[#allocation5 + $0x1660] sm:$0xf]  ;;  %v16658_v51 = vld [vmem:[#allocation5 + $0x1664] sm:$0xf0] }
 0x4fa   :  { %7871 = vmatpush.bf16.msra.mxu2 %v14176_v13  ;;  %v6819_v40 = vadd.f32 %v6818_v19, %v6805_v38  ;;  %v16633_v13 = vld [vmem:[#allocation5 + $0x15a4] sm:$0xf]  ;;  %v16674_v38 = vld [vmem:[#allocation5 + $0x16e4] sm:$0xf0]  ;;  %v14555_v19 = vld [vmem:[#allocation5 + $0x1760] sm:$0xf] }
 0x4fb   :  { %7884 = vmatpush.bf16.msra.mxu3 %v14240_v10  ;;  %v14333_v10 = vld [vmem:[#allocation5 + $0x15a8] sm:$0xf0] }
 0x4fc   :  { %7897 = vmatpush.bf16.msrb.mxu0 %v14304_v11  ;;  %v16599_v11 = vld [vmem:[#allocation5 + $0x1494] sm:$0xf]  ;;  %v6832_v5 = vadd.f32 %v6831_v60, %v6819_v40 }
 0x4fd   :  { %7910 = vmatpush.bf16.msrb.mxu1 %v14368_v3  ;;  %v6833_v3 = vpop.f32.mrf.mxu0 }
 0x4fe   :  { %7872 = vmatpush.bf16.msra.mxu2 %v14168_v25  ;;  %v14336_v25 = vor.u32 %v16633_v13, %v14333_v10  ;;  %v6845_v7 = vadd.f32 %v6844_v9, %v6832_v5  ;;  %v16708_v9 = vld [vmem:[#allocation5 + $0x17f4] sm:$0xf0]  ;;  %v16706_v13 = vld [vmem:[#allocation5 + $0x17e4] sm:$0xf0]  ;;  %v14492_v10 = vor.u32 %v16674_v38, %v14491_v30  ;;  %v14547_v5 = vld [vmem:[#allocation5 + $0x1750] sm:$0xf] }
 0x4ff   :  { %7885 = vmatpush.bf16.msra.mxu3 %v14232_v16  ;;  %v16631_v16 = vld [vmem:[#allocation5 + $0x1594] sm:$0xf]  ;;  %v6846_v28 = vpop.f32.mrf.mxu1  ;;  %v14628_v40 = vor.u32 %v16708_v9, %v14627_v31  ;;  %v14548_v23 = vor.u32 %v16688_v2, %v14547_v5  ;;  %v14587_v9 = vld [vmem:[#allocation5 + $0x17a0] sm:$0xf]  ;;  %v16648_v30 = vld [vmem:[#allocation5 + $0x1614] sm:$0xf0] }
 0x500   :  { %7898 = vmatpush.bf16.msrb.mxu0 %v14296_v34  ;;  %v14200_v34 = vor.u32 %v16599_v11, %v14197_v21  ;;  %v17874_v32 = vadd.f32 %v6845_v7, %v17840_v41  ;;  %v14328_v46 = vor.u32 %v16631_v16, %v14325_v14  ;;  %v6807_v57 = vpop.f32.mrf.mxu2  ;;  %v14436_v41 = vor.u32 %v16660_v0, %v14435_v48  ;;  %v14483_v11 = vld [vmem:[#allocation5 + $0x16d0] sm:$0xf]  ;;  %v16672_v21 = vld [vmem:[#allocation5 + $0x16d4] sm:$0xf0]  ;;  %v16654_v7 = vld [vmem:[#allocation5 + $0x1644] sm:$0xf0] }
 0x501   :  { %7911 = vmatpush.bf16.msrb.mxu1 %v14360_v52  ;;  %v14189_v52 = vld [vmem:[#allocation5 + $0x1488] sm:$0xf0]  ;;  %v6820_v60 = vpop.f32.mrf.mxu3  ;;  %v16704_v16 = vld [vmem:[#allocation5 + $0x17d4] sm:$0xf0]  ;;  %v14484_v14 = vor.u32 %v16672_v21, %v14483_v11  ;;  %v14531_v48 = vld [vmem:[#allocation5 + $0x1730] sm:$0xf] }
 0x502   :  { %7873 = vmatpush.bf16.msra.mxu2 %v14160_v56  ;;  %v16613_v56 = vld [vmem:[#allocation5 + $0x1504] sm:$0xf]  ;;  %v14532_v12 = vor.u32 %v16684_v47, %v14531_v48  ;;  %v14395_v57 = vld [vmem:[#allocation5 + $0x1620] sm:$0xf]  ;;  %v16650_v60 = vld [vmem:[#allocation5 + $0x1624] sm:$0xf0] }
 0x503   :  { %7886 = vmatpush.bf16.msra.mxu3 %v14224_v45  ;;  %v14253_v45 = vld [vmem:[#allocation5 + $0x1508] sm:$0xf0]  ;;  %v16696_v5 = vld [vmem:[#allocation5 + $0x1794] sm:$0xf0]  ;;  %v14379_v2 = vld [vmem:[#allocation5 + $0x1600] sm:$0xf] }
 0x504   :  { %7899 = vmatpush.bf16.msrb.mxu0 %v14288_v39  ;;  %v14499_v39 = vld [vmem:[#allocation5 + $0x16f0] sm:$0xf]  ;;  %v14256_v49 = vor.u32 %v16613_v56, %v14253_v45  ;;  %v16668_v45 = vld [vmem:[#allocation5 + $0x16b4] sm:$0xf0]  ;;  %v14565_v48 = vld [vmem:[#allocation5 + $0x1778] sm:$0xf0] }
 0x505   :  { %7912 = vmatpush.bf16.msrb.mxu1 %v14352_v17  ;;  %v14128_v17 = vor.u32 %v16581_v50, %v14125_v26  ;;  %v16702_v26 = vld [vmem:[#allocation5 + $0x17c4] sm:$0xf0]  ;;  %v14467_v56 = vld [vmem:[#allocation5 + $0x16b0] sm:$0xf]  ;;  %v14571_v47 = vld [vmem:[#allocation5 + $0x1780] sm:$0xf] }
 0x506   :  { %7874 = vmatpush.bf16.msra.mxu2 %v14152_v24  ;;  %v14192_v24 = vor.u32 %v16597_v43, %v14189_v52  ;;  %v16652_v52 = vld [vmem:[#allocation5 + $0x1634] sm:$0xf0]  ;;  %v14468_v27 = vor.u32 %v16668_v45, %v14467_v56 }
 0x507   :  { %7887 = vmatpush.bf16.msra.mxu3 %v14216_v62  ;;  %v16629_v62 = vld [vmem:[#allocation5 + $0x1584] sm:$0xf] }
 0x508   :  { %7900 = vmatpush.bf16.msrb.mxu0 %v14280_v54  ;;  %v14500_v54 = vor.u32 %v16676_v55, %v14499_v39  ;;  %v14320_v63 = vor.u32 %v16629_v62, %v14317_v1  ;;  %v16700_v55 = vld [vmem:[#allocation5 + $0x17b4] sm:$0xf0]  ;;  %v16666_v62 = vld [vmem:[#allocation5 + $0x16a4] sm:$0xf0]  ;;  %v14523_v1 = vld [vmem:[#allocation5 + $0x1720] sm:$0xf] }
 0x509   :  { %7913 = vmatpush.bf16.msrb.mxu1 %v14344_v29  ;;  %v16690_v29 = vld [vmem:[#allocation5 + $0x1764] sm:$0xf0] }
 0x50a   :  { %7875 = vmatpush.bf16.msra.mxu2 %v14144_v15  ;;  %v14428_v15 = vor.u32 %v16658_v51, %v14427_v33  ;;  %v14556_v36 = vor.u32 %v16690_v29, %v14555_v19  ;;  %v16698_v33 = vld [vmem:[#allocation5 + $0x17a4] sm:$0xf0]  ;;  %v14387_v51 = vld [vmem:[#allocation5 + $0x1610] sm:$0xf] }
 0x50b   :  { %7888 = vmatpush.bf16.msra.mxu3 %v14208_v59  ;;  %v14619_v59 = vld [vmem:[#allocation5 + $0x17e0] sm:$0xf]  ;;  %v14451_v29 = vld [vmem:[#allocation5 + $0x1690] sm:$0xf]  ;;  %v14388_v21 = vor.u32 %v16648_v30, %v14387_v51  ;;  %v14557_v51 = vld [vmem:[#allocation5 + $0x1768] sm:$0xf0] }
 0x50c   :  { %7901 = vmatpush.bf16.msrb.mxu0 %v14272_v4  ;;  %v14419_v4 = vld [vmem:[#allocation5 + $0x1650] sm:$0xf]  ;;  %v14620_v53 = vor.u32 %v16706_v13, %v14619_v59  ;;  %v16680_v13 = vld [vmem:[#allocation5 + $0x1714] sm:$0xf0] }
 0x50d   :  { %7914 = vmatpush.bf16.msrb.mxu1 %v14336_v25  ;;  %v14420_v3 = vor.u32 %v16656_v35, %v14419_v4  ;;  %v14611_v25 = vld [vmem:[#allocation5 + $0x17d0] sm:$0xf]  ;;  %v14588_v4 = vor.u32 %v16698_v33, %v14587_v9  ;;  %v16689_v33 = vld [vmem:[#allocation5 + $0x1764] sm:$0xf] }
 0x50e   :  { %7876 = vmatpush.bf16.msra.mxu2 %v14136_v6  ;;  %v14475_v6 = vld [vmem:[#allocation5 + $0x16c0] sm:$0xf]  ;;  %v14612_v50 = vor.u32 %v16704_v16, %v14611_v25  ;;  %v14515_v59 = vld [vmem:[#allocation5 + $0x1710] sm:$0xf] }
 0x50f   :  { %7889 = vmatpush.bf16.msra.mxu3 %v14200_v34  ;;  %v16686_v34 = vld [vmem:[#allocation5 + $0x1744] sm:$0xf0]  ;;  %v14476_v43 = vor.u32 %v16670_v58, %v14475_v6  ;;  %v14579_v35 = vld [vmem:[#allocation5 + $0x1790] sm:$0xf]  ;;  %v14507_v6 = vld [vmem:[#allocation5 + $0x1700] sm:$0xf] }
 0x510   :  { %7902 = vmatpush.bf16.msrb.mxu0 %v14264_v37  ;;  %v14403_v37 = vld [vmem:[#allocation5 + $0x1630] sm:$0xf] }
 0x511   :  { %7915 = vmatpush.bf16.msrb.mxu1 %v14328_v46  ;;  %v14404_v39 = vor.u32 %v16652_v52, %v14403_v37  ;;  %v14595_v46 = vld [vmem:[#allocation5 + $0x17b0] sm:$0xf]  ;;  %v16691_v37 = vld [vmem:[#allocation5 + $0x1774] sm:$0xf] }
 0x512   :  { %7877 = vmatpush.bf16.msra.mxu2 %v14128_v17  ;;  %v14459_v17 = vld [vmem:[#allocation5 + $0x16a0] sm:$0xf]  ;;  %v14596_v31 = vor.u32 %v16700_v55, %v14595_v46 }
 0x513   :  { %7890 = vmatpush.bf16.msra.mxu3 %v14192_v24  ;;  %v14460_v38 = vor.u32 %v16666_v62, %v14459_v17  ;;  %v14629_v17 = vld [vmem:[#allocation5 + $0x17f8] sm:$0xf0]  ;;  %v14568_v62 = vor.u32 %v16691_v37, %v14565_v48  ;;  %v16667_v37 = vld [vmem:[#allocation5 + $0x16b4] sm:$0xf] }
 0x514   :  { %7903 = vmatpush.bf16.msrb.mxu0 %v14256_v49  ;;  %v6883_v0 = vpop.f32.mrf.mxu0  ;;  %v16682_v49 = vld [vmem:[#allocation5 + $0x1724] sm:$0xf0] }
 0x515   :  { %7916 = vmatpush.bf16.msrb.mxu1 %v14320_v63  ;;  %7878 = vmatmul.bf16.vlgmr.msra.gmra.mxu2 %v7490_v44  ;;  %v14411_v44 = vld [vmem:[#allocation5 + $0x1640] sm:$0xf]  ;;  %v6896_v24 = vpop.f32.mrf.mxu1  ;;  %v14524_v19 = vor.u32 %v16682_v49, %v14523_v1  ;;  %v14429_v49 = vld [vmem:[#allocation5 + $0x1668] sm:$0xf0] }
 0x516   :  { %8329 = vmatpush.bf16.msrb.mxu2 %v14436_v41  ;;  %7891 = vmatmul.bf16.vlgmr.msra.gmra.mxu3 %v7491_v8  ;;  %v14539_v8 = vld [vmem:[#allocation5 + $0x1740] sm:$0xf]  ;;  %v14412_v61 = vor.u32 %v16654_v7, %v14411_v44  ;;  %v16662_v7 = vld [vmem:[#allocation5 + $0x1684] sm:$0xf0] }
 0x517   :  { %8342 = vmatpush.bf16.msrb.mxu3 %v14500_v54  ;;  %7904 = vmatmul.bf16.vlgmr.msrb.gmra.mxu0 %v7492_v42  ;;  %v14603_v42 = vld [vmem:[#allocation5 + $0x17c0] sm:$0xf]  ;;  %v14540_v28 = vor.u32 %v16686_v34, %v14539_v8  ;;  %v16678_v34 = vld [vmem:[#allocation5 + $0x1704] sm:$0xf0] }
 0x518   :  { %8355 = vmatpush.bf16.msra.mxu0 %v14564_v22  ;;  %7917 = vmatmul.bf16.vlgmr.msrb.gmra.mxu1 %v7493_v20  ;;  %v14604_v20 = vor.u32 %v16702_v26, %v14603_v42  ;;  %v6857_v41 = vpop.f32.mrf.mxu2  ;;  %v14396_v22 = vor.u32 %v16650_v60, %v14395_v57  ;;  %v14443_v44 = vld [vmem:[#allocation5 + $0x1680] sm:$0xf]  ;;  %v14580_v26 = vor.u32 %v16696_v5, %v14579_v35  ;;  %v16707_v60 = vld [vmem:[#allocation5 + $0x17f4] sm:$0xf] }
 0x519   :  { %8368 = vmatpush.bf16.msra.mxu1 %v14628_v40  ;;  %v6870_v54 = vpop.f32.mrf.mxu3  ;;  %v16664_v40 = vld [vmem:[#allocation5 + $0x1694] sm:$0xf0]  ;;  %v14508_v55 = vor.u32 %v16678_v34, %v14507_v6  ;;  %v14632_v30 = vor.u32 %v16707_v60, %v14629_v17  ;;  %v16687_v35 = vld [vmem:[#allocation5 + $0x1754] sm:$0xf]  ;;  %v14541_v6 = vld [vmem:[#allocation5 + $0x1748] sm:$0xf0] }
 0x51a   :  { %8330 = vmatpush.bf16.msrb.mxu2 %v14428_v15  ;;  %v6871_v63 = vadd.f32 %v6870_v54, %v6857_v41  ;;  %v7924_v15 = vld [vmem:[#allocation4 + $0x8] sm:$0x88]  ;;  %v16673_v41 = vld [vmem:[#allocation5 + $0x16e4] sm:$0xf] }
 0x51b   :  { %8343 = vmatpush.bf16.msrb.mxu3 %v14492_v10  ;;  %v7925_v10 = vld [vmem:[#allocation4 + $0x20] sm:$0x88]  ;;  %v7994_v25 = vunpack.c.h.b16 %v7924_v15  ;;  %v14397_v17 = vld [vmem:[#allocation5 + $0x1628] sm:$0xf0] }
 0x51c   :  { %8356 = vmatpush.bf16.msra.mxu0 %v14556_v36  ;;  %v6884_v36 = vadd.f32 %v6883_v0, %v6871_v63  ;;  %v6885_v11 = vpop.f32.mrf.mxu0  ;;  %v7995_v58 = vunpack.c.l.b16 %v7925_v10  ;;  %v7996_v56 = vunpack.c.h.b16 %v7925_v10  ;;  %v16705_v63 = vld [vmem:[#allocation5 + $0x17e4] sm:$0xf]  ;;  %v16671_v10 = vld [vmem:[#allocation5 + $0x16d4] sm:$0xf] }
 0x51d   :  { %8369 = vmatpush.bf16.msra.mxu1 %v14620_v53  ;;  %v16646_v53 = vld [vmem:[#allocation5 + $0x1604] sm:$0xf0]  ;;  %v6898_v8 = vpop.f32.mrf.mxu1  ;;  %v14549_v11 = vld [vmem:[#allocation5 + $0x1758] sm:$0xf0] }
 0x51e   :  { %8331 = vmatpush.bf16.msrb.mxu2 %v14420_v3  ;;  %v7993_v3 = vunpack.c.l.b16 %v7924_v15  ;;  %v6897_v16 = vadd.f32 %v6896_v24, %v6884_v36  ;;  %v14380_v45 = vor.u32 %v16646_v53, %v14379_v2  ;;  %v16657_v24 = vld [vmem:[#allocation5 + $0x1664] sm:$0xf]  ;;  %v17893_v9 = vpack.c.b16 %v7996_v56, %v7996_v56  ;;  %v16655_v15 = vld [vmem:[#allocation5 + $0x1654] sm:$0xf]  ;;  %v14485_v36 = vld [vmem:[#allocation5 + $0x16d8] sm:$0xf0] }
 0x51f   :  { %8344 = vmatpush.bf16.msrb.mxu3 %v14484_v14  ;;  %v14452_v14 = vor.u32 %v16664_v40, %v14451_v29  ;;  %v14621_v40 = vld [vmem:[#allocation5 + $0x17e8] sm:$0xf0]  ;;  %v14488_v2 = vor.u32 %v16671_v10, %v14485_v36  ;;  %v16703_v53 = vld [vmem:[#allocation5 + $0x17d4] sm:$0xf]  ;;  %v14453_v10 = vld [vmem:[#allocation5 + $0x1698] sm:$0xf0] }
 0x520   :  { %8357 = vmatpush.bf16.msra.mxu0 %v14548_v23  ;;  %v14516_v23 = vor.u32 %v16680_v13, %v14515_v59  ;;  %v17885_v42 = vadd.f32 %v6897_v16, %v17851_v18  ;;  %v6859_v52 = vpop.f32.mrf.mxu2  ;;  %v17887_v0 = vpack.c.b16 %v7993_v3, %v7993_v3  ;;  %v14444_v18 = vor.u32 %v16662_v7, %v14443_v44  ;;  %v14421_v59 = vld [vmem:[#allocation5 + $0x1658] sm:$0xf0]  ;;  %v14477_v44 = vld [vmem:[#allocation5 + $0x16c8] sm:$0xf0]  ;;  %v16685_v7 = vld [vmem:[#allocation5 + $0x1744] sm:$0xf] }
 0x521   :  { %8370 = vmatpush.bf16.msra.mxu1 %v14612_v50  ;;  %v16659_v50 = vld [vmem:[#allocation5 + $0x1674] sm:$0xf]  ;;  %v6872_v46 = vpop.f32.mrf.mxu3  ;;  %v14560_v13 = vor.u32 %v16689_v33, %v14557_v51  ;;  %v14424_v5 = vor.u32 %v16655_v15, %v14421_v59  ;;  %v14613_v3 = vld [vmem:[#allocation5 + $0x17d8] sm:$0xf0]  ;;  %v14552_v16 = vor.u32 %v16687_v35, %v14549_v11 }
 0x522   :  { %8332 = vmatpush.bf16.msrb.mxu2 %v14412_v61  ;;  %v14437_v61 = vld [vmem:[#allocation5 + $0x1678] sm:$0xf0]  ;;  %v8001_v54 = vrot.slane %v17887_v0, 3  ;;  %v16683_v56 = vld [vmem:[#allocation5 + $0x1734] sm:$0xf] }
 0x523   :  { %8345 = vmatpush.bf16.msrb.mxu3 %v14476_v43  ;;  %v16675_v43 = vld [vmem:[#allocation5 + $0x16f4] sm:$0xf]  ;;  %v14469_v52 = vld [vmem:[#allocation5 + $0x16b8] sm:$0xf0] }
 0x524   :  { %8358 = vmatpush.bf16.msra.mxu0 %v14540_v28  ;;  %v14501_v28 = vld [vmem:[#allocation5 + $0x16f8] sm:$0xf0]  ;;  %v14472_v46 = vor.u32 %v16667_v37, %v14469_v52  ;;  %v16679_v35 = vld [vmem:[#allocation5 + $0x1714] sm:$0xf]  ;;  %v16740_v37 = vld [vmem:[#allocation5 + $0x18f4] sm:$0xf0] }
 0x525   :  { %8371 = vmatpush.bf16.msra.mxu1 %v14604_v20  ;;  %v16694_v20 = vld [vmem:[#allocation5 + $0x1784] sm:$0xf0]  ;;  %v14504_v57 = vor.u32 %v16675_v43, %v14501_v28  ;;  %v14544_v43 = vor.u32 %v16685_v7, %v14541_v6  ;;  %v14405_v28 = vld [vmem:[#allocation5 + $0x1638] sm:$0xf0]  ;;  %v14819_v52 = vld [vmem:[#allocation5 + $0x1970] sm:$0xf] }
 0x526   :  { %8333 = vmatpush.bf16.msrb.mxu2 %v14404_v39  ;;  %v17889_v39 = vpack.c.b16 %v7994_v25, %v7994_v25  ;;  %v14572_v1 = vor.u32 %v16694_v20, %v14571_v47  ;;  %v16653_v25 = vld [vmem:[#allocation5 + $0x1644] sm:$0xf]  ;;  %v14389_v59 = vld [vmem:[#allocation5 + $0x1618] sm:$0xf0] }
 0x527   :  { %8346 = vmatpush.bf16.msrb.mxu3 %v14468_v27  ;;  %v17891_v27 = vpack.c.b16 %v7995_v58, %v7995_v58  ;;  %v14616_v58 = vor.u32 %v16703_v53, %v14613_v3  ;;  %v14517_v11 = vld [vmem:[#allocation5 + $0x1718] sm:$0xf0] }
 0x528   :  { %8359 = vmatpush.bf16.msra.mxu0 %v14532_v12  ;;  %v14440_v12 = vor.u32 %v16659_v50, %v14437_v61  ;;  %v16701_v50 = vld [vmem:[#allocation5 + $0x17c4] sm:$0xf]  ;;  %v14605_v61 = vld [vmem:[#allocation5 + $0x17c8] sm:$0xf0]  ;;  %v14581_v53 = vld [vmem:[#allocation5 + $0x1798] sm:$0xf0]  ;;  %v14520_v6 = vor.u32 %v16679_v35, %v14517_v11 }
 0x529   :  { %8372 = vmatpush.bf16.msra.mxu1 %v14596_v31  ;;  %v14493_v31 = vld [vmem:[#allocation5 + $0x16e8] sm:$0xf0]  ;;  %v14608_v47 = vor.u32 %v16701_v50, %v14605_v61  ;;  %v14691_v61 = vld [vmem:[#allocation5 + $0x1870] sm:$0xf]  ;;  %v16752_v35 = vld [vmem:[#allocation5 + $0x1954] sm:$0xf0] }
 0x52a   :  { %8334 = vmatpush.bf16.msrb.mxu2 %v14396_v22  ;;  %v8002_v22 = vrot.slane %v17889_v39, 3  ;;  %v14496_v29 = vor.u32 %v16673_v41, %v14493_v31  ;;  %v16734_v39 = vld [vmem:[#allocation5 + $0x18c4] sm:$0xf0] }
 0x52b   :  { %8347 = vmatpush.bf16.msrb.mxu3 %v14460_v38  ;;  %v8003_v38 = vrot.slane %v17891_v27, 3 }
 0x52c   :  { %8360 = vmatpush.bf16.msra.mxu0 %v14524_v19  ;;  %v14432_v19 = vor.u32 %v16657_v24, %v14429_v49  ;;  %v16665_v24 = vld [vmem:[#allocation5 + $0x16a4] sm:$0xf]  ;;  %v14525_v49 = vld [vmem:[#allocation5 + $0x1728] sm:$0xf0] }
 0x52d   :  { %8373 = vmatpush.bf16.msra.mxu1 %v14588_v4  ;;  %v8004_v4 = vrot.slane %v17893_v9, 3  ;;  %v16748_v9 = vld [vmem:[#allocation5 + $0x1934] sm:$0xf0] }
 0x52e   :  { %8335 = vmatpush.bf16.msrb.mxu2 %v14388_v21  ;;  %v14624_v21 = vor.u32 %v16705_v63, %v14621_v40  ;;  %v16647_v40 = vld [vmem:[#allocation5 + $0x1614] sm:$0xf] }
 0x52f   :  { %8348 = vmatpush.bf16.msrb.mxu3 %v14452_v14  ;;  %v14413_v14 = vld [vmem:[#allocation5 + $0x1648] sm:$0xf0] }
 0x530   :  { %8361 = vmatpush.bf16.msra.mxu0 %v14516_v23  ;;  %v16669_v23 = vld [vmem:[#allocation5 + $0x16c4] sm:$0xf]  ;;  %v14416_v8 = vor.u32 %v16653_v25, %v14413_v14  ;;  %v14392_v25 = vor.u32 %v16647_v40, %v14389_v59  ;;  %v16720_v59 = vld [vmem:[#allocation5 + $0x1854] sm:$0xf0] }
 0x531   :  { %8374 = vmatpush.bf16.msra.mxu1 %v14580_v26  ;;  %v14480_v34 = vor.u32 %v16669_v23, %v14477_v44  ;;  %v16651_v26 = vld [vmem:[#allocation5 + $0x1634] sm:$0xf]  ;;  %v16645_v14 = vld [vmem:[#allocation5 + $0x1604] sm:$0xf]  ;;  %v14381_v23 = vld [vmem:[#allocation5 + $0x1608] sm:$0xf0] }
 0x532   :  { %8336 = vmatpush.bf16.msrb.mxu2 %v14380_v45  ;;  %v14533_v45 = vld [vmem:[#allocation5 + $0x1738] sm:$0xf0]  ;;  %v14408_v20 = vor.u32 %v16651_v26, %v14405_v28  ;;  %v16661_v44 = vld [vmem:[#allocation5 + $0x1684] sm:$0xf]  ;;  %v16724_v26 = vld [vmem:[#allocation5 + $0x1874] sm:$0xf0] }
 0x533   :  { %8349 = vmatpush.bf16.msrb.mxu3 %v14444_v18  ;;  %v16699_v18 = vld [vmem:[#allocation5 + $0x17b4] sm:$0xf]  ;;  %v14536_v60 = vor.u32 %v16683_v56, %v14533_v45  ;;  %v16756_v56 = vld [vmem:[#allocation5 + $0x1974] sm:$0xf0] }
 0x534   :  { %8362 = vmatpush.bf16.msra.mxu0 %v14508_v55  ;;  %v7342_v48 = vpop.f32.mrf.mxu0  ;;  %v14597_v55 = vld [vmem:[#allocation5 + $0x17b8] sm:$0xf0] }
 0x535   :  { %8375 = vmatpush.bf16.msra.mxu1 %v14572_v1  ;;  %8337 = vmatmul.bf16.vlgmr.msrb.gmra.mxu2 %v8001_v54  ;;  %v16681_v1 = vld [vmem:[#allocation5 + $0x1724] sm:$0xf]  ;;  %v14600_v33 = vor.u32 %v16699_v18, %v14597_v55  ;;  %v14573_v18 = vld [vmem:[#allocation5 + $0x1788] sm:$0xf0] }
 0x536   :  { %8381 = vmatpush.bf16.msra.mxu2 %v14440_v12  ;;  %8350 = vmatmul.bf16.vlgmr.msrb.gmra.mxu3 %v8002_v22  ;;  %v16649_v12 = vld [vmem:[#allocation5 + $0x1624] sm:$0xf]  ;;  %v14528_v15 = vor.u32 %v16681_v1, %v14525_v49  ;;  %v14747_v1 = vld [vmem:[#allocation5 + $0x18e0] sm:$0xf] }
 0x537   :  { %8394 = vmatpush.bf16.msra.mxu3 %v14504_v57  ;;  %8363 = vmatmul.bf16.vlgmr.msra.gmra.mxu0 %v8003_v38  ;;  %v7355_v57 = vpop.f32.mrf.mxu1 }
 0x538   :  { %8407 = vmatpush.bf16.msrb.mxu0 %v14568_v62  ;;  %8376 = vmatmul.bf16.vlgmr.msra.gmra.mxu1 %v8004_v4  ;;  %v14461_v62 = vld [vmem:[#allocation5 + $0x16a8] sm:$0xf0]  ;;  %v7316_v41 = vpop.f32.mrf.mxu2 }
 0x539   :  { %8420 = vmatpush.bf16.msrb.mxu1 %v14632_v30  ;;  %v7329_v31 = vpop.f32.mrf.mxu3  ;;  %v14400_v30 = vor.u32 %v16649_v12, %v14397_v17  ;;  %v14464_v63 = vor.u32 %v16665_v24, %v14461_v62  ;;  %v14883_v12 = vld [vmem:[#allocation5 + $0x19f0] sm:$0xf]  ;;  %v14820_v17 = vor.u32 %v16756_v56, %v14819_v52  ;;  %v14683_v24 = vld [vmem:[#allocation5 + $0x1860] sm:$0xf]  ;;  %v16722_v62 = vld [vmem:[#allocation5 + $0x1864] sm:$0xf0] }
 0x53a   :  { %8382 = vmatpush.bf16.msra.mxu2 %v14432_v19  ;;  %v7330_v51 = vadd.f32 %v7329_v31, %v7316_v41  ;;  %v16697_v19 = vld [vmem:[#allocation5 + $0x17a4] sm:$0xf]  ;;  %v16738_v41 = vld [vmem:[#allocation5 + $0x18e4] sm:$0xf0]  ;;  %v14811_v31 = vld [vmem:[#allocation5 + $0x1960] sm:$0xf] }
 0x53b   :  { %8395 = vmatpush.bf16.msra.mxu3 %v14496_v29  ;;  %v14589_v29 = vld [vmem:[#allocation5 + $0x17a8] sm:$0xf0] }
 0x53c   :  { %8408 = vmatpush.bf16.msrb.mxu0 %v14560_v13  ;;  %v16663_v13 = vld [vmem:[#allocation5 + $0x1694] sm:$0xf]  ;;  %v7343_v36 = vadd.f32 %v7342_v48, %v7330_v51 }
 0x53d   :  { %8421 = vmatpush.bf16.msrb.mxu1 %v14624_v21  ;;  %v7344_v21 = vpop.f32.mrf.mxu0 }
 0x53e   :  { %8383 = vmatpush.bf16.msra.mxu2 %v14424_v5  ;;  %v14592_v5 = vor.u32 %v16697_v19, %v14589_v29  ;;  %v7356_v3 = vadd.f32 %v7355_v57, %v7343_v36  ;;  %v16772_v57 = vld [vmem:[#allocation5 + $0x19f4] sm:$0xf0]  ;;  %v16770_v19 = vld [vmem:[#allocation5 + $0x19e4] sm:$0xf0]  ;;  %v14748_v29 = vor.u32 %v16738_v41, %v14747_v1  ;;  %v14803_v36 = vld [vmem:[#allocation5 + $0x1950] sm:$0xf] }
 0x53f   :  { %8396 = vmatpush.bf16.msra.mxu3 %v14488_v2  ;;  %v16695_v2 = vld [vmem:[#allocation5 + $0x1794] sm:$0xf]  ;;  %v7357_v7 = vpop.f32.mrf.mxu1  ;;  %v14884_v51 = vor.u32 %v16772_v57, %v14883_v12  ;;  %v14804_v0 = vor.u32 %v16752_v35, %v14803_v36  ;;  %v14643_v41 = vld [vmem:[#allocation5 + $0x1810] sm:$0xf]  ;;  %v16710_v36 = vld [vmem:[#allocation5 + $0x1804] sm:$0xf0] }
 0x540   :  { %8409 = vmatpush.bf16.msrb.mxu0 %v14552_v16  ;;  %v14456_v16 = vor.u32 %v16663_v13, %v14453_v10  ;;  %v17908_v50 = vadd.f32 %v7356_v3, %v17874_v32  ;;  %v14584_v28 = vor.u32 %v16695_v2, %v14581_v53  ;;  %v7318_v45 = vpop.f32.mrf.mxu2  ;;  %v14692_v32 = vor.u32 %v16724_v26, %v14691_v61  ;;  %v14739_v13 = vld [vmem:[#allocation5 + $0x18d0] sm:$0xf]  ;;  %v16736_v10 = vld [vmem:[#allocation5 + $0x18d4] sm:$0xf0]  ;;  %v16718_v3 = vld [vmem:[#allocation5 + $0x1844] sm:$0xf0] }
 0x541   :  { %8422 = vmatpush.bf16.msrb.mxu1 %v14616_v58  ;;  %v14445_v58 = vld [vmem:[#allocation5 + $0x1688] sm:$0xf0]  ;;  %v7331_v48 = vpop.f32.mrf.mxu3  ;;  %v16768_v2 = vld [vmem:[#allocation5 + $0x19d4] sm:$0xf0]  ;;  %v14740_v53 = vor.u32 %v16736_v10, %v14739_v13  ;;  %v14787_v61 = vld [vmem:[#allocation5 + $0x1930] sm:$0xf] }
 0x542   :  { %8384 = vmatpush.bf16.msra.mxu2 %v14416_v8  ;;  %v16677_v8 = vld [vmem:[#allocation5 + $0x1704] sm:$0xf]  ;;  %v14788_v56 = vor.u32 %v16748_v9, %v14787_v61  ;;  %v14651_v45 = vld [vmem:[#allocation5 + $0x1820] sm:$0xf]  ;;  %v16714_v48 = vld [vmem:[#allocation5 + $0x1824] sm:$0xf0] }
 0x543   :  { %8397 = vmatpush.bf16.msra.mxu3 %v14480_v34  ;;  %v14509_v34 = vld [vmem:[#allocation5 + $0x1708] sm:$0xf0]  ;;  %v14699_v35 = vld [vmem:[#allocation5 + $0x1880] sm:$0xf] }
 0x544   :  { %8410 = vmatpush.bf16.msrb.mxu0 %v14544_v43  ;;  %v14755_v43 = vld [vmem:[#allocation5 + $0x18f0] sm:$0xf]  ;;  %v14512_v55 = vor.u32 %v16677_v8, %v14509_v34  ;;  %v16732_v34 = vld [vmem:[#allocation5 + $0x18b4] sm:$0xf0] }
 0x545   :  { %8423 = vmatpush.bf16.msrb.mxu1 %v14608_v47  ;;  %v14384_v47 = vor.u32 %v16645_v14, %v14381_v23  ;;  %v16766_v23 = vld [vmem:[#allocation5 + $0x19c4] sm:$0xf0]  ;;  %v14723_v8 = vld [vmem:[#allocation5 + $0x18b0] sm:$0xf] }
 0x546   :  { %8385 = vmatpush.bf16.msra.mxu2 %v14408_v20  ;;  %v14448_v20 = vor.u32 %v16661_v44, %v14445_v58  ;;  %v16716_v58 = vld [vmem:[#allocation5 + $0x1834] sm:$0xf0]  ;;  %v14724_v52 = vor.u32 %v16732_v34, %v14723_v8  ;;  %v16758_v8 = vld [vmem:[#allocation5 + $0x1984] sm:$0xf0] }
 0x547   :  { %8398 = vmatpush.bf16.msra.mxu3 %v14472_v46  ;;  %v16693_v46 = vld [vmem:[#allocation5 + $0x1784] sm:$0xf] }
 0x548   :  { %8411 = vmatpush.bf16.msrb.mxu0 %v14536_v60  ;;  %v14756_v60 = vor.u32 %v16740_v37, %v14755_v43  ;;  %v14576_v49 = vor.u32 %v16693_v46, %v14573_v18  ;;  %v16764_v37 = vld [vmem:[#allocation5 + $0x19b4] sm:$0xf0]  ;;  %v16730_v46 = vld [vmem:[#allocation5 + $0x18a4] sm:$0xf0]  ;;  %v14779_v18 = vld [vmem:[#allocation5 + $0x1920] sm:$0xf] }
 0x549   :  { %8424 = vmatpush.bf16.msrb.mxu1 %v14600_v33  ;;  %v16754_v33 = vld [vmem:[#allocation5 + $0x1964] sm:$0xf0] }
 0x54a   :  { %8386 = vmatpush.bf16.msra.mxu2 %v14400_v30  ;;  %v14684_v30 = vor.u32 %v16722_v62, %v14683_v24  ;;  %v14812_v40 = vor.u32 %v16754_v33, %v14811_v31  ;;  %v16762_v24 = vld [vmem:[#allocation5 + $0x19a4] sm:$0xf0]  ;;  %v16712_v31 = vld [vmem:[#allocation5 + $0x1814] sm:$0xf0]  ;;  %v14707_v33 = vld [vmem:[#allocation5 + $0x1890] sm:$0xf] }
 0x54b   :  { %8399 = vmatpush.bf16.msra.mxu3 %v14464_v63  ;;  %v14875_v63 = vld [vmem:[#allocation5 + $0x19e0] sm:$0xf]  ;;  %v14644_v10 = vor.u32 %v16712_v31, %v14643_v41  ;;  %v16719_v41 = vld [vmem:[#allocation5 + $0x1854] sm:$0xf] }
 0x54c   :  { %8412 = vmatpush.bf16.msrb.mxu0 %v14528_v15  ;;  %v14675_v15 = vld [vmem:[#allocation5 + $0x1850] sm:$0xf]  ;;  %v14876_v11 = vor.u32 %v16770_v19, %v14875_v63  ;;  %v16744_v63 = vld [vmem:[#allocation5 + $0x1914] sm:$0xf0] }
 0x54d   :  { %8425 = vmatpush.bf16.msrb.mxu1 %v14592_v5  ;;  %v14676_v21 = vor.u32 %v16720_v59, %v14675_v15  ;;  %v14867_v5 = vld [vmem:[#allocation5 + $0x19d0] sm:$0xf]  ;;  %v16760_v15 = vld [vmem:[#allocation5 + $0x1994] sm:$0xf0]  ;;  %v14635_v59 = vld [vmem:[#allocation5 + $0x1800] sm:$0xf] }
 0x54e   :  { %8387 = vmatpush.bf16.msra.mxu2 %v14392_v25  ;;  %v14731_v25 = vld [vmem:[#allocation5 + $0x18c0] sm:$0xf]  ;;  %v14868_v14 = vor.u32 %v16768_v2, %v14867_v5 }
 0x54f   :  { %8400 = vmatpush.bf16.msra.mxu3 %v14456_v16  ;;  %v16750_v16 = vld [vmem:[#allocation5 + $0x1944] sm:$0xf0]  ;;  %v14732_v44 = vor.u32 %v16734_v39, %v14731_v25  ;;  %v16723_v25 = vld [vmem:[#allocation5 + $0x1874] sm:$0xf]  ;;  %v14693_v39 = vld [vmem:[#allocation5 + $0x1878] sm:$0xf0] }
 0x550   :  { %8413 = vmatpush.bf16.msrb.mxu0 %v14520_v6  ;;  %v14659_v6 = vld [vmem:[#allocation5 + $0x1830] sm:$0xf] }
 0x551   :  { %8426 = vmatpush.bf16.msrb.mxu1 %v14584_v28  ;;  %v14660_v43 = vor.u32 %v16716_v58, %v14659_v6  ;;  %v14851_v28 = vld [vmem:[#allocation5 + $0x19b0] sm:$0xf]  ;;  %v14821_v6 = vld [vmem:[#allocation5 + $0x1978] sm:$0xf0]  ;;  %v14827_v58 = vld [vmem:[#allocation5 + $0x1980] sm:$0xf] }
 0x552   :  { %8388 = vmatpush.bf16.msra.mxu2 %v14384_v47  ;;  %v14715_v47 = vld [vmem:[#allocation5 + $0x18a0] sm:$0xf]  ;;  %v14852_v12 = vor.u32 %v16764_v37, %v14851_v28  ;;  %v16771_v37 = vld [vmem:[#allocation5 + $0x19f4] sm:$0xf] }
 0x553   :  { %8401 = vmatpush.bf16.msra.mxu3 %v14448_v20  ;;  %v14716_v1 = vor.u32 %v16730_v46, %v14715_v47  ;;  %v14685_v47 = vld [vmem:[#allocation5 + $0x1868] sm:$0xf0] }
 0x554   :  { %8414 = vmatpush.bf16.msrb.mxu0 %v14512_v55  ;;  %v7394_v26 = vpop.f32.mrf.mxu0  ;;  %v16746_v55 = vld [vmem:[#allocation5 + $0x1924] sm:$0xf0]  ;;  %v14749_v46 = vld [vmem:[#allocation5 + $0x18e8] sm:$0xf0] }
 0x555   :  { %8427 = vmatpush.bf16.msrb.mxu1 %v14576_v49  ;;  %8389 = vmatmul.bf16.vlgmr.msra.gmra.mxu2 %v8001_v54  ;;  %v14667_v54 = vld [vmem:[#allocation5 + $0x1840] sm:$0xf]  ;;  %v7407_v20 = vpop.f32.mrf.mxu1  ;;  %v14780_v49 = vor.u32 %v16746_v55, %v14779_v18 }
 0x556   :  { %8836 = vmatpush.bf16.msrb.mxu2 %v14692_v32  ;;  %8402 = vmatmul.bf16.vlgmr.msra.gmra.mxu3 %v8002_v22  ;;  %v14795_v22 = vld [vmem:[#allocation5 + $0x1940] sm:$0xf]  ;;  %v14668_v27 = vor.u32 %v16718_v3, %v14667_v54  ;;  %v8435_v54 = vld [vmem:[#allocation4 + $0x28] sm:$0x11] }
 0x557   :  { %8849 = vmatpush.bf16.msrb.mxu3 %v14756_v60  ;;  %8415 = vmatmul.bf16.vlgmr.msrb.gmra.mxu0 %v8003_v38  ;;  %v14859_v38 = vld [vmem:[#allocation5 + $0x19c0] sm:$0xf]  ;;  %v14796_v7 = vor.u32 %v16750_v16, %v14795_v22  ;;  %v14652_v60 = vor.u32 %v16714_v48, %v14651_v45  ;;  %v8436_v22 = vld [vmem:[#allocation4 + $0x38] sm:$0x11]  ;;  %v8504_v34 = vunpack.c.l.b16 %v8435_v54  ;;  %v8505_v61 = vunpack.c.h.b16 %v8435_v54 }
 0x558   :  { %8862 = vmatpush.bf16.msra.mxu0 %v14820_v17  ;;  %8428 = vmatmul.bf16.vlgmr.msrb.gmra.mxu1 %v8004_v4  ;;  %v14860_v4 = vor.u32 %v16766_v23, %v14859_v38  ;;  %v7368_v32 = vpop.f32.mrf.mxu2  ;;  %v14843_v17 = vld [vmem:[#allocation5 + $0x19a0] sm:$0xf]  ;;  %v14757_v38 = vld [vmem:[#allocation5 + $0x18f8] sm:$0xf0]  ;;  %v16755_v23 = vld [vmem:[#allocation5 + $0x1974] sm:$0xf]  ;;  %v14828_v48 = vor.u32 %v16758_v8, %v14827_v58  ;;  %v8507_v18 = vunpack.c.h.b16 %v8436_v22 }
 0x559   :  { %8875 = vmatpush.bf16.msra.mxu1 %v14884_v51  ;;  %v7381_v57 = vpop.f32.mrf.mxu3  ;;  %v16728_v51 = vld [vmem:[#allocation5 + $0x1894] sm:$0xf0]  ;;  %v14824_v45 = vor.u32 %v16755_v23, %v14821_v6  ;;  %v17921_v55 = vpack.c.b16 %v8504_v34, %v8504_v34  ;;  %v14725_v23 = vld [vmem:[#allocation5 + $0x18b8] sm:$0xf0] }
 0x55a   :  { %8837 = vmatpush.bf16.msrb.mxu2 %v14684_v30  ;;  %v7382_v62 = vadd.f32 %v7381_v57, %v7368_v32  ;;  %v14771_v30 = vld [vmem:[#allocation5 + $0x1910] sm:$0xf]  ;;  %v14708_v5 = vor.u32 %v16728_v51, %v14707_v33  ;;  %v17923_v32 = vpack.c.b16 %v8505_v61, %v8505_v61  ;;  %v14813_v57 = vld [vmem:[#allocation5 + $0x1968] sm:$0xf0]  ;;  %v14677_v33 = vld [vmem:[#allocation5 + $0x1858] sm:$0xf0] }
 0x55b   :  { %8850 = vmatpush.bf16.msrb.mxu3 %v14748_v29  ;;  %v14844_v29 = vor.u32 %v16762_v24, %v14843_v17  ;;  %v14772_v2 = vor.u32 %v16744_v63, %v14771_v30  ;;  %v16735_v51 = vld [vmem:[#allocation5 + $0x18d4] sm:$0xf]  ;;  %v14741_v30 = vld [vmem:[#allocation5 + $0x18d8] sm:$0xf0]  ;;  %v17927_v63 = vpack.c.b16 %v8507_v18, %v8507_v18 }
 0x55c   :  { %8863 = vmatpush.bf16.msra.mxu0 %v14812_v40  ;;  %v7395_v19 = vadd.f32 %v7394_v26, %v7382_v62  ;;  %v14835_v40 = vld [vmem:[#allocation5 + $0x1990] sm:$0xf]  ;;  %v7396_v13 = vpop.f32.mrf.mxu0  ;;  %v16763_v61 = vld [vmem:[#allocation5 + $0x19b4] sm:$0xf] }
 0x55d   :  { %8876 = vmatpush.bf16.msra.mxu1 %v14876_v11  ;;  %v16726_v11 = vld [vmem:[#allocation5 + $0x1884] sm:$0xf0]  ;;  %v7409_v3 = vpop.f32.mrf.mxu1  ;;  %v16767_v13 = vld [vmem:[#allocation5 + $0x19d4] sm:$0xf] }
 0x55e   :  { %8838 = vmatpush.bf16.msrb.mxu2 %v14676_v21  ;;  %v7408_v21 = vadd.f32 %v7407_v20, %v7395_v19  ;;  %v16737_v20 = vld [vmem:[#allocation5 + $0x18e4] sm:$0xf]  ;;  %v16751_v19 = vld [vmem:[#allocation5 + $0x1954] sm:$0xf] }
 0x55f   :  { %8851 = vmatpush.bf16.msrb.mxu3 %v14740_v53  ;;  %v14763_v53 = vld [vmem:[#allocation5 + $0x1900] sm:$0xf]  ;;  %v14752_v62 = vor.u32 %v16737_v20, %v14749_v46 }
 0x560   :  { %8864 = vmatpush.bf16.msra.mxu0 %v14804_v0  ;;  %v16742_v0 = vld [vmem:[#allocation5 + $0x1904] sm:$0xf0]  ;;  %v17919_v16 = vadd.f32 %v7408_v21, %v17885_v42  ;;  %v8506_v42 = vunpack.c.l.b16 %v8436_v22  ;;  %v16733_v21 = vld [vmem:[#allocation5 + $0x18c4] sm:$0xf]  ;;  %v16715_v22 = vld [vmem:[#allocation5 + $0x1834] sm:$0xf] }
 0x561   :  { %8877 = vmatpush.bf16.msra.mxu1 %v14868_v14  ;;  %v14836_v14 = vor.u32 %v16760_v15, %v14835_v40  ;;  %v7383_v9 = vpop.f32.mrf.mxu3  ;;  %v14764_v26 = vor.u32 %v16742_v0, %v14763_v53  ;;  %v14680_v15 = vor.u32 %v16719_v41, %v14677_v33  ;;  %v14797_v53 = vld [vmem:[#allocation5 + $0x1948] sm:$0xf0]  ;;  %v14773_v33 = vld [vmem:[#allocation5 + $0x1918] sm:$0xf0] }
 0x562   :  { %8839 = vmatpush.bf16.msrb.mxu2 %v14668_v27  ;;  %v16739_v27 = vld [vmem:[#allocation5 + $0x18f4] sm:$0xf]  ;;  %v17925_v17 = vpack.c.b16 %v8506_v42, %v8506_v42  ;;  %v14853_v9 = vld [vmem:[#allocation5 + $0x19b8] sm:$0xf0] }
 0x563   :  { %8852 = vmatpush.bf16.msrb.mxu3 %v14732_v44  ;;  %v7370_v44 = vpop.f32.mrf.mxu2  ;;  %v14760_v28 = vor.u32 %v16739_v27, %v14757_v38  ;;  %v14661_v27 = vld [vmem:[#allocation5 + $0x1838] sm:$0xf0]  ;;  %v16731_v38 = vld [vmem:[#allocation5 + $0x18b4] sm:$0xf] }
 0x564   :  { %8865 = vmatpush.bf16.msra.mxu0 %v14796_v7  ;;  %v14636_v7 = vor.u32 %v16710_v36, %v14635_v59  ;;  %v14744_v59 = vor.u32 %v16735_v51, %v14741_v30  ;;  %v16717_v36 = vld [vmem:[#allocation5 + $0x1844] sm:$0xf]  ;;  %v16747_v44 = vld [vmem:[#allocation5 + $0x1934] sm:$0xf]  ;;  %v14664_v8 = vor.u32 %v16715_v22, %v14661_v27  ;;  %v14728_v34 = vor.u32 %v16731_v38, %v14725_v23  ;;  %v15075_v22 = vld [vmem:[#allocation5 + $0x1b70] sm:$0xf] }
 0x565   :  { %8878 = vmatpush.bf16.msra.mxu1 %v14860_v4  ;;  %v14700_v4 = vor.u32 %v16726_v11, %v14699_v35  ;;  %v14669_v11 = vld [vmem:[#allocation5 + $0x1848] sm:$0xf0] }
 0x566   :  { %8840 = vmatpush.bf16.msrb.mxu2 %v14660_v43  ;;  %v14696_v43 = vor.u32 %v16723_v25, %v14693_v39  ;;  %v14672_v54 = vor.u32 %v16717_v36, %v14669_v11  ;;  %v16765_v25 = vld [vmem:[#allocation5 + $0x19c4] sm:$0xf]  ;;  %v14861_v39 = vld [vmem:[#allocation5 + $0x19c8] sm:$0xf0] }
 0x567   :  { %8853 = vmatpush.bf16.msrb.mxu3 %v14724_v52  ;;  %v14885_v52 = vld [vmem:[#allocation5 + $0x19f8] sm:$0xf0]  ;;  %v14864_v58 = vor.u32 %v16765_v25, %v14861_v39  ;;  %v16725_v36 = vld [vmem:[#allocation5 + $0x1884] sm:$0xf]  ;;  %v16804_v39 = vld [vmem:[#allocation5 + $0x1af4] sm:$0xf0] }
 0x568   :  { %8866 = vmatpush.bf16.msra.mxu0 %v14788_v56  ;;  %v16721_v56 = vld [vmem:[#allocation5 + $0x1864] sm:$0xf] }
 0x569   :  { %8879 = vmatpush.bf16.msra.mxu1 %v14852_v12  ;;  %v16753_v12 = vld [vmem:[#allocation5 + $0x1964] sm:$0xf]  ;;  %v14688_v24 = vor.u32 %v16721_v56, %v14685_v47  ;;  %v14781_v56 = vld [vmem:[#allocation5 + $0x1928] sm:$0xf0]  ;;  %v14856_v47 = vor.u32 %v16763_v61, %v14853_v9 }
 0x56a   :  { %8841 = vmatpush.bf16.msrb.mxu2 %v14652_v60  ;;  %v14888_v60 = vor.u32 %v16771_v37, %v14885_v52  ;;  %v14816_v31 = vor.u32 %v16753_v12, %v14813_v57  ;;  %v14717_v37 = vld [vmem:[#allocation5 + $0x18a8] sm:$0xf0]  ;;  %v16745_v52 = vld [vmem:[#allocation5 + $0x1924] sm:$0xf] }
 0x56b   :  { %8854 = vmatpush.bf16.msrb.mxu3 %v14716_v1  ;;  %v16769_v1 = vld [vmem:[#allocation5 + $0x19e4] sm:$0xf]  ;;  %v14845_v57 = vld [vmem:[#allocation5 + $0x19a8] sm:$0xf0] }
 0x56c   :  { %8867 = vmatpush.bf16.msra.mxu0 %v14780_v49  ;;  %v14877_v49 = vld [vmem:[#allocation5 + $0x19e8] sm:$0xf0]  ;;  %v16761_v12 = vld [vmem:[#allocation5 + $0x19a4] sm:$0xf] }
 0x56d   :  { %8880 = vmatpush.bf16.msra.mxu1 %v14844_v29  ;;  %v14805_v29 = vld [vmem:[#allocation5 + $0x1958] sm:$0xf0]  ;;  %v14880_v40 = vor.u32 %v16769_v1, %v14877_v49  ;;  %v16727_v1 = vld [vmem:[#allocation5 + $0x1894] sm:$0xf]  ;;  %v14848_v30 = vor.u32 %v16761_v12, %v14845_v57  ;;  %v16784_v12 = vld [vmem:[#allocation5 + $0x1a54] sm:$0xf0] }
 0x56e   :  { %8842 = vmatpush.bf16.msrb.mxu2 %v14644_v10  ;;  %v14869_v10 = vld [vmem:[#allocation5 + $0x19d8] sm:$0xf0]  ;;  %v14808_v35 = vor.u32 %v16751_v19, %v14805_v29  ;;  %v16759_v19 = vld [vmem:[#allocation5 + $0x1994] sm:$0xf]  ;;  %v14995_v57 = vld [vmem:[#allocation5 + $0x1ad0] sm:$0xf] }
 0x56f   :  { %8855 = vmatpush.bf16.msrb.mxu3 %v14708_v5  ;;  %v14733_v5 = vld [vmem:[#allocation5 + $0x18c8] sm:$0xf0]  ;;  %v14872_v0 = vor.u32 %v16767_v13, %v14869_v10  ;;  %v14709_v49 = vld [vmem:[#allocation5 + $0x1898] sm:$0xf0]  ;;  %v16709_v13 = vld [vmem:[#allocation5 + $0x1804] sm:$0xf] }
 0x570   :  { %8868 = vmatpush.bf16.msra.mxu0 %v14772_v2  ;;  %v16749_v2 = vld [vmem:[#allocation5 + $0x1944] sm:$0xf]  ;;  %v14736_v3 = vor.u32 %v16733_v21, %v14733_v5  ;;  %v14837_v29 = vld [vmem:[#allocation5 + $0x1998] sm:$0xf0]  ;;  %v14637_v10 = vld [vmem:[#allocation5 + $0x1808] sm:$0xf0] }
 0x571   :  { %8881 = vmatpush.bf16.msra.mxu1 %v14836_v14  ;;  %v14800_v14 = vor.u32 %v16749_v2, %v14797_v53  ;;  %v14701_v21 = vld [vmem:[#allocation5 + $0x1888] sm:$0xf0]  ;;  %v16741_v5 = vld [vmem:[#allocation5 + $0x1904] sm:$0xf]  ;;  %v14840_v25 = vor.u32 %v16759_v19, %v14837_v29  ;;  %v14640_v23 = vor.u32 %v16709_v13, %v14637_v10  ;;  %v16782_v19 = vld [vmem:[#allocation5 + $0x1a44] sm:$0xf0] }
 0x572   :  { %8843 = vmatpush.bf16.msrb.mxu2 %v14636_v7  ;;  %v14789_v7 = vld [vmem:[#allocation5 + $0x1938] sm:$0xf0]  ;;  %v14765_v2 = vld [vmem:[#allocation5 + $0x1908] sm:$0xf0]  ;;  %v16798_v29 = vld [vmem:[#allocation5 + $0x1ac4] sm:$0xf0] }
 0x573   :  { %8856 = vmatpush.bf16.msrb.mxu3 %v14700_v4  ;;  %v16713_v4 = vld [vmem:[#allocation5 + $0x1824] sm:$0xf]  ;;  %v14792_v42 = vor.u32 %v16747_v44, %v14789_v7  ;;  %v14704_v44 = vor.u32 %v16725_v36, %v14701_v21  ;;  %v15115_v13 = vld [vmem:[#allocation5 + $0x1bc0] sm:$0xf]  ;;  %v14979_v21 = vld [vmem:[#allocation5 + $0x1ab0] sm:$0xf] }
 0x574   :  { %8869 = vmatpush.bf16.msra.mxu0 %v14764_v26  ;;  %v7853_v6 = vpop.f32.mrf.mxu0  ;;  %v16757_v7 = vld [vmem:[#allocation5 + $0x1984] sm:$0xf] }
 0x575   :  { %8882 = vmatpush.bf16.msra.mxu1 %v14828_v48  ;;  %8844 = vmatmul.bf16.vlgmr.msrb.gmra.mxu2 %v17921_v55  ;;  %v7866_v26 = vpop.f32.mrf.mxu1 }
 0x576   :  { %8888 = vmatpush.bf16.msra.mxu2 %v14696_v43  ;;  %8857 = vmatmul.bf16.vlgmr.msrb.gmra.mxu3 %v17923_v32  ;;  %v14653_v43 = vld [vmem:[#allocation5 + $0x1828] sm:$0xf0] }
 0x577   :  { %8901 = vmatpush.bf16.msra.mxu3 %v14760_v28  ;;  %8870 = vmatmul.bf16.vlgmr.msra.gmra.mxu0 %v17925_v17  ;;  %v16729_v28 = vld [vmem:[#allocation5 + $0x18a4] sm:$0xf]  ;;  %v14656_v46 = vor.u32 %v16713_v4, %v14653_v43  ;;  %v14939_v4 = vld [vmem:[#allocation5 + $0x1a60] sm:$0xf] }
 0x578   :  { %8914 = vmatpush.bf16.msrb.mxu0 %v14824_v45  ;;  %8883 = vmatmul.bf16.vlgmr.msra.gmra.mxu1 %v17927_v63  ;;  %v7827_v45 = vpop.f32.mrf.mxu2  ;;  %v14720_v18 = vor.u32 %v16729_v28, %v14717_v37  ;;  %v16802_v28 = vld [vmem:[#allocation5 + $0x1ae4] sm:$0xf0]  ;;  %v15067_v37 = vld [vmem:[#allocation5 + $0x1b60] sm:$0xf] }
 0x579   :  { %8927 = vmatpush.bf16.msrb.mxu1 %v14888_v60  ;;  %v7840_v48 = vpop.f32.mrf.mxu3  ;;  %v16711_v60 = vld [vmem:[#allocation5 + $0x1814] sm:$0xf] }
 0x57a   :  { %8889 = vmatpush.bf16.msra.mxu2 %v14688_v24  ;;  %v7841_v20 = vadd.f32 %v7840_v48, %v7827_v45  ;;  %v14784_v24 = vor.u32 %v16745_v52, %v14781_v56  ;;  %v16818_v52 = vld [vmem:[#allocation5 + $0x1b64] sm:$0xf0]  ;;  %v15131_v48 = vld [vmem:[#allocation5 + $0x1be0] sm:$0xf] }
 0x57b   :  { %8902 = vmatpush.bf16.msra.mxu3 %v14752_v62  ;;  %v14645_v62 = vld [vmem:[#allocation5 + $0x1818] sm:$0xf0] }
 0x57c   :  { %8915 = vmatpush.bf16.msrb.mxu0 %v14816_v31  ;;  %v7854_v41 = vadd.f32 %v7853_v6, %v7841_v20  ;;  %v16743_v31 = vld [vmem:[#allocation5 + $0x1914] sm:$0xf]  ;;  %v7855_v51 = vpop.f32.mrf.mxu0  ;;  %v14829_v6 = vld [vmem:[#allocation5 + $0x1988] sm:$0xf0] }
 0x57d   :  { %8928 = vmatpush.bf16.msrb.mxu1 %v14880_v40  ;;  %v14776_v11 = vor.u32 %v16743_v31, %v14773_v33  ;;  %v14832_v43 = vor.u32 %v16757_v7, %v14829_v6  ;;  %v16832_v31 = vld [vmem:[#allocation5 + $0x1bd4] sm:$0xf0]  ;;  %v16794_v7 = vld [vmem:[#allocation5 + $0x1aa4] sm:$0xf0]  ;;  %v15035_v6 = vld [vmem:[#allocation5 + $0x1b20] sm:$0xf] }
 0x57e   :  { %8890 = vmatpush.bf16.msra.mxu2 %v14680_v15  ;;  %v7867_v40 = vadd.f32 %v7866_v26, %v7854_v41  ;;  %v14648_v15 = vor.u32 %v16711_v60, %v14645_v62  ;;  %v16786_v26 = vld [vmem:[#allocation5 + $0x1a64] sm:$0xf0]  ;;  %v16800_v60 = vld [vmem:[#allocation5 + $0x1ad4] sm:$0xf0]  ;;  %v15123_v41 = vld [vmem:[#allocation5 + $0x1bd0] sm:$0xf] }
 0x57f   :  { %8903 = vmatpush.bf16.msra.mxu3 %v14744_v59  ;;  %v14712_v59 = vor.u32 %v16727_v1, %v14709_v49  ;;  %v14940_v45 = vor.u32 %v16786_v26, %v14939_v4  ;;  %v16816_v62 = vld [vmem:[#allocation5 + $0x1b54] sm:$0xf0]  ;;  %v14996_v33 = vor.u32 %v16800_v60, %v14995_v57  ;;  %v16826_v4 = vld [vmem:[#allocation5 + $0x1ba4] sm:$0xf0]  ;;  %v14899_v26 = vld [vmem:[#allocation5 + $0x1a10] sm:$0xf] }
 0x580   :  { %8916 = vmatpush.bf16.msrb.mxu0 %v14808_v35  ;;  %v7868_v35 = vpop.f32.mrf.mxu1  ;;  %v17934_v53 = vadd.f32 %v7867_v40, %v17908_v50  ;;  %v7829_v27 = vpop.f32.mrf.mxu2  ;;  %v15051_v40 = vld [vmem:[#allocation5 + $0x1b40] sm:$0xf] }
 0x581   :  { %8929 = vmatpush.bf16.msrb.mxu1 %v14872_v0  ;;  %v14947_v0 = vld [vmem:[#allocation5 + $0x1a70] sm:$0xf]  ;;  %v7842_v38 = vpop.f32.mrf.mxu3  ;;  %v14907_v27 = vld [vmem:[#allocation5 + $0x1a20] sm:$0xf] }
 0x582   :  { %8891 = vmatpush.bf16.msra.mxu2 %v14672_v54  ;;  %v16788_v54 = vld [vmem:[#allocation5 + $0x1a74] sm:$0xf0]  ;;  %v14915_v35 = vld [vmem:[#allocation5 + $0x1a30] sm:$0xf]  ;;  %v16778_v38 = vld [vmem:[#allocation5 + $0x1a24] sm:$0xf0] }
 0x583   :  { %8904 = vmatpush.bf16.msra.mxu3 %v14736_v3  ;;  %v15011_v3 = vld [vmem:[#allocation5 + $0x1af0] sm:$0xf]  ;;  %v14948_v50 = vor.u32 %v16788_v54, %v14947_v0  ;;  %v16812_v0 = vld [vmem:[#allocation5 + $0x1b34] sm:$0xf0] }
 0x584   :  { %8917 = vmatpush.bf16.msrb.mxu0 %v14800_v14  ;;  %v16820_v14 = vld [vmem:[#allocation5 + $0x1b74] sm:$0xf0]  ;;  %v15012_v61 = vor.u32 %v16804_v39, %v15011_v3 }
 0x585   :  { %8930 = vmatpush.bf16.msrb.mxu1 %v14864_v58  ;;  %v14768_v58 = vor.u32 %v16741_v5, %v14765_v2  ;;  %v15076_v9 = vor.u32 %v16820_v14, %v15075_v22  ;;  %v16796_v5 = vld [vmem:[#allocation5 + $0x1ab4] sm:$0xf0]  ;;  %v15043_v2 = vld [vmem:[#allocation5 + $0x1b30] sm:$0xf] }
 0x586   :  { %8892 = vmatpush.bf16.msra.mxu2 %v14664_v8  ;;  %v15139_v8 = vld [vmem:[#allocation5 + $0x1bf0] sm:$0xf]  ;;  %v16828_v39 = vld [vmem:[#allocation5 + $0x1bb4] sm:$0xf0]  ;;  %v14980_v22 = vor.u32 %v16796_v5, %v14979_v21  ;;  %v15044_v14 = vor.u32 %v16812_v0, %v15043_v2  ;;  %v15077_v2 = vld [vmem:[#allocation5 + $0x1b78] sm:$0xf0] }
 0x587   :  { %8905 = vmatpush.bf16.msra.mxu3 %v14728_v34  ;;  %v16836_v34 = vld [vmem:[#allocation5 + $0x1bf4] sm:$0xf0]  ;;  %v15083_v0 = vld [vmem:[#allocation5 + $0x1b80] sm:$0xf] }
 0x588   :  { %8918 = vmatpush.bf16.msrb.mxu0 %v14792_v42  ;;  %v15003_v42 = vld [vmem:[#allocation5 + $0x1ae0] sm:$0xf]  ;;  %v15140_v56 = vor.u32 %v16836_v34, %v15139_v8 }
 0x589   :  { %8931 = vmatpush.bf16.msrb.mxu1 %v14856_v47  ;;  %v16834_v47 = vld [vmem:[#allocation5 + $0x1be4] sm:$0xf0]  ;;  %v15004_v20 = vor.u32 %v16802_v28, %v15003_v42  ;;  %v15099_v34 = vld [vmem:[#allocation5 + $0x1ba0] sm:$0xf]  ;;  %v16776_v42 = vld [vmem:[#allocation5 + $0x1a14] sm:$0xf0] }
 0x58a   :  { %8893 = vmatpush.bf16.msra.mxu2 %v14656_v46  ;;  %v15068_v46 = vor.u32 %v16818_v52, %v15067_v37  ;;  %v15132_v1 = vor.u32 %v16834_v47, %v15131_v48  ;;  %v14963_v52 = vld [vmem:[#allocation5 + $0x1a90] sm:$0xf]  ;;  %v16808_v47 = vld [vmem:[#allocation5 + $0x1b14] sm:$0xf0]  ;;  %v14900_v60 = vor.u32 %v16776_v42, %v14899_v26  ;;  %v15069_v26 = vld [vmem:[#allocation5 + $0x1b68] sm:$0xf0] }
 0x58b   :  { %8906 = vmatpush.bf16.msra.mxu3 %v14720_v18  ;;  %v14931_v18 = vld [vmem:[#allocation5 + $0x1a50] sm:$0xf] }
 0x58c   :  { %8919 = vmatpush.bf16.msrb.mxu0 %v14784_v24  ;;  %v15059_v24 = vld [vmem:[#allocation5 + $0x1b50] sm:$0xf]  ;;  %v14932_v49 = vor.u32 %v16784_v12, %v14931_v18  ;;  %v15100_v18 = vor.u32 %v16826_v4, %v15099_v34  ;;  %v16817_v4 = vld [vmem:[#allocation5 + $0x1b64] sm:$0xf] }
 0x58d   :  { %8932 = vmatpush.bf16.msrb.mxu1 %v14848_v30  ;;  %v15060_v51 = vor.u32 %v16816_v62, %v15059_v24  ;;  %v14923_v30 = vld [vmem:[#allocation5 + $0x1a40] sm:$0xf]  ;;  %v15027_v48 = vld [vmem:[#allocation5 + $0x1b10] sm:$0xf]  ;;  %v16824_v24 = vld [vmem:[#allocation5 + $0x1b94] sm:$0xf0] }
 0x58e   :  { %8894 = vmatpush.bf16.msra.mxu2 %v14648_v15  ;;  %v15124_v15 = vor.u32 %v16832_v31, %v15123_v41  ;;  %v15091_v12 = vld [vmem:[#allocation5 + $0x1b90] sm:$0xf]  ;;  %v14891_v62 = vld [vmem:[#allocation5 + $0x1a00] sm:$0xf] }
 0x58f   :  { %8907 = vmatpush.bf16.msra.mxu3 %v14712_v59  ;;  %v14924_v59 = vor.u32 %v16782_v19, %v14923_v30  ;;  %v14955_v30 = vld [vmem:[#allocation5 + $0x1a80] sm:$0xf]  ;;  %v16790_v19 = vld [vmem:[#allocation5 + $0x1a84] sm:$0xf0] }
 0x590   :  { %8920 = vmatpush.bf16.msrb.mxu0 %v14776_v11  ;;  %v16780_v11 = vld [vmem:[#allocation5 + $0x1a34] sm:$0xf0] }
 0x591   :  { %8933 = vmatpush.bf16.msrb.mxu1 %v14840_v25  ;;  %v14916_v3 = vor.u32 %v16780_v11, %v14915_v35  ;;  %v15107_v25 = vld [vmem:[#allocation5 + $0x1bb0] sm:$0xf]  ;;  %v16819_v35 = vld [vmem:[#allocation5 + $0x1b74] sm:$0xf] }
 0x592   :  { %8895 = vmatpush.bf16.msra.mxu2 %v14640_v23  ;;  %v14971_v23 = vld [vmem:[#allocation5 + $0x1aa0] sm:$0xf]  ;;  %v15108_v8 = vor.u32 %v16828_v39, %v15107_v25 }
 0x593   :  { %8908 = vmatpush.bf16.msra.mxu3 %v14704_v44  ;;  %v14972_v28 = vor.u32 %v16794_v7, %v14971_v23  ;;  %v15141_v23 = vld [vmem:[#allocation5 + $0x1bf8] sm:$0xf0]  ;;  %v15080_v7 = vor.u32 %v16819_v35, %v15077_v2  ;;  %v16795_v35 = vld [vmem:[#allocation5 + $0x1ab4] sm:$0xf] }
 0x594   :  { %8921 = vmatpush.bf16.msrb.mxu0 %v14768_v58  ;;  %v7905_v54 = vpop.f32.mrf.mxu0  ;;  %v16810_v58 = vld [vmem:[#allocation5 + $0x1b24] sm:$0xf0] }
 0x595   :  { %8934 = vmatpush.bf16.msrb.mxu1 %v14832_v43  ;;  %8896 = vmatmul.bf16.vlgmr.msra.gmra.mxu2 %v17921_v55  ;;  %v14987_v55 = vld [vmem:[#allocation5 + $0x1ac0] sm:$0xf]  ;;  %v7918_v44 = vpop.f32.mrf.mxu1  ;;  %v15036_v37 = vor.u32 %v16810_v58, %v15035_v6  ;;  %v14941_v58 = vld [vmem:[#allocation5 + $0x1a68] sm:$0xf0] }
 0x596   :  { %9347 = vmatpush.bf16.msrb.mxu2 %v14948_v50  ;;  %8909 = vmatmul.bf16.vlgmr.msra.gmra.mxu3 %v17923_v32  ;;  %v16814_v32 = vld [vmem:[#allocation5 + $0x1b44] sm:$0xf0]  ;;  %v14988_v10 = vor.u32 %v16798_v29, %v14987_v55  ;;  %v15019_v55 = vld [vmem:[#allocation5 + $0x1b00] sm:$0xf] }
 0x597   :  { %9360 = vmatpush.bf16.msrb.mxu3 %v15012_v61  ;;  %8922 = vmatmul.bf16.vlgmr.msrb.gmra.mxu0 %v17925_v17  ;;  %v16830_v17 = vld [vmem:[#allocation5 + $0x1bc4] sm:$0xf0]  ;;  %v15052_v36 = vor.u32 %v16814_v32, %v15051_v40 }
 0x598   :  { %9373 = vmatpush.bf16.msra.mxu0 %v15076_v9  ;;  %8935 = vmatmul.bf16.vlgmr.msrb.gmra.mxu1 %v17927_v63  ;;  %v15116_v63 = vor.u32 %v16830_v17, %v15115_v13  ;;  %v7879_v50 = vpop.f32.mrf.mxu2  ;;  %v14908_v9 = vor.u32 %v16778_v38, %v14907_v27  ;;  %v16806_v32 = vld [vmem:[#allocation5 + $0x1b04] sm:$0xf0]  ;;  %v15092_v17 = vor.u32 %v16824_v24, %v15091_v12  ;;  %v16835_v38 = vld [vmem:[#allocation5 + $0x1bf4] sm:$0xf] }
 0x599   :  { %9386 = vmatpush.bf16.msra.mxu1 %v15140_v56  ;;  %v7892_v61 = vpop.f32.mrf.mxu3  ;;  %v16792_v56 = vld [vmem:[#allocation5 + $0x1a94] sm:$0xf0]  ;;  %v15020_v39 = vor.u32 %v16806_v32, %v15019_v55  ;;  %v15144_v42 = vor.u32 %v16835_v38, %v15141_v23  ;;  %v16815_v12 = vld [vmem:[#allocation5 + $0x1b54] sm:$0xf]  ;;  %v15053_v55 = vld [vmem:[#allocation5 + $0x1b48] sm:$0xf0] }
 0x59a   :  { %9348 = vmatpush.bf16.msrb.mxu2 %v14940_v45  ;;  %v7893_v43 = vadd.f32 %v7892_v61, %v7879_v50  ;;  %v8942_v45 = vld [vmem:[#allocation4 + $0x28] sm:$0x22]  ;;  %v16801_v50 = vld [vmem:[#allocation5 + $0x1ae4] sm:$0xf] }
 0x59b   :  { %9361 = vmatpush.bf16.msrb.mxu3 %v15004_v20  ;;  %v8943_v20 = vld [vmem:[#allocation4 + $0x38] sm:$0x22]  ;;  %v9012_v41 = vunpack.c.h.b16 %v8942_v45  ;;  %v14909_v23 = vld [vmem:[#allocation5 + $0x1a28] sm:$0xf0] }
 0x59c   :  { %9374 = vmatpush.bf16.msra.mxu0 %v15068_v46  ;;  %v7906_v46 = vadd.f32 %v7905_v54, %v7893_v43  ;;  %v7907_v57 = vpop.f32.mrf.mxu0  ;;  %v9013_v29 = vunpack.c.l.b16 %v8943_v20  ;;  %v9014_v21 = vunpack.c.h.b16 %v8943_v20  ;;  %v16833_v43 = vld [vmem:[#allocation5 + $0x1be4] sm:$0xf]  ;;  %v16799_v20 = vld [vmem:[#allocation5 + $0x1ad4] sm:$0xf] }
 0x59d   :  { %9387 = vmatpush.bf16.msra.mxu1 %v15132_v1  ;;  %v16774_v1 = vld [vmem:[#allocation5 + $0x1a04] sm:$0xf0]  ;;  %v7920_v40 = vpop.f32.mrf.mxu1  ;;  %v15061_v57 = vld [vmem:[#allocation5 + $0x1b58] sm:$0xf0] }
 0x59e   :  { %9349 = vmatpush.bf16.msrb.mxu2 %v14932_v49  ;;  %v9011_v49 = vunpack.c.l.b16 %v8942_v45  ;;  %v7919_v31 = vadd.f32 %v7918_v44, %v7906_v46  ;;  %v14892_v5 = vor.u32 %v16774_v1, %v14891_v62  ;;  %v16785_v44 = vld [vmem:[#allocation5 + $0x1a64] sm:$0xf]  ;;  %v17949_v34 = vpack.c.b16 %v9014_v21, %v9014_v21  ;;  %v16783_v45 = vld [vmem:[#allocation5 + $0x1a54] sm:$0xf]  ;;  %v14997_v46 = vld [vmem:[#allocation5 + $0x1ad8] sm:$0xf0] }
 0x59f   :  { %9362 = vmatpush.bf16.msrb.mxu3 %v14996_v33  ;;  %v14964_v33 = vor.u32 %v16792_v56, %v14963_v52  ;;  %v15133_v56 = vld [vmem:[#allocation5 + $0x1be8] sm:$0xf0]  ;;  %v15000_v62 = vor.u32 %v16799_v20, %v14997_v46  ;;  %v16831_v1 = vld [vmem:[#allocation5 + $0x1bd4] sm:$0xf]  ;;  %v14965_v20 = vld [vmem:[#allocation5 + $0x1a98] sm:$0xf0] }
 0x5a0   :  { %9375 = vmatpush.bf16.msra.mxu0 %v15060_v51  ;;  %v15028_v51 = vor.u32 %v16808_v47, %v15027_v48  ;;  %v17941_v13 = vadd.f32 %v7919_v31, %v17919_v16  ;;  %v7881_v11 = vpop.f32.mrf.mxu2  ;;  %v17943_v54 = vpack.c.b16 %v9011_v49, %v9011_v49  ;;  %v14956_v16 = vor.u32 %v16790_v19, %v14955_v30  ;;  %v14933_v48 = vld [vmem:[#allocation5 + $0x1a58] sm:$0xf0]  ;;  %v14989_v30 = vld [vmem:[#allocation5 + $0x1ac8] sm:$0xf0]  ;;  %v16813_v19 = vld [vmem:[#allocation5 + $0x1b44] sm:$0xf] }
 0x5a1   :  { %9388 = vmatpush.bf16.msra.mxu1 %v15124_v15  ;;  %v16787_v15 = vld [vmem:[#allocation5 + $0x1a74] sm:$0xf]  ;;  %v7894_v25 = vpop.f32.mrf.mxu3  ;;  %v15072_v47 = vor.u32 %v16817_v4, %v15069_v26  ;;  %v14936_v24 = vor.u32 %v16783_v45, %v14933_v48  ;;  %v15125_v49 = vld [vmem:[#allocation5 + $0x1bd8] sm:$0xf0]  ;;  %v15064_v31 = vor.u32 %v16815_v12, %v15061_v57 }
 0x5a2   :  { %9350 = vmatpush.bf16.msrb.mxu2 %v14924_v59  ;;  %v14949_v59 = vld [vmem:[#allocation5 + $0x1a78] sm:$0xf0]  ;;  %v9019_v61 = vrot.slane %v17943_v54, 1  ;;  %v16811_v21 = vld [vmem:[#allocation5 + $0x1b34] sm:$0xf] }
 0x5a3   :  { %9363 = vmatpush.bf16.msrb.mxu3 %v14988_v10  ;;  %v16803_v10 = vld [vmem:[#allocation5 + $0x1af4] sm:$0xf]  ;;  %v14981_v11 = vld [vmem:[#allocation5 + $0x1ab8] sm:$0xf0] }
 0x5a4   :  { %9376 = vmatpush.bf16.msra.mxu0 %v15052_v36  ;;  %v15013_v36 = vld [vmem:[#allocation5 + $0x1af8] sm:$0xf0]  ;;  %v14984_v25 = vor.u32 %v16795_v35, %v14981_v11  ;;  %v16807_v12 = vld [vmem:[#allocation5 + $0x1b14] sm:$0xf]  ;;  %v16868_v35 = vld [vmem:[#allocation5 + $0x1cf4] sm:$0xf0] }
 0x5a5   :  { %9389 = vmatpush.bf16.msra.mxu1 %v15116_v63  ;;  %v16822_v63 = vld [vmem:[#allocation5 + $0x1b84] sm:$0xf0]  ;;  %v15016_v27 = vor.u32 %v16803_v10, %v15013_v36  ;;  %v15056_v10 = vor.u32 %v16813_v19, %v15053_v55  ;;  %v14917_v36 = vld [vmem:[#allocation5 + $0x1a38] sm:$0xf0]  ;;  %v15331_v11 = vld [vmem:[#allocation5 + $0x1d70] sm:$0xf] }
 0x5a6   :  { %9351 = vmatpush.bf16.msrb.mxu2 %v14916_v3  ;;  %v17945_v3 = vpack.c.b16 %v9012_v41, %v9012_v41  ;;  %v15084_v6 = vor.u32 %v16822_v63, %v15083_v0  ;;  %v16781_v41 = vld [vmem:[#allocation5 + $0x1a44] sm:$0xf]  ;;  %v14901_v48 = vld [vmem:[#allocation5 + $0x1a18] sm:$0xf0] }
 0x5a7   :  { %9364 = vmatpush.bf16.msrb.mxu3 %v14980_v22  ;;  %v17947_v22 = vpack.c.b16 %v9013_v29, %v9013_v29  ;;  %v15128_v29 = vor.u32 %v16831_v1, %v15125_v49  ;;  %v15029_v57 = vld [vmem:[#allocation5 + $0x1b18] sm:$0xf0] }
 0x5a8   :  { %9377 = vmatpush.bf16.msra.mxu0 %v15044_v14  ;;  %v14952_v14 = vor.u32 %v16787_v15, %v14949_v59  ;;  %v16829_v15 = vld [vmem:[#allocation5 + $0x1bc4] sm:$0xf]  ;;  %v15117_v59 = vld [vmem:[#allocation5 + $0x1bc8] sm:$0xf0]  ;;  %v15093_v1 = vld [vmem:[#allocation5 + $0x1b98] sm:$0xf0]  ;;  %v15032_v55 = vor.u32 %v16807_v12, %v15029_v57 }
 0x5a9   :  { %9390 = vmatpush.bf16.msra.mxu1 %v15108_v8  ;;  %v15005_v8 = vld [vmem:[#allocation5 + $0x1ae8] sm:$0xf0]  ;;  %v15120_v0 = vor.u32 %v16829_v15, %v15117_v59  ;;  %v15203_v59 = vld [vmem:[#allocation5 + $0x1c70] sm:$0xf]  ;;  %v16880_v12 = vld [vmem:[#allocation5 + $0x1d54] sm:$0xf0] }
 0x5aa   :  { %9352 = vmatpush.bf16.msrb.mxu2 %v14908_v9  ;;  %v9020_v9 = vrot.slane %v17945_v3, 1  ;;  %v15008_v52 = vor.u32 %v16801_v50, %v15005_v8  ;;  %v16862_v3 = vld [vmem:[#allocation5 + $0x1cc4] sm:$0xf0] }
 0x5ab   :  { %9365 = vmatpush.bf16.msrb.mxu3 %v14972_v28  ;;  %v9021_v28 = vrot.slane %v17947_v22, 1 }
 0x5ac   :  { %9378 = vmatpush.bf16.msra.mxu0 %v15036_v37  ;;  %v14944_v37 = vor.u32 %v16785_v44, %v14941_v58  ;;  %v16793_v44 = vld [vmem:[#allocation5 + $0x1aa4] sm:$0xf]  ;;  %v15037_v58 = vld [vmem:[#allocation5 + $0x1b28] sm:$0xf0] }
 0x5ad   :  { %9391 = vmatpush.bf16.msra.mxu1 %v15100_v18  ;;  %v9022_v18 = vrot.slane %v17949_v34, 1  ;;  %v16876_v34 = vld [vmem:[#allocation5 + $0x1d34] sm:$0xf0] }
 0x5ae   :  { %9353 = vmatpush.bf16.msrb.mxu2 %v14900_v60  ;;  %v15136_v60 = vor.u32 %v16833_v43, %v15133_v56  ;;  %v16775_v56 = vld [vmem:[#allocation5 + $0x1a14] sm:$0xf] }
 0x5af   :  { %9366 = vmatpush.bf16.msrb.mxu3 %v14964_v33  ;;  %v14925_v33 = vld [vmem:[#allocation5 + $0x1a48] sm:$0xf0] }
 0x5b0   :  { %9379 = vmatpush.bf16.msra.mxu0 %v15028_v51  ;;  %v16797_v51 = vld [vmem:[#allocation5 + $0x1ac4] sm:$0xf]  ;;  %v14928_v40 = vor.u32 %v16781_v41, %v14925_v33  ;;  %v14904_v41 = vor.u32 %v16775_v56, %v14901_v48  ;;  %v16848_v48 = vld [vmem:[#allocation5 + $0x1c54] sm:$0xf0] }
 0x5b1   :  { %9392 = vmatpush.bf16.msra.mxu1 %v15092_v17  ;;  %v14992_v32 = vor.u32 %v16797_v51, %v14989_v30  ;;  %v16779_v17 = vld [vmem:[#allocation5 + $0x1a34] sm:$0xf]  ;;  %v16773_v33 = vld [vmem:[#allocation5 + $0x1a04] sm:$0xf]  ;;  %v14893_v51 = vld [vmem:[#allocation5 + $0x1a08] sm:$0xf0] }
 0x5b2   :  { %9354 = vmatpush.bf16.msrb.mxu2 %v14892_v5  ;;  %v15045_v5 = vld [vmem:[#allocation5 + $0x1b38] sm:$0xf0]  ;;  %v14920_v63 = vor.u32 %v16779_v17, %v14917_v36  ;;  %v16789_v30 = vld [vmem:[#allocation5 + $0x1a84] sm:$0xf]  ;;  %v16852_v17 = vld [vmem:[#allocation5 + $0x1c74] sm:$0xf0] }
 0x5b3   :  { %9367 = vmatpush.bf16.msrb.mxu3 %v14956_v16  ;;  %v16827_v16 = vld [vmem:[#allocation5 + $0x1bb4] sm:$0xf]  ;;  %v15048_v38 = vor.u32 %v16811_v21, %v15045_v5  ;;  %v16884_v21 = vld [vmem:[#allocation5 + $0x1d74] sm:$0xf0] }
 0x5b4   :  { %9380 = vmatpush.bf16.msra.mxu0 %v15020_v39  ;;  %v8364_v2 = vpop.f32.mrf.mxu0  ;;  %v15109_v39 = vld [vmem:[#allocation5 + $0x1bb8] sm:$0xf0] }
 0x5b5   :  { %9393 = vmatpush.bf16.msra.mxu1 %v15084_v6  ;;  %9355 = vmatmul.bf16.vlgmr.msrb.gmra.mxu2 %v9019_v61  ;;  %v16809_v6 = vld [vmem:[#allocation5 + $0x1b24] sm:$0xf]  ;;  %v15112_v4 = vor.u32 %v16827_v16, %v15109_v39  ;;  %v15085_v16 = vld [vmem:[#allocation5 + $0x1b88] sm:$0xf0] }
 0x5b6   :  { %9399 = vmatpush.bf16.msra.mxu2 %v14952_v14  ;;  %9368 = vmatmul.bf16.vlgmr.msrb.gmra.mxu3 %v9020_v9  ;;  %v16777_v14 = vld [vmem:[#allocation5 + $0x1a24] sm:$0xf]  ;;  %v15040_v45 = vor.u32 %v16809_v6, %v15037_v58  ;;  %v15259_v6 = vld [vmem:[#allocation5 + $0x1ce0] sm:$0xf] }
 0x5b7   :  { %9412 = vmatpush.bf16.msra.mxu3 %v15016_v27  ;;  %9381 = vmatmul.bf16.vlgmr.msra.gmra.mxu0 %v9021_v28  ;;  %v8377_v27 = vpop.f32.mrf.mxu1 }
 0x5b8   :  { %9425 = vmatpush.bf16.msrb.mxu0 %v15080_v7  ;;  %9394 = vmatmul.bf16.vlgmr.msra.gmra.mxu1 %v9022_v18  ;;  %v14973_v7 = vld [vmem:[#allocation5 + $0x1aa8] sm:$0xf0]  ;;  %v8338_v50 = vpop.f32.mrf.mxu2 }
 0x5b9   :  { %9438 = vmatpush.bf16.msrb.mxu1 %v15144_v42  ;;  %v8351_v8 = vpop.f32.mrf.mxu3  ;;  %v14912_v42 = vor.u32 %v16777_v14, %v14909_v23  ;;  %v14976_v43 = vor.u32 %v16793_v44, %v14973_v7  ;;  %v15395_v14 = vld [vmem:[#allocation5 + $0x1df0] sm:$0xf]  ;;  %v15332_v23 = vor.u32 %v16884_v21, %v15331_v11  ;;  %v15195_v44 = vld [vmem:[#allocation5 + $0x1c60] sm:$0xf]  ;;  %v16850_v7 = vld [vmem:[#allocation5 + $0x1c64] sm:$0xf0] }
 0x5ba   :  { %9400 = vmatpush.bf16.msra.mxu2 %v14944_v37  ;;  %v8352_v26 = vadd.f32 %v8351_v8, %v8338_v50  ;;  %v16825_v37 = vld [vmem:[#allocation5 + $0x1ba4] sm:$0xf]  ;;  %v16866_v50 = vld [vmem:[#allocation5 + $0x1ce4] sm:$0xf0]  ;;  %v15323_v8 = vld [vmem:[#allocation5 + $0x1d60] sm:$0xf] }
 0x5bb   :  { %9413 = vmatpush.bf16.msra.mxu3 %v15008_v52  ;;  %v15101_v52 = vld [vmem:[#allocation5 + $0x1ba8] sm:$0xf0] }
 0x5bc   :  { %9426 = vmatpush.bf16.msrb.mxu0 %v15072_v47  ;;  %v16791_v47 = vld [vmem:[#allocation5 + $0x1a94] sm:$0xf]  ;;  %v8365_v46 = vadd.f32 %v8364_v2, %v8352_v26 }
 0x5bd   :  { %9439 = vmatpush.bf16.msrb.mxu1 %v15136_v60  ;;  %v8366_v60 = vpop.f32.mrf.mxu0 }
 0x5be   :  { %9401 = vmatpush.bf16.msra.mxu2 %v14936_v24  ;;  %v15104_v24 = vor.u32 %v16825_v37, %v15101_v52  ;;  %v8378_v49 = vadd.f32 %v8377_v27, %v8365_v46  ;;  %v16900_v27 = vld [vmem:[#allocation5 + $0x1df4] sm:$0xf0]  ;;  %v16898_v37 = vld [vmem:[#allocation5 + $0x1de4] sm:$0xf0]  ;;  %v15260_v52 = vor.u32 %v16866_v50, %v15259_v6  ;;  %v15315_v46 = vld [vmem:[#allocation5 + $0x1d50] sm:$0xf] }
 0x5bf   :  { %9414 = vmatpush.bf16.msra.mxu3 %v15000_v62  ;;  %v16823_v62 = vld [vmem:[#allocation5 + $0x1b94] sm:$0xf]  ;;  %v8379_v19 = vpop.f32.mrf.mxu1  ;;  %v15396_v26 = vor.u32 %v16900_v27, %v15395_v14  ;;  %v15316_v54 = vor.u32 %v16880_v12, %v15315_v46  ;;  %v15355_v27 = vld [vmem:[#allocation5 + $0x1da0] sm:$0xf]  ;;  %v16840_v6 = vld [vmem:[#allocation5 + $0x1c14] sm:$0xf0] }
 0x5c0   :  { %9427 = vmatpush.bf16.msrb.mxu0 %v15064_v31  ;;  %v14968_v31 = vor.u32 %v16791_v47, %v14965_v20  ;;  %v17964_v15 = vadd.f32 %v8378_v49, %v17934_v53  ;;  %v15096_v36 = vor.u32 %v16823_v62, %v15093_v1  ;;  %v8340_v5 = vpop.f32.mrf.mxu2  ;;  %v15204_v53 = vor.u32 %v16852_v17, %v15203_v59  ;;  %v15251_v47 = vld [vmem:[#allocation5 + $0x1cd0] sm:$0xf]  ;;  %v16864_v20 = vld [vmem:[#allocation5 + $0x1cd4] sm:$0xf0]  ;;  %v16846_v49 = vld [vmem:[#allocation5 + $0x1c44] sm:$0xf0] }
 0x5c1   :  { %9440 = vmatpush.bf16.msrb.mxu1 %v15128_v29  ;;  %v14957_v29 = vld [vmem:[#allocation5 + $0x1a88] sm:$0xf0]  ;;  %v8353_v2 = vpop.f32.mrf.mxu3  ;;  %v16896_v62 = vld [vmem:[#allocation5 + $0x1dd4] sm:$0xf0]  ;;  %v15252_v1 = vor.u32 %v16864_v20, %v15251_v47  ;;  %v15299_v59 = vld [vmem:[#allocation5 + $0x1d30] sm:$0xf] }
 0x5c2   :  { %9402 = vmatpush.bf16.msra.mxu2 %v14928_v40  ;;  %v16805_v40 = vld [vmem:[#allocation5 + $0x1b04] sm:$0xf]  ;;  %v15300_v21 = vor.u32 %v16876_v34, %v15299_v59  ;;  %v15163_v5 = vld [vmem:[#allocation5 + $0x1c20] sm:$0xf]  ;;  %v16842_v2 = vld [vmem:[#allocation5 + $0x1c24] sm:$0xf0] }
 0x5c3   :  { %9415 = vmatpush.bf16.msra.mxu3 %v14992_v32  ;;  %v15021_v32 = vld [vmem:[#allocation5 + $0x1b08] sm:$0xf0]  ;;  %v16888_v46 = vld [vmem:[#allocation5 + $0x1d94] sm:$0xf0]  ;;  %v15147_v12 = vld [vmem:[#allocation5 + $0x1c00] sm:$0xf] }
 0x5c4   :  { %9428 = vmatpush.bf16.msrb.mxu0 %v15056_v10  ;;  %v15267_v10 = vld [vmem:[#allocation5 + $0x1cf0] sm:$0xf]  ;;  %v15024_v39 = vor.u32 %v16805_v40, %v15021_v32  ;;  %v16860_v32 = vld [vmem:[#allocation5 + $0x1cb4] sm:$0xf0]  ;;  %v15333_v59 = vld [vmem:[#allocation5 + $0x1d78] sm:$0xf0] }
 0x5c5   :  { %9441 = vmatpush.bf16.msrb.mxu1 %v15120_v0  ;;  %v14896_v0 = vor.u32 %v16773_v33, %v14893_v51  ;;  %v16894_v51 = vld [vmem:[#allocation5 + $0x1dc4] sm:$0xf0]  ;;  %v15235_v40 = vld [vmem:[#allocation5 + $0x1cb0] sm:$0xf]  ;;  %v15339_v34 = vld [vmem:[#allocation5 + $0x1d80] sm:$0xf] }
 0x5c6   :  { %9403 = vmatpush.bf16.msra.mxu2 %v14920_v63  ;;  %v14960_v63 = vor.u32 %v16789_v30, %v14957_v29  ;;  %v16844_v29 = vld [vmem:[#allocation5 + $0x1c34] sm:$0xf0]  ;;  %v15236_v11 = vor.u32 %v16860_v32, %v15235_v40 }
 0x5c7   :  { %9416 = vmatpush.bf16.msra.mxu3 %v14984_v25  ;;  %v16821_v25 = vld [vmem:[#allocation5 + $0x1b84] sm:$0xf] }
 0x5c8   :  { %9429 = vmatpush.bf16.msrb.mxu0 %v15048_v38  ;;  %v15268_v38 = vor.u32 %v16868_v35, %v15267_v10  ;;  %v15088_v58 = vor.u32 %v16821_v25, %v15085_v16  ;;  %v16892_v35 = vld [vmem:[#allocation5 + $0x1db4] sm:$0xf0]  ;;  %v16858_v25 = vld [vmem:[#allocation5 + $0x1ca4] sm:$0xf0]  ;;  %v15291_v16 = vld [vmem:[#allocation5 + $0x1d20] sm:$0xf] }
 0x5c9   :  { %9442 = vmatpush.bf16.msrb.mxu1 %v15112_v4  ;;  %v16882_v4 = vld [vmem:[#allocation5 + $0x1d64] sm:$0xf0] }
 0x5ca   :  { %9404 = vmatpush.bf16.msra.mxu2 %v14912_v42  ;;  %v15196_v42 = vor.u32 %v16850_v7, %v15195_v44  ;;  %v15324_v56 = vor.u32 %v16882_v4, %v15323_v8  ;;  %v16890_v44 = vld [vmem:[#allocation5 + $0x1da4] sm:$0xf0]  ;;  %v15155_v7 = vld [vmem:[#allocation5 + $0x1c10] sm:$0xf] }
 0x5cb   :  { %9417 = vmatpush.bf16.msra.mxu3 %v14976_v43  ;;  %v15387_v43 = vld [vmem:[#allocation5 + $0x1de0] sm:$0xf]  ;;  %v15219_v4 = vld [vmem:[#allocation5 + $0x1c90] sm:$0xf]  ;;  %v15156_v20 = vor.u32 %v16840_v6, %v15155_v7  ;;  %v15325_v7 = vld [vmem:[#allocation5 + $0x1d68] sm:$0xf0] }
 0x5cc   :  { %9430 = vmatpush.bf16.msrb.mxu0 %v15040_v45  ;;  %v15187_v45 = vld [vmem:[#allocation5 + $0x1c50] sm:$0xf]  ;;  %v15388_v57 = vor.u32 %v16898_v37, %v15387_v43  ;;  %v16872_v37 = vld [vmem:[#allocation5 + $0x1d14] sm:$0xf0] }
 0x5cd   :  { %9443 = vmatpush.bf16.msrb.mxu1 %v15104_v24  ;;  %v15188_v60 = vor.u32 %v16848_v48, %v15187_v45  ;;  %v15379_v24 = vld [vmem:[#allocation5 + $0x1dd0] sm:$0xf]  ;;  %v15356_v45 = vor.u32 %v16890_v44, %v15355_v27  ;;  %v16881_v44 = vld [vmem:[#allocation5 + $0x1d64] sm:$0xf] }
 0x5ce   :  { %9405 = vmatpush.bf16.msra.mxu2 %v14904_v41  ;;  %v15243_v41 = vld [vmem:[#allocation5 + $0x1cc0] sm:$0xf]  ;;  %v15380_v33 = vor.u32 %v16896_v62, %v15379_v24  ;;  %v15283_v43 = vld [vmem:[#allocation5 + $0x1d10] sm:$0xf] }
 0x5cf   :  { %9418 = vmatpush.bf16.msra.mxu3 %v14968_v31  ;;  %v16878_v31 = vld [vmem:[#allocation5 + $0x1d44] sm:$0xf0]  ;;  %v15244_v30 = vor.u32 %v16862_v3, %v15243_v41  ;;  %v15347_v48 = vld [vmem:[#allocation5 + $0x1d90] sm:$0xf]  ;;  %v15275_v41 = vld [vmem:[#allocation5 + $0x1d00] sm:$0xf] }
 0x5d0   :  { %9431 = vmatpush.bf16.msrb.mxu0 %v15032_v55  ;;  %v15171_v55 = vld [vmem:[#allocation5 + $0x1c30] sm:$0xf] }
 0x5d1   :  { %9444 = vmatpush.bf16.msrb.mxu1 %v15096_v36  ;;  %v15172_v10 = vor.u32 %v16844_v29, %v15171_v55  ;;  %v15363_v36 = vld [vmem:[#allocation5 + $0x1db0] sm:$0xf]  ;;  %v16883_v55 = vld [vmem:[#allocation5 + $0x1d74] sm:$0xf] }
 0x5d2   :  { %9406 = vmatpush.bf16.msra.mxu2 %v14896_v0  ;;  %v15227_v0 = vld [vmem:[#allocation5 + $0x1ca0] sm:$0xf]  ;;  %v15364_v14 = vor.u32 %v16892_v35, %v15363_v36 }
 0x5d3   :  { %9419 = vmatpush.bf16.msra.mxu3 %v14960_v63  ;;  %v15228_v50 = vor.u32 %v16858_v25, %v15227_v0  ;;  %v15397_v0 = vld [vmem:[#allocation5 + $0x1df8] sm:$0xf0]  ;;  %v15336_v25 = vor.u32 %v16883_v55, %v15333_v59  ;;  %v16859_v55 = vld [vmem:[#allocation5 + $0x1cb4] sm:$0xf] }
 0x5d4   :  { %9432 = vmatpush.bf16.msrb.mxu0 %v15024_v39  ;;  %v8416_v17 = vpop.f32.mrf.mxu0  ;;  %v16874_v39 = vld [vmem:[#allocation5 + $0x1d24] sm:$0xf0] }
 0x5d5   :  { %9445 = vmatpush.bf16.msrb.mxu1 %v15088_v58  ;;  %9407 = vmatmul.bf16.vlgmr.msra.gmra.mxu2 %v9019_v61  ;;  %v15179_v61 = vld [vmem:[#allocation5 + $0x1c40] sm:$0xf]  ;;  %v8429_v63 = vpop.f32.mrf.mxu1  ;;  %v15292_v8 = vor.u32 %v16874_v39, %v15291_v16  ;;  %v15197_v39 = vld [vmem:[#allocation5 + $0x1c68] sm:$0xf0] }
 0x5d6   :  { %9858 = vmatpush.bf16.msrb.mxu2 %v15204_v53  ;;  %9420 = vmatmul.bf16.vlgmr.msra.gmra.mxu3 %v9020_v9  ;;  %v15307_v9 = vld [vmem:[#allocation5 + $0x1d40] sm:$0xf]  ;;  %v15180_v22 = vor.u32 %v16846_v49, %v15179_v61  ;;  %v16854_v49 = vld [vmem:[#allocation5 + $0x1c84] sm:$0xf0] }
 0x5d7   :  { %9871 = vmatpush.bf16.msrb.mxu3 %v15268_v38  ;;  %9433 = vmatmul.bf16.vlgmr.msrb.gmra.mxu0 %v9021_v28  ;;  %v15371_v28 = vld [vmem:[#allocation5 + $0x1dc0] sm:$0xf]  ;;  %v15308_v19 = vor.u32 %v16878_v31, %v15307_v9  ;;  %v16870_v31 = vld [vmem:[#allocation5 + $0x1d04] sm:$0xf0] }
 0x5d8   :  { %9884 = vmatpush.bf16.msra.mxu0 %v15332_v23  ;;  %9446 = vmatmul.bf16.vlgmr.msrb.gmra.mxu1 %v9022_v18  ;;  %v15372_v18 = vor.u32 %v16894_v51, %v15371_v28  ;;  %v8390_v53 = vpop.f32.mrf.mxu2  ;;  %v15164_v23 = vor.u32 %v16842_v2, %v15163_v5  ;;  %v15211_v61 = vld [vmem:[#allocation5 + $0x1c80] sm:$0xf]  ;;  %v15348_v51 = vor.u32 %v16888_v46, %v15347_v48  ;;  %v16899_v2 = vld [vmem:[#allocation5 + $0x1df4] sm:$0xf] }
 0x5d9   :  { %9897 = vmatpush.bf16.msra.mxu1 %v15396_v26  ;;  %v8403_v38 = vpop.f32.mrf.mxu3  ;;  %v16856_v26 = vld [vmem:[#allocation5 + $0x1c94] sm:$0xf0]  ;;  %v15276_v35 = vor.u32 %v16870_v31, %v15275_v41  ;;  %v15400_v6 = vor.u32 %v16899_v2, %v15397_v0  ;;  %v16879_v48 = vld [vmem:[#allocation5 + $0x1d54] sm:$0xf]  ;;  %v15309_v41 = vld [vmem:[#allocation5 + $0x1d48] sm:$0xf0] }
 0x5da   :  { %9859 = vmatpush.bf16.msrb.mxu2 %v15196_v42  ;;  %v8404_v58 = vadd.f32 %v8403_v38, %v8390_v53  ;;  %v9453_v42 = vld [vmem:[#allocation4 + $0x28] sm:$0x44]  ;;  %v16865_v53 = vld [vmem:[#allocation5 + $0x1ce4] sm:$0xf] }
 0x5db   :  { %9872 = vmatpush.bf16.msrb.mxu3 %v15260_v52  ;;  %v9454_v52 = vld [vmem:[#allocation4 + $0x38] sm:$0x44]  ;;  %v9523_v24 = vunpack.c.h.b16 %v9453_v42  ;;  %v15165_v0 = vld [vmem:[#allocation5 + $0x1c28] sm:$0xf0] }
 0x5dc   :  { %9885 = vmatpush.bf16.msra.mxu0 %v15324_v56  ;;  %v8417_v56 = vadd.f32 %v8416_v17, %v8404_v58  ;;  %v8418_v47 = vpop.f32.mrf.mxu0  ;;  %v9524_v3 = vunpack.c.l.b16 %v9454_v52  ;;  %v9525_v40 = vunpack.c.h.b16 %v9454_v52  ;;  %v16897_v58 = vld [vmem:[#allocation5 + $0x1de4] sm:$0xf]  ;;  %v16863_v52 = vld [vmem:[#allocation5 + $0x1cd4] sm:$0xf] }
 0x5dd   :  { %9898 = vmatpush.bf16.msra.mxu1 %v15388_v57  ;;  %v16838_v57 = vld [vmem:[#allocation5 + $0x1c04] sm:$0xf0]  ;;  %v8431_v9 = vpop.f32.mrf.mxu1  ;;  %v15317_v47 = vld [vmem:[#allocation5 + $0x1d58] sm:$0xf0] }
 0x5de   :  { %9860 = vmatpush.bf16.msrb.mxu2 %v15188_v60  ;;  %v9522_v60 = vunpack.c.l.b16 %v9453_v42  ;;  %v8430_v62 = vadd.f32 %v8429_v63, %v8417_v56  ;;  %v15148_v32 = vor.u32 %v16838_v57, %v15147_v12  ;;  %v16849_v63 = vld [vmem:[#allocation5 + $0x1c64] sm:$0xf]  ;;  %v17983_v27 = vpack.c.b16 %v9525_v40, %v9525_v40  ;;  %v16847_v42 = vld [vmem:[#allocation5 + $0x1c54] sm:$0xf]  ;;  %v15253_v56 = vld [vmem:[#allocation5 + $0x1cd8] sm:$0xf0] }
 0x5df   :  { %9873 = vmatpush.bf16.msrb.mxu3 %v15252_v1  ;;  %v15220_v1 = vor.u32 %v16856_v26, %v15219_v4  ;;  %v15389_v26 = vld [vmem:[#allocation5 + $0x1de8] sm:$0xf0]  ;;  %v15256_v12 = vor.u32 %v16863_v52, %v15253_v56  ;;  %v16895_v57 = vld [vmem:[#allocation5 + $0x1dd4] sm:$0xf]  ;;  %v15221_v52 = vld [vmem:[#allocation5 + $0x1c98] sm:$0xf0] }
 0x5e0   :  { %9886 = vmatpush.bf16.msra.mxu0 %v15316_v54  ;;  %v15284_v54 = vor.u32 %v16872_v37, %v15283_v43  ;;  %v17975_v28 = vadd.f32 %v8430_v62, %v17941_v13  ;;  %v8392_v29 = vpop.f32.mrf.mxu2  ;;  %v17977_v17 = vpack.c.b16 %v9522_v60, %v9522_v60  ;;  %v15212_v13 = vor.u32 %v16854_v49, %v15211_v61  ;;  %v15189_v43 = vld [vmem:[#allocation5 + $0x1c58] sm:$0xf0]  ;;  %v15245_v61 = vld [vmem:[#allocation5 + $0x1cc8] sm:$0xf0]  ;;  %v16877_v49 = vld [vmem:[#allocation5 + $0x1d44] sm:$0xf] }
 0x5e1   :  { %9899 = vmatpush.bf16.msra.mxu1 %v15380_v33  ;;  %v16851_v33 = vld [vmem:[#allocation5 + $0x1c74] sm:$0xf]  ;;  %v8405_v36 = vpop.f32.mrf.mxu3  ;;  %v15328_v37 = vor.u32 %v16881_v44, %v15325_v7  ;;  %v15192_v46 = vor.u32 %v16847_v42, %v15189_v43  ;;  %v15381_v60 = vld [vmem:[#allocation5 + $0x1dd8] sm:$0xf0]  ;;  %v15320_v62 = vor.u32 %v16879_v48, %v15317_v47 }
 0x5e2   :  { %9861 = vmatpush.bf16.msrb.mxu2 %v15180_v22  ;;  %v15205_v22 = vld [vmem:[#allocation5 + $0x1c78] sm:$0xf0]  ;;  %v9530_v38 = vrot.slane %v17977_v17, 2  ;;  %v16875_v40 = vld [vmem:[#allocation5 + $0x1d34] sm:$0xf] }
 0x5e3   :  { %9874 = vmatpush.bf16.msrb.mxu3 %v15244_v30  ;;  %v16867_v30 = vld [vmem:[#allocation5 + $0x1cf4] sm:$0xf]  ;;  %v15237_v29 = vld [vmem:[#allocation5 + $0x1cb8] sm:$0xf0] }
 0x5e4   :  { %9887 = vmatpush.bf16.msra.mxu0 %v15308_v19  ;;  %v15269_v19 = vld [vmem:[#allocation5 + $0x1cf8] sm:$0xf0]  ;;  %v15240_v36 = vor.u32 %v16859_v55, %v15237_v29  ;;  %v16871_v48 = vld [vmem:[#allocation5 + $0x1d14] sm:$0xf]  ;;  %v16932_v55 = vld [vmem:[#allocation5 + $0x1ef4] sm:$0xf0] }
 0x5e5   :  { %9900 = vmatpush.bf16.msra.mxu1 %v15372_v18  ;;  %v16886_v18 = vld [vmem:[#allocation5 + $0x1d84] sm:$0xf0]  ;;  %v15272_v5 = vor.u32 %v16867_v30, %v15269_v19  ;;  %v15312_v30 = vor.u32 %v16877_v49, %v15309_v41  ;;  %v15173_v19 = vld [vmem:[#allocation5 + $0x1c38] sm:$0xf0]  ;;  %v15587_v29 = vld [vmem:[#allocation5 + $0x1f70] sm:$0xf] }
 0x5e6   :  { %9862 = vmatpush.bf16.msrb.mxu2 %v15172_v10  ;;  %v17979_v10 = vpack.c.b16 %v9523_v24, %v9523_v24  ;;  %v15340_v16 = vor.u32 %v16886_v18, %v15339_v34  ;;  %v16845_v24 = vld [vmem:[#allocation5 + $0x1c44] sm:$0xf]  ;;  %v15157_v43 = vld [vmem:[#allocation5 + $0x1c18] sm:$0xf0] }
 0x5e7   :  { %9875 = vmatpush.bf16.msrb.mxu3 %v15236_v11  ;;  %v17981_v11 = vpack.c.b16 %v9524_v3, %v9524_v3  ;;  %v15384_v3 = vor.u32 %v16895_v57, %v15381_v60  ;;  %v15285_v47 = vld [vmem:[#allocation5 + $0x1d18] sm:$0xf0] }
 0x5e8   :  { %9888 = vmatpush.bf16.msra.mxu0 %v15300_v21  ;;  %v15208_v21 = vor.u32 %v16851_v33, %v15205_v22  ;;  %v16893_v33 = vld [vmem:[#allocation5 + $0x1dc4] sm:$0xf]  ;;  %v15373_v22 = vld [vmem:[#allocation5 + $0x1dc8] sm:$0xf0]  ;;  %v15349_v57 = vld [vmem:[#allocation5 + $0x1d98] sm:$0xf0]  ;;  %v15288_v41 = vor.u32 %v16871_v48, %v15285_v47 }
 0x5e9   :  { %9901 = vmatpush.bf16.msra.mxu1 %v15364_v14  ;;  %v15261_v14 = vld [vmem:[#allocation5 + $0x1ce8] sm:$0xf0]  ;;  %v15376_v34 = vor.u32 %v16893_v33, %v15373_v22  ;;  %v15459_v22 = vld [vmem:[#allocation5 + $0x1e70] sm:$0xf]  ;;  %v16944_v48 = vld [vmem:[#allocation5 + $0x1f54] sm:$0xf0] }
 0x5ea   :  { %9863 = vmatpush.bf16.msrb.mxu2 %v15164_v23  ;;  %v9531_v23 = vrot.slane %v17979_v10, 2  ;;  %v15264_v4 = vor.u32 %v16865_v53, %v15261_v14  ;;  %v16926_v10 = vld [vmem:[#allocation5 + $0x1ec4] sm:$0xf0] }
 0x5eb   :  { %9876 = vmatpush.bf16.msrb.mxu3 %v15228_v50  ;;  %v9532_v50 = vrot.slane %v17981_v11, 2 }
 0x5ec   :  { %9889 = vmatpush.bf16.msra.mxu0 %v15292_v8  ;;  %v15200_v8 = vor.u32 %v16849_v63, %v15197_v39  ;;  %v16857_v63 = vld [vmem:[#allocation5 + $0x1ca4] sm:$0xf]  ;;  %v15293_v39 = vld [vmem:[#allocation5 + $0x1d28] sm:$0xf0] }
 0x5ed   :  { %9902 = vmatpush.bf16.msra.mxu1 %v15356_v45  ;;  %v9533_v45 = vrot.slane %v17983_v27, 2  ;;  %v16940_v27 = vld [vmem:[#allocation5 + $0x1f34] sm:$0xf0] }
 0x5ee   :  { %9864 = vmatpush.bf16.msrb.mxu2 %v15156_v20  ;;  %v15392_v20 = vor.u32 %v16897_v58, %v15389_v26  ;;  %v16839_v26 = vld [vmem:[#allocation5 + $0x1c14] sm:$0xf] }
 0x5ef   :  { %9877 = vmatpush.bf16.msrb.mxu3 %v15220_v1  ;;  %v15181_v1 = vld [vmem:[#allocation5 + $0x1c48] sm:$0xf0] }
 0x5f0   :  { %9890 = vmatpush.bf16.msra.mxu0 %v15284_v54  ;;  %v16861_v54 = vld [vmem:[#allocation5 + $0x1cc4] sm:$0xf]  ;;  %v15184_v9 = vor.u32 %v16845_v24, %v15181_v1  ;;  %v15160_v24 = vor.u32 %v16839_v26, %v15157_v43  ;;  %v16912_v43 = vld [vmem:[#allocation5 + $0x1e54] sm:$0xf0] }
 0x5f1   :  { %9903 = vmatpush.bf16.msra.mxu1 %v15348_v51  ;;  %v15248_v31 = vor.u32 %v16861_v54, %v15245_v61  ;;  %v16843_v51 = vld [vmem:[#allocation5 + $0x1c34] sm:$0xf]  ;;  %v16837_v1 = vld [vmem:[#allocation5 + $0x1c04] sm:$0xf]  ;;  %v15149_v54 = vld [vmem:[#allocation5 + $0x1c08] sm:$0xf0] }
 0x5f2   :  { %9865 = vmatpush.bf16.msrb.mxu2 %v15148_v32  ;;  %v15301_v32 = vld [vmem:[#allocation5 + $0x1d38] sm:$0xf0]  ;;  %v15176_v18 = vor.u32 %v16843_v51, %v15173_v19  ;;  %v16853_v61 = vld [vmem:[#allocation5 + $0x1c84] sm:$0xf]  ;;  %v16916_v51 = vld [vmem:[#allocation5 + $0x1e74] sm:$0xf0] }
 0x5f3   :  { %9878 = vmatpush.bf16.msrb.mxu3 %v15212_v13  ;;  %v16891_v13 = vld [vmem:[#allocation5 + $0x1db4] sm:$0xf]  ;;  %v15304_v2 = vor.u32 %v16875_v40, %v15301_v32  ;;  %v16948_v40 = vld [vmem:[#allocation5 + $0x1f74] sm:$0xf0] }
 0x5f4   :  { %9891 = vmatpush.bf16.msra.mxu0 %v15276_v35  ;;  %v8871_v59 = vpop.f32.mrf.mxu0  ;;  %v15365_v35 = vld [vmem:[#allocation5 + $0x1db8] sm:$0xf0] }
 0x5f5   :  { %9904 = vmatpush.bf16.msra.mxu1 %v15340_v16  ;;  %9866 = vmatmul.bf16.vlgmr.msrb.gmra.mxu2 %v9530_v38  ;;  %v16873_v16 = vld [vmem:[#allocation5 + $0x1d24] sm:$0xf]  ;;  %v15368_v44 = vor.u32 %v16891_v13, %v15365_v35  ;;  %v15341_v13 = vld [vmem:[#allocation5 + $0x1d88] sm:$0xf0] }
 0x5f6   :  { %9910 = vmatpush.bf16.msra.mxu2 %v15208_v21  ;;  %9879 = vmatmul.bf16.vlgmr.msrb.gmra.mxu3 %v9531_v23  ;;  %v16841_v21 = vld [vmem:[#allocation5 + $0x1c24] sm:$0xf]  ;;  %v15296_v42 = vor.u32 %v16873_v16, %v15293_v39  ;;  %v15515_v16 = vld [vmem:[#allocation5 + $0x1ee0] sm:$0xf] }
 0x5f7   :  { %9923 = vmatpush.bf16.msra.mxu3 %v15272_v5  ;;  %9892 = vmatmul.bf16.vlgmr.msra.gmra.mxu0 %v9532_v50  ;;  %v8884_v5 = vpop.f32.mrf.mxu1 }
 0x5f8   :  { %9936 = vmatpush.bf16.msrb.mxu0 %v15336_v25  ;;  %9905 = vmatmul.bf16.vlgmr.msra.gmra.mxu1 %v9533_v45  ;;  %v15229_v25 = vld [vmem:[#allocation5 + $0x1ca8] sm:$0xf0]  ;;  %v8845_v53 = vpop.f32.mrf.mxu2 }
 0x5f9   :  { %9949 = vmatpush.bf16.msrb.mxu1 %v15400_v6  ;;  %v8858_v14 = vpop.f32.mrf.mxu3  ;;  %v15168_v6 = vor.u32 %v16841_v21, %v15165_v0  ;;  %v15232_v58 = vor.u32 %v16857_v63, %v15229_v25  ;;  %v15651_v21 = vld [vmem:[#allocation5 + $0x1ff0] sm:$0xf]  ;;  %v15588_v0 = vor.u32 %v16948_v40, %v15587_v29  ;;  %v15451_v63 = vld [vmem:[#allocation5 + $0x1e60] sm:$0xf]  ;;  %v16914_v25 = vld [vmem:[#allocation5 + $0x1e64] sm:$0xf0] }
 0x5fa   :  { %9911 = vmatpush.bf16.msra.mxu2 %v15200_v8  ;;  %v8859_v7 = vadd.f32 %v8858_v14, %v8845_v53  ;;  %v16889_v8 = vld [vmem:[#allocation5 + $0x1da4] sm:$0xf]  ;;  %v16930_v53 = vld [vmem:[#allocation5 + $0x1ee4] sm:$0xf0]  ;;  %v15579_v14 = vld [vmem:[#allocation5 + $0x1f60] sm:$0xf] }
 0x5fb   :  { %9924 = vmatpush.bf16.msra.mxu3 %v15264_v4  ;;  %v15357_v4 = vld [vmem:[#allocation5 + $0x1da8] sm:$0xf0] }
 0x5fc   :  { %9937 = vmatpush.bf16.msrb.mxu0 %v15328_v37  ;;  %v16855_v37 = vld [vmem:[#allocation5 + $0x1c94] sm:$0xf]  ;;  %v8872_v56 = vadd.f32 %v8871_v59, %v8859_v7 }
 0x5fd   :  { %9950 = vmatpush.bf16.msrb.mxu1 %v15392_v20  ;;  %v8873_v20 = vpop.f32.mrf.mxu0 }
 0x5fe   :  { %9912 = vmatpush.bf16.msra.mxu2 %v15192_v46  ;;  %v15360_v46 = vor.u32 %v16889_v8, %v15357_v4  ;;  %v8885_v60 = vadd.f32 %v8884_v5, %v8872_v56  ;;  %v16964_v5 = vld [vmem:[#allocation5 + $0x1ff4] sm:$0xf0]  ;;  %v16962_v8 = vld [vmem:[#allocation5 + $0x1fe4] sm:$0xf0]  ;;  %v15516_v4 = vor.u32 %v16930_v53, %v15515_v16  ;;  %v15571_v56 = vld [vmem:[#allocation5 + $0x1f50] sm:$0xf] }
 0x5ff   :  { %9925 = vmatpush.bf16.msra.mxu3 %v15256_v12  ;;  %v16887_v12 = vld [vmem:[#allocation5 + $0x1d94] sm:$0xf]  ;;  %v8886_v49 = vpop.f32.mrf.mxu1  ;;  %v15652_v7 = vor.u32 %v16964_v5, %v15651_v21  ;;  %v15572_v17 = vor.u32 %v16944_v48, %v15571_v56  ;;  %v15611_v5 = vld [vmem:[#allocation5 + $0x1fa0] sm:$0xf]  ;;  %v16904_v16 = vld [vmem:[#allocation5 + $0x1e14] sm:$0xf0] }
 0x600   :  { %9938 = vmatpush.bf16.msrb.mxu0 %v15320_v62  ;;  %v15224_v62 = vor.u32 %v16855_v37, %v15221_v52  ;;  %v17998_v33 = vadd.f32 %v8885_v60, %v17964_v15  ;;  %v15352_v19 = vor.u32 %v16887_v12, %v15349_v57  ;;  %v8847_v32 = vpop.f32.mrf.mxu2  ;;  %v15460_v15 = vor.u32 %v16916_v51, %v15459_v22  ;;  %v15507_v37 = vld [vmem:[#allocation5 + $0x1ed0] sm:$0xf]  ;;  %v16928_v52 = vld [vmem:[#allocation5 + $0x1ed4] sm:$0xf0]  ;;  %v16910_v60 = vld [vmem:[#allocation5 + $0x1e44] sm:$0xf0] }
 0x601   :  { %9951 = vmatpush.bf16.msrb.mxu1 %v15384_v3  ;;  %v15213_v3 = vld [vmem:[#allocation5 + $0x1c88] sm:$0xf0]  ;;  %v8860_v59 = vpop.f32.mrf.mxu3  ;;  %v16960_v12 = vld [vmem:[#allocation5 + $0x1fd4] sm:$0xf0]  ;;  %v15508_v57 = vor.u32 %v16928_v52, %v15507_v37  ;;  %v15555_v22 = vld [vmem:[#allocation5 + $0x1f30] sm:$0xf] }
 0x602   :  { %9913 = vmatpush.bf16.msra.mxu2 %v15184_v9  ;;  %v16869_v9 = vld [vmem:[#allocation5 + $0x1d04] sm:$0xf]  ;;  %v15556_v40 = vor.u32 %v16940_v27, %v15555_v22  ;;  %v15419_v32 = vld [vmem:[#allocation5 + $0x1e20] sm:$0xf]  ;;  %v16906_v59 = vld [vmem:[#allocation5 + $0x1e24] sm:$0xf0] }
 0x603   :  { %9926 = vmatpush.bf16.msra.mxu3 %v15248_v31  ;;  %v15277_v31 = vld [vmem:[#allocation5 + $0x1d08] sm:$0xf0]  ;;  %v16952_v56 = vld [vmem:[#allocation5 + $0x1f94] sm:$0xf0]  ;;  %v15403_v48 = vld [vmem:[#allocation5 + $0x1e00] sm:$0xf] }
 0x604   :  { %9939 = vmatpush.bf16.msrb.mxu0 %v15312_v30  ;;  %v15523_v30 = vld [vmem:[#allocation5 + $0x1ef0] sm:$0xf]  ;;  %v15280_v35 = vor.u32 %v16869_v9, %v15277_v31  ;;  %v16924_v31 = vld [vmem:[#allocation5 + $0x1eb4] sm:$0xf0]  ;;  %v15589_v22 = vld [vmem:[#allocation5 + $0x1f78] sm:$0xf0] }
 0x605   :  { %9952 = vmatpush.bf16.msrb.mxu1 %v15376_v34  ;;  %v15152_v34 = vor.u32 %v16837_v1, %v15149_v54  ;;  %v16958_v54 = vld [vmem:[#allocation5 + $0x1fc4] sm:$0xf0]  ;;  %v15491_v9 = vld [vmem:[#allocation5 + $0x1eb0] sm:$0xf]  ;;  %v15595_v27 = vld [vmem:[#allocation5 + $0x1f80] sm:$0xf] }
 0x606   :  { %9914 = vmatpush.bf16.msra.mxu2 %v15176_v18  ;;  %v15216_v18 = vor.u32 %v16853_v61, %v15213_v3  ;;  %v16908_v3 = vld [vmem:[#allocation5 + $0x1e34] sm:$0xf0]  ;;  %v15492_v29 = vor.u32 %v16924_v31, %v15491_v9 }
 0x607   :  { %9927 = vmatpush.bf16.msra.mxu3 %v15240_v36  ;;  %v16885_v36 = vld [vmem:[#allocation5 + $0x1d84] sm:$0xf] }
 0x608   :  { %9940 = vmatpush.bf16.msrb.mxu0 %v15304_v2  ;;  %v15524_v2 = vor.u32 %v16932_v55, %v15523_v30  ;;  %v15344_v39 = vor.u32 %v16885_v36, %v15341_v13  ;;  %v16956_v55 = vld [vmem:[#allocation5 + $0x1fb4] sm:$0xf0]  ;;  %v16922_v36 = vld [vmem:[#allocation5 + $0x1ea4] sm:$0xf0]  ;;  %v15547_v13 = vld [vmem:[#allocation5 + $0x1f20] sm:$0xf] }
 0x609   :  { %9953 = vmatpush.bf16.msrb.mxu1 %v15368_v44  ;;  %v16946_v44 = vld [vmem:[#allocation5 + $0x1f64] sm:$0xf0] }
 0x60a   :  { %9915 = vmatpush.bf16.msra.mxu2 %v15168_v6  ;;  %v15452_v6 = vor.u32 %v16914_v25, %v15451_v63  ;;  %v15580_v26 = vor.u32 %v16946_v44, %v15579_v14  ;;  %v16954_v63 = vld [vmem:[#allocation5 + $0x1fa4] sm:$0xf0]  ;;  %v15411_v25 = vld [vmem:[#allocation5 + $0x1e10] sm:$0xf] }
 0x60b   :  { %9928 = vmatpush.bf16.msra.mxu3 %v15232_v58  ;;  %v15643_v58 = vld [vmem:[#allocation5 + $0x1fe0] sm:$0xf]  ;;  %v15475_v44 = vld [vmem:[#allocation5 + $0x1e90] sm:$0xf]  ;;  %v15412_v52 = vor.u32 %v16904_v16, %v15411_v25  ;;  %v15581_v25 = vld [vmem:[#allocation5 + $0x1f68] sm:$0xf0] }
 0x60c   :  { %9941 = vmatpush.bf16.msrb.mxu0 %v15296_v42  ;;  %v15443_v42 = vld [vmem:[#allocation5 + $0x1e50] sm:$0xf]  ;;  %v15644_v47 = vor.u32 %v16962_v8, %v15643_v58  ;;  %v16936_v8 = vld [vmem:[#allocation5 + $0x1f14] sm:$0xf0] }
 0x60d   :  { %9954 = vmatpush.bf16.msrb.mxu1 %v15360_v46  ;;  %v15444_v20 = vor.u32 %v16912_v43, %v15443_v42  ;;  %v15635_v46 = vld [vmem:[#allocation5 + $0x1fd0] sm:$0xf]  ;;  %v15612_v42 = vor.u32 %v16954_v63, %v15611_v5  ;;  %v16945_v63 = vld [vmem:[#allocation5 + $0x1f64] sm:$0xf] }
 0x60e   :  { %9916 = vmatpush.bf16.msra.mxu2 %v15160_v24  ;;  %v15499_v24 = vld [vmem:[#allocation5 + $0x1ec0] sm:$0xf]  ;;  %v15636_v1 = vor.u32 %v16960_v12, %v15635_v46  ;;  %v15539_v58 = vld [vmem:[#allocation5 + $0x1f10] sm:$0xf] }
 0x60f   :  { %9929 = vmatpush.bf16.msra.mxu3 %v15224_v62  ;;  %v16942_v62 = vld [vmem:[#allocation5 + $0x1f44] sm:$0xf0]  ;;  %v15500_v61 = vor.u32 %v16926_v10, %v15499_v24  ;;  %v15603_v43 = vld [vmem:[#allocation5 + $0x1f90] sm:$0xf]  ;;  %v15531_v24 = vld [vmem:[#allocation5 + $0x1f00] sm:$0xf] }
 0x610   :  { %9942 = vmatpush.bf16.msrb.mxu0 %v15288_v41  ;;  %v15427_v41 = vld [vmem:[#allocation5 + $0x1e30] sm:$0xf] }
 0x611   :  { %9955 = vmatpush.bf16.msrb.mxu1 %v15352_v19  ;;  %v15428_v30 = vor.u32 %v16908_v3, %v15427_v41  ;;  %v15619_v19 = vld [vmem:[#allocation5 + $0x1fb0] sm:$0xf]  ;;  %v16947_v41 = vld [vmem:[#allocation5 + $0x1f74] sm:$0xf] }
 0x612   :  { %9917 = vmatpush.bf16.msra.mxu2 %v15152_v34  ;;  %v15483_v34 = vld [vmem:[#allocation5 + $0x1ea0] sm:$0xf]  ;;  %v15620_v21 = vor.u32 %v16956_v55, %v15619_v19 }
 0x613   :  { %9930 = vmatpush.bf16.msra.mxu3 %v15216_v18  ;;  %v15484_v53 = vor.u32 %v16922_v36, %v15483_v34  ;;  %v15653_v34 = vld [vmem:[#allocation5 + $0x1ff8] sm:$0xf0]  ;;  %v15592_v36 = vor.u32 %v16947_v41, %v15589_v22  ;;  %v16923_v41 = vld [vmem:[#allocation5 + $0x1eb4] sm:$0xf] }
 0x614   :  { %9943 = vmatpush.bf16.msrb.mxu0 %v15280_v35  ;;  %v8923_v51 = vpop.f32.mrf.mxu0  ;;  %v16938_v35 = vld [vmem:[#allocation5 + $0x1f24] sm:$0xf0] }
 0x615   :  { %9956 = vmatpush.bf16.msrb.mxu1 %v15344_v39  ;;  %9918 = vmatmul.bf16.vlgmr.msra.gmra.mxu2 %v9530_v38  ;;  %v15435_v38 = vld [vmem:[#allocation5 + $0x1e40] sm:$0xf]  ;;  %v8936_v18 = vpop.f32.mrf.mxu1  ;;  %v15548_v14 = vor.u32 %v16938_v35, %v15547_v13  ;;  %v15453_v35 = vld [vmem:[#allocation5 + $0x1e68] sm:$0xf0] }
 0x616   :  { %10369 = vmatpush.bf16.msrb.mxu2 %v15460_v15  ;;  %9931 = vmatmul.bf16.vlgmr.msra.gmra.mxu3 %v9531_v23  ;;  %v15563_v23 = vld [vmem:[#allocation5 + $0x1f40] sm:$0xf]  ;;  %v15436_v11 = vor.u32 %v16910_v60, %v15435_v38  ;;  %v16918_v60 = vld [vmem:[#allocation5 + $0x1e84] sm:$0xf0] }
 0x617   :  { %10382 = vmatpush.bf16.msrb.mxu3 %v15524_v2  ;;  %9944 = vmatmul.bf16.vlgmr.msrb.gmra.mxu0 %v9532_v50  ;;  %v15627_v50 = vld [vmem:[#allocation5 + $0x1fc0] sm:$0xf]  ;;  %v15564_v49 = vor.u32 %v16942_v62, %v15563_v23  ;;  %v16934_v62 = vld [vmem:[#allocation5 + $0x1f04] sm:$0xf0] }
 0x618   :  { %10395 = vmatpush.bf16.msra.mxu0 %v15588_v0  ;;  %9957 = vmatmul.bf16.vlgmr.msrb.gmra.mxu1 %v9533_v45  ;;  %v15628_v45 = vor.u32 %v16958_v54, %v15627_v50  ;;  %v8897_v15 = vpop.f32.mrf.mxu2  ;;  %v15420_v0 = vor.u32 %v16906_v59, %v15419_v32  ;;  %v15467_v38 = vld [vmem:[#allocation5 + $0x1e80] sm:$0xf]  ;;  %v15604_v54 = vor.u32 %v16952_v56, %v15603_v43  ;;  %v16963_v59 = vld [vmem:[#allocation5 + $0x1ff4] sm:$0xf] }
 0x619   :  { %10408 = vmatpush.bf16.msra.mxu1 %v15652_v7  ;;  %v8910_v2 = vpop.f32.mrf.mxu3  ;;  %v16920_v7 = vld [vmem:[#allocation5 + $0x1e94] sm:$0xf0]  ;;  %v15532_v55 = vor.u32 %v16934_v62, %v15531_v24  ;;  %v15656_v16 = vor.u32 %v16963_v59, %v15653_v34  ;;  %v16943_v43 = vld [vmem:[#allocation5 + $0x1f54] sm:$0xf]  ;;  %v15565_v24 = vld [vmem:[#allocation5 + $0x1f48] sm:$0xf0] }
 0x61a   :  { %10370 = vmatpush.bf16.msrb.mxu2 %v15452_v6  ;;  %v8911_v39 = vadd.f32 %v8910_v2, %v8897_v15  ;;  %v9964_v6 = vld [vmem:[#allocation4 + $0x28] sm:$0x88]  ;;  %v16929_v15 = vld [vmem:[#allocation5 + $0x1ee4] sm:$0xf] }
 0x61b   :  { %10383 = vmatpush.bf16.msrb.mxu3 %v15516_v4  ;;  %v9965_v4 = vld [vmem:[#allocation4 + $0x38] sm:$0x88]  ;;  %v10034_v46 = vunpack.c.h.b16 %v9964_v6  ;;  %v15421_v34 = vld [vmem:[#allocation5 + $0x1e28] sm:$0xf0] }
 0x61c   :  { %10396 = vmatpush.bf16.msra.mxu0 %v15580_v26  ;;  %v8924_v26 = vadd.f32 %v8923_v51, %v8911_v39  ;;  %v8925_v37 = vpop.f32.mrf.mxu0  ;;  %v10035_v10 = vunpack.c.l.b16 %v9965_v4  ;;  %v10036_v9 = vunpack.c.h.b16 %v9965_v4  ;;  %v16961_v39 = vld [vmem:[#allocation5 + $0x1fe4] sm:$0xf]  ;;  %v16927_v4 = vld [vmem:[#allocation5 + $0x1ed4] sm:$0xf] }
 0x61d   :  { %10409 = vmatpush.bf16.msra.mxu1 %v15644_v47  ;;  %v16902_v47 = vld [vmem:[#allocation5 + $0x1e04] sm:$0xf0]  ;;  %v8938_v23 = vpop.f32.mrf.mxu1  ;;  %v15573_v37 = vld [vmem:[#allocation5 + $0x1f58] sm:$0xf0] }
 0x61e   :  { %10371 = vmatpush.bf16.msrb.mxu2 %v15444_v20  ;;  %v10033_v20 = vunpack.c.l.b16 %v9964_v6  ;;  %v8937_v12 = vadd.f32 %v8936_v18, %v8924_v26  ;;  %v15404_v31 = vor.u32 %v16902_v47, %v15403_v48  ;;  %v16913_v18 = vld [vmem:[#allocation5 + $0x1e64] sm:$0xf]  ;;  %v18017_v5 = vpack.c.b16 %v10036_v9, %v10036_v9  ;;  %v16911_v6 = vld [vmem:[#allocation5 + $0x1e54] sm:$0xf]  ;;  %v15509_v26 = vld [vmem:[#allocation5 + $0x1ed8] sm:$0xf0] }
 0x61f   :  { %10384 = vmatpush.bf16.msrb.mxu3 %v15508_v57  ;;  %v15476_v57 = vor.u32 %v16920_v7, %v15475_v44  ;;  %v15645_v7 = vld [vmem:[#allocation5 + $0x1fe8] sm:$0xf0]  ;;  %v15512_v48 = vor.u32 %v16927_v4, %v15509_v26  ;;  %v16959_v47 = vld [vmem:[#allocation5 + $0x1fd4] sm:$0xf]  ;;  %v15477_v4 = vld [vmem:[#allocation5 + $0x1e98] sm:$0xf0] }
 0x620   :  { %10397 = vmatpush.bf16.msra.mxu0 %v15572_v17  ;;  %v15540_v17 = vor.u32 %v16936_v8, %v15539_v58  ;;  %v18009_v50 = vadd.f32 %v8937_v12, %v17975_v28  ;;  %v8899_v3 = vpop.f32.mrf.mxu2  ;;  %v18011_v51 = vpack.c.b16 %v10033_v20, %v10033_v20  ;;  %v15468_v28 = vor.u32 %v16918_v60, %v15467_v38  ;;  %v15445_v58 = vld [vmem:[#allocation5 + $0x1e58] sm:$0xf0]  ;;  %v15501_v38 = vld [vmem:[#allocation5 + $0x1ec8] sm:$0xf0]  ;;  %v16941_v60 = vld [vmem:[#allocation5 + $0x1f44] sm:$0xf] }
 0x621   :  { %10410 = vmatpush.bf16.msra.mxu1 %v15636_v1  ;;  %v16915_v1 = vld [vmem:[#allocation5 + $0x1e74] sm:$0xf]  ;;  %v8912_v19 = vpop.f32.mrf.mxu3  ;;  %v15584_v8 = vor.u32 %v16945_v63, %v15581_v25  ;;  %v15448_v56 = vor.u32 %v16911_v6, %v15445_v58  ;;  %v15637_v20 = vld [vmem:[#allocation5 + $0x1fd8] sm:$0xf0]  ;;  %v15576_v12 = vor.u32 %v16943_v43, %v15573_v37 }
 0x622   :  { %10372 = vmatpush.bf16.msrb.mxu2 %v15436_v11  ;;  %v15461_v11 = vld [vmem:[#allocation5 + $0x1e78] sm:$0xf0]  ;;  %v10041_v2 = vrot.slane %v18011_v51, 3  ;;  %v16939_v9 = vld [vmem:[#allocation5 + $0x1f34] sm:$0xf] }
 0x623   :  { %10385 = vmatpush.bf16.msrb.mxu3 %v15500_v61  ;;  %v16931_v61 = vld [vmem:[#allocation5 + $0x1ef4] sm:$0xf]  ;;  %v15493_v3 = vld [vmem:[#allocation5 + $0x1eb8] sm:$0xf0] }
 0x624   :  { %10398 = vmatpush.bf16.msra.mxu0 %v15564_v49  ;;  %v15525_v49 = vld [vmem:[#allocation5 + $0x1ef8] sm:$0xf0]  ;;  %v15496_v19 = vor.u32 %v16923_v41, %v15493_v3  ;;  %v16935_v43 = vld [vmem:[#allocation5 + $0x1f14] sm:$0xf]  ;;  %v16949_v3 = vld [vmem:[#allocation5 + $0x1f84] sm:$0xf] }
 0x625   :  { %10411 = vmatpush.bf16.msra.mxu1 %v15628_v45  ;;  %v16950_v45 = vld [vmem:[#allocation5 + $0x1f84] sm:$0xf0]  ;;  %v15528_v32 = vor.u32 %v16931_v61, %v15525_v49  ;;  %v15568_v61 = vor.u32 %v16941_v60, %v15565_v24  ;;  %v15429_v49 = vld [vmem:[#allocation5 + $0x1e38] sm:$0xf0]  ;;  %v15405_v60 = vld [vmem:[#allocation5 + $0x1e08] sm:$0xf0] }
 0x626   :  { %10373 = vmatpush.bf16.msrb.mxu2 %v15428_v30  ;;  %v18013_v30 = vpack.c.b16 %v10034_v46, %v10034_v46  ;;  %v15596_v13 = vor.u32 %v16950_v45, %v15595_v27  ;;  %v16909_v46 = vld [vmem:[#allocation5 + $0x1e44] sm:$0xf]  ;;  %v15413_v58 = vld [vmem:[#allocation5 + $0x1e18] sm:$0xf0] }
 0x627   :  { %10386 = vmatpush.bf16.msrb.mxu3 %v15492_v29  ;;  %v18015_v29 = vpack.c.b16 %v10035_v10, %v10035_v10  ;;  %v15640_v10 = vor.u32 %v16959_v47, %v15637_v20  ;;  %v15541_v37 = vld [vmem:[#allocation5 + $0x1f18] sm:$0xf0]  ;;  %v16917_v24 = vld [vmem:[#allocation5 + $0x1e84] sm:$0xf] }
 0x628   :  { %10399 = vmatpush.bf16.msra.mxu0 %v15556_v40  ;;  %v15464_v40 = vor.u32 %v16915_v1, %v15461_v11  ;;  %v16957_v1 = vld [vmem:[#allocation5 + $0x1fc4] sm:$0xf]  ;;  %v15629_v11 = vld [vmem:[#allocation5 + $0x1fc8] sm:$0xf0] }
 0x629   :  { %10412 = vmatpush.bf16.msra.mxu1 %v15620_v21  ;;  %v15517_v21 = vld [vmem:[#allocation5 + $0x1ee8] sm:$0xf0]  ;;  %v15632_v27 = vor.u32 %v16957_v1, %v15629_v11 }
 0x62a   :  { %10374 = vmatpush.bf16.msrb.mxu2 %v15420_v0  ;;  %v10042_v0 = vrot.slane %v18013_v30, 3  ;;  %v15520_v44 = vor.u32 %v16929_v15, %v15517_v21  ;;  %v15533_v1 = vld [vmem:[#allocation5 + $0x1f08] sm:$0xf0] }
 0x62b   :  { %10387 = vmatpush.bf16.msrb.mxu3 %v15484_v53  ;;  %v10043_v53 = vrot.slane %v18015_v29, 3 }
 0x62c   :  { %10400 = vmatpush.bf16.msra.mxu0 %v15548_v14  ;;  %v15456_v14 = vor.u32 %v16913_v18, %v15453_v35  ;;  %v16921_v18 = vld [vmem:[#allocation5 + $0x1ea4] sm:$0xf]  ;;  %v15549_v35 = vld [vmem:[#allocation5 + $0x1f28] sm:$0xf0] }
 0x62d   :  { %10413 = vmatpush.bf16.msra.mxu1 %v15612_v42  ;;  %v10044_v42 = vrot.slane %v18017_v5, 3 }
 0x62e   :  { %10375 = vmatpush.bf16.msrb.mxu2 %v15412_v52  ;;  %v15648_v52 = vor.u32 %v16961_v39, %v15645_v7  ;;  %v16903_v7 = vld [vmem:[#allocation5 + $0x1e14] sm:$0xf] }
 0x62f   :  { %10388 = vmatpush.bf16.msrb.mxu3 %v15476_v57  ;;  %v15437_v57 = vld [vmem:[#allocation5 + $0x1e48] sm:$0xf0]  ;;  %v15416_v47 = vor.u32 %v16903_v7, %v15413_v58  ;;  %v16967_v58 = vld [vmem:[%s18099_s7 + $0x10] sm:$0xff] }
 0x630   :  { %10401 = vmatpush.bf16.msra.mxu0 %v15540_v17  ;;  %v16925_v17 = vld [vmem:[#allocation5 + $0x1ec4] sm:$0xf]  ;;  %v15440_v23 = vor.u32 %v16909_v46, %v15437_v57  ;;  %v16951_v46 = vld [vmem:[#allocation5 + $0x1f94] sm:$0xf] }
 0x631   :  { %10414 = vmatpush.bf16.msra.mxu1 %v15604_v54  ;;  %v15504_v62 = vor.u32 %v16925_v17, %v15501_v38  ;;  %v16907_v54 = vld [vmem:[#allocation5 + $0x1e34] sm:$0xf]  ;;  %v16901_v57 = vld [vmem:[#allocation5 + $0x1e04] sm:$0xf]  ;;  %v15544_v38 = vor.u32 %v16935_v43, %v15541_v37  ;;  %v16966_v43 = vld [vmem:[%s18099_s7 + $0x8] sm:$0xff] }
 0x632   :  { %10376 = vmatpush.bf16.msrb.mxu2 %v15404_v31  ;;  %v15557_v31 = vld [vmem:[#allocation5 + $0x1f38] sm:$0xf0]  ;;  %v15432_v45 = vor.u32 %v16907_v54, %v15429_v49  ;;  %v15408_v49 = vor.u32 %v16901_v57, %v15405_v60  ;;  %v16978_v57 = vld [vmem:[%s18099_s7 + $0x68] sm:$0xff] }
 0x633   :  { %10389 = vmatpush.bf16.msrb.mxu3 %v15468_v28  ;;  %v16955_v28 = vld [vmem:[#allocation5 + $0x1fb4] sm:$0xf]  ;;  %v15560_v59 = vor.u32 %v16939_v9, %v15557_v31  ;;  %v15597_v9 = vld [vmem:[#allocation5 + $0x1f88] sm:$0xf0]  ;;  %v16976_v60 = vld [vmem:[%s18099_s7 + $0x58] sm:$0xff] }
 0x634   :  { %10402 = vmatpush.bf16.msra.mxu0 %v15532_v55  ;;  %v9382_v22 = vpop.f32.mrf.mxu0  ;;  %v15621_v55 = vld [vmem:[#allocation5 + $0x1fb8] sm:$0xf0] }
 0x635   :  { %10415 = vmatpush.bf16.msra.mxu1 %v15596_v13  ;;  %10377 = vmatmul.bf16.vlgmr.msrb.gmra.mxu2 %v10041_v2  ;;  %v16937_v13 = vld [vmem:[#allocation5 + $0x1f24] sm:$0xf]  ;;  %v15624_v63 = vor.u32 %v16955_v28, %v15621_v55 }
 0x636   :  { %10421 = vmatpush.bf16.msra.mxu2 %v15464_v40  ;;  %10390 = vmatmul.bf16.vlgmr.msrb.gmra.mxu3 %v10042_v0  ;;  %v16905_v40 = vld [vmem:[#allocation5 + $0x1e24] sm:$0xf]  ;;  %v15552_v6 = vor.u32 %v16937_v13, %v15549_v35  ;;  %v16972_v35 = vld [vmem:[%s18099_s7 + $0x38] sm:$0xff] }
 0x637   :  { %10434 = vmatpush.bf16.msra.mxu3 %v15528_v32  ;;  %10403 = vmatmul.bf16.vlgmr.msra.gmra.mxu0 %v10043_v53  ;;  %v9395_v32 = vpop.f32.mrf.mxu1 }
 0x638   :  { %10447 = vmatpush.bf16.msrb.mxu0 %v15592_v36  ;;  %10416 = vmatmul.bf16.vlgmr.msra.gmra.mxu1 %v10044_v42  ;;  %v15485_v36 = vld [vmem:[#allocation5 + $0x1ea8] sm:$0xf0]  ;;  %v9356_v15 = vpop.f32.mrf.mxu2 }
 0x639   :  { %10460 = vmatpush.bf16.msrb.mxu1 %v15656_v16  ;;  %v9369_v21 = vpop.f32.mrf.mxu3  ;;  %v15424_v16 = vor.u32 %v16905_v40, %v15421_v34  ;;  %v15488_v39 = vor.u32 %v16921_v18, %v15485_v36 }
 0x63a   :  { %10422 = vmatpush.bf16.msra.mxu2 %v15456_v14  ;;  %v9370_v25 = vadd.f32 %v9369_v21, %v9356_v15  ;;  %v16953_v14 = vld [vmem:[#allocation5 + $0x1fa4] sm:$0xf] }
 0x63b   :  { %10435 = vmatpush.bf16.msra.mxu3 %v15520_v44  ;;  %v15613_v44 = vld [vmem:[#allocation5 + $0x1fa8] sm:$0xf0] }
 0x63c   :  { %10448 = vmatpush.bf16.msrb.mxu0 %v15584_v8  ;;  %v16919_v8 = vld [vmem:[#allocation5 + $0x1e94] sm:$0xf]  ;;  %v9383_v26 = vadd.f32 %v9382_v22, %v9370_v25  ;;  %v15600_v22 = vor.u32 %v16949_v3, %v15597_v9  ;;  %v16970_v25 = vld [vmem:[%s18099_s7 + $0x28] sm:$0xff] }
 0x63d   :  { %10461 = vmatpush.bf16.msrb.mxu1 %v15648_v52  ;;  %v9384_v52 = vpop.f32.mrf.mxu0  ;;  %v15480_v20 = vor.u32 %v16919_v8, %v15477_v4 }
 0x63e   :  { %10423 = vmatpush.bf16.msra.mxu2 %v15448_v56  ;;  %v15616_v56 = vor.u32 %v16953_v14, %v15613_v44  ;;  %v16968_v14 = vld [vmem:[%s18099_s7 + $0x18] sm:$0xff] }
 0x63f   :  { %10436 = vmatpush.bf16.msra.mxu3 %v15512_v48  ;;  %v9396_v48 = vadd.f32 %v9395_v32, %v9383_v26  ;;  %v9397_v17 = vpop.f32.mrf.mxu1 }
 0x640   :  { %10449 = vmatpush.bf16.msrb.mxu0 %v15576_v12  ;;  %v15605_v12 = vld [vmem:[#allocation5 + $0x1f98] sm:$0xf0]  ;;  %v9358_v54 = vpop.f32.mrf.mxu2  ;;  %v16977_v17 = vld [vmem:[%s18099_s7 + $0x60] sm:$0xff] }
 0x641   :  { %10462 = vmatpush.bf16.msrb.mxu1 %v15640_v10  ;;  %v15469_v10 = vld [vmem:[#allocation5 + $0x1e88] sm:$0xf0]  ;;  %v15608_v11 = vor.u32 %v16951_v46, %v15605_v12  ;;  %v16980_v46 = vld [vmem:[%s18099_s7 + $0x78] sm:$0xff]  ;;  %v16979_v12 = vld [vmem:[%s18099_s7 + $0x70] sm:$0xff] }
 0x642   :  { %10424 = vmatpush.bf16.msra.mxu2 %v15440_v23  ;;  %v9451_v23 = vadd.f32 %v9396_v48, %v17998_v33  ;;  %v15472_v41 = vor.u32 %v16917_v24, %v15469_v10 }
 0x643   :  { %10437 = vmatpush.bf16.msra.mxu3 %v15504_v62  ;;  %v16933_v62 = vld [vmem:[#allocation5 + $0x1f04] sm:$0xf] }
 0x644   :  { %10450 = vmatpush.bf16.msrb.mxu0 %v15568_v61  ;;  %v9371_v61 = vpop.f32.mrf.mxu3  ;;  %v15536_v31 = vor.u32 %v16933_v62, %v15533_v1  ;;  %v16975_v62 = vld [vmem:[%s18099_s7 + $0x50] sm:$0xff] }
 0x645   :  { %10463 = vmatpush.bf16.msrb.mxu1 %v15632_v27 }
 0x646   :  { %10425 = vmatpush.bf16.msra.mxu2 %v15432_v45 }
 0x647   :  { %10438 = vmatpush.bf16.msra.mxu3 %v15496_v19 }
 0x648   :  { %10451 = vmatpush.bf16.msrb.mxu0 %v15560_v59 }
 0x649   :  { %10464 = vmatpush.bf16.msrb.mxu1 %v15624_v63 }
 0x64a   :  { %10426 = vmatpush.bf16.msra.mxu2 %v15424_v16  ;;  %v16969_v16 = vld [vmem:[%s18099_s7 + $0x20] sm:$0xff] }
 0x64b   :  { %10439 = vmatpush.bf16.msra.mxu3 %v15488_v39 }
 0x64c   :  { %10452 = vmatpush.bf16.msrb.mxu0 %v15552_v6 }
 0x64d   :  { %10465 = vmatpush.bf16.msrb.mxu1 %v15616_v56 }
 0x64e   :  { %10427 = vmatpush.bf16.msra.mxu2 %v15416_v47 }
 0x64f   :  { %10440 = vmatpush.bf16.msra.mxu3 %v15480_v20  ;;  %v16965_v20 = vld [vmem:[%s18099_s7] sm:$0xff] }
 0x650   :  { %10453 = vmatpush.bf16.msrb.mxu0 %v15544_v38 }
 0x651   :  { %10466 = vmatpush.bf16.msrb.mxu1 %v15608_v11  ;;  %v10475_v11 = vld [vmem:[#allocation15] sm:$0x3] }
 0x652   :  { %10428 = vmatpush.bf16.msra.mxu2 %v15408_v49  ;;  %v16974_v49 = vld [vmem:[%s18099_s7 + $0x48] sm:$0xff]  ;;  %v10477_v3 = vperm.slane %v10475_v11, 0 }
 0x653   :  { %10441 = vmatpush.bf16.msra.mxu3 %v15472_v41 }
 0x654   :  { %10454 = vmatpush.bf16.msrb.mxu0 %v15536_v31  ;;  %v9434_v33 = vpop.f32.mrf.mxu0 }
 0x655   :  { %10467 = vmatpush.bf16.msrb.mxu1 %v15600_v22  ;;  %10429 = vmatmul.bf16.vlgmr.msra.gmra.mxu2 %v10041_v2  ;;  %v9447_v27 = vpop.f32.mrf.mxu1 }
 0x656   :  { %10442 = vmatmul.bf16.vlgmr.msra.gmra.mxu3 %v10042_v0  ;;  %10619 = vmatpush.bf16.msrb.mxu2 %v16972_v35 }
 0x657   :  { %10455 = vmatmul.bf16.vlgmr.msrb.gmra.mxu0 %v10043_v53  ;;  %10632 = vmatpush.bf16.msrb.mxu3 %v16980_v46 }
 0x658   :  { %10468 = vmatmul.bf16.vlgmr.msrb.gmra.mxu1 %v10044_v42  ;;  %v9408_v45 = vpop.f32.mrf.mxu2 }
 0x659   :  { %v9421_v19 = vpop.f32.mrf.mxu3 }
 0x65a   :  { %v9422_v28 = vadd.f32 %v9421_v19, %v9408_v45 }
 0x65b   :  { %10633 = vmatpush.bf16.msrb.mxu3 %v16979_v12 }
 0x65c   :  { %v9435_v55 = vadd.f32 %v9434_v33, %v9422_v28  ;;  %v9436_v40 = vpop.f32.mrf.mxu0 }
 0x65d   :  { %v9449_v59 = vpop.f32.mrf.mxu1 }
 0x65e   :  { %v9448_v32 = vadd.f32 %v9447_v27, %v9435_v55  ;;  %v16973_v27 = vld [vmem:[%s18099_s7 + $0x40] sm:$0xff] }
 0x65f   :  { %10634 = vmatpush.bf16.msrb.mxu3 %v16978_v57 }
 0x660   :  { %v9452_v51 = vadd.f32 %v9448_v32, %v18009_v50  ;;  %v9410_v2 = vpop.f32.mrf.mxu2  ;;  %v16971_v50 = vld [vmem:[%s18099_s7 + $0x30] sm:$0xff]  ;;  %s17215_s7 = smov [#allocation18]  }
 0x661   :  { %v9423_v30 = vpop.f32.mrf.mxu3  ;;  %10620 = vmatpush.bf16.msrb.mxu2 %v16971_v50  ;;  %v16998_v50 = vld [vmem:[#allocation16] ss:$0 sm:$0xff]  ;;  %s10652_s28 = sshll.u32 %s17215_s7, 4  ;;  %s10653_s28 = int_to_ptr.vmem [resolvable:$true] %s10652_s28 }
 0x663   :  { %10635 = vmatpush.bf16.msrb.mxu3 %v16977_v17 }
 0x665   :  { %10621 = vmatpush.bf16.msrb.mxu2 %v16970_v25 }
 0x667   :  { %10636 = vmatpush.bf16.msrb.mxu3 %v16976_v60 }
 0x669   :  { %10622 = vmatpush.bf16.msrb.mxu2 %v16969_v16 }
 0x66b   :  { %10637 = vmatpush.bf16.msrb.mxu3 %v16975_v62 }
 0x66d   :  { %10623 = vmatpush.bf16.msrb.mxu2 %v16968_v14 }
 0x66f   :  { %10638 = vmatpush.bf16.msrb.mxu3 %v16974_v49 }
 0x671   :  { %10624 = vmatpush.bf16.msrb.mxu2 %v16967_v58 }
 0x673   :  { %10639 = vmatpush.bf16.msrb.mxu3 %v16973_v27 }
 0x674   :  { %v9893_v0 = vpop.f32.mrf.mxu0 }
 0x675   :  { %v9906_v34 = vpop.f32.mrf.mxu1  ;;  %10625 = vmatpush.bf16.msrb.mxu2 %v16966_v43 }
 0x678   :  { %v9867_v29 = vpop.f32.mrf.mxu2 }
 0x679   :  { %v9880_v53 = vpop.f32.mrf.mxu3  ;;  %10626 = vmatpush.bf16.msrb.mxu2 %v16965_v20 }
 0x67a   :  { %v9881_v18 = vadd.f32 %v9880_v53, %v9867_v29 }
 0x67c   :  { %v9894_v5 = vadd.f32 %v9893_v0, %v9881_v18  ;;  %v9895_v42 = vpop.f32.mrf.mxu0 }
 0x67d   :  { %v9908_v13 = vpop.f32.mrf.mxu1 }
 0x67e   :  { %v9907_v36 = vadd.f32 %v9906_v34, %v9894_v5  ;;  %v10478_v34 = vperm.slane %v10475_v11, 1 }
 0x680   :  { %v9962_v15 = vadd.f32 %v9907_v36, %v9451_v23  ;;  %v9869_v21 = vpop.f32.mrf.mxu2 }
 0x681   :  { %v9882_v63 = vpop.f32.mrf.mxu3 }
 0x694   :  { %v9945_v39 = vpop.f32.mrf.mxu0 }
 0x695   :  { %v9958_v44 = vpop.f32.mrf.mxu1 }
 0x698   :  { %v9919_v7 = vpop.f32.mrf.mxu2 }
 0x699   :  { %v9932_v6 = vpop.f32.mrf.mxu3 }
 0x69a   :  { %v9933_v8 = vadd.f32 %v9932_v6, %v9919_v7 }
 0x69c   :  { %v9946_v4 = vadd.f32 %v9945_v39, %v9933_v8  ;;  %v9947_v26 = vpop.f32.mrf.mxu0 }
 0x69d   :  { %v9960_v52 = vpop.f32.mrf.mxu1 }
 0x69e   :  { %v9959_v37 = vadd.f32 %v9958_v44, %v9946_v4 }
 0x6a0   :  { %v9963_v56 = vadd.f32 %v9959_v37, %v9452_v51  ;;  %v9921_v48 = vpop.f32.mrf.mxu2 }
 0x6a1   :  { %v9934_v47 = vpop.f32.mrf.mxu3 }
 0x6b4   :  { %v10404_v38 = vpop.f32.mrf.mxu0 }
 0x6b5   :  { %v10417_v24 = vpop.f32.mrf.mxu1 }
 0x6b8   :  { %v10378_v10 = vpop.f32.mrf.mxu2 }
 0x6b9   :  { %v10391_v23 = vpop.f32.mrf.mxu3 }
 0x6ba   :  { %v10392_v1 = vadd.f32 %v10391_v23, %v10378_v10 }
 0x6bc   :  { %v10405_v54 = vadd.f32 %v10404_v38, %v10392_v1  ;;  %v10406_v61 = vpop.f32.mrf.mxu0 }
 0x6bd   :  { %v10419_v9 = vpop.f32.mrf.mxu1 }
 0x6be   :  { %v10418_v41 = vadd.f32 %v10417_v24, %v10405_v54 }
 0x6c0   :  { %v10473_v31 = vadd.f32 %v10418_v41, %v9962_v15  ;;  %v10380_v22 = vpop.f32.mrf.mxu2 }
 0x6c1   :  { %v10393_v33 = vpop.f32.mrf.mxu3 }
 0x6c2   :  { %v10481_v45 = vadd.f32 %v10477_v3, %v10473_v31 }
 0x6c4   :  { %v10483_v19 = vmax.f32 %v10481_v45, 0.0 }
 0x6c6   :  { %v10485_v28 = vpack.c.bf16 %v10483_v19, %v10483_v19 }
 0x6c8   :  { %10627 = vmatmul.bf16.vlgmr.msrb.gmra.mxu2 %v10485_v28 }
 0x6d4   :  { %v10456_v55 = vpop.f32.mrf.mxu0 }
 0x6d5   :  { %v10469_v40 = vpop.f32.mrf.mxu1 }
 0x6d8   :  { %v10430_v32 = vpop.f32.mrf.mxu2 }
 0x6d9   :  { %v10443_v59 = vpop.f32.mrf.mxu3 }
 0x6da   :  { %v10444_v51 = vadd.f32 %v10443_v59, %v10430_v32 }
 0x6dc   :  { %v10458_v2 = vpop.f32.mrf.mxu0  ;;  %v10457_v30 = vadd.f32 %v10456_v55, %v10444_v51 }
 0x6dd   :  { %v10471_v0 = vpop.f32.mrf.mxu1 }
 0x6de   :  { %v10470_v29 = vadd.f32 %v10469_v40, %v10457_v30 }
 0x6e0   :  { %v10474_v53 = vadd.f32 %v10470_v29, %v9963_v56  ;;  %v10432_v18 = vpop.f32.mrf.mxu2 }
 0x6e1   :  { %v10445_v5 = vpop.f32.mrf.mxu3 }
 0x6e2   :  { %v10482_v42 = vadd.f32 %v10478_v34, %v10474_v53 }
 0x6e4   :  { %v10484_v36 = vmax.f32 %v10482_v42, 0.0 }
 0x6e6   :  { %v10486_v13 = vpack.c.bf16 %v10484_v36, %v10484_v36 }
 0x6e8   :  { %10640 = vmatmul.bf16.vlgmr.msrb.gmra.mxu3 %v10486_v13 }
 0x74b   :  { %v10628_v35 = vpop.f32.mrf.mxu2 }
 0x74c   :  { %v10629_v21 = vadd.f32 %v16998_v50, %v10628_v35 }
 0x753   :  { %v10630_v15 = vpop.f32.mrf.mxu2 }
 0x76b   :  { %v10641_v63 = vpop.f32.mrf.mxu3 }
 0x76c   :  { %v10642_v25 = vadd.f32 %v10641_v63, %v10629_v21 }
 0x76e   :  { %10646 = vst.msk [vmem:[#allocation18] sm:$0x3] %vm10645_vm10, %v10642_v25 }
 0x76f   :  { %10657 = dma.vmem_to_hbm [thread:$0]  %s10653_s28, 32, %s10655_s1, [#allocation9]  }
 0x773   :  { %v10643_v16 = vpop.f32.mrf.mxu3 }
 0x774   :  { %17201 = dma.done.wait [#allocation9], 32  }
 0x775   :  { %17202 = vsyncadd [#allocation9], 4294967264 }
 0x776   :  { %10662 = vsyncpa [#allocation8], 1 }
 0x777   :  { %10663 = vsyncpa [#allocation11], 1 }
 0x778   :  { %10664 = vsyncpa [#allocation14], 1 }
 0x779   :  { %10665 = vsyncpa [#allocation17], 1 }
 0x77a   :  { %10666 = vsyncpa [#allocation9], 1 }
 0x77b   :  { %10667 = vsyncmov [#allocation6] }
 0x77e   :  { %s10668_s10 = vpop.sfrf %10667 }
 0x77f   :  { %p15721_p0 = scmp.ne.s32.totalorder %s10668_s10, 0 }
 0x781   :  { %10672 = shalt.err (%p15721_p0)  }

</bundles_post_ra>
